<compile_context>
chip_gen: v5e
topology: v5e:2x2
jax: 0.10.0
libtpu: 0.0.40
codegen_flags: <defaults>
</compile_context>

<pallas_src>
import functools

import jax
import jax.numpy as jnp
from jax import lax
from jax.experimental import pallas as pl
from jax.experimental.pallas import tpu as pltpu


# ---------------------------------------------------------------------------
# Fused Pallas kernel: conv1..conv4 (+BN+ELU) + GLU conv5, all in VMEM
# ---------------------------------------------------------------------------

def _dense_block_kernel(x_ref, w1_ref, b1_ref, w2_ref, b2_ref, w3_ref, b3_ref,
                        w4_ref, b4_ref, w5_ref, b5_ref, o_ref, act_ref):
    tm, W, Cin = x_ref.shape            # rows-per-tile, width, input channels
    Cpad = act_ref.shape[2]             # lane-padded channel capacity (>=128)
    M2 = tm * W                         # matmul M dimension
    g = b1_ref.shape[1]                 # growth rate (branch output channels)
    two_co = b5_ref.shape[1]
    Co = two_co // 2

    # Zero the scratch: provides the W-axis zero-padding columns and zeros for
    # channels not yet written / beyond Ctot (their weight rows are zero too,
    # but uninitialized VMEM could hold NaN/Inf).
    act_ref[...] = jnp.zeros_like(act_ref)
    # Place x at channels [0:Cin], interior W positions [1:W+1].
    act_ref[:, 1:W + 1, 0:Cin] = x_ref[...]

    def conv1x3(w_ref, b_ref):
        # (1,3) conv as 3 tap-matmuls against shifted windows of the padded
        # activation scratch; bias (with BN folded in for the branches) added.
        y = jnp.dot(act_ref[:, 0:W, :].reshape(M2, Cpad), w_ref[0],
                    preferred_element_type=jnp.float32)
        y = y + jnp.dot(act_ref[:, 1:W + 1, :].reshape(M2, Cpad), w_ref[1],
                        preferred_element_type=jnp.float32)
        y = y + jnp.dot(act_ref[:, 2:W + 2, :].reshape(M2, Cpad), w_ref[2],
                        preferred_element_type=jnp.float32)
        return y + b_ref[...]

    # Dense branches: conv (bias+BN folded) + ELU, appended to the channel
    # concat in VMEM (never written back to HBM).
    c0 = Cin
    for w_ref, b_ref in ((w1_ref, b1_ref), (w2_ref, b2_ref),
                         (w3_ref, b3_ref), (w4_ref, b4_ref)):
        y = conv1x3(w_ref, b_ref)
        y = jnp.where(y > 0, y, jnp.exp(jnp.minimum(y, 0.0)) - 1.0)   # ELU
        act_ref[:, 1:W + 1, c0:c0 + g] = y.reshape(tm, W, g)
        c0 += g

    # GLU head: both convs merged into a single (Cpad, 2*Co) RHS.
    y5 = conv1x3(w5_ref, b5_ref)
    a = y5[:, 0:Co]
    gate = y5[:, Co:two_co]
    o_ref[...] = a * (1.0 / (1.0 + jnp.exp(-gate)))


# ---------------------------------------------------------------------------
# Weight preparation (glue): fold BN, reorder to (kw, ci, co), lane-pad K
# ---------------------------------------------------------------------------

def _fold_bn(weight, bias, gamma, beta, mean, var, eps):
    scale = gamma / jnp.sqrt(var + eps)              # (Co,)
    w_eff = weight * scale[:, None, None, None]      # (Co, Ci, 1, 3)
    b_eff = bias * scale + (beta - mean * scale)     # (Co,)
    return w_eff, b_eff


def _pack_weight(weight, cpad):
    """Torch (Co, Ci, 1, 3) -> (3, Cpad, Co); zero rows for ci >= Ci."""
    ci = weight.shape[1]
    w = jnp.transpose(weight[:, :, 0, :], (2, 1, 0))   # (3, Ci, Co)
    return jnp.pad(w, ((0, 0), (0, cpad - ci), (0, 0)))


# ---------------------------------------------------------------------------
# Wrapper around the single pallas_call
# ---------------------------------------------------------------------------

def dense_conv2d_forward(params, x, tm_rows=16, eps=1e-5):
    """x: (B, in_channels, H, W) NCHW -> (B, out_channels, H, W)."""
    B, Cin, H, W = x.shape
    g = params["conv1"][0].shape[0]
    Co = params["conv5_a"][0].shape[0]
    Ctot = Cin + 4 * g
    Cpad = max(128, ((Ctot + 127) // 128) * 128)     # lane-aligned K per tap

    # Fold BN/bias into the branch weights; lane-pad all weight matrices.
    ws, bs = [], []
    for i in range(1, 5):
        w, b = params[f"conv{i}"]
        gamma, beta, mean, var = params[f"bn{i}"]
        w_eff, b_eff = _fold_bn(w, b, gamma, beta, mean, var, eps)
        ws.append(_pack_weight(w_eff, Cpad))
        bs.append(b_eff.reshape(1, g))
    w5a, b5a = params["conv5_a"]
    w5b, b5b = params["conv5_b"]
    w5 = jnp.concatenate([_pack_weight(w5a, Cpad), _pack_weight(w5b, Cpad)], axis=-1)
    b5 = jnp.concatenate([b5a, b5b]).reshape(1, 2 * Co)

    # NCHW -> (rows, W, Cin) with rows = B*H (rows are independent for (1,3) conv).
    x_rows = jnp.transpose(x, (0, 2, 3, 1)).reshape(B * H, W, Cin)
    R = B * H
    tm = min(tm_rows, R)
    Rp = -(-R // tm) * tm
    if Rp != R:
        x_rows = jnp.pad(x_rows, ((0, Rp - R), (0, 0), (0, 0)))
    if Rp // tm > 1 and (tm * W) % 8 != 0:
        tm = Rp                                      # single-step fallback
    grid = (Rp // tm,)

    in_specs = [pl.BlockSpec((tm, W, Cin), lambda i: (i, 0, 0))]
    for _ in range(4):
        in_specs.append(pl.BlockSpec((3, Cpad, g), lambda i: (0, 0, 0)))
        in_specs.append(pl.BlockSpec((1, g), lambda i: (0, 0)))
    in_specs.append(pl.BlockSpec((3, Cpad, 2 * Co), lambda i: (0, 0, 0)))
    in_specs.append(pl.BlockSpec((1, 2 * Co), lambda i: (0, 0)))

    out2d = pl.pallas_call(
        _dense_block_kernel,
        out_shape=jax.ShapeDtypeStruct((Rp * W, Co), jnp.float32),
        grid=grid,
        in_specs=in_specs,
        out_specs=pl.BlockSpec((tm * W, Co), lambda i: (i, 0)),
        scratch_shapes=[pltpu.VMEM((tm, W + 2, Cpad), jnp.float32)],
        compiler_params=pltpu.CompilerParams(dimension_semantics=("parallel",)),
    )(x_rows, ws[0], bs[0], ws[1], bs[1], ws[2], bs[2], ws[3], bs[3], w5, b5)

    out = out2d.reshape(Rp, W, Co)[:R].reshape(B, H, W, Co).transpose(0, 3, 1, 2)
    return out


# ---------------------------------------------------------------------------
# DenseConv2d parameter init (matches the torch module's shapes)
# ---------------------------------------------------------------------------

def init_dense_conv2d_params(key, in_channels, out_channels, grate):
    params = {}
    ks = iter(jax.random.split(key, 32))

    def conv_p(cin, cout):
        w = 0.1 * jax.random.normal(next(ks), (cout, cin, 1, 3), jnp.float32)
        b = 0.1 * jax.random.normal(next(ks), (cout,), jnp.float32)
        return w, b

    def bn_p(c):
        gamma = 1.0 + 0.1 * jax.random.normal(next(ks), (c,), jnp.float32)
        beta = 0.1 * jax.random.normal(next(ks), (c,), jnp.float32)
        mean = 0.1 * jax.random.normal(next(ks), (c,), jnp.float32)
        var = 1.0 + 0.1 * jnp.abs(jax.random.normal(next(ks), (c,), jnp.float32))
        return gamma, beta, mean, var

    cins = [in_channels, in_channels + grate, in_channels + 2 * grate,
            in_channels + 3 * grate]
    for i, cin in enumerate(cins, start=1):
        params[f"conv{i}"] = conv_p(cin, grate)
        params[f"bn{i}"] = bn_p(grate)

    cin5 = in_channels + 4 * grate
    params["conv5_a"] = conv_p(cin5, out_channels)
    params["conv5_b"] = conv_p(cin5, out_channels)
    return params


# ---------------------------------------------------------------------------
# Pure-JAX reference (for correctness check)
# ---------------------------------------------------------------------------

def _ref_conv1x3(x, w, b):
    y = lax.conv_general_dilated(
        x, w, window_strides=(1, 1), padding=((0, 0), (1, 1)),
        dimension_numbers=("NCHW", "OIHW", "NCHW"))
    return y + b[None, :, None, None]


def _ref_bn_elu(y, gamma, beta, mean, var, eps=1e-5):
    y = (y - mean[None, :, None, None]) / jnp.sqrt(var[None, :, None, None] + eps)
    y = y * gamma[None, :, None, None] + beta[None, :, None, None]
    return jnp.where(y > 0, y, jnp.exp(jnp.minimum(y, 0.0)) - 1.0)


def dense_conv2d_reference(params, x):
    def branch(i, inp):
        w, b = params[f"conv{i}"]
        g, be, m, v = params[f"bn{i}"]
        return _ref_bn_elu(_ref_conv1x3(inp, w, b), g, be, m, v)

    out1 = branch(1, x)
    cat1 = jnp.concatenate([x, out1], axis=1)
    out2 = branch(2, cat1)
    cat2 = jnp.concatenate([x, out1, out2], axis=1)
    out3 = branch(3, cat2)
    cat3 = jnp.concatenate([x, out1, out2, out3], axis=1)
    out4 = branch(4, cat3)
    cat4 = jnp.concatenate([x, out1, out2, out3, out4], axis=1)

    w1, b1 = params["conv5_a"]
    w2, b2 = params["conv5_b"]
    a = _ref_conv1x3(cat4, w1, b1)
    g = _ref_conv1x3(cat4, w2, b2)
    return a * jax.nn.sigmoid(g)


# ---------------------------------------------------------------------------
# Main
# ---------------------------------------------------------------------------

if __name__ == "__main__":
    key = jax.random.PRNGKey(0)
    k_params, k_x = jax.random.split(key)

    B, in_channels, H, W = 2, 4, 16, 16
    grate, out_channels = 8, 8

    params = init_dense_conv2d_params(k_params, in_channels, out_channels, grate)
    x = jax.random.normal(k_x, (B, in_channels, H, W), jnp.float32)

    out = jax.jit(functools.partial(dense_conv2d_forward, params))(x)
    out = jax.block_until_ready(out)

    ref = dense_conv2d_reference(params, x)
    assert out.shape == (B, out_channels, H, W), out.shape
    assert jnp.allclose(out, ref, rtol=1e-4, atol=1e-4), float(jnp.max(jnp.abs(out - ref)))

    print("KERNEL_OK")
</pallas_src>

<mosaic_0001>
module attributes {stable_mosaic.version = 11 : i64} {
  func.func @_dense_block_kernel(%arg0: i32, %arg1: memref<16x16x4xf32, #tpu.memory_space<vmem>>, %arg2: memref<3x128x8xf32, #tpu.memory_space<vmem>>, %arg3: memref<1x8xf32, #tpu.memory_space<vmem>>, %arg4: memref<3x128x8xf32, #tpu.memory_space<vmem>>, %arg5: memref<1x8xf32, #tpu.memory_space<vmem>>, %arg6: memref<3x128x8xf32, #tpu.memory_space<vmem>>, %arg7: memref<1x8xf32, #tpu.memory_space<vmem>>, %arg8: memref<3x128x8xf32, #tpu.memory_space<vmem>>, %arg9: memref<1x8xf32, #tpu.memory_space<vmem>>, %arg10: memref<3x128x16xf32, #tpu.memory_space<vmem>>, %arg11: memref<1x16xf32, #tpu.memory_space<vmem>>, %arg12: memref<256x8xf32, #tpu.memory_space<vmem>>, %arg13: memref<16x18x128xf32, #tpu.memory_space<vmem>>) attributes {dimension_semantics = [#tpu.dimension_semantics<parallel>], iteration_bounds = array<i64: 2>, scalar_prefetch = 0 : i64, scratch_operands = 1 : i64, tpu.core_type = #tpu.core_type<tc>, window_params = [{transform_indices = @transform_0, window_bounds = array<i64: 16, 16, 4>}, {pipeline_mode = #tpu.pipeline_mode<synchronous>, transform_indices = @transform_1, window_bounds = array<i64: 3, 128, 8>}, {pipeline_mode = #tpu.pipeline_mode<synchronous>, transform_indices = @transform_2, window_bounds = array<i64: 1, 8>}, {pipeline_mode = #tpu.pipeline_mode<synchronous>, transform_indices = @transform_3, window_bounds = array<i64: 3, 128, 8>}, {pipeline_mode = #tpu.pipeline_mode<synchronous>, transform_indices = @transform_4, window_bounds = array<i64: 1, 8>}, {pipeline_mode = #tpu.pipeline_mode<synchronous>, transform_indices = @transform_5, window_bounds = array<i64: 3, 128, 8>}, {pipeline_mode = #tpu.pipeline_mode<synchronous>, transform_indices = @transform_6, window_bounds = array<i64: 1, 8>}, {pipeline_mode = #tpu.pipeline_mode<synchronous>, transform_indices = @transform_7, window_bounds = array<i64: 3, 128, 8>}, {pipeline_mode = #tpu.pipeline_mode<synchronous>, transform_indices = @transform_8, window_bounds = array<i64: 1, 8>}, {pipeline_mode = #tpu.pipeline_mode<synchronous>, transform_indices = @transform_9, window_bounds = array<i64: 3, 128, 16>}, {pipeline_mode = #tpu.pipeline_mode<synchronous>, transform_indices = @transform_10, window_bounds = array<i64: 1, 16>}, {transform_indices = @transform_11, window_bounds = array<i64: 256, 8>}]} {
    %cst = arith.constant 0.000000e+00 : f32
    %0 = vector.broadcast %cst : f32 to vector<16x18x128xf32>
    %c0 = arith.constant 0 : index
    %c0_0 = arith.constant 0 : index
    %c0_1 = arith.constant 0 : index
    %1 = vector.load %arg13[%c0, %c0_0, %c0_1] : memref<16x18x128xf32, #tpu.memory_space<vmem>>, vector<16x18x128xf32>
    tpu.vector_store %arg13[%c0, %c0_0, %c0_1], %0 {strides = array<i32>} : memref<16x18x128xf32, #tpu.memory_space<vmem>>, vector<16x18x128xf32>,
    %c0_2 = arith.constant 0 : index
    %c0_3 = arith.constant 0 : index
    %c0_4 = arith.constant 0 : index
    %2 = vector.load %arg1[%c0_2, %c0_3, %c0_4] : memref<16x16x4xf32, #tpu.memory_space<vmem>>, vector<16x16x4xf32>
    %c0_5 = arith.constant 0 : index
    %c1 = arith.constant 1 : index
    %c0_6 = arith.constant 0 : index
    %3 = vector.load %arg13[%c0_5, %c1, %c0_6] : memref<16x18x128xf32, #tpu.memory_space<vmem>>, vector<16x16x4xf32>
    tpu.vector_store %arg13[%c0_5, %c1, %c0_6], %2 {strides = array<i32>} : memref<16x18x128xf32, #tpu.memory_space<vmem>>, vector<16x16x4xf32>,
    %c0_7 = arith.constant 0 : index
    %c0_8 = arith.constant 0 : index
    %c0_9 = arith.constant 0 : index
    %4 = vector.load %arg13[%c0_7, %c0_8, %c0_9] : memref<16x18x128xf32, #tpu.memory_space<vmem>>, vector<16x16x128xf32>
    %5 = vector.shape_cast %4 : vector<16x16x128xf32> to vector<256x128xf32>
    %c0_10 = arith.constant 0 : index
    %c0_11 = arith.constant 0 : index
    %c0_12 = arith.constant 0 : index
    %6 = vector.load %arg2[%c0_10, %c0_11, %c0_12] : memref<3x128x8xf32, #tpu.memory_space<vmem>>, vector<1x128x8xf32>
    %7 = vector.shape_cast %6 : vector<1x128x8xf32> to vector<128x8xf32>
    %cst_13 = arith.constant dense<0.000000e+00> : vector<256x8xf32>
    %8 = tpu.matmul %5, %7, %cst_13 {dimension_numbers = #tpu.dot_dimension_numbers<[1], [0], [0], [1], [0, 0, 1, 1], [], []>} : vector<256x128xf32>, vector<128x8xf32>, vector<256x8xf32> -> vector<256x8xf32>
    %c0_14 = arith.constant 0 : index
    %c1_15 = arith.constant 1 : index
    %c0_16 = arith.constant 0 : index
    %9 = vector.load %arg13[%c0_14, %c1_15, %c0_16] : memref<16x18x128xf32, #tpu.memory_space<vmem>>, vector<16x16x128xf32>
    %10 = vector.shape_cast %9 : vector<16x16x128xf32> to vector<256x128xf32>
    %c1_17 = arith.constant 1 : index
    %c0_18 = arith.constant 0 : index
    %c0_19 = arith.constant 0 : index
    %11 = vector.load %arg2[%c1_17, %c0_18, %c0_19] : memref<3x128x8xf32, #tpu.memory_space<vmem>>, vector<1x128x8xf32>
    %12 = vector.shape_cast %11 : vector<1x128x8xf32> to vector<128x8xf32>
    %cst_20 = arith.constant dense<0.000000e+00> : vector<256x8xf32>
    %13 = tpu.matmul %10, %12, %cst_20 {dimension_numbers = #tpu.dot_dimension_numbers<[1], [0], [0], [1], [0, 0, 1, 1], [], []>} : vector<256x128xf32>, vector<128x8xf32>, vector<256x8xf32> -> vector<256x8xf32>
    %14 = arith.addf %8, %13 : vector<256x8xf32>
    %c0_21 = arith.constant 0 : index
    %c2 = arith.constant 2 : index
    %c0_22 = arith.constant 0 : index
    %15 = vector.load %arg13[%c0_21, %c2, %c0_22] : memref<16x18x128xf32, #tpu.memory_space<vmem>>, vector<16x16x128xf32>
    %16 = vector.shape_cast %15 : vector<16x16x128xf32> to vector<256x128xf32>
    %c2_23 = arith.constant 2 : index
    %c0_24 = arith.constant 0 : index
    %c0_25 = arith.constant 0 : index
    %17 = vector.load %arg2[%c2_23, %c0_24, %c0_25] : memref<3x128x8xf32, #tpu.memory_space<vmem>>, vector<1x128x8xf32>
    %18 = vector.shape_cast %17 : vector<1x128x8xf32> to vector<128x8xf32>
    %cst_26 = arith.constant dense<0.000000e+00> : vector<256x8xf32>
    %19 = tpu.matmul %16, %18, %cst_26 {dimension_numbers = #tpu.dot_dimension_numbers<[1], [0], [0], [1], [0, 0, 1, 1], [], []>} : vector<256x128xf32>, vector<128x8xf32>, vector<256x8xf32> -> vector<256x8xf32>
    %20 = arith.addf %14, %19 : vector<256x8xf32>
    %c0_27 = arith.constant 0 : index
    %c0_28 = arith.constant 0 : index
    %21 = vector.load %arg3[%c0_27, %c0_28] : memref<1x8xf32, #tpu.memory_space<vmem>>, vector<1x8xf32>
    %22 = vector.broadcast %21 : vector<1x8xf32> to vector<256x8xf32>
    %23 = arith.addf %20, %22 : vector<256x8xf32>
    %cst_29 = arith.constant 0.000000e+00 : f32
    %24 = vector.broadcast %cst_29 : f32 to vector<256x8xf32>
    %25 = arith.cmpf ogt, %23, %24 : vector<256x8xf32>
    %cst_30 = arith.constant 0.000000e+00 : f32
    %26 = vector.broadcast %cst_30 : f32 to vector<256x8xf32>
    %27 = arith.minimumf %23, %26 : vector<256x8xf32>
    %28 = math.exp %27 : vector<256x8xf32>
    %cst_31 = arith.constant 1.000000e+00 : f32
    %29 = vector.broadcast %cst_31 : f32 to vector<256x8xf32>
    %30 = arith.subf %28, %29 : vector<256x8xf32>
    %31 = arith.select %25, %23, %30 : vector<256x8xi1>, vector<256x8xf32>
    %32 = vector.shape_cast %31 : vector<256x8xf32> to vector<16x16x8xf32>
    %c0_32 = arith.constant 0 : index
    %c1_33 = arith.constant 1 : index
    %c4 = arith.constant 4 : index
    %33 = vector.load %arg13[%c0_32, %c1_33, %c4] : memref<16x18x128xf32, #tpu.memory_space<vmem>>, vector<16x16x8xf32>
    tpu.vector_store %arg13[%c0_32, %c1_33, %c4], %32 {strides = array<i32>} : memref<16x18x128xf32, #tpu.memory_space<vmem>>, vector<16x16x8xf32>,
    %c0_34 = arith.constant 0 : index
    %c0_35 = arith.constant 0 : index
    %c0_36 = arith.constant 0 : index
    %34 = vector.load %arg13[%c0_34, %c0_35, %c0_36] : memref<16x18x128xf32, #tpu.memory_space<vmem>>, vector<16x16x128xf32>
    %35 = vector.shape_cast %34 : vector<16x16x128xf32> to vector<256x128xf32>
    %c0_37 = arith.constant 0 : index
    %c0_38 = arith.constant 0 : index
    %c0_39 = arith.constant 0 : index
    %36 = vector.load %arg4[%c0_37, %c0_38, %c0_39] : memref<3x128x8xf32, #tpu.memory_space<vmem>>, vector<1x128x8xf32>
    %37 = vector.shape_cast %36 : vector<1x128x8xf32> to vector<128x8xf32>
    %cst_40 = arith.constant dense<0.000000e+00> : vector<256x8xf32>
    %38 = tpu.matmul %35, %37, %cst_40 {dimension_numbers = #tpu.dot_dimension_numbers<[1], [0], [0], [1], [0, 0, 1, 1], [], []>} : vector<256x128xf32>, vector<128x8xf32>, vector<256x8xf32> -> vector<256x8xf32>
    %c0_41 = arith.constant 0 : index
    %c1_42 = arith.constant 1 : index
    %c0_43 = arith.constant 0 : index
    %39 = vector.load %arg13[%c0_41, %c1_42, %c0_43] : memref<16x18x128xf32, #tpu.memory_space<vmem>>, vector<16x16x128xf32>
    %40 = vector.shape_cast %39 : vector<16x16x128xf32> to vector<256x128xf32>
    %c1_44 = arith.constant 1 : index
    %c0_45 = arith.constant 0 : index
    %c0_46 = arith.constant 0 : index
    %41 = vector.load %arg4[%c1_44, %c0_45, %c0_46] : memref<3x128x8xf32, #tpu.memory_space<vmem>>, vector<1x128x8xf32>
    %42 = vector.shape_cast %41 : vector<1x128x8xf32> to vector<128x8xf32>
    %cst_47 = arith.constant dense<0.000000e+00> : vector<256x8xf32>
    %43 = tpu.matmul %40, %42, %cst_47 {dimension_numbers = #tpu.dot_dimension_numbers<[1], [0], [0], [1], [0, 0, 1, 1], [], []>} : vector<256x128xf32>, vector<128x8xf32>, vector<256x8xf32> -> vector<256x8xf32>
    %44 = arith.addf %38, %43 : vector<256x8xf32>
    %c0_48 = arith.constant 0 : index
    %c2_49 = arith.constant 2 : index
    %c0_50 = arith.constant 0 : index
    %45 = vector.load %arg13[%c0_48, %c2_49, %c0_50] : memref<16x18x128xf32, #tpu.memory_space<vmem>>, vector<16x16x128xf32>
    %46 = vector.shape_cast %45 : vector<16x16x128xf32> to vector<256x128xf32>
    %c2_51 = arith.constant 2 : index
    %c0_52 = arith.constant 0 : index
    %c0_53 = arith.constant 0 : index
    %47 = vector.load %arg4[%c2_51, %c0_52, %c0_53] : memref<3x128x8xf32, #tpu.memory_space<vmem>>, vector<1x128x8xf32>
    %48 = vector.shape_cast %47 : vector<1x128x8xf32> to vector<128x8xf32>
    %cst_54 = arith.constant dense<0.000000e+00> : vector<256x8xf32>
    %49 = tpu.matmul %46, %48, %cst_54 {dimension_numbers = #tpu.dot_dimension_numbers<[1], [0], [0], [1], [0, 0, 1, 1], [], []>} : vector<256x128xf32>, vector<128x8xf32>, vector<256x8xf32> -> vector<256x8xf32>
    %50 = arith.addf %44, %49 : vector<256x8xf32>
    %c0_55 = arith.constant 0 : index
    %c0_56 = arith.constant 0 : index
    %51 = vector.load %arg5[%c0_55, %c0_56] : memref<1x8xf32, #tpu.memory_space<vmem>>, vector<1x8xf32>
    %52 = vector.broadcast %51 : vector<1x8xf32> to vector<256x8xf32>
    %53 = arith.addf %50, %52 : vector<256x8xf32>
    %cst_57 = arith.constant 0.000000e+00 : f32
    %54 = vector.broadcast %cst_57 : f32 to vector<256x8xf32>
    %55 = arith.cmpf ogt, %53, %54 : vector<256x8xf32>
    %cst_58 = arith.constant 0.000000e+00 : f32
    %56 = vector.broadcast %cst_58 : f32 to vector<256x8xf32>
    %57 = arith.minimumf %53, %56 : vector<256x8xf32>
    %58 = math.exp %57 : vector<256x8xf32>
    %cst_59 = arith.constant 1.000000e+00 : f32
    %59 = vector.broadcast %cst_59 : f32 to vector<256x8xf32>
    %60 = arith.subf %58, %59 : vector<256x8xf32>
    %61 = arith.select %55, %53, %60 : vector<256x8xi1>, vector<256x8xf32>
    %62 = vector.shape_cast %61 : vector<256x8xf32> to vector<16x16x8xf32>
    %c0_60 = arith.constant 0 : index
    %c1_61 = arith.constant 1 : index
    %c12 = arith.constant 12 : index
    %63 = vector.load %arg13[%c0_60, %c1_61, %c12] : memref<16x18x128xf32, #tpu.memory_space<vmem>>, vector<16x16x8xf32>
    tpu.vector_store %arg13[%c0_60, %c1_61, %c12], %62 {strides = array<i32>} : memref<16x18x128xf32, #tpu.memory_space<vmem>>, vector<16x16x8xf32>,
    %c0_62 = arith.constant 0 : index
    %c0_63 = arith.constant 0 : index
    %c0_64 = arith.constant 0 : index
    %64 = vector.load %arg13[%c0_62, %c0_63, %c0_64] : memref<16x18x128xf32, #tpu.memory_space<vmem>>, vector<16x16x128xf32>
    %65 = vector.shape_cast %64 : vector<16x16x128xf32> to vector<256x128xf32>
    %c0_65 = arith.constant 0 : index
    %c0_66 = arith.constant 0 : index
    %c0_67 = arith.constant 0 : index
    %66 = vector.load %arg6[%c0_65, %c0_66, %c0_67] : memref<3x128x8xf32, #tpu.memory_space<vmem>>, vector<1x128x8xf32>
    %67 = vector.shape_cast %66 : vector<1x128x8xf32> to vector<128x8xf32>
    %cst_68 = arith.constant dense<0.000000e+00> : vector<256x8xf32>
    %68 = tpu.matmul %65, %67, %cst_68 {dimension_numbers = #tpu.dot_dimension_numbers<[1], [0], [0], [1], [0, 0, 1, 1], [], []>} : vector<256x128xf32>, vector<128x8xf32>, vector<256x8xf32> -> vector<256x8xf32>
    %c0_69 = arith.constant 0 : index
    %c1_70 = arith.constant 1 : index
    %c0_71 = arith.constant 0 : index
    %69 = vector.load %arg13[%c0_69, %c1_70, %c0_71] : memref<16x18x128xf32, #tpu.memory_space<vmem>>, vector<16x16x128xf32>
    %70 = vector.shape_cast %69 : vector<16x16x128xf32> to vector<256x128xf32>
    %c1_72 = arith.constant 1 : index
    %c0_73 = arith.constant 0 : index
    %c0_74 = arith.constant 0 : index
    %71 = vector.load %arg6[%c1_72, %c0_73, %c0_74] : memref<3x128x8xf32, #tpu.memory_space<vmem>>, vector<1x128x8xf32>
    %72 = vector.shape_cast %71 : vector<1x128x8xf32> to vector<128x8xf32>
    %cst_75 = arith.constant dense<0.000000e+00> : vector<256x8xf32>
    %73 = tpu.matmul %70, %72, %cst_75 {dimension_numbers = #tpu.dot_dimension_numbers<[1], [0], [0], [1], [0, 0, 1, 1], [], []>} : vector<256x128xf32>, vector<128x8xf32>, vector<256x8xf32> -> vector<256x8xf32>
    %74 = arith.addf %68, %73 : vector<256x8xf32>
    %c0_76 = arith.constant 0 : index
    %c2_77 = arith.constant 2 : index
    %c0_78 = arith.constant 0 : index
    %75 = vector.load %arg13[%c0_76, %c2_77, %c0_78] : memref<16x18x128xf32, #tpu.memory_space<vmem>>, vector<16x16x128xf32>
    %76 = vector.shape_cast %75 : vector<16x16x128xf32> to vector<256x128xf32>
    %c2_79 = arith.constant 2 : index
    %c0_80 = arith.constant 0 : index
    %c0_81 = arith.constant 0 : index
    %77 = vector.load %arg6[%c2_79, %c0_80, %c0_81] : memref<3x128x8xf32, #tpu.memory_space<vmem>>, vector<1x128x8xf32>
    %78 = vector.shape_cast %77 : vector<1x128x8xf32> to vector<128x8xf32>
    %cst_82 = arith.constant dense<0.000000e+00> : vector<256x8xf32>
    %79 = tpu.matmul %76, %78, %cst_82 {dimension_numbers = #tpu.dot_dimension_numbers<[1], [0], [0], [1], [0, 0, 1, 1], [], []>} : vector<256x128xf32>, vector<128x8xf32>, vector<256x8xf32> -> vector<256x8xf32>
    %80 = arith.addf %74, %79 : vector<256x8xf32>
    %c0_83 = arith.constant 0 : index
    %c0_84 = arith.constant 0 : index
    %81 = vector.load %arg7[%c0_83, %c0_84] : memref<1x8xf32, #tpu.memory_space<vmem>>, vector<1x8xf32>
    %82 = vector.broadcast %81 : vector<1x8xf32> to vector<256x8xf32>
    %83 = arith.addf %80, %82 : vector<256x8xf32>
    %cst_85 = arith.constant 0.000000e+00 : f32
    %84 = vector.broadcast %cst_85 : f32 to vector<256x8xf32>
    %85 = arith.cmpf ogt, %83, %84 : vector<256x8xf32>
    %cst_86 = arith.constant 0.000000e+00 : f32
    %86 = vector.broadcast %cst_86 : f32 to vector<256x8xf32>
    %87 = arith.minimumf %83, %86 : vector<256x8xf32>
    %88 = math.exp %87 : vector<256x8xf32>
    %cst_87 = arith.constant 1.000000e+00 : f32
    %89 = vector.broadcast %cst_87 : f32 to vector<256x8xf32>
    %90 = arith.subf %88, %89 : vector<256x8xf32>
    %91 = arith.select %85, %83, %90 : vector<256x8xi1>, vector<256x8xf32>
    %92 = vector.shape_cast %91 : vector<256x8xf32> to vector<16x16x8xf32>
    %c0_88 = arith.constant 0 : index
    %c1_89 = arith.constant 1 : index
    %c20 = arith.constant 20 : index
    %93 = vector.load %arg13[%c0_88, %c1_89, %c20] : memref<16x18x128xf32, #tpu.memory_space<vmem>>, vector<16x16x8xf32>
    tpu.vector_store %arg13[%c0_88, %c1_89, %c20], %92 {strides = array<i32>} : memref<16x18x128xf32, #tpu.memory_space<vmem>>, vector<16x16x8xf32>,
    %c0_90 = arith.constant 0 : index
    %c0_91 = arith.constant 0 : index
    %c0_92 = arith.constant 0 : index
    %94 = vector.load %arg13[%c0_90, %c0_91, %c0_92] : memref<16x18x128xf32, #tpu.memory_space<vmem>>, vector<16x16x128xf32>
    %95 = vector.shape_cast %94 : vector<16x16x128xf32> to vector<256x128xf32>
    %c0_93 = arith.constant 0 : index
    %c0_94 = arith.constant 0 : index
    %c0_95 = arith.constant 0 : index
    %96 = vector.load %arg8[%c0_93, %c0_94, %c0_95] : memref<3x128x8xf32, #tpu.memory_space<vmem>>, vector<1x128x8xf32>
    %97 = vector.shape_cast %96 : vector<1x128x8xf32> to vector<128x8xf32>
    %cst_96 = arith.constant dense<0.000000e+00> : vector<256x8xf32>
    %98 = tpu.matmul %95, %97, %cst_96 {dimension_numbers = #tpu.dot_dimension_numbers<[1], [0], [0], [1], [0, 0, 1, 1], [], []>} : vector<256x128xf32>, vector<128x8xf32>, vector<256x8xf32> -> vector<256x8xf32>
    %c0_97 = arith.constant 0 : index
    %c1_98 = arith.constant 1 : index
    %c0_99 = arith.constant 0 : index
    %99 = vector.load %arg13[%c0_97, %c1_98, %c0_99] : memref<16x18x128xf32, #tpu.memory_space<vmem>>, vector<16x16x128xf32>
    %100 = vector.shape_cast %99 : vector<16x16x128xf32> to vector<256x128xf32>
    %c1_100 = arith.constant 1 : index
    %c0_101 = arith.constant 0 : index
    %c0_102 = arith.constant 0 : index
    %101 = vector.load %arg8[%c1_100, %c0_101, %c0_102] : memref<3x128x8xf32, #tpu.memory_space<vmem>>, vector<1x128x8xf32>
    %102 = vector.shape_cast %101 : vector<1x128x8xf32> to vector<128x8xf32>
    %cst_103 = arith.constant dense<0.000000e+00> : vector<256x8xf32>
    %103 = tpu.matmul %100, %102, %cst_103 {dimension_numbers = #tpu.dot_dimension_numbers<[1], [0], [0], [1], [0, 0, 1, 1], [], []>} : vector<256x128xf32>, vector<128x8xf32>, vector<256x8xf32> -> vector<256x8xf32>
    %104 = arith.addf %98, %103 : vector<256x8xf32>
    %c0_104 = arith.constant 0 : index
    %c2_105 = arith.constant 2 : index
    %c0_106 = arith.constant 0 : index
    %105 = vector.load %arg13[%c0_104, %c2_105, %c0_106] : memref<16x18x128xf32, #tpu.memory_space<vmem>>, vector<16x16x128xf32>
    %106 = vector.shape_cast %105 : vector<16x16x128xf32> to vector<256x128xf32>
    %c2_107 = arith.constant 2 : index
    %c0_108 = arith.constant 0 : index
    %c0_109 = arith.constant 0 : index
    %107 = vector.load %arg8[%c2_107, %c0_108, %c0_109] : memref<3x128x8xf32, #tpu.memory_space<vmem>>, vector<1x128x8xf32>
    %108 = vector.shape_cast %107 : vector<1x128x8xf32> to vector<128x8xf32>
    %cst_110 = arith.constant dense<0.000000e+00> : vector<256x8xf32>
    %109 = tpu.matmul %106, %108, %cst_110 {dimension_numbers = #tpu.dot_dimension_numbers<[1], [0], [0], [1], [0, 0, 1, 1], [], []>} : vector<256x128xf32>, vector<128x8xf32>, vector<256x8xf32> -> vector<256x8xf32>
    %110 = arith.addf %104, %109 : vector<256x8xf32>
    %c0_111 = arith.constant 0 : index
    %c0_112 = arith.constant 0 : index
    %111 = vector.load %arg9[%c0_111, %c0_112] : memref<1x8xf32, #tpu.memory_space<vmem>>, vector<1x8xf32>
    %112 = vector.broadcast %111 : vector<1x8xf32> to vector<256x8xf32>
    %113 = arith.addf %110, %112 : vector<256x8xf32>
    %cst_113 = arith.constant 0.000000e+00 : f32
    %114 = vector.broadcast %cst_113 : f32 to vector<256x8xf32>
    %115 = arith.cmpf ogt, %113, %114 : vector<256x8xf32>
    %cst_114 = arith.constant 0.000000e+00 : f32
    %116 = vector.broadcast %cst_114 : f32 to vector<256x8xf32>
    %117 = arith.minimumf %113, %116 : vector<256x8xf32>
    %118 = math.exp %117 : vector<256x8xf32>
    %cst_115 = arith.constant 1.000000e+00 : f32
    %119 = vector.broadcast %cst_115 : f32 to vector<256x8xf32>
    %120 = arith.subf %118, %119 : vector<256x8xf32>
    %121 = arith.select %115, %113, %120 : vector<256x8xi1>, vector<256x8xf32>
    %122 = vector.shape_cast %121 : vector<256x8xf32> to vector<16x16x8xf32>
    %c0_116 = arith.constant 0 : index
    %c1_117 = arith.constant 1 : index
    %c28 = arith.constant 28 : index
    %123 = vector.load %arg13[%c0_116, %c1_117, %c28] : memref<16x18x128xf32, #tpu.memory_space<vmem>>, vector<16x16x8xf32>
    tpu.vector_store %arg13[%c0_116, %c1_117, %c28], %122 {strides = array<i32>} : memref<16x18x128xf32, #tpu.memory_space<vmem>>, vector<16x16x8xf32>,
    %c0_118 = arith.constant 0 : index
    %c0_119 = arith.constant 0 : index
    %c0_120 = arith.constant 0 : index
    %124 = vector.load %arg13[%c0_118, %c0_119, %c0_120] : memref<16x18x128xf32, #tpu.memory_space<vmem>>, vector<16x16x128xf32>
    %125 = vector.shape_cast %124 : vector<16x16x128xf32> to vector<256x128xf32>
    %c0_121 = arith.constant 0 : index
    %c0_122 = arith.constant 0 : index
    %c0_123 = arith.constant 0 : index
    %126 = vector.load %arg10[%c0_121, %c0_122, %c0_123] : memref<3x128x16xf32, #tpu.memory_space<vmem>>, vector<1x128x16xf32>
    %127 = vector.shape_cast %126 : vector<1x128x16xf32> to vector<128x16xf32>
    %cst_124 = arith.constant dense<0.000000e+00> : vector<256x16xf32>
    %128 = tpu.matmul %125, %127, %cst_124 {dimension_numbers = #tpu.dot_dimension_numbers<[1], [0], [0], [1], [0, 0, 1, 1], [], []>} : vector<256x128xf32>, vector<128x16xf32>, vector<256x16xf32> -> vector<256x16xf32>
    %c0_125 = arith.constant 0 : index
    %c1_126 = arith.constant 1 : index
    %c0_127 = arith.constant 0 : index
    %129 = vector.load %arg13[%c0_125, %c1_126, %c0_127] : memref<16x18x128xf32, #tpu.memory_space<vmem>>, vector<16x16x128xf32>
    %130 = vector.shape_cast %129 : vector<16x16x128xf32> to vector<256x128xf32>
    %c1_128 = arith.constant 1 : index
    %c0_129 = arith.constant 0 : index
    %c0_130 = arith.constant 0 : index
    %131 = vector.load %arg10[%c1_128, %c0_129, %c0_130] : memref<3x128x16xf32, #tpu.memory_space<vmem>>, vector<1x128x16xf32>
    %132 = vector.shape_cast %131 : vector<1x128x16xf32> to vector<128x16xf32>
    %cst_131 = arith.constant dense<0.000000e+00> : vector<256x16xf32>
    %133 = tpu.matmul %130, %132, %cst_131 {dimension_numbers = #tpu.dot_dimension_numbers<[1], [0], [0], [1], [0, 0, 1, 1], [], []>} : vector<256x128xf32>, vector<128x16xf32>, vector<256x16xf32> -> vector<256x16xf32>
    %134 = arith.addf %128, %133 : vector<256x16xf32>
    %c0_132 = arith.constant 0 : index
    %c2_133 = arith.constant 2 : index
    %c0_134 = arith.constant 0 : index
    %135 = vector.load %arg13[%c0_132, %c2_133, %c0_134] : memref<16x18x128xf32, #tpu.memory_space<vmem>>, vector<16x16x128xf32>
    %136 = vector.shape_cast %135 : vector<16x16x128xf32> to vector<256x128xf32>
    %c2_135 = arith.constant 2 : index
    %c0_136 = arith.constant 0 : index
    %c0_137 = arith.constant 0 : index
    %137 = vector.load %arg10[%c2_135, %c0_136, %c0_137] : memref<3x128x16xf32, #tpu.memory_space<vmem>>, vector<1x128x16xf32>
    %138 = vector.shape_cast %137 : vector<1x128x16xf32> to vector<128x16xf32>
    %cst_138 = arith.constant dense<0.000000e+00> : vector<256x16xf32>
    %139 = tpu.matmul %136, %138, %cst_138 {dimension_numbers = #tpu.dot_dimension_numbers<[1], [0], [0], [1], [0, 0, 1, 1], [], []>} : vector<256x128xf32>, vector<128x16xf32>, vector<256x16xf32> -> vector<256x16xf32>
    %140 = arith.addf %134, %139 : vector<256x16xf32>
    %c0_139 = arith.constant 0 : index
    %c0_140 = arith.constant 0 : index
    %141 = vector.load %arg11[%c0_139, %c0_140] : memref<1x16xf32, #tpu.memory_space<vmem>>, vector<1x16xf32>
    %142 = vector.broadcast %141 : vector<1x16xf32> to vector<256x16xf32>
    %143 = arith.addf %140, %142 : vector<256x16xf32>
    %144 = vector.extract_strided_slice %143 {offsets = [0, 0], sizes = [256, 8], strides = [1, 1]} : vector<256x16xf32> to vector<256x8xf32>
    %145 = vector.extract_strided_slice %143 {offsets = [0, 8], sizes = [256, 8], strides = [1, 1]} : vector<256x16xf32> to vector<256x8xf32>
    %cst_141 = arith.constant 0.000000e+00 : f32
    %146 = vector.broadcast %cst_141 : f32 to vector<256x8xf32>
    %147 = arith.subf %146, %145 : vector<256x8xf32>
    %148 = math.exp %147 : vector<256x8xf32>
    %cst_142 = arith.constant 1.000000e+00 : f32
    %149 = vector.broadcast %cst_142 : f32 to vector<256x8xf32>
    %150 = arith.addf %149, %148 : vector<256x8xf32>
    %cst_143 = arith.constant 1.000000e+00 : f32
    %151 = vector.broadcast %cst_143 : f32 to vector<256x8xf32>
    %152 = arith.divf %151, %150 : vector<256x8xf32>
    %153 = arith.mulf %144, %152 : vector<256x8xf32>
    %c0_144 = arith.constant 0 : index
    %c0_145 = arith.constant 0 : index
    %154 = vector.load %arg12[%c0_144, %c0_145] : memref<256x8xf32, #tpu.memory_space<vmem>>, vector<256x8xf32>
    tpu.vector_store %arg12[%c0_144, %c0_145], %153 {strides = array<i32>} : memref<256x8xf32, #tpu.memory_space<vmem>>, vector<256x8xf32>,
    return
  }
  func.func @transform_0(%arg0: i32) -> (i32, i32, i32) {
    %c0_i32 = arith.constant 0 : i32
    %c0_i32_0 = arith.constant 0 : i32
    %c0_i32_1 = arith.constant 0 : i32
    return %arg0, %c0_i32, %c0_i32_0 : i32, i32, i32
  }
  func.func @transform_1(%arg0: i32) -> (i32, i32, i32) {
    %c0_i32 = arith.constant 0 : i32
    %c0_i32_0 = arith.constant 0 : i32
    %c0_i32_1 = arith.constant 0 : i32
    %c0_i32_2 = arith.constant 0 : i32
    return %c0_i32, %c0_i32_0, %c0_i32_1 : i32, i32, i32
  }
  func.func @transform_2(%arg0: i32) -> (i32, i32) {
    %c0_i32 = arith.constant 0 : i32
    %c0_i32_0 = arith.constant 0 : i32
    %c0_i32_1 = arith.constant 0 : i32
    return %c0_i32, %c0_i32_0 : i32, i32
  }
  func.func @transform_3(%arg0: i32) -> (i32, i32, i32) {
    %c0_i32 = arith.constant 0 : i32
    %c0_i32_0 = arith.constant 0 : i32
    %c0_i32_1 = arith.constant 0 : i32
    %c0_i32_2 = arith.constant 0 : i32
    return %c0_i32, %c0_i32_0, %c0_i32_1 : i32, i32, i32
  }
  func.func @transform_4(%arg0: i32) -> (i32, i32) {
    %c0_i32 = arith.constant 0 : i32
    %c0_i32_0 = arith.constant 0 : i32
    %c0_i32_1 = arith.constant 0 : i32
    return %c0_i32, %c0_i32_0 : i32, i32
  }
  func.func @transform_5(%arg0: i32) -> (i32, i32, i32) {
    %c0_i32 = arith.constant 0 : i32
    %c0_i32_0 = arith.constant 0 : i32
    %c0_i32_1 = arith.constant 0 : i32
    %c0_i32_2 = arith.constant 0 : i32
    return %c0_i32, %c0_i32_0, %c0_i32_1 : i32, i32, i32
  }
  func.func @transform_6(%arg0: i32) -> (i32, i32) {
    %c0_i32 = arith.constant 0 : i32
    %c0_i32_0 = arith.constant 0 : i32
    %c0_i32_1 = arith.constant 0 : i32
    return %c0_i32, %c0_i32_0 : i32, i32
  }
  func.func @transform_7(%arg0: i32) -> (i32, i32, i32) {
    %c0_i32 = arith.constant 0 : i32
    %c0_i32_0 = arith.constant 0 : i32
    %c0_i32_1 = arith.constant 0 : i32
    %c0_i32_2 = arith.constant 0 : i32
    return %c0_i32, %c0_i32_0, %c0_i32_1 : i32, i32, i32
  }
  func.func @transform_8(%arg0: i32) -> (i32, i32) {
    %c0_i32 = arith.constant 0 : i32
    %c0_i32_0 = arith.constant 0 : i32
    %c0_i32_1 = arith.constant 0 : i32
    return %c0_i32, %c0_i32_0 : i32, i32
  }
  func.func @transform_9(%arg0: i32) -> (i32, i32, i32) {
    %c0_i32 = arith.constant 0 : i32
    %c0_i32_0 = arith.constant 0 : i32
    %c0_i32_1 = arith.constant 0 : i32
    %c0_i32_2 = arith.constant 0 : i32
    return %c0_i32, %c0_i32_0, %c0_i32_1 : i32, i32, i32
  }
  func.func @transform_10(%arg0: i32) -> (i32, i32) {
    %c0_i32 = arith.constant 0 : i32
    %c0_i32_0 = arith.constant 0 : i32
    %c0_i32_1 = arith.constant 0 : i32
    return %c0_i32, %c0_i32_0 : i32, i32
  }
  func.func @transform_11(%arg0: i32) -> (i32, i32) {
    %c0_i32 = arith.constant 0 : i32
    %c0_i32_0 = arith.constant 0 : i32
    return %arg0, %c0_i32 : i32, i32
  }
}

</mosaic_0001>

<bundles_post_ra>
// kernel: dense_conv2d_forward.1
= control target key start
LH: loop header
LB: loop body
LE: loop exit
PB: predicated region body
PF: predicated region fallthrough
CT: control target
= control target key end

     0   :  { %16 = vsyncpa [#allocation4], 0  ;;  %s8059_s0 = inlined_call_operand.vmem [shape: f32[32,16,4], index: 0, kind: input, shape index: {}]   ;;  %s8060_s1 = inlined_call_operand.hbm [shape: f32[3,128,8], index: 1, kind: input, shape index: {}]   ;;  %s8061_s2 = inlined_call_operand.vmem [shape: f32[1,8], index: 2, kind: input, shape index: {}]   ;;  %s8062_s3 = inlined_call_operand.hbm [shape: f32[3,128,8], index: 3, kind: input, shape index: {}]   ;;  %s8063_s4 = inlined_call_operand.vmem [shape: f32[1,8], index: 4, kind: input, shape index: {}]   ;;  %s8064_s5 = inlined_call_operand.hbm [shape: f32[3,128,8], index: 5, kind: input, shape index: {}]   ;;  %s8065_s6 = inlined_call_operand.vmem [shape: f32[1,8], index: 6, kind: input, shape index: {}]   ;;  %s8066_s7 = inlined_call_operand.hbm [shape: f32[3,128,8], index: 7, kind: input, shape index: {}]   ;;  %s8067_s8 = inlined_call_operand.vmem [shape: f32[1,8], index: 8, kind: input, shape index: {}]   ;;  %s8068_s9 = inlined_call_operand.vmem [shape: f32[3,128,16], index: 9, kind: input, shape index: {}]   ;;  %s8069_s10 = inlined_call_operand.vmem [shape: f32[1,16], index: 10, kind: input, shape index: {}]   ;;  %s8070_s11 = inlined_call_operand.vmem [shape: f32[512,8], index: 11, kind: output, shape index: {}]  }
   0x1   :  { %17 = vsyncpa [#allocation6], 0 }
   0x2   :  { %18 = vsyncpa [#allocation9], 0  ;;  %s6540_s17 = smov 0  }
   0x3 LB: > { %s6546_s18 = sadd.s32 4294967295, %s6466_s17   ;;  %p5650_p0 = scmp.ge.s32.totalorder %s6466_s17, 1  ;;  %s6466_s17 = sphi %s6540_s17, %s24_s17  }
   0x4   : > { %p291_p1 = scmp.lt.s32.totalorder %s6466_s17, 3  ;;  %p5906_p2 = scmp.eq.s32.totalorder %s6546_s18, 0 }
   0x5   : > { %s319_s21 = sshll.u32 %s8062_s3, 4  ;;  %s302_s25 = sshll.u32 %s8060_s1, 4  ;;  %s320_s21 = int_to_ptr.hbm [resolvable:$true] %s319_s21  ;;  %s303_s25 = int_to_ptr.hbm [resolvable:$true] %s302_s25 }
   0x6   : > { %p6554_p3 = pnand %p5650_p0, %p291_p1  ;;  %s6468_s26 = smov [#allocation5]  }
   0x7   : > { %s321_s27 = sshll.u32 %s6468_s26, 4  ;;  %s6469_s29 = smov [#allocation3]   ;;  %s322_s27 = int_to_ptr.vmem [resolvable:$true] %s321_s27 }
   0x8   : > { %p5893_p4 = pneg %p6554_p3  ;;  %s304_s30 = sshll.u32 %s6469_s29, 4  ;;  %s305_s30 = int_to_ptr.vmem [resolvable:$true] %s304_s30 }
   0x9   : > { %s336_s14 = sshll.u32 %s8064_s5, 4  ;;  %s6470_s15 = smov 128   ;;  %s337_s14 = int_to_ptr.hbm [resolvable:$true] %s336_s14 }
   0xa   : > { %p6565_p5 = pnand %p5906_p2, %p5893_p4  ;;  %s6471_s16 = smov 8  }
   0xb   : > { %s6472_s19 = smov [#allocation7]   ;;  %s353_s26 = sshll.u32 %s8066_s7, 4  ;;  %s354_s26 = int_to_ptr.hbm [resolvable:$true] %s353_s26 }
   0xc   : > { %5899 = dma.hbm_to_vmem [thread:$0]  (!%p6565_p5), %s320_s21, 6144, %s322_s27, [#allocation6], %s6470_s15, %s6470_s15, %s6471_s16  }
   0xd   : > { %5896 = dma.hbm_to_vmem [thread:$0]  (!%p6565_p5), %s303_s25, 6144, %s305_s30, [#allocation4], %s6470_s15, %s6470_s15, %s6471_s16  }
   0xe   : > { %s338_s20 = sshll.u32 %s6472_s19, 4  ;;  %s6473_s29 = smov [#allocation8]   ;;  %s339_s20 = int_to_ptr.vmem [resolvable:$true] %s338_s20 }
   0xf   : > { %5902 = dma.hbm_to_vmem [thread:$0]  (!%p6565_p5), %s337_s14, 6144, %s339_s20, [#allocation6], %s6470_s15, %s6470_s15, %s6471_s16  }
  0x10   : > { %s355_s12 = sshll.u32 %s6473_s29, 4  ;;  %390 = sbr.rel (%p6554_p3) target bundleno = 1807 (0x70f), region = 64  ;;  %s356_s12 = int_to_ptr.vmem [resolvable:$true] %s355_s12 }
  0x11   : > { %5905 = dma.hbm_to_vmem [thread:$0]  (!%p6565_p5), %s354_s26, 6144, %s356_s12, [#allocation9], %s6470_s15, %s6470_s15, %s6471_s16  }
  0x15   : > { %6453 = dma.done.wait (%p5906_p2), [#allocation4], 6144  }
  0x16   : > { %6455 = vsyncadd (%p5906_p2), [#allocation4], 4294961152 }
  0x17   : > { %6457 = dma.done.wait (%p5906_p2), [#allocation6], 12288  }
  0x18   : > { %6459 = vsyncadd (%p5906_p2), [#allocation6], 4294955008 }
  0x19   : > { %6461 = dma.done.wait (%p5906_p2), [#allocation9], 6144  }
  0x1a   : > { %6463 = vsyncadd (%p5906_p2), [#allocation9], 4294961152  ;;  %v6474_v0 = vmov 0.0   ;;  %s5661_s21 = sshll.u32 %s6546_s18, 4  ;;  %v669_v1 = vld [vmem:[#allocation3 + $0xf8] sm:$0xff]  ;;  %v668_v3 = vld [vmem:[#allocation3 + $0xf0] sm:$0xff] }
  0x1b   : > { %496 = vst [vmem:[#allocation2 + $0x120] sm:$0xff] %v6474_v0  ;;  %v6604_v2 = vld [vmem:[#allocation3 + $0x178] sm:$0xff]  ;;  %5829 = vmatpush.msra.mxu3 %v669_v1  ;;  %v6608_v4 = vld [vmem:[#allocation3 + $0x170] sm:$0xff]  ;;  %p6614_p6 = scmp.lt.s32.totalorder %s5661_s21, 31  ;;  %670 = vmatpush.msra.mxu0 %v669_v1  ;;  %v667_v6 = vld [vmem:[#allocation3 + $0xe8] sm:$0xff]  ;;  %vm540_vm0 = vcmask 31744  }
  0x1c   : > { %497 = vst [vmem:[#allocation2 + $0x128] sm:$0xff] %v6474_v0  ;;  %945 = vmatpush.msra.mxu2 %v6604_v2  ;;  %v6610_v5 = vld [vmem:[#allocation3 + $0x78] sm:$0xff]  ;;  %v6620_v7 = vld [vmem:[#allocation3 + $0x168] sm:$0xff]  ;;  %v6622_v8 = vld [vmem:[#allocation3 + $0x70] sm:$0xff]  ;;  %s6475_s15 = smov 4   ;;  %s6476_s24 = smov 12  }
  0x1d   : > { %460 = vst [vmem:[#allocation2] sm:$0xff] %v6474_v0  ;;  %783 = vmatpush.msra.mxu1 %v6610_v5  ;;  %5830 = vmatpush.msra.mxu3 %v668_v3  ;;  %v6626_v9 = vld [vmem:[#allocation3 + $0x68] sm:$0xff]  ;;  %v666_v10 = vld [vmem:[#allocation3 + $0xe0] sm:$0xff]  ;;  %s8086_s21 = smov (!%p6614_p6, %s5661_s21), 31  ;;  %v665_v13 = vld [vmem:[#allocation3 + $0xd8] sm:$0xff]  ;;  %s6477_s22 = smov 20  }
  0x1e   : > { %461 = vst [vmem:[#allocation2 + $0x8] sm:$0xff] %v6474_v0  ;;  %946 = vmatpush.msra.mxu2 %v6608_v4  ;;  %671 = vmatpush.msra.mxu0 %v668_v3  ;;  %v6630_v11 = vld [vmem:[#allocation3 + $0x160] sm:$0xff]  ;;  %v6644_v14 = vld [vmem:[#allocation3 + $0x158] sm:$0xff]  ;;  %v664_v16 = vld [vmem:[#allocation3 + $0xd0] sm:$0xff]  ;;  %s5828_s25 = sshll.u32 %s8086_s21, 4  ;;  %s5664_s19 = sshll.u32 %s6546_s18, 5 }
  0x1f   : > { %462 = vst [vmem:[#allocation2 + $0x10] sm:$0x3] %v6474_v0  ;;  %784 = vmatpush.msra.mxu1 %v6622_v8  ;;  %5831 = vmatpush.msra.mxu3 %v667_v6  ;;  %v6634_v12 = vld [vmem:[#allocation3 + $0x60] sm:$0xff]  ;;  %v6648_v15 = vld [vmem:[#allocation3 + $0x58] sm:$0xff]  ;;  %v6652_v17 = vld [vmem:[#allocation3 + $0x150] sm:$0xff]  ;;  %s6674_s30 = scalar_lea.vmem %s8059_s0, %s5828_s25  ;;  %p7725_p7 = scmp.lt.s32.totalorder %s5664_s19, 63 }
  0x20   : > { %463 = vst [vmem:[#allocation2 + $0x18] sm:$0xff] %v6474_v0  ;;  %947 = vmatpush.msra.mxu2 %v6620_v7  ;;  %672 = vmatpush.msra.mxu0 %v667_v6  ;;  %v6656_v18 = vld [vmem:[#allocation3 + $0x50] sm:$0xff]  ;;  %v663_v19 = vld [vmem:[#allocation3 + $0xc8] sm:$0xff]  ;;  %v662_v22 = vld [vmem:[#allocation3 + $0xc0] sm:$0xff] }
  0x21   : > { %464 = vst [vmem:[#allocation2 + $0x20] sm:$0xff] %v6474_v0  ;;  %785 = vmatpush.msra.mxu1 %v6626_v9  ;;  %5832 = vmatpush.msra.mxu3 %v666_v10  ;;  %v6661_v20 = vld [vmem:[#allocation3 + $0x148] sm:$0xff]  ;;  %v6669_v23 = vld [vmem:[#allocation3 + $0x140] sm:$0xff]  ;;  %v661_v25 = vld [vmem:[#allocation3 + $0xb8] sm:$0xff]  ;;  %s8088_s19 = smov (!%p7725_p7, %s5664_s19), 63 }
  0x22   : > { %465 = vst [vmem:[#allocation2 + $0x28] sm:$0x3] %v6474_v0  ;;  %948 = vmatpush.msra.mxu2 %v6630_v11  ;;  %673 = vmatpush.msra.mxu0 %v666_v10  ;;  %v6665_v21 = vld [vmem:[#allocation3 + $0x48] sm:$0xff]  ;;  %v6678_v24 = vld [vmem:[#allocation3 + $0x40] sm:$0xff]  ;;  %v6682_v26 = vld [vmem:[#allocation3 + $0x138] sm:$0xff]  ;;  %s5665_s18 = sshll.u32 %s8088_s19, 3 }
  0x23   : > { %466 = vst [vmem:[#allocation2 + $0x30] sm:$0xff] %v6474_v0  ;;  %786 = vmatpush.msra.mxu1 %v6634_v12  ;;  %5833 = vmatpush.msra.mxu3 %v665_v13  ;;  %v660_v27 = vld [vmem:[#allocation3 + $0xb0] sm:$0xff]  ;;  %v6688_v29 = vld [vmem:[#allocation3 + $0x38] sm:$0xff]  ;;  %v532_v30 = vld [vmem:[%s6674_s30 + $0xc0] sm:$0xff]  ;;  %s7765_s26 = scalar_lea.vmem %s8070_s11, %s5665_s18 }
  0x24   : > { %467 = vst [vmem:[#allocation2 + $0x38] sm:$0xff] %v6474_v0  ;;  %949 = vmatpush.msra.mxu2 %v6644_v14  ;;  %674 = vmatpush.msra.mxu0 %v665_v13  ;;  %v6686_v28 = vld [vmem:[#allocation3 + $0x130] sm:$0xff]  ;;  %v659_v32 = vld [vmem:[#allocation3 + $0xa8] sm:$0xff]  ;;  %v658_v35 = vld [vmem:[#allocation3 + $0xa0] sm:$0xff] }
  0x25   : > { %468 = vst [vmem:[#allocation2 + $0x40] sm:$0x3] %v6474_v0  ;;  %787 = vmatpush.msra.mxu1 %v6648_v15  ;;  %5834 = vmatpush.msra.mxu3 %v664_v16  ;;  %v6693_v31 = vld [vmem:[#allocation3 + $0x30] sm:$0xff]  ;;  %v6699_v33 = vld [vmem:[#allocation3 + $0x128] sm:$0xff]  ;;  %v6707_v36 = vld [vmem:[#allocation3 + $0x120] sm:$0xff] }
  0x26   : > { %469 = vst [vmem:[#allocation2 + $0x48] sm:$0xff] %v6474_v0  ;;  %950 = vmatpush.msra.mxu2 %v6652_v17  ;;  %675 = vmatpush.msra.mxu0 %v664_v16  ;;  %v6703_v34 = vld [vmem:[#allocation3 + $0x28] sm:$0xff]  ;;  %v6711_v37 = vld [vmem:[#allocation3 + $0x20] sm:$0xff]  ;;  %v657_v38 = vld [vmem:[#allocation3 + $0x98] sm:$0xff] }
  0x27   : > { %470 = vst [vmem:[#allocation2 + $0x50] sm:$0xff] %v6474_v0  ;;  %788 = vmatpush.msra.mxu1 %v6656_v18  ;;  %5835 = vmatpush.msra.mxu3 %v663_v19  ;;  %v6715_v39 = vld [vmem:[#allocation3 + $0x118] sm:$0xff]  ;;  %v656_v41 = vld [vmem:[#allocation3 + $0x90] sm:$0xff]  ;;  %v655_v44 = vld [vmem:[#allocation3 + $0x88] sm:$0xff] }
  0x28   : > { %471 = vst [vmem:[#allocation2 + $0x58] sm:$0x3] %v6474_v0  ;;  %951 = vmatpush.msra.mxu2 %v6661_v20  ;;  %676 = vmatpush.msra.mxu0 %v663_v19  ;;  %v6719_v40 = vld [vmem:[#allocation3 + $0x18] sm:$0xff]  ;;  %v6723_v42 = vld [vmem:[#allocation3 + $0x110] sm:$0xff]  ;;  %v6731_v45 = vld [vmem:[#allocation3 + $0x108] sm:$0xff] }
  0x29   : > { %472 = vst [vmem:[#allocation2 + $0x60] sm:$0xff] %v6474_v0  ;;  %789 = vmatpush.msra.mxu1 %v6665_v21  ;;  %5836 = vmatpush.msra.mxu3 %v662_v22  ;;  %v6727_v43 = vld [vmem:[#allocation3 + $0x10] sm:$0xff]  ;;  %v6736_v46 = vld [vmem:[#allocation3 + $0x8] sm:$0xff]  ;;  %v654_v47 = vld [vmem:[#allocation3 + $0x80] sm:$0xff] }
  0x2a   : > { %473 = vst [vmem:[#allocation2 + $0x68] sm:$0xff] %v6474_v0  ;;  %952 = vmatpush.msra.mxu2 %v6669_v23  ;;  %677 = vmatpush.msra.mxu0 %v662_v22  ;;  %v6739_v48 = vld [vmem:[#allocation3 + $0x100] sm:$0xff]  ;;  %v509_v52 = vld [vmem:[%s6674_s30 + $0x8] sm:$0xff]  ;;  %v534_v54 = vld [vmem:[%s6674_s30 + $0xd0] sm:$0xff] }
  0x2b   : > { %474 = vst [vmem:[#allocation2 + $0x70] sm:$0x3] %v6474_v0  ;;  %790 = vmatpush.msra.mxu1 %v6678_v24  ;;  %5837 = vmatpush.msra.mxu3 %v661_v25  ;;  %v6746_v50 = vld [vmem:[#allocation3] sm:$0xff]  ;;  %v533_v53 = vld [vmem:[%s6674_s30 + $0xc8] sm:$0xff]  ;;  %v510_v55 = vld [vmem:[%s6674_s30 + $0x10] sm:$0xff] }
  0x2c   : > { %475 = vst [vmem:[#allocation2 + $0x78] sm:$0xff] %v6474_v0  ;;  %953 = vmatpush.msra.mxu2 %v6682_v26  ;;  %678 = vmatpush.msra.mxu0 %v661_v25  ;;  %v508_v51 = vld [vmem:[%s6674_s30] sm:$0xff]  ;;  %v511_v56 = vld [vmem:[%s6674_s30 + $0x18] sm:$0xff]  ;;  %v513_v60 = vld [vmem:[%s6674_s30 + $0x28] sm:$0xff] }
  0x2d   : > { %476 = vst [vmem:[#allocation2 + $0x80] sm:$0xff] %v6474_v0  ;;  %791 = vmatpush.msra.mxu1 %v6688_v29  ;;  %5838 = vmatpush.msra.mxu3 %v660_v27  ;;  %v535_v57 = vld [vmem:[%s6674_s30 + $0xd8] sm:$0xff]  ;;  %v536_v58 = vld [vmem:[%s6674_s30 + $0xe0] sm:$0xff]  ;;  %v537_v1 = vld [vmem:[%s6674_s30 + $0xe8] sm:$0xff] }
  0x2e   : > { %477 = vst [vmem:[#allocation2 + $0x88] sm:$0x3] %v6474_v0  ;;  %954 = vmatpush.msra.mxu2 %v6686_v28  ;;  %679 = vmatpush.msra.mxu0 %v660_v27  ;;  %v512_v59 = vld [vmem:[%s6674_s30 + $0x20] sm:$0xff]  ;;  %v514_v10 = vld [vmem:[%s6674_s30 + $0x30] sm:$0xff]  ;;  %v539_v19 = vld [vmem:[%s6674_s30 + $0xf8] sm:$0xff] }
  0x2f   : > { %478 = vst [vmem:[#allocation2 + $0x90] sm:$0xff] %v6474_v0  ;;  %792 = vmatpush.msra.mxu1 %v6693_v31  ;;  %5839 = vmatpush.msra.mxu3 %v659_v32  ;;  %v516_v25 = vld [vmem:[%s6674_s30 + $0x40] sm:$0xff]  ;;  %v517_v27 = vld [vmem:[%s6674_s30 + $0x48] sm:$0xff] }
  0x30   : > { %479 = vst [vmem:[#allocation2 + $0x98] sm:$0xff] %v6474_v0  ;;  %955 = vmatpush.msra.mxu2 %v6699_v33  ;;  %680 = vmatpush.msra.mxu0 %v659_v32 }
  0x31   : > { %565 = vst.msk [vmem:[#allocation2 + $0x121] sm:$0xff] %vm540_vm0, %v532_v30  ;;  %793 = vmatpush.msra.mxu1 %v6703_v34  ;;  %5840 = vmatpush.msra.mxu3 %v658_v35  ;;  %v519_v30 = vld [vmem:[%s6674_s30 + $0x58] sm:$0xff] }
  0x32   : > { %480 = vst [vmem:[#allocation2 + $0xa0] sm:$0x3] %v6474_v0  ;;  %956 = vmatpush.msra.mxu2 %v6707_v36  ;;  %681 = vmatpush.msra.mxu0 %v658_v35 }
  0x33   : > { %481 = vst [vmem:[#allocation2 + $0xa8] sm:$0xff] %v6474_v0  ;;  %794 = vmatpush.msra.mxu1 %v6711_v37  ;;  %5841 = vmatpush.msra.mxu3 %v657_v38 }
  0x34   : > { %482 = vst [vmem:[#allocation2 + $0xb0] sm:$0xff] %v6474_v0  ;;  %957 = vmatpush.msra.mxu2 %v6715_v39  ;;  %682 = vmatpush.msra.mxu0 %v657_v38 }
  0x35   : > { %483 = vst [vmem:[#allocation2 + $0xb8] sm:$0x3] %v6474_v0  ;;  %795 = vmatpush.msra.mxu1 %v6719_v40  ;;  %5842 = vmatpush.msra.mxu3 %v656_v41 }
  0x36   : > { %484 = vst [vmem:[#allocation2 + $0xc0] sm:$0xff] %v6474_v0  ;;  %958 = vmatpush.msra.mxu2 %v6723_v42  ;;  %683 = vmatpush.msra.mxu0 %v656_v41  ;;  %v1850_v41 = vld [vmem:[#allocation5 + $0x178] sm:$0xff] }
  0x37   : > { %485 = vst [vmem:[#allocation2 + $0xc8] sm:$0xff] %v6474_v0  ;;  %796 = vmatpush.msra.mxu1 %v6727_v43  ;;  %5843 = vmatpush.msra.mxu3 %v655_v44 }
  0x38   : > { %486 = vst [vmem:[#allocation2 + $0xd0] sm:$0x3] %v6474_v0  ;;  %959 = vmatpush.msra.mxu2 %v6731_v45  ;;  %v645_v49 = vld [vmem:[#allocation2 + $0x121] sm:$0xff]  ;;  %684 = vmatpush.msra.mxu0 %v655_v44 }
  0x39   : > { %487 = vst [vmem:[#allocation2 + $0xd8] sm:$0xff] %v6474_v0  ;;  %797 = vmatpush.msra.mxu1 %v6736_v46  ;;  %5844 = vmatpush.msra.mxu3 %v654_v47  ;;  %v597_v38 = vld [vmem:[#allocation2 + $0x120] sm:$0xff] }
  0x3a   : > { %488 = vst [vmem:[#allocation2 + $0xe0] sm:$0xff] %v6474_v0  ;;  %960 = vmatpush.msra.mxu2 %v6739_v48  ;;  %758 = vmatmul.f32.vlgmr.msra.gmra.mxu3 %v645_v49 }
  0x3b   : > { %489 = vst [vmem:[#allocation2 + $0xe8] sm:$0x3] %v6474_v0  ;;  %685 = vmatpush.msra.mxu0 %v654_v47  ;;  %798 = vmatpush.msra.mxu1 %v6746_v50  ;;  %v1849_v47 = vld [vmem:[#allocation5 + $0x170] sm:$0xff] }
  0x3c   : > { %490 = vst [vmem:[#allocation2 + $0xf0] sm:$0xff] %v6474_v0  ;;  %5845 = vmatpush.msrb.mxu3 %v6610_v5 }
  0x3d   : > { %491 = vst [vmem:[#allocation2 + $0xf8] sm:$0xff] %v6474_v0  ;;  %1851 = vmatpush.msrb.mxu1 %v1850_v41 }
  0x3e   : > { %492 = vst [vmem:[#allocation2 + $0x100] sm:$0x3] %v6474_v0  ;;  %5846 = vmatpush.msrb.mxu3 %v6622_v8 }
  0x3f   : > { %493 = vst [vmem:[#allocation2 + $0x108] sm:$0xff] %v6474_v0  ;;  %1852 = vmatpush.msrb.mxu1 %v1849_v47 }
  0x40   : > { %494 = vst [vmem:[#allocation2 + $0x110] sm:$0xff] %v6474_v0  ;;  %5847 = vmatpush.msrb.mxu3 %v6626_v9  ;;  %v538_v9 = vld [vmem:[%s6674_s30 + $0xf0] sm:$0xff] }
  0x41   : > { %495 = vst [vmem:[#allocation2 + $0x118] sm:$0x3] %v6474_v0 }
  0x42   : > { %498 = vst [vmem:[#allocation2 + $0x130] sm:$0x3] %v6474_v0  ;;  %5848 = vmatpush.msrb.mxu3 %v6634_v12  ;;  %v515_v12 = vld [vmem:[%s6674_s30 + $0x38] sm:$0xff] }
  0x43   : > { %499 = vst [vmem:[#allocation2 + $0x138] sm:$0xff] %v6474_v0 }
  0x44   : > { %500 = vst [vmem:[#allocation2 + $0x140] sm:$0xff] %v6474_v0  ;;  %5849 = vmatpush.msrb.mxu3 %v6648_v15 }
  0x45   : > { %501 = vst [vmem:[#allocation2 + $0x148] sm:$0x3] %v6474_v0 }
  0x46   : > { %502 = vst [vmem:[#allocation2 + $0x150] sm:$0xff] %v6474_v0  ;;  %5850 = vmatpush.msrb.mxu3 %v6656_v18 }
  0x47   : > { %503 = vst [vmem:[#allocation2 + $0x158] sm:$0xff] %v6474_v0 }
  0x48   : > { %504 = vst [vmem:[#allocation2 + $0x160] sm:$0x3] %v6474_v0  ;;  %5851 = vmatpush.msrb.mxu3 %v6665_v21 }
  0x49   : > { %505 = vst [vmem:[#allocation2 + $0x168] sm:$0xff] %v6474_v0 }
  0x4a   : > { %506 = vst [vmem:[#allocation2 + $0x170] sm:$0xff] %v6474_v0  ;;  %5852 = vmatpush.msrb.mxu3 %v6678_v24 }
  0x4b   : > { %507 = vst [vmem:[#allocation2 + $0x178] sm:$0x3] %v6474_v0 }
  0x4c   : > { %541 = vst.msk [vmem:[#allocation2 + $0x1] sm:$0xff] %vm540_vm0, %v508_v51  ;;  %5853 = vmatpush.msrb.mxu3 %v6688_v29 }
  0x4d   : > { %542 = vst.msk [vmem:[#allocation2 + $0x9] sm:$0xff] %vm540_vm0, %v509_v52  ;;  %v522_v52 = vld [vmem:[%s6674_s30 + $0x70] sm:$0xff] }
  0x4e   : > { %566 = vst.msk [vmem:[#allocation2 + $0x129] sm:$0xff] %vm540_vm0, %v533_v53  ;;  %5854 = vmatpush.msrb.mxu3 %v6693_v31  ;;  %v523_v53 = vld [vmem:[%s6674_s30 + $0x78] sm:$0xff] }
  0x4f   : > { %567 = vst.msk [vmem:[#allocation2 + $0x139] sm:$0xff] %vm540_vm0, %v534_v54  ;;  %v1524_v54 = vld [vmem:[#allocation5 + $0x68] sm:$0xff] }
  0x50   : > { %543 = vst.msk [vmem:[#allocation2 + $0x19] sm:$0xff] %vm540_vm0, %v510_v55  ;;  %5855 = vmatpush.msrb.mxu3 %v6703_v34  ;;  %v1526_v34 = vld [vmem:[#allocation5 + $0x78] sm:$0xff] }
  0x51   : > { %544 = vst.msk [vmem:[#allocation2 + $0x21] sm:$0xff] %vm540_vm0, %v511_v56  ;;  %1689 = vmatpush.msrb.mxu0 %v1526_v34 }
  0x52   : > { %568 = vst.msk [vmem:[#allocation2 + $0x141] sm:$0xff] %vm540_vm0, %v535_v57  ;;  %5856 = vmatpush.msrb.mxu3 %v6711_v37 }
  0x53   : > { %v621_v61 = vld [vmem:[#allocation2 + $0x1] sm:$0xff]  ;;  %569 = vst.msk [vmem:[#allocation2 + $0x151] sm:$0xff] %vm540_vm0, %v536_v58 }
  0x54   : > { %v573_v62 = vld [vmem:[#allocation2] sm:$0xff]  ;;  %686 = vmatmul.f32.vlgmr.msra.gmra.mxu0 %v621_v61  ;;  %545 = vst.msk [vmem:[#allocation2 + $0x31] sm:$0xff] %vm540_vm0, %v512_v59  ;;  %v622_v3 = vld [vmem:[#allocation2 + $0x9] sm:$0xff]  ;;  %5857 = vmatpush.msrb.mxu3 %v6719_v40 }
  0x55   : > { %v896_v63 = vld [vmem:[#allocation2 + $0x2] sm:$0xff]  ;;  %799 = vmatmul.f32.vlgmr.msra.gmra.mxu1 %v573_v62  ;;  %546 = vst.msk [vmem:[#allocation2 + $0x39] sm:$0xff] %vm540_vm0, %v513_v60  ;;  %v897_v6 = vld [vmem:[#allocation2 + $0xa] sm:$0xff] }
  0x56   : > { %961 = vmatmul.f32.vlgmr.msra.gmra.mxu2 %v896_v63  ;;  %v646_v0 = vld [vmem:[#allocation2 + $0x129] sm:$0xff]  ;;  %570 = vst.msk [vmem:[#allocation2 + $0x159] sm:$0xff] %vm540_vm0, %v537_v1  ;;  %v647_v8 = vld [vmem:[#allocation2 + $0x139] sm:$0xff]  ;;  %5858 = vmatpush.msrb.mxu3 %v6727_v43 }
  0x57   : > { %761 = vmatmul.f32.gmra.mxu3 %v646_v0  ;;  %v574_v5 = vld [vmem:[#allocation2 + $0x8] sm:$0xff]  ;;  %571 = vst.msk [vmem:[#allocation2 + $0x169] sm:$0xff] %vm540_vm0, %v538_v9  ;;  %v623_v13 = vld [vmem:[#allocation2 + $0x19] sm:$0xff] }
  0x58   : > { %547 = vst.msk [vmem:[#allocation2 + $0x49] sm:$0xff] %vm540_vm0, %v514_v10  ;;  %5859 = vmatpush.msrb.mxu3 %v6736_v46  ;;  %v575_v15 = vld [vmem:[#allocation2 + $0x18] sm:$0xff]  ;;  %v624_v21 = vld [vmem:[#allocation2 + $0x21] sm:$0xff]  ;;  %v1525_v46 = vld [vmem:[#allocation5 + $0x70] sm:$0xff] }
  0x59   : > { %548 = vst.msk [vmem:[#allocation2 + $0x51] sm:$0xff] %vm540_vm0, %v515_v12  ;;  %v898_v16 = vld [vmem:[#allocation2 + $0x1a] sm:$0xff]  ;;  %v899_v24 = vld [vmem:[#allocation2 + $0x22] sm:$0xff]  ;;  %1690 = vmatpush.msrb.mxu0 %v1525_v46  ;;  %v921_v34 = vld [vmem:[#allocation2 + $0x12a] sm:$0xff] }
  0x5a   : > { %5860 = vmatpush.msrb.mxu3 %v6746_v50  ;;  %v648_v18 = vld [vmem:[#allocation2 + $0x141] sm:$0xff]  ;;  %572 = vst.msk [vmem:[#allocation2 + $0x171] sm:$0xff] %vm540_vm0, %v539_v19  ;;  %v599_v51 = vld [vmem:[#allocation2 + $0x138] sm:$0xff]  ;;  %v601_v63 = vld [vmem:[#allocation2 + $0x150] sm:$0xff] }
  0x5b   : > { %v576_v22 = vld [vmem:[#allocation2 + $0x20] sm:$0xff]  ;;  %549 = vst.msk [vmem:[#allocation2 + $0x61] sm:$0xff] %vm540_vm0, %v516_v25  ;;  %v521_v40 = vld [vmem:[%s6674_s30 + $0x68] sm:$0xff]  ;;  %1691 = vmatpush.msrb.mxu0 %v1524_v54  ;;  %v526_v19 = vld [vmem:[%s6674_s30 + $0x90] sm:$0xff] }
  0x5c   : > { %689 = vmatmul.f32.gmra.mxu0 %v622_v3  ;;  %5861 = vmatpush.msra.mxu3 %v6604_v2  ;;  %v649_v2 = vld [vmem:[#allocation2 + $0x151] sm:$0xff]  ;;  %550 = vst.msk [vmem:[#allocation2 + $0x69] sm:$0xff] %vm540_vm0, %v517_v27  ;;  %v901_v29 = vld [vmem:[#allocation2 + $0x3a] sm:$0xff]  ;;  %v1848_v59 = vld [vmem:[#allocation5 + $0x168] sm:$0xff] }
  0x5d   : > { %802 = vmatmul.f32.gmra.mxu1 %v574_v5  ;;  %552 = vst.msk [vmem:[#allocation2 + $0x81] sm:$0xff] %vm540_vm0, %v519_v30  ;;  %v600_v58 = vld [vmem:[#allocation2 + $0x140] sm:$0xff]  ;;  %v525_v1 = vld [vmem:[%s6674_s30 + $0x88] sm:$0xff]  ;;  %v602_v10 = vld [vmem:[#allocation2 + $0x158] sm:$0xff] }
  0x5e   : > { %964 = vmatmul.f32.gmra.mxu2 %v897_v6  ;;  %5862 = vmatpush.msra.mxu3 %v6608_v4  ;;  %v625_v4 = vld [vmem:[#allocation2 + $0x31] sm:$0xff]  ;;  %554 = vst.msk [vmem:[#allocation2 + $0x99] sm:$0xff] %vm540_vm0, %v521_v40  ;;  %v524_v0 = vld [vmem:[%s6674_s30 + $0x80] sm:$0xff] }
  0x5f   : > { %764 = vmatmul.f32.gmra.mxu3 %v647_v8  ;;  %v579_v31 = vld [vmem:[#allocation2 + $0x48] sm:$0xff]  ;;  %555 = vst.msk [vmem:[#allocation2 + $0xa9] sm:$0xff] %vm540_vm0, %v522_v52  ;;  %1853 = vmatpush.msrb.mxu1 %v1848_v59  ;;  %v1523_v3 = vld [vmem:[#allocation5 + $0x60] sm:$0xff] }
  0x60   : > { %5863 = vmatpush.msra.mxu3 %v6620_v7  ;;  %v577_v7 = vld [vmem:[#allocation2 + $0x30] sm:$0xff]  ;;  %556 = vst.msk [vmem:[#allocation2 + $0xb1] sm:$0xff] %vm540_vm0, %v523_v53  ;;  %1692 = vmatpush.msrb.mxu0 %v1523_v3  ;;  %v1847_v5 = vld [vmem:[#allocation5 + $0x160] sm:$0xff] }
  0x61   : > { %v902_v32 = vld [vmem:[#allocation2 + $0x4a] sm:$0xff]  ;;  %v903_v37 = vld [vmem:[#allocation2 + $0x52] sm:$0xff]  ;;  %557 = vst.msk [vmem:[#allocation2 + $0xc1] sm:$0xff] %vm540_vm0, %v524_v0  ;;  %1854 = vmatpush.msrb.mxu1 %v1847_v5  ;;  %v1519_v3 = vld [vmem:[#allocation5 + $0x40] sm:$0xff] }
  0x62   : > { %5864 = vmatpush.msra.mxu3 %v6630_v11  ;;  %v900_v11 = vld [vmem:[#allocation2 + $0x32] sm:$0xff]  ;;  %v581_v43 = vld [vmem:[#allocation2 + $0x60] sm:$0xff]  ;;  %558 = vst.msk [vmem:[#allocation2 + $0xc9] sm:$0xff] %vm540_vm0, %v525_v1 }
  0x63   : > { %v628_v35 = vld [vmem:[#allocation2 + $0x51] sm:$0xff]  ;;  %v904_v44 = vld [vmem:[#allocation2 + $0x62] sm:$0xff]  ;;  %559 = vst.msk [vmem:[#allocation2 + $0xd9] sm:$0xff] %vm540_vm0, %v526_v19 }
  0x64   : > { %692 = vmatmul.f32.gmra.mxu0 %v623_v13  ;;  %5865 = vmatpush.msra.mxu3 %v6644_v14  ;;  %v650_v14 = vld [vmem:[#allocation2 + $0x159] sm:$0xff]  ;;  %v582_v49 = vld [vmem:[#allocation2 + $0x68] sm:$0xff]  ;;  %v604_v27 = vld [vmem:[#allocation2 + $0x170] sm:$0xff] }
  0x65   : > { %805 = vmatmul.f32.gmra.mxu1 %v575_v15  ;;  %v905_v50 = vld [vmem:[#allocation2 + $0x6a] sm:$0xff]  ;;  %v632_v60 = vld [vmem:[#allocation2 + $0x81] sm:$0xff]  ;;  %v634_v12 = vld [vmem:[#allocation2 + $0x99] sm:$0xff] }
  0x66   : > { %967 = vmatmul.f32.gmra.mxu2 %v898_v16  ;;  %5866 = vmatpush.msra.mxu3 %v6652_v17  ;;  %v626_v17 = vld [vmem:[#allocation2 + $0x39] sm:$0xff]  ;;  %v907_v62 = vld [vmem:[#allocation2 + $0x82] sm:$0xff] }
  0x67   : > { %767 = vmatmul.f32.gmra.mxu3 %v648_v18  ;;  %v909_v15 = vld [vmem:[#allocation2 + $0x9a] sm:$0xff]  ;;  %v603_v16 = vld [vmem:[#allocation2 + $0x168] sm:$0xff] }
  0x68   : > { %5867 = vmatpush.msra.mxu3 %v6661_v20  ;;  %v578_v20 = vld [vmem:[#allocation2 + $0x38] sm:$0xff]  ;;  %v910_v25 = vld [vmem:[#allocation2 + $0xaa] sm:$0xff]  ;;  %v1843_v5 = vld [vmem:[#allocation5 + $0x140] sm:$0xff] }
  0x69   : > { %v1522_v18 = vld [vmem:[#allocation5 + $0x58] sm:$0xff] }
  0x6a   : > { %5868 = vmatpush.msra.mxu3 %v6669_v23  ;;  %v651_v23 = vld [vmem:[#allocation2 + $0x169] sm:$0xff]  ;;  %1693 = vmatpush.msrb.mxu0 %v1522_v18  ;;  %v591_v59 = vld [vmem:[#allocation2 + $0xd8] sm:$0xff] }
  0x6c   : > { %695 = vmatmul.f32.gmra.mxu0 %v624_v21  ;;  %5869 = vmatpush.msra.mxu3 %v6682_v26  ;;  %v518_v26 = vld [vmem:[%s6674_s30 + $0x50] sm:$0xff]  ;;  %v527_v21 = vld [vmem:[%s6674_s30 + $0x98] sm:$0xff] }
  0x6d   : > { %808 = vmatmul.f32.gmra.mxu1 %v576_v22  ;;  %551 = vst.msk [vmem:[#allocation2 + $0x79] sm:$0xff] %vm540_vm0, %v518_v26  ;;  %v1846_v22 = vld [vmem:[#allocation5 + $0x158] sm:$0xff] }
  0x6e   : > { %970 = vmatmul.f32.gmra.mxu2 %v899_v24  ;;  %5870 = vmatpush.msra.mxu3 %v6686_v28  ;;  %v627_v28 = vld [vmem:[#allocation2 + $0x49] sm:$0xff]  ;;  %560 = vst.msk [vmem:[#allocation2 + $0xe1] sm:$0xff] %vm540_vm0, %v527_v21 }
  0x6f   : > { %770 = vmatmul.f32.gmra.mxu3 %v649_v2  ;;  %1855 = vmatpush.msrb.mxu1 %v1846_v22  ;;  %v635_v24 = vld [vmem:[#allocation2 + $0xa9] sm:$0xff] }
  0x70   : > { %5871 = vmatpush.msra.mxu3 %v6699_v33  ;;  %v652_v33 = vld [vmem:[#allocation2 + $0x171] sm:$0xff]  ;;  %v587_v2 = vld [vmem:[#allocation2 + $0xa8] sm:$0xff] }
  0x72   : > { %5872 = vmatpush.msra.mxu3 %v6707_v36  ;;  %v580_v36 = vld [vmem:[#allocation2 + $0x50] sm:$0xff] }
  0x74   : > { %698 = vmatmul.f32.gmra.mxu0 %v625_v4  ;;  %5873 = vmatpush.msra.mxu3 %v6715_v39  ;;  %v520_v39 = vld [vmem:[%s6674_s30 + $0x60] sm:$0xff]  ;;  %v583_v56 = vld [vmem:[#allocation2 + $0x78] sm:$0xff] }
  0x75   : > { %811 = vmatmul.f32.gmra.mxu1 %v577_v7  ;;  %553 = vst.msk [vmem:[#allocation2 + $0x91] sm:$0xff] %vm540_vm0, %v520_v39  ;;  %v631_v55 = vld [vmem:[#allocation2 + $0x79] sm:$0xff]  ;;  %v636_v4 = vld [vmem:[#allocation2 + $0xb1] sm:$0xff]  ;;  %v915_v21 = vld [vmem:[#allocation2 + $0xe2] sm:$0xff] }
  0x76   : > { %973 = vmatmul.f32.gmra.mxu2 %v900_v11  ;;  %5874 = vmatpush.msra.mxu3 %v6723_v42  ;;  %v629_v42 = vld [vmem:[#allocation2 + $0x61] sm:$0xff]  ;;  %v588_v7 = vld [vmem:[#allocation2 + $0xb0] sm:$0xff] }
  0x77   : > { %773 = vmatmul.f32.gmra.mxu3 %v650_v14  ;;  %v906_v57 = vld [vmem:[#allocation2 + $0x7a] sm:$0xff]  ;;  %v911_v11 = vld [vmem:[#allocation2 + $0xb2] sm:$0xff]  ;;  %v920_v14 = vld [vmem:[#allocation2 + $0x122] sm:$0xff] }
  0x78   : > { %5875 = vmatpush.msra.mxu3 %v6731_v45  ;;  %v598_v45 = vld [vmem:[#allocation2 + $0x128] sm:$0xff]  ;;  %v584_v61 = vld [vmem:[#allocation2 + $0x80] sm:$0xff] }
  0x79   : > { %v592_v18 = vld [vmem:[#allocation2 + $0xe0] sm:$0xff] }
  0x7a   : > { %5876 = vmatpush.msra.mxu3 %v6739_v48  ;;  %v630_v48 = vld [vmem:[#allocation2 + $0x69] sm:$0xff] }
  0x7c   : > { %701 = vmatmul.f32.gmra.mxu0 %v626_v17  ;;  %v633_v6 = vld [vmem:[#allocation2 + $0x91] sm:$0xff] }
  0x7d   : > { %814 = vmatmul.f32.gmra.mxu1 %v578_v20  ;;  %v585_v8 = vld [vmem:[#allocation2 + $0x90] sm:$0xff]  ;;  %v586_v13 = vld [vmem:[#allocation2 + $0x98] sm:$0xff] }
  0x7e   : > { %976 = vmatmul.f32.gmra.mxu2 %v901_v29  ;;  %v908_v9 = vld [vmem:[#allocation2 + $0x92] sm:$0xff]  ;;  %v528_v29 = vld [vmem:[%s6674_s30 + $0xa0] sm:$0xff] }
  0x7f   : > { %776 = vmatmul.f32.gmra.mxu3 %v651_v23  ;;  %v1521_v17 = vld [vmem:[#allocation5 + $0x50] sm:$0xff]  ;;  %v529_v23 = vld [vmem:[%s6674_s30 + $0xa8] sm:$0xff]  ;;  %561 = vst.msk [vmem:[#allocation2 + $0xf1] sm:$0xff] %vm540_vm0, %v528_v29 }
  0x80   : > { %v1845_v20 = vld [vmem:[#allocation5 + $0x150] sm:$0xff]  ;;  %1694 = vmatpush.msrb.mxu0 %v1521_v17  ;;  %562 = vst.msk [vmem:[#allocation2 + $0xf9] sm:$0xff] %vm540_vm0, %v529_v23 }
  0x81   : > { %1856 = vmatpush.msrb.mxu1 %v1845_v20 }
  0x84   : > { %704 = vmatmul.f32.gmra.mxu0 %v627_v28 }
  0x85   : > { %817 = vmatmul.f32.gmra.mxu1 %v579_v31  ;;  %v637_v31 = vld [vmem:[#allocation2 + $0xc1] sm:$0xff] }
  0x86   : > { %979 = vmatmul.f32.gmra.mxu2 %v902_v32  ;;  %v589_v32 = vld [vmem:[#allocation2 + $0xc0] sm:$0xff] }
  0x87   : > { %779 = vmatmul.f32.gmra.mxu3 %v652_v33  ;;  %v912_v33 = vld [vmem:[#allocation2 + $0xc2] sm:$0xff] }
  0x8c   : > { %707 = vmatmul.f32.gmra.mxu0 %v628_v35 }
  0x8d   : > { %820 = vmatmul.f32.gmra.mxu1 %v580_v36  ;;  %v1520_v36 = vld [vmem:[#allocation5 + $0x48] sm:$0xff] }
  0x8e   : > { %982 = vmatmul.f32.gmra.mxu2 %v903_v37  ;;  %v1844_v37 = vld [vmem:[#allocation5 + $0x148] sm:$0xff]  ;;  %1695 = vmatpush.msrb.mxu0 %v1520_v36 }
  0x8f   : > { %871 = vmatmul.f32.vlgmr.msrb.gmra.mxu3 %v597_v38  ;;  %v6857_v38 = vld [vmem:[%s8061_s2] ss:$0 sm:$0xff]  ;;  %1857 = vmatpush.msrb.mxu1 %v1844_v37 }
  0x90   : > { %1696 = vmatpush.msrb.mxu0 %v1519_v3 }
  0x91   : > { %1858 = vmatpush.msrb.mxu1 %v1843_v5 }
  0x94   : > { %710 = vmatmul.f32.gmra.mxu0 %v629_v42 }
  0x95   : > { %823 = vmatmul.f32.gmra.mxu1 %v581_v43  ;;  %v638_v43 = vld [vmem:[#allocation2 + $0xc9] sm:$0xff] }
  0x96   : > { %985 = vmatmul.f32.gmra.mxu2 %v904_v44  ;;  %v590_v44 = vld [vmem:[#allocation2 + $0xc8] sm:$0xff] }
  0x97   : > { %874 = vmatmul.f32.gmra.mxu3 %v598_v45  ;;  %v913_v45 = vld [vmem:[#allocation2 + $0xca] sm:$0xff] }
  0x9c   : > { %713 = vmatmul.f32.gmra.mxu0 %v630_v48  ;;  %v922_v48 = vld [vmem:[#allocation2 + $0x13a] sm:$0xff] }
  0x9d   : > { %826 = vmatmul.f32.gmra.mxu1 %v582_v49  ;;  %v530_v49 = vld [vmem:[%s6674_s30 + $0xb0] sm:$0xff] }
  0x9e   : > { %988 = vmatmul.f32.gmra.mxu2 %v905_v50  ;;  %v531_v50 = vld [vmem:[%s6674_s30 + $0xb8] sm:$0xff]  ;;  %563 = vst.msk [vmem:[#allocation2 + $0x109] sm:$0xff] %vm540_vm0, %v530_v49 }
  0x9f   : > { %877 = vmatmul.f32.gmra.mxu3 %v599_v51  ;;  %564 = vst.msk [vmem:[#allocation2 + $0x111] sm:$0xff] %vm540_vm0, %v531_v50  ;;  %v594_v49 = vld [vmem:[#allocation2 + $0xf8] sm:$0xff]  ;;  %vm1446_vm0 = vcmask 97312  }
  0xa4   : > { %716 = vmatmul.f32.gmra.mxu0 %v631_v55 }
  0xa5   : > { %829 = vmatmul.f32.gmra.mxu1 %v583_v56  ;;  %v643_v5 = vld [vmem:[#allocation2 + $0x109] sm:$0xff] }
  0xa6   : > { %991 = vmatmul.f32.gmra.mxu2 %v906_v57 }
  0xa7   : > { %880 = vmatmul.f32.gmra.mxu3 %v600_v58  ;;  %v639_v58 = vld [vmem:[#allocation2 + $0xd9] sm:$0xff] }
  0xac   : > { %719 = vmatmul.f32.gmra.mxu0 %v632_v60  ;;  %v914_v60 = vld [vmem:[#allocation2 + $0xda] sm:$0xff] }
  0xad   : > { %832 = vmatmul.f32.gmra.mxu1 %v584_v61 }
  0xae   : > { %994 = vmatmul.f32.gmra.mxu2 %v907_v62 }
  0xaf   : > { %883 = vmatmul.f32.gmra.mxu3 %v601_v63  ;;  %v923_v63 = vld [vmem:[#allocation2 + $0x142] sm:$0xff] }
  0xb4   : > { %722 = vmatmul.f32.gmra.mxu0 %v633_v6 }
  0xb5   : > { %835 = vmatmul.f32.gmra.mxu1 %v585_v8 }
  0xb6   : > { %997 = vmatmul.f32.gmra.mxu2 %v908_v9 }
  0xb7   : > { %886 = vmatmul.f32.gmra.mxu3 %v602_v10 }
  0xbc   : > { %725 = vmatmul.f32.gmra.mxu0 %v634_v12 }
  0xbd   : > { %838 = vmatmul.f32.gmra.mxu1 %v586_v13  ;;  %v6852_v26 = vpop.f32.mrf.mxu3 }
  0xbe   : > { %1000 = vmatmul.f32.gmra.mxu2 %v909_v15 }
  0xbf   : > { %889 = vmatmul.f32.gmra.mxu3 %v603_v16  ;;  %v640_v16 = vld [vmem:[#allocation2 + $0xe1] sm:$0xff] }
  0xc4   : > { %728 = vmatmul.f32.gmra.mxu0 %v635_v24 }
  0xc5   : > { %841 = vmatmul.f32.gmra.mxu1 %v587_v2  ;;  %v924_v2 = vld [vmem:[#allocation2 + $0x152] sm:$0xff] }
  0xc6   : > { %1003 = vmatmul.f32.gmra.mxu2 %v910_v25 }
  0xc7   : > { %892 = vmatmul.f32.gmra.mxu3 %v604_v27 }
  0xcc   : > { %731 = vmatmul.f32.gmra.mxu0 %v636_v4  ;;  %v1518_v4 = vld [vmem:[#allocation5 + $0x38] sm:$0xff] }
  0xcd   : > { %844 = vmatmul.f32.gmra.mxu1 %v588_v7  ;;  %v1842_v7 = vld [vmem:[#allocation5 + $0x138] sm:$0xff]  ;;  %1697 = vmatpush.msrb.mxu0 %v1518_v4 }
  0xce   : > { %1006 = vmatmul.f32.gmra.mxu2 %v911_v11  ;;  %1859 = vmatpush.msrb.mxu1 %v1842_v7 }
  0xcf   : > { %1033 = vmatmul.f32.vlgmr.msra.gmra.mxu3 %v920_v14 }
  0xd1   : > { %v687_v30 = vpop.f32.mrf.mxu0 }
  0xd2   : > { %v800_v28 = vpop.f32.mrf.mxu1 }
  0xd3   : > { %v801_v35 = vadd.f32 %v800_v28, %v687_v30  ;;  %v641_v28 = vld [vmem:[#allocation2 + $0xf1] sm:$0xff] }
  0xd4   : > { %734 = vmatmul.f32.gmra.mxu0 %v637_v31  ;;  %v593_v31 = vld [vmem:[#allocation2 + $0xf0] sm:$0xff] }
  0xd5   : > { %847 = vmatmul.f32.gmra.mxu1 %v589_v32 }
  0xd6   : > { %1009 = vmatmul.f32.gmra.mxu2 %v912_v33  ;;  %v916_v33 = vld [vmem:[#allocation2 + $0xf2] sm:$0xff] }
  0xd7   : > { %1036 = vmatmul.f32.gmra.mxu3 %v921_v34 }
  0xd9   : > { %v962_v39 = vpop.f32.mrf.mxu2  ;;  %v690_v41 = vpop.f32.mrf.mxu0 }
  0xda   : > { %v1058_v40 = vadd.f32 %v962_v39, %v801_v35  ;;  %v803_v42 = vpop.f32.mrf.mxu1  ;;  %v6859_v46 = vpop.f32.mrf.mxu3  ;;  %v925_v35 = vld [vmem:[#allocation2 + $0x15a] sm:$0xff] }
  0xdb   : > { %v804_v51 = vadd.f32 %v803_v42, %v690_v41 }
  0xdc   : > { %v1094_v47 = vadd.f32 %v6857_v38, %v1058_v40  ;;  %737 = vmatmul.f32.gmra.mxu0 %v638_v43 }
  0xdd   : > { %850 = vmatmul.f32.gmra.mxu1 %v590_v44 }
  0xde   : > { %1012 = vmatmul.f32.gmra.mxu2 %v913_v45  ;;  %v1158_v52 = vmin.f32 %v1094_v47, 0.0  ;;  %vm1126_vm1 = vcmp.gt.f32.partialorder %v1094_v47, 0.0 }
  0xdf   : > { %1039 = vmatmul.f32.gmra.mxu3 %v922_v48  ;;  %v642_v48 = vld [vmem:[#allocation2 + $0xf9] sm:$0xff] }
  0xe0   : > { %v1190_v53 = vmul.f32 1.442695, %v1158_v52 }
  0xe1   : > { %v965_v54 = vpop.f32.mrf.mxu2  ;;  %v693_v56 = vpop.f32.mrf.mxu0 }
  0xe2   : > { %v1059_v55 = vadd.f32 %v965_v54, %v804_v51  ;;  %v806_v57 = vpop.f32.mrf.mxu1  ;;  %5939 = vpow2.f32 %v1190_v53  ;;  %v6866_v61 = vpop.f32.mrf.mxu3  ;;  %v917_v51 = vld [vmem:[#allocation2 + $0xfa] sm:$0xff]  ;;  %v926_v53 = vld [vmem:[#allocation2 + $0x16a] sm:$0xff] }
  0xe3   : > { %v807_v1 = vadd.f32 %v806_v57, %v693_v56  ;;  %v1517_v56 = vld [vmem:[#allocation5 + $0x30] sm:$0xff] }
  0xe4   : > { %v1095_v62 = vadd.f32 %v6857_v38, %v1059_v55  ;;  %740 = vmatmul.f32.gmra.mxu0 %v639_v58  ;;  %v1841_v57 = vld [vmem:[#allocation5 + $0x130] sm:$0xff] }
  0xe5   : > { %853 = vmatmul.f32.gmra.mxu1 %v591_v59  ;;  %1698 = vmatpush.msrb.mxu0 %v1517_v56 }
  0xe6   : > { %v1159_v0 = vmin.f32 %v1095_v62, 0.0  ;;  %1015 = vmatmul.f32.gmra.mxu2 %v914_v60  ;;  %vm1127_vm2 = vcmp.gt.f32.partialorder %v1095_v62, 0.0  ;;  %1860 = vmatpush.msrb.mxu1 %v1841_v57 }
  0xe7   : > { %1042 = vmatmul.f32.gmra.mxu3 %v923_v63 }
  0xe8   : > { %v5940_v6 = vpop.eup %5939  ;;  %v1192_v8 = vmul.f32 1.442695, %v1159_v0 }
  0xe9   : > { %v968_v9 = vpop.f32.mrf.mxu2  ;;  %v5666_v10 = vadd.f32 -1.0, %v5940_v6  ;;  %v696_v13 = vpop.f32.mrf.mxu0  ;;  %v595_v6 = vld [vmem:[#allocation2 + $0x108] sm:$0xff] }
  0xea   : > { %v1060_v12 = vadd.f32 %v968_v9, %v807_v1  ;;  %v809_v15 = vpop.f32.mrf.mxu1  ;;  %5941 = vpow2.f32 %v1192_v8  ;;  %v6869_v22 = vpop.f32.mrf.mxu3  ;;  %v918_v9 = vld [vmem:[#allocation2 + $0x10a] sm:$0xff] }
  0xeb   : > { %v1286_v19 = vsel %vm1126_vm1, %v1094_v47, %v5666_v10  ;;  %v810_v25 = vadd.f32 %v809_v15, %v696_v13 }
  0xec   : > { %v1096_v24 = vadd.f32 %v6857_v38, %v1060_v12  ;;  %1350 = vrot.lane.b32.xlu0 %v1286_v19, %s6475_s15  ;;  %743 = vmatmul.f32.gmra.mxu0 %v640_v16  ;;  %v927_v12 = vld [vmem:[#allocation2 + $0x172] sm:$0xff]  ;;  %v1516_v16 = vld [vmem:[#allocation5 + $0x28] sm:$0xff] }
  0xed   : > { %856 = vmatmul.f32.gmra.mxu1 %v592_v18  ;;  %v1575_v18 = vld [vmem:[#allocation5 + $0xf8] sm:$0xff]  ;;  %v1840_v19 = vld [vmem:[#allocation5 + $0x128] sm:$0xff]  ;;  %1699 = vmatpush.msrb.mxu0 %v1516_v16 }
  0xee   : > { %1018 = vmatmul.f32.gmra.mxu2 %v915_v21  ;;  %v1160_v27 = vmin.f32 %v1096_v24, 0.0  ;;  %vm1128_vm3 = vcmp.gt.f32.partialorder %v1096_v24, 0.0  ;;  %1576 = vmatpush.msrb.mxu3 %v1575_v18 }
  0xef   : > { %1045 = vmatmul.f32.gmra.mxu3 %v924_v2  ;;  %1861 = vmatpush.msrb.mxu1 %v1840_v19 }
  0xf0   : > { %v5942_v11 = vpop.eup %5941  ;;  %v1194_v14 = vmul.f32 1.442695, %v1160_v27 }
  0xf1   : > { %v971_v17 = vpop.f32.mrf.mxu2  ;;  %v5667_v20 = vadd.f32 -1.0, %v5942_v11  ;;  %v699_v23 = vpop.f32.mrf.mxu0 }
  0xf2   : > { %v1061_v29 = vadd.f32 %v971_v17, %v810_v25  ;;  %v812_v30 = vpop.f32.mrf.mxu1  ;;  %5943 = vpow2.f32 %v1194_v14  ;;  %v6875_v36 = vpop.f32.mrf.mxu3  ;;  %v644_v14 = vld [vmem:[#allocation2 + $0x111] sm:$0xff] }
  0xf3   : > { %v1287_v32 = vsel %vm1127_vm2, %v1095_v62, %v5667_v20  ;;  %v813_v39 = vadd.f32 %v812_v30, %v699_v23  ;;  %v596_v17 = vld [vmem:[#allocation2 + $0x110] sm:$0xff] }
  0xf4   : > { %v1097_v34 = vadd.f32 %v6857_v38, %v1061_v29  ;;  %1352 = vrot.lane.b32.xlu0 %v1287_v32, %s6475_s15  ;;  %746 = vmatmul.f32.gmra.mxu0 %v641_v28  ;;  %v919_v29 = vld [vmem:[#allocation2 + $0x112] sm:$0xff]  ;;  %v1573_v32 = vld [vmem:[#allocation5 + $0xe8] sm:$0xff] }
  0xf5   : > { %859 = vmatmul.f32.gmra.mxu1 %v593_v31  ;;  %v1574_v31 = vld [vmem:[#allocation5 + $0xf0] sm:$0xff] }
  0xf6   : > { %v1161_v37 = vmin.f32 %v1097_v34, 0.0  ;;  %1021 = vmatmul.f32.gmra.mxu2 %v916_v33  ;;  %vm1129_vm4 = vcmp.gt.f32.partialorder %v1097_v34, 0.0  ;;  %1577 = vmatpush.msrb.mxu3 %v1574_v31 }
  0xf7   : > { %1048 = vmatmul.f32.gmra.mxu3 %v925_v35 }
  0xf8   : > { %v5944_v40 = vpop.eup %5943  ;;  %v1196_v41 = vmul.f32 1.442695, %v1161_v37  ;;  %1578 = vmatpush.msrb.mxu3 %v1573_v32 }
  0xf9   : > { %v974_v42 = vpop.f32.mrf.mxu2  ;;  %v5668_v43 = vadd.f32 -1.0, %v5944_v40  ;;  %v702_v45 = vpop.f32.mrf.mxu0 }
  0xfa   : > { %v1062_v44 = vadd.f32 %v974_v42, %v813_v39  ;;  %v815_v47 = vpop.f32.mrf.mxu1  ;;  %5945 = vpow2.f32 %v1196_v41  ;;  %v6879_v58 = vpop.f32.mrf.mxu3 }
  0xfb   : > { %v1288_v50 = vsel %vm1128_vm3, %v1096_v24, %v5668_v43  ;;  %v816_v54 = vadd.f32 %v815_v47, %v702_v45 }
  0xfc   : > { %v1098_v52 = vadd.f32 %v6857_v38, %v1062_v44  ;;  %1354 = vrot.lane.b32.xlu1 %v1288_v50, %s6475_s15  ;;  %749 = vmatmul.f32.gmra.mxu0 %v642_v48  ;;  %v1515_v48 = vld [vmem:[#allocation5 + $0x20] sm:$0xff] }
  0xfd   : > { %862 = vmatmul.f32.gmra.mxu1 %v594_v49  ;;  %v1572_v49 = vld [vmem:[#allocation5 + $0xe0] sm:$0xff]  ;;  %1700 = vmatpush.msrb.mxu0 %v1515_v48 }
  0xfe   : > { %1024 = vmatmul.f32.gmra.mxu2 %v917_v51  ;;  %v1162_v55 = vmin.f32 %v1098_v52, 0.0  ;;  %vm1130_vm5 = vcmp.gt.f32.partialorder %v1098_v52, 0.0  ;;  %v1839_v50 = vld [vmem:[#allocation5 + $0x120] sm:$0xff]  ;;  %1579 = vmatpush.msrb.mxu3 %v1572_v49  ;;  %v1571_v51 = vld [vmem:[#allocation5 + $0xd8] sm:$0xff] }
  0xff   : > { %1051 = vmatmul.f32.gmra.mxu3 %v926_v53  ;;  %1862 = vmatpush.msrb.mxu1 %v1839_v50 }
 0x100   : > { %v5946_v59 = vpop.eup %5945  ;;  %v1198_v60 = vmul.f32 1.442695, %v1162_v55  ;;  %1580 = vmatpush.msrb.mxu3 %v1571_v51 }
 0x101   : > { %v977_v62 = vpop.f32.mrf.mxu2  ;;  %v5669_v63 = vadd.f32 -1.0, %v5946_v59  ;;  %v705_v1 = vpop.f32.mrf.mxu0 }
 0x102   : > { %v1063_v0 = vadd.f32 %v977_v62, %v816_v54  ;;  %v818_v3 = vpop.f32.mrf.mxu1  ;;  %5947 = vpow2.f32 %v1198_v60  ;;  %v6883_v2 = vpop.f32.mrf.mxu3 }
 0x103   : > { %v1289_v8 = vsel %vm1129_vm4, %v1097_v34, %v5669_v63  ;;  %v819_v15 = vadd.f32 %v818_v3, %v705_v1  ;;  %v1570_v3 = vld [vmem:[#allocation5 + $0xd0] sm:$0xff] }
 0x104   : > { %v1099_v10 = vadd.f32 %v6857_v38, %v1063_v0  ;;  %1356 = vrot.lane.b32.xlu1 %v1289_v8, %s6475_s15  ;;  %752 = vmatmul.f32.gmra.mxu0 %v643_v5  ;;  %v1514_v5 = vld [vmem:[#allocation5 + $0x18] sm:$0xff] }
 0x105   : > { %865 = vmatmul.f32.gmra.mxu1 %v595_v6  ;;  %v1569_v6 = vld [vmem:[#allocation5 + $0xc8] sm:$0xff]  ;;  %1581 = vmatpush.msrb.mxu3 %v1570_v3  ;;  %v1838_v8 = vld [vmem:[#allocation5 + $0x118] sm:$0xff] }
 0x106   : > { %v1163_v13 = vmin.f32 %v1099_v10, 0.0  ;;  %1027 = vmatmul.f32.gmra.mxu2 %v918_v9  ;;  %vm1131_vm6 = vcmp.gt.f32.partialorder %v1099_v10, 0.0  ;;  %1701 = vmatpush.msrb.mxu0 %v1514_v5 }
 0x107   : > { %1054 = vmatmul.f32.gmra.mxu3 %v927_v12  ;;  %1863 = vmatpush.msrb.mxu1 %v1838_v8 }
 0x108   : > { %v5948_v21 = vpop.eup %5947  ;;  %v1200_v24 = vmul.f32 1.442695, %v1163_v13  ;;  %1582 = vmatpush.msrb.mxu3 %v1569_v6 }
 0x109   : > { %v980_v25 = vpop.f32.mrf.mxu2  ;;  %v5670_v27 = vadd.f32 -1.0, %v5948_v21  ;;  %v708_v7 = vpop.f32.mrf.mxu0 }
 0x10a   : > { %v1064_v4 = vadd.f32 %v980_v25, %v819_v15  ;;  %v821_v11 = vpop.f32.mrf.mxu1  ;;  %5949 = vpow2.f32 %v1200_v24  ;;  %v6887_v42 = vpop.f32.mrf.mxu3 }
 0x10b   : > { %v1290_v20 = vsel %vm1130_vm5, %v1098_v52, %v5670_v27  ;;  %v822_v28 = vadd.f32 %v821_v11, %v708_v7  ;;  %v1568_v27 = vld [vmem:[#allocation5 + $0xc0] sm:$0xff] }
 0x10c   : > { %v1100_v23 = vadd.f32 %v6857_v38, %v1064_v4  ;;  %1358 = vrot.lane.b32.xlu2 %v1290_v20, %s6475_s15  ;;  %755 = vmatmul.f32.gmra.mxu0 %v644_v14  ;;  %v1567_v4 = vld [vmem:[#allocation5 + $0xb8] sm:$0xff] }
 0x10d   : > { %868 = vmatmul.f32.gmra.mxu1 %v596_v17  ;;  %1583 = vmatpush.msrb.mxu3 %v1568_v27 }
 0x10e   : > { %v1164_v30 = vmin.f32 %v1100_v23, 0.0  ;;  %1030 = vmatmul.f32.gmra.mxu2 %v919_v29  ;;  %vm1132_vm7 = vcmp.gt.f32.partialorder %v1100_v23, 0.0 }
 0x10f   : > { %1584 = vmatpush.msrb.mxu3 %v1567_v4 }
 0x110   : > { %v5950_v33 = vpop.eup %5949  ;;  %v1202_v34 = vmul.f32 1.442695, %v1164_v30 }
 0x111   : > { %v983_v35 = vpop.f32.mrf.mxu2  ;;  %v5671_v37 = vadd.f32 -1.0, %v5950_v33  ;;  %v711_v40 = vpop.f32.mrf.mxu0 }
 0x112   : > { %v1065_v39 = vadd.f32 %v983_v35, %v822_v28  ;;  %v824_v41 = vpop.f32.mrf.mxu1  ;;  %5951 = vpow2.f32 %v1202_v34  ;;  %v6893_v63 = vpop.f32.mrf.mxu3  ;;  %v1513_v34 = vld [vmem:[#allocation5 + $0x10] sm:$0xff] }
 0x113   : > { %v1291_v43 = vsel %vm1131_vm6, %v1099_v10, %v5671_v37  ;;  %v825_v47 = vadd.f32 %v824_v41, %v711_v40  ;;  %v1566_v35 = vld [vmem:[#allocation5 + $0xb0] sm:$0xff]  ;;  %1702 = vmatpush.msrb.mxu0 %v1513_v34 }
 0x114   : > { %v1101_v44 = vadd.f32 %v6857_v38, %v1065_v39  ;;  %1360 = vrot.lane.b32.xlu2 %v1291_v43, %s6475_s15  ;;  %v1837_v37 = vld [vmem:[#allocation5 + $0x110] sm:$0xff]  ;;  %1585 = vmatpush.msrb.mxu3 %v1566_v35  ;;  %v1565_v39 = vld [vmem:[#allocation5 + $0xa8] sm:$0xff] }
 0x115   : > { %1864 = vmatpush.msrb.mxu1 %v1837_v37 }
 0x116   : > { %v1165_v45 = vmin.f32 %v1101_v44, 0.0  ;;  %vm1133_vm8 = vcmp.gt.f32.partialorder %v1101_v44, 0.0  ;;  %1586 = vmatpush.msrb.mxu3 %v1565_v39 }
 0x118   : > { %v5952_v52 = vpop.eup %5951  ;;  %v1204_v53 = vmul.f32 1.442695, %v1165_v45 }
 0x119   : > { %v986_v54 = vpop.f32.mrf.mxu2  ;;  %v5672_v55 = vadd.f32 -1.0, %v5952_v52  ;;  %v714_v57 = vpop.f32.mrf.mxu0 }
 0x11a   : > { %v1066_v56 = vadd.f32 %v986_v54, %v825_v47  ;;  %v827_v59 = vpop.f32.mrf.mxu1  ;;  %5953 = vpow2.f32 %v1204_v53  ;;  %v6897_v7 = vpop.f32.mrf.mxu3  ;;  %v1564_v54 = vld [vmem:[#allocation5 + $0xa0] sm:$0xff] }
 0x11b   : > { %v1292_v60 = vsel %vm1132_vm7, %v1100_v23, %v5672_v55  ;;  %v828_v1 = vadd.f32 %v827_v59, %v714_v57  ;;  %v1512_v55 = vld [vmem:[#allocation5 + $0x8] sm:$0xff]  ;;  %1587 = vmatpush.msrb.mxu3 %v1564_v54 }
 0x11c   : > { %v1102_v62 = vadd.f32 %v6857_v38, %v1066_v56  ;;  %1362 = vrot.lane.b32.xlu0 %v1292_v60, %s6475_s15  ;;  %v1563_v56 = vld [vmem:[#allocation5 + $0x98] sm:$0xff]  ;;  %1703 = vmatpush.msrb.mxu0 %v1512_v55  ;;  %v1836_v57 = vld [vmem:[#allocation5 + $0x108] sm:$0xff] }
 0x11d   : > { %1865 = vmatpush.msrb.mxu1 %v1836_v57  ;;  %1588 = vmatpush.msrb.mxu3 %v1563_v56 }
 0x11e   : > { %v1166_v0 = vmin.f32 %v1102_v62, 0.0  ;;  %vm1134_vm9 = vcmp.gt.f32.partialorder %v1102_v62, 0.0 }
 0x120   : > { %v5954_v9 = vpop.eup %5953  ;;  %v1206_v10 = vmul.f32 1.442695, %v1166_v0 }
 0x121   : > { %v989_v12 = vpop.f32.mrf.mxu2  ;;  %v5673_v13 = vadd.f32 -1.0, %v5954_v9  ;;  %v717_v16 = vpop.f32.mrf.mxu0 }
 0x122   : > { %v1067_v15 = vadd.f32 %v989_v12, %v828_v1  ;;  %v830_v18 = vpop.f32.mrf.mxu1  ;;  %5955 = vpow2.f32 %v1206_v10  ;;  %v6901_v43 = vpop.f32.mrf.mxu3 }
 0x123   : > { %v1293_v19 = vsel %vm1133_vm8, %v1101_v44, %v5673_v13  ;;  %v831_v25 = vadd.f32 %v830_v18, %v717_v16  ;;  %v1562_v13 = vld [vmem:[#allocation5 + $0x90] sm:$0xff] }
 0x124   : > { %v1103_v21 = vadd.f32 %v6857_v38, %v1067_v15  ;;  %1364 = vrot.lane.b32.xlu1 %v1293_v19, %s6475_s15  ;;  %1589 = vmatpush.msrb.mxu3 %v1562_v13  ;;  %v1561_v15 = vld [vmem:[#allocation5 + $0x88] sm:$0xff] }
 0x126   : > { %v1167_v24 = vmin.f32 %v1103_v21, 0.0  ;;  %vm1135_vm10 = vcmp.gt.f32.partialorder %v1103_v21, 0.0  ;;  %1590 = vmatpush.msrb.mxu3 %v1561_v15 }
 0x128   : > { %v5956_v11 = vpop.eup %5955  ;;  %v1208_v14 = vmul.f32 1.442695, %v1167_v24 }
 0x129   : > { %v992_v17 = vpop.f32.mrf.mxu2  ;;  %v5674_v20 = vadd.f32 -1.0, %v5956_v11  ;;  %v720_v23 = vpop.f32.mrf.mxu0 }
 0x12a   : > { %v1068_v29 = vadd.f32 %v992_v17, %v831_v25  ;;  %v833_v30 = vpop.f32.mrf.mxu1  ;;  %5957 = vpow2.f32 %v1208_v14  ;;  %v6905_v6 = vpop.f32.mrf.mxu3  ;;  %v1511_v17 = vld [vmem:[#allocation5] sm:$0xff] }
 0x12b   : > { %v1294_v28 = vsel %vm1134_vm9, %v1102_v62, %v5674_v20  ;;  %v834_v33 = vadd.f32 %v833_v30, %v720_v23  ;;  %v1560_v20 = vld [vmem:[#allocation5 + $0x80] sm:$0xff]  ;;  %1704 = vmatpush.msrb.mxu0 %v1511_v17 }
 0x12c   : > { %v1104_v31 = vadd.f32 %v6857_v38, %v1068_v29  ;;  %1366 = vrot.lane.b32.xlu2 %v1294_v28, %s6475_s15  ;;  %1591 = vmatpush.msrb.mxu3 %v1560_v20  ;;  %v1835_v30 = vld [vmem:[#allocation5 + $0x100] sm:$0xff] }
 0x12d   : > { %1866 = vmatpush.msrb.mxu1 %v1835_v30 }
 0x12e   : > { %v1168_v32 = vmin.f32 %v1104_v31, 0.0  ;;  %vm1136_vm11 = vcmp.gt.f32.partialorder %v1104_v31, 0.0 }
 0x130   : > { %v5958_v40 = vpop.eup %5957  ;;  %v1210_v41 = vmul.f32 1.442695, %v1168_v32 }
 0x131   : > { %v995_v44 = vpop.f32.mrf.mxu2  ;;  %v5675_v45 = vadd.f32 -1.0, %v5958_v40  ;;  %v723_v48 = vpop.f32.mrf.mxu0 }
 0x132   : > { %v1069_v47 = vadd.f32 %v995_v44, %v834_v33  ;;  %v836_v49 = vpop.f32.mrf.mxu1  ;;  %5959 = vpow2.f32 %v1210_v41  ;;  %v6911_v14 = vpop.f32.mrf.mxu3 }
 0x133   : > { %v1295_v50 = vsel %vm1135_vm10, %v1103_v21, %v5675_v45  ;;  %v837_v53 = vadd.f32 %v836_v49, %v723_v48 }
 0x134   : > { %v1105_v51 = vadd.f32 %v6857_v38, %v1069_v47  ;;  %1368 = vrot.lane.b32.xlu0 %v1295_v50, %s6475_s15 }
 0x136   : > { %v1169_v52 = vmin.f32 %v1105_v51, 0.0  ;;  %vm1137_vm12 = vcmp.gt.f32.partialorder %v1105_v51, 0.0 }
 0x138   : > { %v5960_v59 = vpop.eup %5959  ;;  %v1212_v60 = vmul.f32 1.442695, %v1169_v52 }
 0x139   : > { %v998_v62 = vpop.f32.mrf.mxu2  ;;  %v5676_v0 = vadd.f32 -1.0, %v5960_v59  ;;  %v726_v3 = vpop.f32.mrf.mxu0 }
 0x13a   : > { %v1070_v1 = vadd.f32 %v998_v62, %v837_v53  ;;  %v839_v5 = vpop.f32.mrf.mxu1  ;;  %5961 = vpow2.f32 %v1212_v60  ;;  %v6915_v45 = vpop.f32.mrf.mxu3 }
 0x13b   : > { %v1296_v8 = vsel %vm1136_vm11, %v1104_v31, %v5676_v0  ;;  %v840_v12 = vadd.f32 %v839_v5, %v726_v3 }
 0x13c   : > { %v1106_v9 = vadd.f32 %v6857_v38, %v1070_v1  ;;  %1370 = vrot.lane.b32.xlu1 %v1296_v8, %s6475_s15 }
 0x13e   : > { %v1170_v10 = vmin.f32 %v1106_v9, 0.0  ;;  %vm1138_vm13 = vcmp.gt.f32.partialorder %v1106_v9, 0.0 }
 0x140   : > { %v5962_v16 = vpop.eup %5961  ;;  %v1214_v18 = vmul.f32 1.442695, %v1170_v10 }
 0x141   : > { %v1001_v19 = vpop.f32.mrf.mxu2  ;;  %v5677_v21 = vadd.f32 -1.0, %v5962_v16  ;;  %v729_v25 = vpop.f32.mrf.mxu0 }
 0x142   : > { %v1071_v24 = vadd.f32 %v1001_v19, %v840_v12  ;;  %v842_v27 = vpop.f32.mrf.mxu1  ;;  %5963 = vpow2.f32 %v1214_v18  ;;  %v6919_v62 = vpop.f32.mrf.mxu3 }
 0x143   : > { %v1297_v4 = vsel %vm1137_vm12, %v1105_v51, %v5677_v21  ;;  %v843_v23 = vadd.f32 %v842_v27, %v729_v25 }
 0x144   : > { %v1107_v11 = vadd.f32 %v6857_v38, %v1071_v24  ;;  %1372 = vrot.lane.b32.xlu2 %v1297_v4, %s6475_s15 }
 0x146   : > { %v1171_v29 = vmin.f32 %v1107_v11, 0.0  ;;  %vm1139_vm14 = vcmp.gt.f32.partialorder %v1107_v11, 0.0 }
 0x148   : > { %v5964_v28 = vpop.eup %5963  ;;  %v1216_v31 = vmul.f32 1.442695, %v1171_v29 }
 0x149   : > { %v1004_v32 = vpop.f32.mrf.mxu2  ;;  %v5678_v33 = vadd.f32 -1.0, %v5964_v28  ;;  %v732_v35 = vpop.f32.mrf.mxu0 }
 0x14a   : > { %v1072_v34 = vadd.f32 %v1004_v32, %v843_v23  ;;  %v845_v37 = vpop.f32.mrf.mxu1  ;;  %5965 = vpow2.f32 %v1216_v31  ;;  %v6924_v4 = vpop.f32.mrf.mxu3 }
 0x14b   : > { %v1298_v39 = vsel %vm1138_vm13, %v1106_v9, %v5678_v33  ;;  %v846_v44 = vadd.f32 %v845_v37, %v732_v35 }
 0x14c   : > { %v1108_v40 = vadd.f32 %v6857_v38, %v1072_v34  ;;  %1374 = vrot.lane.b32.xlu0 %v1298_v39, %s6475_s15 }
 0x14e   : > { %v1172_v41 = vmin.f32 %v1108_v40, 0.0  ;;  %vm1140_vm15 = vcmp.gt.f32.partialorder %v1108_v40, 0.0 }
 0x150   : > { %v5966_v47 = vpop.eup %5965  ;;  %v1218_v48 = vmul.f32 1.442695, %v1172_v41 }
 0x151   : > { %v1007_v49 = vpop.f32.mrf.mxu2  ;;  %v5679_v50 = vadd.f32 -1.0, %v5966_v47  ;;  %v735_v52 = vpop.f32.mrf.mxu0 }
 0x152   : > { %v1073_v51 = vadd.f32 %v1007_v49, %v846_v44  ;;  %v848_v53 = vpop.f32.mrf.mxu1  ;;  %5967 = vpow2.f32 %v1218_v48  ;;  %v1034_v47 = vpop.f32.mrf.mxu3 }
 0x153   : > { %v1299_v54 = vsel %vm1139_vm14, %v1107_v11, %v5679_v50  ;;  %v849_v57 = vadd.f32 %v848_v53, %v735_v52 }
 0x154   : > { %v1109_v55 = vadd.f32 %v6857_v38, %v1073_v51  ;;  %1376 = vrot.lane.b32.xlu1 %v1299_v54, %s6475_s15 }
 0x156   : > { %v1173_v56 = vmin.f32 %v1109_v55, 0.0  ;;  %vm1141_vm1 = vcmp.gt.f32.partialorder %v1109_v55, 0.0 }
 0x158   : > { %v5968_v59 = vpop.eup %5967  ;;  %v1220_v60 = vmul.f32 1.442695, %v1173_v56 }
 0x159   : > { %v1010_v0 = vpop.f32.mrf.mxu2  ;;  %v5680_v1 = vadd.f32 -1.0, %v5968_v59  ;;  %v738_v5 = vpop.f32.mrf.mxu0 }
 0x15a   : > { %v1074_v3 = vadd.f32 %v1010_v0, %v849_v57  ;;  %v851_v8 = vpop.f32.mrf.mxu1  ;;  %5969 = vpow2.f32 %v1220_v60 }
 0x15b   : > { %v1300_v9 = vsel %vm1140_vm15, %v1108_v40, %v5680_v1  ;;  %v852_v15 = vadd.f32 %v851_v8, %v738_v5 }
 0x15c   : > { %v1110_v10 = vadd.f32 %v6857_v38, %v1074_v3  ;;  %1378 = vrot.lane.b32.xlu2 %v1300_v9, %s6475_s15 }
 0x15e   : > { %v1174_v12 = vmin.f32 %v1110_v10, 0.0  ;;  %v1351_v13 = vpop.permute.xlu0 %1350  ;;  %vm1142_vm2 = vcmp.gt.f32.partialorder %v1110_v10, 0.0 }
 0x15f   : > { %1447 = vst.msk [vmem:[#allocation2 + $0x1] sm:$0xff] %vm1446_vm0, %v1351_v13 }
 0x160   : > { %v5970_v16 = vpop.eup %5969  ;;  %v1222_v18 = vmul.f32 1.442695, %v1174_v12 }
 0x161   : > { %v1013_v19 = vpop.f32.mrf.mxu2  ;;  %v5681_v21 = vadd.f32 -1.0, %v5970_v16  ;;  %v741_v25 = vpop.f32.mrf.mxu0 }
 0x162   : > { %v1075_v24 = vadd.f32 %v1013_v19, %v852_v15  ;;  %v854_v27 = vpop.f32.mrf.mxu1  ;;  %5971 = vpow2.f32 %v1222_v18  ;;  %v1037_v18 = vpop.f32.mrf.mxu3 }
 0x163   : > { %v1301_v11 = vsel %vm1141_vm1, %v1109_v55, %v5681_v21  ;;  %v855_v23 = vadd.f32 %v854_v27, %v741_v25 }
 0x164   : > { %v1111_v17 = vadd.f32 %v6857_v38, %v1075_v24  ;;  %1380 = vrot.lane.b32.xlu0 %v1301_v11, %s6475_s15 }
 0x166   : > { %v1175_v20 = vmin.f32 %v1111_v17, 0.0  ;;  %v1353_v29 = vpop.permute.xlu0 %1352  ;;  %v1527_v30 = vld [vmem:[#allocation2 + $0x1] sm:$0xff]  ;;  %v1359_v31 = vpop.permute.xlu2 %1358  ;;  %vm1143_vm3 = vcmp.gt.f32.partialorder %v1111_v17, 0.0 }
 0x167   : > { %v1479_v28 = vld [vmem:[#allocation2] sm:$0xff]  ;;  %1448 = vst.msk [vmem:[#allocation2 + $0x9] sm:$0xff] %vm1446_vm0, %v1353_v29  ;;  %1592 = vmatmul.f32.vlgmr.msrb.gmra.mxu3 %v1527_v30 }
 0x168   : > { %1705 = vmatmul.f32.vlgmr.msrb.gmra.mxu0 %v1479_v28  ;;  %v5972_v32 = vpop.eup %5971  ;;  %1451 = vst.msk [vmem:[#allocation2 + $0x31] sm:$0xff] %vm1446_vm0, %v1359_v31  ;;  %v1224_v33 = vmul.f32 1.442695, %v1175_v20  ;;  %v873_v20 = vadd.f32 %v6893_v63, %v6852_v26 }
 0x169   : > { %v1016_v34 = vpop.f32.mrf.mxu2  ;;  %v5682_v35 = vadd.f32 -1.0, %v5972_v32  ;;  %v744_v39 = vpop.f32.mrf.mxu0 }
 0x16a   : > { %v1076_v37 = vadd.f32 %v1016_v34, %v855_v23  ;;  %v857_v40 = vpop.f32.mrf.mxu1  ;;  %5973 = vpow2.f32 %v1224_v33  ;;  %v1082_v23 = vadd.f32 %v1034_v47, %v873_v20  ;;  %v1040_v63 = vpop.f32.mrf.mxu3 }
 0x16b   : > { %v1302_v41 = vsel %vm1142_vm2, %v1110_v10, %v5682_v35  ;;  %v858_v50 = vadd.f32 %v857_v40, %v744_v39 }
 0x16c   : > { %v1112_v44 = vadd.f32 %v6857_v38, %v1076_v37  ;;  %1382 = vrot.lane.b32.xlu1 %v1302_v41, %s6475_s15  ;;  %v6942_v26 = vadd.f32 %v6857_v38, %v1082_v23  ;;  %v876_v41 = vadd.f32 %v6897_v7, %v6859_v46 }
 0x16e   : > { %v1176_v48 = vmin.f32 %v1112_v44, 0.0  ;;  %v1355_v49 = vpop.permute.xlu1 %1354  ;;  %v1528_v51 = vld [vmem:[#allocation2 + $0x9] sm:$0xff]  ;;  %v1361_v54 = vpop.permute.xlu2 %1360  ;;  %vm1144_vm4 = vcmp.gt.f32.partialorder %v1112_v44, 0.0  ;;  %vm1150_vm9 = vcmp.gt.f32.partialorder %v6942_v26, 0.0 }
 0x16f   : > { %v1480_v52 = vld [vmem:[#allocation2 + $0x8] sm:$0xff]  ;;  %1449 = vst.msk [vmem:[#allocation2 + $0x19] sm:$0xff] %vm1446_vm0, %v1355_v49  ;;  %1595 = vmatmul.f32.gmra.mxu3 %v1528_v51  ;;  %v879_v49 = vadd.f32 %v6901_v43, %v6866_v61  ;;  %v1083_v51 = vadd.f32 %v1037_v18, %v876_v41 }
 0x170   : > { %v1802_v53 = vld [vmem:[#allocation2 + $0x2] sm:$0xff]  ;;  %1708 = vmatmul.f32.gmra.mxu0 %v1480_v52  ;;  %v5974_v55 = vpop.eup %5973  ;;  %1452 = vst.msk [vmem:[#allocation2 + $0x39] sm:$0xff] %vm1446_vm0, %v1361_v54  ;;  %v1226_v56 = vmul.f32 1.442695, %v1176_v48  ;;  %v1803_v15 = vld [vmem:[#allocation2 + $0xa] sm:$0xff]  ;;  %v1182_v52 = vmin.f32 %v6942_v26, 0.0 }
 0x171   : > { %1867 = vmatmul.f32.vlgmr.msrb.gmra.mxu1 %v1802_v53  ;;  %v1019_v57 = vpop.f32.mrf.mxu2  ;;  %v5683_v59 = vadd.f32 -1.0, %v5974_v55  ;;  %v747_v0 = vpop.f32.mrf.mxu0  ;;  %v1084_v53 = vadd.f32 %v1040_v63, %v879_v49  ;;  %v6953_v43 = vadd.f32 %v6857_v38, %v1083_v51 }
 0x172   : > { %v1077_v60 = vadd.f32 %v1019_v57, %v858_v50  ;;  %v860_v1 = vpop.f32.mrf.mxu1  ;;  %5975 = vpow2.f32 %v1226_v56  ;;  %v1531_v56 = vld [vmem:[#allocation2 + $0x31] sm:$0xff] }
 0x173   : > { %v1303_v3 = vsel %vm1143_vm3, %v1111_v17, %v5683_v59  ;;  %v861_v10 = vadd.f32 %v860_v1, %v747_v0  ;;  %v1483_v57 = vld [vmem:[#allocation2 + $0x30] sm:$0xff]  ;;  %v6956_v1 = vadd.f32 %v6857_v38, %v1084_v53  ;;  %vm1151_vm11 = vcmp.gt.f32.partialorder %v6953_v43, 0.0 }
 0x174   : > { %v1113_v5 = vadd.f32 %v6857_v38, %v1077_v60  ;;  %1384 = vrot.lane.b32.xlu2 %v1303_v3, %s6475_s15 }
 0x175   : > { %vm1152_vm12 = vcmp.gt.f32.partialorder %v6956_v1, 0.0 }
 0x176   : > { %v1177_v8 = vmin.f32 %v1113_v5, 0.0  ;;  %v1357_v9 = vpop.permute.xlu1 %1356  ;;  %v1529_v12 = vld [vmem:[#allocation2 + $0x19] sm:$0xff]  ;;  %vm1145_vm5 = vcmp.gt.f32.partialorder %v1113_v5, 0.0 }
 0x177   : > { %v1481_v13 = vld [vmem:[#allocation2 + $0x18] sm:$0xff]  ;;  %1450 = vst.msk [vmem:[#allocation2 + $0x21] sm:$0xff] %vm1446_vm0, %v1357_v9  ;;  %1598 = vmatmul.f32.gmra.mxu3 %v1529_v12 }
 0x178   : > { %1711 = vmatmul.f32.gmra.mxu0 %v1481_v13  ;;  %v5976_v16 = vpop.eup %5975  ;;  %v1228_v19 = vmul.f32 1.442695, %v1177_v8  ;;  %v1183_v13 = vmin.f32 %v6953_v43, 0.0 }
 0x179   : > { %1870 = vmatmul.f32.gmra.mxu1 %v1803_v15  ;;  %v1022_v21 = vpop.f32.mrf.mxu2  ;;  %v5684_v24 = vadd.f32 -1.0, %v5976_v16  ;;  %v750_v27 = vpop.f32.mrf.mxu0  ;;  %v1184_v15 = vmin.f32 %v6956_v1, 0.0 }
 0x17a   : > { %v1078_v25 = vadd.f32 %v1022_v21, %v861_v10  ;;  %v863_v11 = vpop.f32.mrf.mxu1  ;;  %5977 = vpow2.f32 %v1228_v19  ;;  %v1532_v19 = vld [vmem:[#allocation2 + $0x39] sm:$0xff] }
 0x17b   : > { %v1304_v17 = vsel %vm1144_vm4, %v1112_v44, %v5684_v24  ;;  %v864_v28 = vadd.f32 %v863_v11, %v750_v27  ;;  %v1484_v21 = vld [vmem:[#allocation2 + $0x38] sm:$0xff] }
 0x17c   : > { %v1114_v29 = vadd.f32 %v6857_v38, %v1078_v25  ;;  %1386 = vrot.lane.b32.xlu0 %v1304_v17, %s6475_s15  ;;  %v1806_v25 = vld [vmem:[#allocation2 + $0x32] sm:$0xff]  ;;  %v1240_v17 = vmul.f32 1.442695, %v1183_v13 }
 0x17d   : > { %v2755_v13 = vld [vmem:[#allocation7 + $0x170] sm:$0xff] }
 0x17e   : > { %v1178_v30 = vmin.f32 %v1114_v29, 0.0  ;;  %v1530_v31 = vld [vmem:[#allocation2 + $0x21] sm:$0xff]  ;;  %vm1146_vm6 = vcmp.gt.f32.partialorder %v1114_v29, 0.0 }
 0x17f   : > { %v1482_v32 = vld [vmem:[#allocation2 + $0x20] sm:$0xff]  ;;  %1601 = vmatmul.f32.gmra.mxu3 %v1530_v31 }
 0x180   : > { %v1804_v33 = vld [vmem:[#allocation2 + $0x1a] sm:$0xff]  ;;  %1714 = vmatmul.f32.gmra.mxu0 %v1482_v32  ;;  %v5978_v34 = vpop.eup %5977  ;;  %v1230_v35 = vmul.f32 1.442695, %v1178_v30  ;;  %v1805_v46 = vld [vmem:[#allocation2 + $0x22] sm:$0xff] }
 0x181   : > { %1873 = vmatmul.f32.gmra.mxu1 %v1804_v33  ;;  %v1025_v37 = vpop.f32.mrf.mxu2  ;;  %v5685_v39 = vadd.f32 -1.0, %v5978_v34  ;;  %v753_v47 = vpop.f32.mrf.mxu0  ;;  %v6967_v31 = vld [vmem:[%s8061_s2] ss:$0 sm:$0xff] }
 0x182   : > { %v1079_v40 = vadd.f32 %v1025_v37, %v864_v28  ;;  %5979 = vpow2.f32 %v1230_v35  ;;  %v866_v48 = vpop.f32.mrf.mxu1 }
 0x183   : > { %v1305_v44 = vsel %vm1145_vm5, %v1113_v5, %v5685_v39  ;;  %v867_v55 = vadd.f32 %v866_v48, %v753_v47  ;;  %v1238_v5 = vmul.f32 1.442695, %v1182_v52  ;;  %v1807_v39 = vld [vmem:[#allocation2 + $0x3a] sm:$0xff] }
 0x184   : > { %v1115_v50 = vadd.f32 %v6857_v38, %v1079_v40  ;;  %1388 = vrot.lane.b32.xlu1 %v1305_v44, %s6475_s15  ;;  %v2432_v44 = vld [vmem:[#allocation7 + $0x78] sm:$0xff] }
 0x185   : > { %2595 = vmatpush.msra.mxu3 %v2432_v44 }
 0x186   : > { %v1179_v54 = vmin.f32 %v1115_v50, 0.0  ;;  %v1367_v59 = vpop.permute.xlu2 %1366  ;;  %vm1147_vm7 = vcmp.gt.f32.partialorder %v1115_v50, 0.0 }
 0x187   : > { %1604 = vmatmul.f32.gmra.mxu3 %v1531_v56  ;;  %1455 = vst.msk [vmem:[#allocation2 + $0x61] sm:$0xff] %vm1446_vm0, %v1367_v59 }
 0x188   : > { %1717 = vmatmul.f32.gmra.mxu0 %v1483_v57  ;;  %v5980_v7 = vpop.eup %5979  ;;  %v1232_v61 = vmul.f32 1.442695, %v1179_v54 }
 0x189   : > { %1876 = vmatmul.f32.gmra.mxu1 %v1805_v46  ;;  %v1028_v60 = vpop.f32.mrf.mxu2  ;;  %v5686_v0 = vadd.f32 -1.0, %v5980_v7  ;;  %v756_v9 = vpop.f32.mrf.mxu0  ;;  %v2756_v46 = vld [vmem:[#allocation7 + $0x178] sm:$0xff] }
 0x18a   : > { %v1080_v3 = vadd.f32 %v1028_v60, %v867_v55  ;;  %5981 = vpow2.f32 %v1232_v61  ;;  %v869_v10 = vpop.f32.mrf.mxu1  ;;  %2757 = vmatpush.msra.mxu0 %v2756_v46 }
 0x18b   : > { %v1306_v8 = vsel %vm1146_vm6, %v1114_v29, %v5686_v0  ;;  %5983 = vpow2.f32 %v1238_v5  ;;  %v870_v24 = vadd.f32 %v869_v10, %v756_v9  ;;  %v1242_v29 = vmul.f32 1.442695, %v1184_v15  ;;  %v2431_v9 = vld [vmem:[#allocation7 + $0x70] sm:$0xff] }
 0x18c   : > { %v1116_v12 = vadd.f32 %v6857_v38, %v1080_v3  ;;  %1390 = vrot.lane.b32.xlu2 %v1306_v8, %s6475_s15  ;;  %2596 = vmatpush.msra.mxu3 %v2431_v9  ;;  %v7008_v9 = vld [vmem:[%s8063_s4] ss:$0 sm:$0xff] }
 0x18d   : > { %2758 = vmatpush.msra.mxu0 %v2755_v13 }
 0x18e   : > { %v1180_v16 = vmin.f32 %v1116_v12, 0.0  ;;  %v1363_v18 = vpop.permute.xlu0 %1362  ;;  %vm1148_vm8 = vcmp.gt.f32.partialorder %v1116_v12, 0.0  ;;  %v1535_v0 = vld [vmem:[#allocation2 + $0x61] sm:$0xff] }
 0x18f   : > { %1453 = vst.msk [vmem:[#allocation2 + $0x49] sm:$0xff] %vm1446_vm0, %v1363_v18  ;;  %1607 = vmatmul.f32.gmra.mxu3 %v1532_v19  ;;  %v1487_v3 = vld [vmem:[#allocation2 + $0x60] sm:$0xff] }
 0x190   : > { %1720 = vmatmul.f32.gmra.mxu0 %v1484_v21  ;;  %v5982_v27 = vpop.eup %5981  ;;  %v1234_v38 = vmul.f32 1.442695, %v1180_v16  ;;  %v2430_v21 = vld [vmem:[#allocation7 + $0x68] sm:$0xff] }
 0x191   : > { %1879 = vmatmul.f32.gmra.mxu1 %v1806_v25  ;;  %v5687_v11 = vadd.f32 -1.0, %v5982_v27  ;;  %v1031_v20 = vpop.f32.mrf.mxu2  ;;  %v5984_v28 = vpop.eup %5983  ;;  %2597 = vmatpush.msra.mxu3 %v2430_v21 }
 0x192   : > { %5985 = vpow2.f32 %v1234_v38  ;;  %v1081_v23 = vadd.f32 %v1031_v20, %v870_v24  ;;  %v5690_v63 = vadd.f32 -1.0, %v5984_v28  ;;  %v6986_v24 = vpop.f32.mrf.mxu3  ;;  %v2754_v20 = vld [vmem:[#allocation7 + $0x168] sm:$0xff] }
 0x193   : > { %v1307_v30 = vsel %vm1147_vm7, %v1115_v50, %v5687_v11  ;;  %5987 = vpow2.f32 %v1240_v17  ;;  %2759 = vmatpush.msra.mxu0 %v2754_v20 }
 0x194   : > { %1392 = vrot.lane.b32.xlu0 %v1307_v30, %s6475_s15  ;;  %v1117_v32 = vadd.f32 %v6967_v31, %v1081_v23  ;;  %5989 = vpow2.f32 %v1242_v29  ;;  %v1310_v50 = vsel %vm1150_vm9, %v6942_v26, %v5690_v63 }
 0x196   : > { %v1365_v33 = vpop.permute.xlu1 %1364  ;;  %v1533_v34 = vld [vmem:[#allocation2 + $0x49] sm:$0xff]  ;;  %v1181_v37 = vmin.f32 %v1117_v32, 0.0  ;;  %vm1149_vm10 = vcmp.gt.f32.partialorder %v1117_v32, 0.0 }
 0x197   : > { %v1485_v35 = vld [vmem:[#allocation2 + $0x48] sm:$0xff]  ;;  %1454 = vst.msk [vmem:[#allocation2 + $0x51] sm:$0xff] %vm1446_vm0, %v1365_v33  ;;  %1610 = vmatmul.f32.gmra.mxu3 %v1533_v34 }
 0x198   : > { %1723 = vmatmul.f32.gmra.mxu0 %v1485_v35  ;;  %v5986_v40 = vpop.eup %5985  ;;  %v1236_v41 = vmul.f32 1.442695, %v1181_v37 }
 0x199   : > { %1882 = vmatmul.f32.gmra.mxu1 %v1807_v39  ;;  %v5688_v47 = vadd.f32 -1.0, %v5986_v40  ;;  %v5988_v48 = vpop.eup %5987  ;;  %v2429_v39 = vld [vmem:[#allocation7 + $0x60] sm:$0xff] }
 0x19a   : > { %5991 = vpow2.f32 %v1236_v41  ;;  %v5990_v51 = vpop.eup %5989  ;;  %v5691_v56 = vadd.f32 -1.0, %v5988_v48  ;;  %v6989_v17 = vpop.f32.mrf.mxu3  ;;  %2598 = vmatpush.msra.mxu3 %v2429_v39  ;;  %v2753_v48 = vld [vmem:[#allocation7 + $0x160] sm:$0xff] }
 0x19b   : > { %v1308_v49 = vsel %vm1148_vm8, %v1116_v12, %v5688_v47  ;;  %v5692_v57 = vadd.f32 -1.0, %v5990_v51  ;;  %2760 = vmatpush.msra.mxu0 %v2753_v48 }
 0x19c   : > { %1394 = vrot.lane.b32.xlu1 %v1308_v49, %s6475_s15  ;;  %1398 = vrot.lane.b32.xlu0 %v1310_v50, %s6475_s15  ;;  %v1311_v7 = vsel %vm1151_vm11, %v6953_v43, %v5691_v56 }
 0x19d   : > { %v1312_v61 = vsel %vm1152_vm12, %v6956_v1, %v5692_v57 }
 0x19e   : > { %v1534_v52 = vld [vmem:[#allocation2 + $0x51] sm:$0xff]  ;;  %v1373_v55 = vpop.permute.xlu2 %1372 }
 0x19f   : > { %v1486_v53 = vld [vmem:[#allocation2 + $0x50] sm:$0xff]  ;;  %1613 = vmatmul.f32.gmra.mxu3 %v1534_v52  ;;  %1458 = vst.msk [vmem:[#allocation2 + $0x81] sm:$0xff] %vm1446_vm0, %v1373_v55  ;;  %v2428_v55 = vld [vmem:[#allocation7 + $0x58] sm:$0xff] }
 0x1a0   : > { %v1808_v54 = vld [vmem:[#allocation2 + $0x4a] sm:$0xff]  ;;  %1726 = vmatmul.f32.gmra.mxu0 %v1486_v53  ;;  %v5992_v59 = vpop.eup %5991  ;;  %v1809_v5 = vld [vmem:[#allocation2 + $0x52] sm:$0xff]  ;;  %2599 = vmatpush.msra.mxu3 %v2428_v55 }
 0x1a1   : > { %1885 = vmatmul.f32.gmra.mxu1 %v1808_v54  ;;  %v5689_v26 = vadd.f32 -1.0, %v5992_v59  ;;  %v2481_v54 = vld [vmem:[#allocation7 + $0xf8] sm:$0xff] }
 0x1a2   : > { %2482 = vmatpush.msrb.mxu2 %v2481_v54 }
 0x1a3   : > { %v1309_v60 = vsel %vm1149_vm10, %v1117_v32, %v5689_v26  ;;  %v6992_v32 = vpop.f32.mrf.mxu3 }
 0x1a4   : > { %1400 = vrot.lane.b32.xlu1 %v1311_v7, %s6475_s15  ;;  %1402 = vrot.lane.b32.xlu0 %v1312_v61, %s6475_s15  ;;  %v882_v7 = vadd.f32 %v6905_v6, %v6869_v22 }
 0x1a5   : > { %1396 = vrot.lane.b32.xlu2 %v1309_v60, %s6475_s15 }
 0x1a6   : > { %v1369_v8 = vpop.permute.xlu0 %1368  ;;  %v1538_v25 = vld [vmem:[#allocation2 + $0x81] sm:$0xff]  ;;  %v1085_v61 = vadd.f32 %v6986_v24, %v882_v7 }
 0x1a7   : > { %1456 = vst.msk [vmem:[#allocation2 + $0x69] sm:$0xff] %vm1446_vm0, %v1369_v8  ;;  %1616 = vmatmul.f32.gmra.mxu3 %v1535_v0  ;;  %v1813_v29 = vld [vmem:[#allocation2 + $0x82] sm:$0xff]  ;;  %v2752_v0 = vld [vmem:[#allocation7 + $0x158] sm:$0xff] }
 0x1a8   : > { %1729 = vmatmul.f32.gmra.mxu0 %v1487_v3  ;;  %v2480_v3 = vld [vmem:[#allocation7 + $0xf0] sm:$0xff]  ;;  %v7011_v22 = vadd.f32 %v6967_v31, %v1085_v61 }
 0x1a9   : > { %1888 = vmatmul.f32.gmra.mxu1 %v1809_v5  ;;  %2761 = vmatpush.msra.mxu0 %v2752_v0  ;;  %v2426_v0 = vld [vmem:[#allocation7 + $0x48] sm:$0xff] }
 0x1aa   : > { %2483 = vmatpush.msrb.mxu2 %v2480_v3  ;;  %v2478_v3 = vld [vmem:[#allocation7 + $0xe0] sm:$0xff]  ;;  %vm1153_vm14 = vcmp.gt.f32.partialorder %v7011_v22, 0.0 }
 0x1ab   : > { %v6996_v47 = vpop.f32.mrf.mxu3 }
 0x1ae   : > { %v1371_v43 = vpop.permute.xlu1 %1370  ;;  %v1536_v1 = vld [vmem:[#allocation2 + $0x69] sm:$0xff] }
 0x1af   : > { %v1488_v10 = vld [vmem:[#allocation2 + $0x68] sm:$0xff]  ;;  %1457 = vst.msk [vmem:[#allocation2 + $0x79] sm:$0xff] %vm1446_vm0, %v1371_v43  ;;  %1619 = vmatmul.f32.gmra.mxu3 %v1536_v1 }
 0x1b0   : > { %v1810_v12 = vld [vmem:[#allocation2 + $0x62] sm:$0xff]  ;;  %1732 = vmatmul.f32.gmra.mxu0 %v1488_v10  ;;  %v1811_v15 = vld [vmem:[#allocation2 + $0x6a] sm:$0xff] }
 0x1b1   : > { %1891 = vmatmul.f32.gmra.mxu1 %v1810_v12 }
 0x1b3   : > { %v6999_v53 = vpop.f32.mrf.mxu3 }
 0x1b6   : > { %v1537_v16 = vld [vmem:[#allocation2 + $0x79] sm:$0xff]  ;;  %v1379_v19 = vpop.permute.xlu2 %1378 }
 0x1b7   : > { %v1489_v18 = vld [vmem:[#allocation2 + $0x78] sm:$0xff]  ;;  %1622 = vmatmul.f32.gmra.mxu3 %v1537_v16  ;;  %1461 = vst.msk [vmem:[#allocation2 + $0xa9] sm:$0xff] %vm1446_vm0, %v1379_v19  ;;  %v1490_v27 = vld [vmem:[#allocation2 + $0x80] sm:$0xff]  ;;  %v1185_v19 = vmin.f32 %v7011_v22, 0.0 }
 0x1b8   : > { %1735 = vmatmul.f32.gmra.mxu0 %v1489_v18  ;;  %v1812_v38 = vld [vmem:[#allocation2 + $0x7a] sm:$0xff] }
 0x1b9   : > { %1894 = vmatmul.f32.gmra.mxu1 %v1811_v15  ;;  %v885_v15 = vadd.f32 %v6911_v14, %v6875_v36 }
 0x1bb   : > { %v1086_v18 = vadd.f32 %v6989_v17, %v885_v15  ;;  %v1244_v17 = vmul.f32 1.442695, %v1185_v19 }
 0x1bd   : > { %v7020_v36 = vadd.f32 %v6967_v31, %v1086_v18 }
 0x1be   : > { %v1375_v11 = vpop.permute.xlu0 %1374  ;;  %v1541_v63 = vld [vmem:[#allocation2 + $0xa9] sm:$0xff] }
 0x1bf   : > { %1459 = vst.msk [vmem:[#allocation2 + $0x91] sm:$0xff] %vm1446_vm0, %v1375_v11  ;;  %1625 = vmatmul.f32.gmra.mxu3 %v1538_v25  ;;  %v1493_v40 = vld [vmem:[#allocation2 + $0xa8] sm:$0xff]  ;;  %v2427_v25 = vld [vmem:[#allocation7 + $0x50] sm:$0xff]  ;;  %vm1154_vm1 = vcmp.gt.f32.partialorder %v7020_v36, 0.0 }
 0x1c0   : > { %1738 = vmatmul.f32.gmra.mxu0 %v1490_v27  ;;  %2600 = vmatpush.msra.mxu3 %v2427_v25 }
 0x1c1   : > { %1897 = vmatmul.f32.gmra.mxu1 %v1812_v38 }
 0x1c2   : > { %2601 = vmatpush.msra.mxu3 %v2426_v0 }
 0x1c6   : > { %v1377_v23 = vpop.permute.xlu1 %1376  ;;  %v1539_v30 = vld [vmem:[#allocation2 + $0x91] sm:$0xff] }
 0x1c7   : > { %v1491_v28 = vld [vmem:[#allocation2 + $0x90] sm:$0xff]  ;;  %1460 = vst.msk [vmem:[#allocation2 + $0x99] sm:$0xff] %vm1446_vm0, %v1377_v23  ;;  %1628 = vmatmul.f32.gmra.mxu3 %v1539_v30 }
 0x1c8   : > { %1741 = vmatmul.f32.gmra.mxu0 %v1491_v28 }
 0x1c9   : > { %1900 = vmatmul.f32.gmra.mxu1 %v1813_v29 }
 0x1ce   : > { %v1540_v33 = vld [vmem:[#allocation2 + $0x99] sm:$0xff]  ;;  %v1385_v37 = vpop.permute.xlu2 %1384 }
 0x1cf   : > { %v1492_v34 = vld [vmem:[#allocation2 + $0x98] sm:$0xff]  ;;  %1631 = vmatmul.f32.gmra.mxu3 %v1540_v33  ;;  %1464 = vst.msk [vmem:[#allocation2 + $0xc9] sm:$0xff] %vm1446_vm0, %v1385_v37  ;;  %v888_v33 = vadd.f32 %v6915_v45, %v6879_v58 }
 0x1d0   : > { %v1814_v35 = vld [vmem:[#allocation2 + $0x92] sm:$0xff]  ;;  %1744 = vmatmul.f32.gmra.mxu0 %v1492_v34  ;;  %v1815_v41 = vld [vmem:[#allocation2 + $0x9a] sm:$0xff] }
 0x1d1   : > { %1903 = vmatmul.f32.gmra.mxu1 %v1814_v35  ;;  %v1186_v35 = vmin.f32 %v7020_v36, 0.0  ;;  %v1087_v37 = vadd.f32 %v6992_v32, %v888_v33 }
 0x1d6   : > { %v1381_v44 = vpop.permute.xlu0 %1380  ;;  %v1544_v43 = vld [vmem:[#allocation2 + $0xc9] sm:$0xff] }
 0x1d7   : > { %1462 = vst.msk [vmem:[#allocation2 + $0xb1] sm:$0xff] %vm1446_vm0, %v1381_v44  ;;  %1634 = vmatmul.f32.gmra.mxu3 %v1541_v63  ;;  %v1819_v20 = vld [vmem:[#allocation2 + $0xca] sm:$0xff] }
 0x1d8   : > { %1747 = vmatmul.f32.gmra.mxu0 %v1493_v40  ;;  %v2479_v40 = vld [vmem:[#allocation7 + $0xe8] sm:$0xff] }
 0x1d9   : > { %1906 = vmatmul.f32.gmra.mxu1 %v1815_v41  ;;  %v2751_v41 = vld [vmem:[#allocation7 + $0x150] sm:$0xff]  ;;  %2484 = vmatpush.msrb.mxu2 %v2479_v40 }
 0x1da   : > { %2762 = vmatpush.msra.mxu0 %v2751_v41 }
 0x1db   : > { %2485 = vmatpush.msrb.mxu2 %v2478_v3 }
 0x1de   : > { %v1383_v49 = vpop.permute.xlu1 %1382  ;;  %v1542_v50 = vld [vmem:[#allocation2 + $0xb1] sm:$0xff] }
 0x1df   : > { %v1494_v51 = vld [vmem:[#allocation2 + $0xb0] sm:$0xff]  ;;  %1463 = vst.msk [vmem:[#allocation2 + $0xc1] sm:$0xff] %vm1446_vm0, %v1383_v49  ;;  %1637 = vmatmul.f32.gmra.mxu3 %v1542_v50 }
 0x1e0   : > { %v1816_v52 = vld [vmem:[#allocation2 + $0xaa] sm:$0xff]  ;;  %1750 = vmatmul.f32.gmra.mxu0 %v1494_v51  ;;  %v1817_v57 = vld [vmem:[#allocation2 + $0xb2] sm:$0xff]  ;;  %v1246_v51 = vmul.f32 1.442695, %v1186_v35 }
 0x1e1   : > { %1909 = vmatmul.f32.gmra.mxu1 %v1816_v52  ;;  %v7032_v52 = vadd.f32 %v6967_v31, %v1087_v37 }
 0x1e3   : > { %vm1155_vm3 = vcmp.gt.f32.partialorder %v7032_v52, 0.0 }
 0x1e5   : > { %v1706_v56 = vpop.f32.mrf.mxu0 }
 0x1e6   : > { %v1543_v59 = vld [vmem:[#allocation2 + $0xc1] sm:$0xff]  ;;  %v1391_v26 = vpop.permute.xlu2 %1390 }
 0x1e7   : > { %v1495_v46 = vld [vmem:[#allocation2 + $0xc0] sm:$0xff]  ;;  %1640 = vmatmul.f32.gmra.mxu3 %v1543_v59  ;;  %1467 = vst.msk [vmem:[#allocation2 + $0xf1] sm:$0xff] %vm1446_vm0, %v1391_v26  ;;  %v1496_v1 = vld [vmem:[#allocation2 + $0xc8] sm:$0xff] }
 0x1e8   : > { %1753 = vmatmul.f32.gmra.mxu0 %v1495_v46  ;;  %v1818_v12 = vld [vmem:[#allocation2 + $0xc2] sm:$0xff] }
 0x1e9   : > { %1912 = vmatmul.f32.gmra.mxu1 %v1817_v57  ;;  %v891_v57 = vadd.f32 %v6919_v62, %v6883_v2 }
 0x1ea   : > { %v1593_v60 = vpop.f32.mrf.mxu3 }
 0x1eb   : > { %v1707_v5 = vadd.f32 %v1706_v56, %v1593_v60  ;;  %v1088_v61 = vadd.f32 %v6996_v47, %v891_v57  ;;  %v1187_v60 = vmin.f32 %v7032_v52, 0.0 }
 0x1ed   : > { %v1709_v8 = vpop.f32.mrf.mxu0 }
 0x1ee   : > { %v1868_v10 = vpop.f32.mrf.mxu1  ;;  %v1387_v13 = vpop.permute.xlu0 %1386 }
 0x1ef   : > { %v1964_v6 = vadd.f32 %v1868_v10, %v1707_v5  ;;  %1465 = vst.msk [vmem:[#allocation2 + $0xd9] sm:$0xff] %vm1446_vm0, %v1387_v13  ;;  %1643 = vmatmul.f32.gmra.mxu3 %v1544_v43  ;;  %v1547_v10 = vld [vmem:[#allocation2 + $0xf1] sm:$0xff]  ;;  %v7045_v13 = vadd.f32 %v6967_v31, %v1088_v61 }
 0x1f0   : > { %1756 = vmatmul.f32.gmra.mxu0 %v1496_v1 }
 0x1f1   : > { %v2000_v16 = vadd.f32 %v7008_v9, %v1964_v6  ;;  %1915 = vmatmul.f32.gmra.mxu1 %v1818_v12  ;;  %v1499_v12 = vld [vmem:[#allocation2 + $0xf0] sm:$0xff]  ;;  %vm1156_vm5 = vcmp.gt.f32.partialorder %v7045_v13, 0.0 }
 0x1f2   : > { %v1596_v24 = vpop.f32.mrf.mxu3 }
 0x1f3   : > { %v2064_v21 = vmin.f32 %v2000_v16, 0.0  ;;  %v1710_v27 = vadd.f32 %v1709_v8, %v1596_v24  ;;  %vm2032_vm13 = vcmp.gt.f32.partialorder %v2000_v16, 0.0 }
 0x1f5   : > { %v1712_v38 = vpop.f32.mrf.mxu0  ;;  %v2096_v11 = vmul.f32 1.442695, %v2064_v21  ;;  %v1248_v21 = vmul.f32 1.442695, %v1187_v60 }
 0x1f6   : > { %v1871_v14 = vpop.f32.mrf.mxu1  ;;  %v1389_v23 = vpop.permute.xlu1 %1388  ;;  %v1545_v30 = vld [vmem:[#allocation2 + $0xd9] sm:$0xff] }
 0x1f7   : > { %v1965_v29 = vadd.f32 %v1871_v14, %v1710_v27  ;;  %v1497_v28 = vld [vmem:[#allocation2 + $0xd8] sm:$0xff]  ;;  %5993 = vpow2.f32 %v2096_v11  ;;  %1466 = vst.msk [vmem:[#allocation2 + $0xe1] sm:$0xff] %vm1446_vm0, %v1389_v23  ;;  %1646 = vmatmul.f32.gmra.mxu3 %v1545_v30  ;;  %v1188_v14 = vmin.f32 %v7045_v13, 0.0  ;;  %v2750_v23 = vld [vmem:[#allocation7 + $0x148] sm:$0xff] }
 0x1f8   : > { %1759 = vmatmul.f32.gmra.mxu0 %v1497_v28  ;;  %5995 = vpow2.f32 %v1244_v17 }
 0x1f9   : > { %v7026_v34 = vadd.f32 %v7008_v9, %v1965_v29  ;;  %1918 = vmatmul.f32.gmra.mxu1 %v1819_v20  ;;  %2763 = vmatpush.msra.mxu0 %v2750_v23  ;;  %v1250_v35 = vmul.f32 1.442695, %v1188_v14 }
 0x1fa   : > { %v1599_v63 = vpop.f32.mrf.mxu3 }
 0x1fb   : > { %v2065_v39 = vmin.f32 %v7026_v34, 0.0  ;;  %v1713_v44 = vadd.f32 %v1712_v38, %v1599_v63  ;;  %vm2033_vm15 = vcmp.gt.f32.partialorder %v7026_v34, 0.0  ;;  %v894_v38 = vadd.f32 %v6924_v4, %v6887_v42 }
 0x1fd   : > { %v5994_v48 = vpop.eup %5993  ;;  %v1715_v49 = vpop.f32.mrf.mxu0  ;;  %v2098_v58 = vmul.f32 1.442695, %v2065_v39 }
 0x1fe   : > { %v1874_v45 = vpop.f32.mrf.mxu1  ;;  %v5698_v50 = vadd.f32 -1.0, %v5994_v48  ;;  %v1546_v32 = vld [vmem:[#allocation2 + $0xe1] sm:$0xff]  ;;  %v5996_v26 = vpop.eup %5995 }
 0x1ff   : > { %v1966_v54 = vadd.f32 %v1874_v45, %v1713_v44  ;;  %v1498_v55 = vld [vmem:[#allocation2 + $0xe0] sm:$0xff]  ;;  %5997 = vpow2.f32 %v2098_v58  ;;  %1649 = vmatmul.f32.gmra.mxu3 %v1546_v32  ;;  %v1397_v46 = vpop.permute.xlu2 %1396  ;;  %v5693_v8 = vadd.f32 -1.0, %v5996_v26 }
 0x200   : > { %v1820_v56 = vld [vmem:[#allocation2 + $0xda] sm:$0xff]  ;;  %v2192_v59 = vsel %vm2032_vm13, %v2000_v16, %v5698_v50  ;;  %1762 = vmatmul.f32.gmra.mxu0 %v1498_v55  ;;  %1470 = vst.msk [vmem:[#allocation2 + $0x111] sm:$0xff] %vm1446_vm0, %v1397_v46  ;;  %5999 = vpow2.f32 %v1246_v51  ;;  %v1821_v19 = vld [vmem:[#allocation2 + $0xe2] sm:$0xff] }
 0x201   : > { %v7037_v7 = vadd.f32 %v7008_v9, %v1966_v54  ;;  %2256 = vrot.lane.b32.xlu2 %v2192_v59, %s6476_s24  ;;  %1921 = vmatmul.f32.gmra.mxu1 %v1820_v56  ;;  %v1313_v24 = vsel %vm1153_vm14, %v7011_v22, %v5693_v8  ;;  %v1089_v22 = vadd.f32 %v6999_v53, %v894_v38  ;;  %v2425_v54 = vld [vmem:[#allocation7 + $0x40] sm:$0xff] }
 0x202   : > { %v1602_v62 = vpop.f32.mrf.mxu3  ;;  %2602 = vmatpush.msra.mxu3 %v2425_v54 }
 0x203   : > { %v2066_v2 = vmin.f32 %v7037_v7, 0.0  ;;  %v1716_v5 = vadd.f32 %v1715_v49, %v1602_v62  ;;  %v7064_v37 = vadd.f32 %v6967_v31, %v1089_v22  ;;  %vm2034_vm2 = vcmp.gt.f32.partialorder %v7037_v7, 0.0 }
 0x205   : > { %v5998_v43 = vpop.eup %5997  ;;  %v1718_v1 = vpop.f32.mrf.mxu0  ;;  %v2100_v6 = vmul.f32 1.442695, %v2066_v2  ;;  %v1189_v45 = vmin.f32 %v7064_v37, 0.0  ;;  %vm1157_vm8 = vcmp.gt.f32.partialorder %v7064_v37, 0.0 }
 0x206   : > { %v1877_v47 = vpop.f32.mrf.mxu1  ;;  %v5699_v15 = vadd.f32 -1.0, %v5998_v43  ;;  %v1393_v18 = vpop.permute.xlu0 %1392 }
 0x207   : > { %v1967_v16 = vadd.f32 %v1877_v47, %v1716_v5  ;;  %6001 = vpow2.f32 %v2100_v6  ;;  %1468 = vst.msk [vmem:[#allocation2 + $0xf9] sm:$0xff] %vm1446_vm0, %v1393_v18  ;;  %1652 = vmatmul.f32.gmra.mxu3 %v1547_v10  ;;  %v6000_v27 = vpop.eup %5999  ;;  %v1252_v3 = vmul.f32 1.442695, %v1189_v45  ;;  %v2749_v6 = vld [vmem:[#allocation7 + $0x140] sm:$0xff]  ;;  %v2476_v47 = vld [vmem:[#allocation7 + $0xd0] sm:$0xff]  ;;  %v2748_v45 = vld [vmem:[#allocation7 + $0x138] sm:$0xff] }
 0x208   : > { %v2193_v25 = vsel %vm2033_vm15, %v7026_v34, %v5699_v15  ;;  %1765 = vmatmul.f32.gmra.mxu0 %v1499_v12  ;;  %6003 = vpow2.f32 %v1248_v21  ;;  %v5694_v28 = vadd.f32 -1.0, %v6000_v27  ;;  %vm2352_vm15 = vcmask 162912  }
 0x209   : > { %v7055_v11 = vadd.f32 %v7008_v9, %v1967_v16  ;;  %1404 = vrot.lane.b32.xlu2 %v1313_v24, %s6475_s15  ;;  %2258 = vrot.lane.b32.xlu1 %v2193_v25, %s6476_s24 }
 0x20a   : > { %1924 = vmatmul.f32.gmra.mxu1 %v1821_v19  ;;  %v1605_v29 = vpop.f32.mrf.mxu3  ;;  %v1314_v49 = vsel %vm1154_vm1, %v7020_v36, %v5694_v28  ;;  %v2477_v36 = vld [vmem:[#allocation7 + $0xd8] sm:$0xff]  ;;  %2764 = vmatpush.msra.mxu0 %v2749_v6 }
 0x20b   : > { %v2067_v20 = vmin.f32 %v7055_v11, 0.0  ;;  %v1719_v30 = vadd.f32 %v1718_v1, %v1605_v29  ;;  %2486 = vmatpush.msrb.mxu2 %v2477_v36  ;;  %vm2035_vm4 = vcmp.gt.f32.partialorder %v7055_v11, 0.0  ;;  %v1550_v19 = vld [vmem:[#allocation2 + $0x111] sm:$0xff] }
 0x20c   : > { %v2424_v28 = vld [vmem:[#allocation7 + $0x38] sm:$0xff]  ;;  %2765 = vmatpush.msra.mxu0 %v2748_v45  ;;  %v2746_v45 = vld [vmem:[#allocation7 + $0x128] sm:$0xff] }
 0x20d   : > { %v6002_v42 = vpop.eup %6001  ;;  %v1721_v4 = vpop.f32.mrf.mxu0  ;;  %v2102_v17 = vmul.f32 1.442695, %v2067_v20  ;;  %2487 = vmatpush.msrb.mxu2 %v2476_v47  ;;  %2603 = vmatpush.msra.mxu3 %v2424_v28  ;;  %v2472_v47 = vld [vmem:[#allocation7 + $0xb0] sm:$0xff] }
 0x20e   : > { %v1880_v33 = vpop.f32.mrf.mxu1  ;;  %v5700_v34 = vadd.f32 -1.0, %v6002_v42  ;;  %v1395_v39 = vpop.permute.xlu1 %1394  ;;  %v1548_v40 = vld [vmem:[#allocation2 + $0xf9] sm:$0xff] }
 0x20f   : > { %v1968_v53 = vadd.f32 %v1880_v33, %v1719_v30  ;;  %v1399_v63 = vpop.permute.xlu0 %1398  ;;  %v1500_v41 = vld [vmem:[#allocation2 + $0xf8] sm:$0xff]  ;;  %6005 = vpow2.f32 %v2102_v17  ;;  %1469 = vst.msk [vmem:[#allocation2 + $0x109] sm:$0xff] %vm1446_vm0, %v1395_v39  ;;  %1655 = vmatmul.f32.gmra.mxu3 %v1548_v40  ;;  %v6004_v58 = vpop.eup %6003 }
 0x210   : > { %v1822_v44 = vld [vmem:[#allocation2 + $0xf2] sm:$0xff]  ;;  %v2194_v48 = vsel %vm2034_vm2, %v7037_v7, %v5700_v34  ;;  %1768 = vmatmul.f32.gmra.mxu0 %v1500_v41  ;;  %1471 = vst.msk [vmem:[#allocation2 + $0x121] sm:$0xff] %vm1446_vm0, %v1399_v63  ;;  %6007 = vpow2.f32 %v1250_v35  ;;  %v5695_v55 = vadd.f32 -1.0, %v6004_v58  ;;  %v1823_v0 = vld [vmem:[#allocation2 + $0xfa] sm:$0xff] }
 0x211   : > { %v7071_v31 = vadd.f32 %v7008_v9, %v1968_v53  ;;  %2260 = vrot.lane.b32.xlu0 %v2194_v48, %s6476_s24  ;;  %1406 = vrot.lane.b32.xlu1 %v1314_v49, %s6475_s15  ;;  %v1825_v40 = vld [vmem:[#allocation2 + $0x112] sm:$0xff] }
 0x212   : > { %1927 = vmatmul.f32.gmra.mxu1 %v1822_v44  ;;  %v1608_v51 = vpop.f32.mrf.mxu3  ;;  %v1315_v8 = vsel %vm1155_vm3, %v7032_v52, %v5695_v55 }
 0x213   : > { %v2068_v50 = vmin.f32 %v7071_v31, 0.0  ;;  %v1722_v32 = vadd.f32 %v1721_v4, %v1608_v51  ;;  %vm2036_vm6 = vcmp.gt.f32.partialorder %v7071_v31, 0.0 }
 0x215   : > { %v6006_v56 = vpop.eup %6005  ;;  %v1724_v57 = vpop.f32.mrf.mxu0  ;;  %v2104_v59 = vmul.f32 1.442695, %v2068_v50 }
 0x216   : > { %v1883_v46 = vpop.f32.mrf.mxu1  ;;  %v5701_v26 = vadd.f32 -1.0, %v6006_v56  ;;  %v1401_v61 = vpop.permute.xlu1 %1400  ;;  %v1549_v2 = vld [vmem:[#allocation2 + $0x109] sm:$0xff] }
 0x217   : > { %v1969_v7 = vadd.f32 %v1883_v46, %v1722_v32  ;;  %v1403_v60 = vpop.permute.xlu0 %1402  ;;  %v1501_v62 = vld [vmem:[#allocation2 + $0x108] sm:$0xff]  ;;  %6009 = vpow2.f32 %v2104_v59  ;;  %1472 = vst.msk [vmem:[#allocation2 + $0x129] sm:$0xff] %vm1446_vm0, %v1401_v61  ;;  %1658 = vmatmul.f32.gmra.mxu3 %v1549_v2  ;;  %v6008_v43 = vpop.eup %6007  ;;  %v1502_v21 = vld [vmem:[#allocation2 + $0x110] sm:$0xff]  ;;  %v1503_v63 = vld [vmem:[#allocation2 + $0x120] sm:$0xff] }
 0x218   : > { %v2195_v5 = vsel %vm2035_vm4, %v7055_v11, %v5701_v26  ;;  %1771 = vmatmul.f32.gmra.mxu0 %v1501_v62  ;;  %1473 = vst.msk [vmem:[#allocation2 + $0x139] sm:$0xff] %vm1446_vm0, %v1403_v60  ;;  %6011 = vpow2.f32 %v1252_v3  ;;  %v5696_v16 = vadd.f32 -1.0, %v6008_v43  ;;  %v1824_v11 = vld [vmem:[#allocation2 + $0x10a] sm:$0xff]  ;;  %v1551_v39 = vld [vmem:[#allocation2 + $0x121] sm:$0xff] }
 0x219   : > { %v2005_v1 = vadd.f32 %v7008_v9, %v1969_v7  ;;  %2262 = vrot.lane.b32.xlu2 %v2195_v5, %s6476_s24  ;;  %1408 = vrot.lane.b32.xlu0 %v1315_v8, %s6475_s15  ;;  %v2423_v60 = vld [vmem:[#allocation7 + $0x30] sm:$0xff]  ;;  %v2474_v2 = vld [vmem:[#allocation7 + $0xc0] sm:$0xff] }
 0x21a   : > { %1930 = vmatmul.f32.gmra.mxu1 %v1823_v0  ;;  %v1611_v12 = vpop.f32.mrf.mxu3  ;;  %v1316_v14 = vsel %vm1156_vm5, %v7045_v13, %v5696_v16  ;;  %2604 = vmatpush.msra.mxu3 %v2423_v60  ;;  %v2473_v0 = vld [vmem:[#allocation7 + $0xb8] sm:$0xff] }
 0x21b   : > { %v2069_v10 = vmin.f32 %v2005_v1, 0.0  ;;  %v1725_v15 = vadd.f32 %v1724_v57, %v1611_v12  ;;  %vm2037_vm7 = vcmp.gt.f32.partialorder %v2005_v1, 0.0 }
 0x21d   : > { %v6010_v52 = vpop.eup %6009  ;;  %v1727_v18 = vpop.f32.mrf.mxu0  ;;  %v2106_v24 = vmul.f32 1.442695, %v2069_v10 }
 0x21e   : > { %v1886_v25 = vpop.f32.mrf.mxu1  ;;  %v5702_v27 = vadd.f32 -1.0, %v6010_v52  ;;  %v6012_v20 = vpop.eup %6011  ;;  %v1552_v56 = vld [vmem:[#allocation2 + $0x129] sm:$0xff] }
 0x21f   : > { %v1970_v38 = vadd.f32 %v1886_v25, %v1725_v15  ;;  %6013 = vpow2.f32 %v2106_v24  ;;  %1661 = vmatmul.f32.gmra.mxu3 %v1550_v19  ;;  %v5697_v4 = vadd.f32 -1.0, %v6012_v20  ;;  %v1504_v57 = vld [vmem:[#allocation2 + $0x128] sm:$0xff]  ;;  %v1553_v12 = vld [vmem:[#allocation2 + $0x139] sm:$0xff]  ;;  %v2747_v24 = vld [vmem:[#allocation7 + $0x130] sm:$0xff] }
 0x220   : > { %v2196_v22 = vsel %vm2036_vm6, %v7071_v31, %v5702_v27  ;;  %1774 = vmatmul.f32.gmra.mxu0 %v1502_v21  ;;  %v2475_v31 = vld [vmem:[#allocation7 + $0xc8] sm:$0xff]  ;;  %v1505_v6 = vld [vmem:[#allocation2 + $0x138] sm:$0xff]  ;;  %v2470_v25 = vld [vmem:[#allocation7 + $0xa0] sm:$0xff] }
 0x221   : > { %v2006_v29 = vadd.f32 %v7008_v9, %v1970_v38  ;;  %1410 = vrot.lane.b32.xlu2 %v1316_v14, %s6475_s15  ;;  %2264 = vrot.lane.b32.xlu1 %v2196_v22, %s6476_s24  ;;  %v1317_v44 = vsel %vm1157_vm8, %v7064_v37, %v5697_v4  ;;  %v1826_v26 = vld [vmem:[#allocation2 + $0x122] sm:$0xff]  ;;  %v1827_v52 = vld [vmem:[#allocation2 + $0x12a] sm:$0xff]  ;;  %v2469_v38 = vld [vmem:[#allocation7 + $0x98] sm:$0xff] }
 0x222   : > { %1933 = vmatmul.f32.gmra.mxu1 %v1824_v11  ;;  %v1614_v30 = vpop.f32.mrf.mxu3  ;;  %2488 = vmatpush.msrb.mxu2 %v2475_v31  ;;  %v2467_v4 = vld [vmem:[#allocation7 + $0x88] sm:$0xff] }
 0x223   : > { %v2070_v23 = vmin.f32 %v2006_v29, 0.0  ;;  %v1728_v42 = vadd.f32 %v1727_v18, %v1614_v30  ;;  %vm2038_vm9 = vcmp.gt.f32.partialorder %v2006_v29, 0.0  ;;  %v2471_v18 = vld [vmem:[#allocation7 + $0xa8] sm:$0xff]  ;;  %2766 = vmatpush.msra.mxu0 %v2747_v24  ;;  %v2468_v30 = vld [vmem:[#allocation7 + $0x90] sm:$0xff] }
 0x224   : > { %2489 = vmatpush.msrb.mxu2 %v2474_v2 }
 0x225   : > { %v6014_v17 = vpop.eup %6013  ;;  %v1730_v13 = vpop.f32.mrf.mxu0  ;;  %v2108_v33 = vmul.f32 1.442695, %v2070_v23  ;;  %2767 = vmatpush.msra.mxu0 %v2746_v45 }
 0x226   : > { %v1889_v34 = vpop.f32.mrf.mxu1  ;;  %v5703_v35 = vadd.f32 -1.0, %v6014_v17  ;;  %2490 = vmatpush.msrb.mxu2 %v2473_v0 }
 0x227   : > { %v1971_v53 = vadd.f32 %v1889_v34, %v1728_v42  ;;  %6015 = vpow2.f32 %v2108_v33  ;;  %1664 = vmatmul.f32.gmra.mxu3 %v1551_v39  ;;  %v2422_v33 = vld [vmem:[#allocation7 + $0x28] sm:$0xff]  ;;  %v2466_v34 = vld [vmem:[#allocation7 + $0x80] sm:$0xff] }
 0x228   : > { %v2197_v41 = vsel %vm2037_vm7, %v2005_v1, %v5703_v35  ;;  %1777 = vmatmul.f32.gmra.mxu0 %v1503_v63  ;;  %2491 = vmatpush.msrb.mxu2 %v2472_v47 }
 0x229   : > { %v2007_v48 = vadd.f32 %v7008_v9, %v1971_v53  ;;  %2266 = vrot.lane.b32.xlu0 %v2197_v41, %s6476_s24  ;;  %1412 = vrot.lane.b32.xlu1 %v1317_v44, %s6475_s15 }
 0x22a   : > { %1936 = vmatmul.f32.gmra.mxu1 %v1825_v40  ;;  %v1617_v58 = vpop.f32.mrf.mxu3  ;;  %2492 = vmatpush.msrb.mxu2 %v2471_v18 }
 0x22b   : > { %v2071_v49 = vmin.f32 %v2007_v48, 0.0  ;;  %v1731_v50 = vadd.f32 %v1730_v13, %v1617_v58  ;;  %vm2039_vm10 = vcmp.gt.f32.partialorder %v2007_v48, 0.0  ;;  %2605 = vmatpush.msra.mxu3 %v2422_v33 }
 0x22c   : > { %2493 = vmatpush.msrb.mxu2 %v2470_v25 }
 0x22d   : > { %v6016_v51 = vpop.eup %6015  ;;  %v1733_v36 = vpop.f32.mrf.mxu0  ;;  %v2110_v54 = vmul.f32 1.442695, %v2071_v49 }
 0x22e   : > { %v1892_v37 = vpop.f32.mrf.mxu1  ;;  %v5704_v32 = vadd.f32 -1.0, %v6016_v51  ;;  %2494 = vmatpush.msrb.mxu2 %v2469_v38 }
 0x22f   : > { %v1972_v55 = vadd.f32 %v1892_v37, %v1731_v50  ;;  %6017 = vpow2.f32 %v2110_v54  ;;  %1667 = vmatmul.f32.gmra.mxu3 %v1552_v56 }
 0x230   : > { %1780 = vmatmul.f32.gmra.mxu0 %v1504_v57  ;;  %v2198_v59 = vsel %vm2038_vm9, %v2006_v29, %v5704_v32  ;;  %2495 = vmatpush.msrb.mxu2 %v2468_v30 }
 0x231   : > { %v2008_v46 = vadd.f32 %v7008_v9, %v1972_v55  ;;  %2268 = vrot.lane.b32.xlu2 %v2198_v59, %s6476_s24 }
 0x232   : > { %1939 = vmatmul.f32.gmra.mxu1 %v1826_v26  ;;  %v1620_v61 = vpop.f32.mrf.mxu3  ;;  %2496 = vmatpush.msrb.mxu2 %v2467_v4  ;;  %v2421_v26 = vld [vmem:[#allocation7 + $0x20] sm:$0xff] }
 0x233   : > { %v2072_v7 = vmin.f32 %v2008_v46, 0.0  ;;  %v1734_v62 = vadd.f32 %v1733_v36, %v1620_v61  ;;  %vm2040_vm11 = vcmp.gt.f32.partialorder %v2008_v46, 0.0  ;;  %2606 = vmatpush.msra.mxu3 %v2421_v26 }
 0x234   : > { %2497 = vmatpush.msrb.mxu2 %v2466_v34 }
 0x235   : > { %v6018_v3 = vpop.eup %6017  ;;  %v1736_v5 = vpop.f32.mrf.mxu0  ;;  %v2112_v8 = vmul.f32 1.442695, %v2072_v7 }
 0x236   : > { %v1895_v43 = vpop.f32.mrf.mxu1  ;;  %v5705_v1 = vadd.f32 -1.0, %v6018_v3 }
 0x237   : > { %v1973_v10 = vadd.f32 %v1895_v43, %v1734_v62  ;;  %6019 = vpow2.f32 %v2112_v8  ;;  %1670 = vmatmul.f32.gmra.mxu3 %v1553_v12  ;;  %v2745_v12 = vld [vmem:[#allocation7 + $0x120] sm:$0xff] }
 0x238   : > { %v2199_v15 = vsel %vm2039_vm10, %v2007_v48, %v5705_v1  ;;  %1783 = vmatmul.f32.gmra.mxu0 %v1505_v6 }
 0x239   : > { %v2009_v16 = vadd.f32 %v7008_v9, %v1973_v10  ;;  %2270 = vrot.lane.b32.xlu0 %v2199_v15, %s6476_s24  ;;  %2768 = vmatpush.msra.mxu0 %v2745_v12 }
 0x23a   : > { %1942 = vmatmul.f32.gmra.mxu1 %v1827_v52  ;;  %v1623_v21 = vpop.f32.mrf.mxu3 }
 0x23b   : > { %v2073_v19 = vmin.f32 %v2009_v16, 0.0  ;;  %v1737_v27 = vadd.f32 %v1736_v5, %v1623_v21  ;;  %vm2041_vm12 = vcmp.gt.f32.partialorder %v2009_v16, 0.0 }
 0x23d   : > { %v6020_v11 = vpop.eup %6019  ;;  %v1739_v14 = vpop.f32.mrf.mxu0  ;;  %v2114_v22 = vmul.f32 1.442695, %v2073_v19 }
 0x23e   : > { %v1898_v20 = vpop.f32.mrf.mxu1  ;;  %v5706_v29 = vadd.f32 -1.0, %v6020_v11 }
 0x23f   : > { %v1974_v23 = vadd.f32 %v1898_v20, %v1737_v27  ;;  %6021 = vpow2.f32 %v2114_v22 }
 0x240   : > { %v2200_v28 = vsel %vm2040_vm11, %v2008_v46, %v5706_v29 }
 0x241   : > { %v2010_v42 = vadd.f32 %v7008_v9, %v1974_v23  ;;  %2272 = vrot.lane.b32.xlu1 %v2200_v28, %s6476_s24 }
 0x242   : > { %v1626_v13 = vpop.f32.mrf.mxu3 }
 0x243   : > { %v2074_v17 = vmin.f32 %v2010_v42, 0.0  ;;  %v1740_v35 = vadd.f32 %v1739_v14, %v1626_v13  ;;  %vm2042_vm13 = vcmp.gt.f32.partialorder %v2010_v42, 0.0  ;;  %v2420_v14 = vld [vmem:[#allocation7 + $0x18] sm:$0xff] }
 0x244   : > { %2607 = vmatpush.msra.mxu3 %v2420_v14 }
 0x245   : > { %v6022_v53 = vpop.eup %6021  ;;  %v1742_v39 = vpop.f32.mrf.mxu0  ;;  %v2116_v63 = vmul.f32 1.442695, %v2074_v17 }
 0x246   : > { %v1901_v40 = vpop.f32.mrf.mxu1  ;;  %v5707_v41 = vadd.f32 -1.0, %v6022_v53 }
 0x247   : > { %v1975_v44 = vadd.f32 %v1901_v40, %v1740_v35  ;;  %6023 = vpow2.f32 %v2116_v63  ;;  %v2744_v63 = vld [vmem:[#allocation7 + $0x118] sm:$0xff] }
 0x248   : > { %v2201_v48 = vsel %vm2041_vm12, %v2009_v16, %v5707_v41  ;;  %2769 = vmatpush.msra.mxu0 %v2744_v63 }
 0x249   : > { %v2011_v49 = vadd.f32 %v7008_v9, %v1975_v44  ;;  %2274 = vrot.lane.b32.xlu2 %v2201_v48, %s6476_s24 }
 0x24a   : > { %v1629_v31 = vpop.f32.mrf.mxu3 }
 0x24b   : > { %v2075_v58 = vmin.f32 %v2011_v49, 0.0  ;;  %v1743_v50 = vadd.f32 %v1742_v39, %v1629_v31  ;;  %vm2043_vm14 = vcmp.gt.f32.partialorder %v2011_v49, 0.0 }
 0x24d   : > { %v6024_v51 = vpop.eup %6023  ;;  %v1745_v36 = vpop.f32.mrf.mxu0  ;;  %v2118_v54 = vmul.f32 1.442695, %v2075_v58 }
 0x24e   : > { %v1904_v37 = vpop.f32.mrf.mxu1  ;;  %v5708_v32 = vadd.f32 -1.0, %v6024_v51 }
 0x24f   : > { %v1976_v55 = vadd.f32 %v1904_v37, %v1743_v50  ;;  %6025 = vpow2.f32 %v2118_v54 }
 0x250   : > { %v2202_v56 = vsel %vm2042_vm13, %v2010_v42, %v5708_v32  ;;  %v2419_v32 = vld [vmem:[#allocation7 + $0x10] sm:$0xff] }
 0x251   : > { %v2012_v57 = vadd.f32 %v7008_v9, %v1976_v55  ;;  %2276 = vrot.lane.b32.xlu0 %v2202_v56, %s6476_s24  ;;  %2608 = vmatpush.msra.mxu3 %v2419_v32 }
 0x252   : > { %v1632_v46 = vpop.f32.mrf.mxu3 }
 0x253   : > { %v2076_v59 = vmin.f32 %v2012_v57, 0.0  ;;  %v1746_v7 = vadd.f32 %v1745_v36, %v1632_v46  ;;  %vm2044_vm1 = vcmp.gt.f32.partialorder %v2012_v57, 0.0 }
 0x255   : > { %v6026_v61 = vpop.eup %6025  ;;  %v1748_v60 = vpop.f32.mrf.mxu0  ;;  %v2120_v2 = vmul.f32 1.442695, %v2076_v59 }
 0x256   : > { %v1907_v62 = vpop.f32.mrf.mxu1  ;;  %v5709_v0 = vadd.f32 -1.0, %v6026_v61 }
 0x257   : > { %v1977_v3 = vadd.f32 %v1907_v62, %v1746_v7  ;;  %6027 = vpow2.f32 %v2120_v2 }
 0x258   : > { %v2203_v5 = vsel %vm2043_vm14, %v2011_v49, %v5709_v0 }
 0x259   : > { %v2013_v8 = vadd.f32 %v7008_v9, %v1977_v3  ;;  %2278 = vrot.lane.b32.xlu1 %v2203_v5, %s6476_s24  ;;  %v2743_v3 = vld [vmem:[#allocation7 + $0x110] sm:$0xff] }
 0x25a   : > { %v1635_v10 = vpop.f32.mrf.mxu3  ;;  %2770 = vmatpush.msra.mxu0 %v2743_v3 }
 0x25b   : > { %v2077_v43 = vmin.f32 %v2013_v8, 0.0  ;;  %v2257_v1 = vpop.permute.xlu2 %2256  ;;  %v1749_v6 = vadd.f32 %v1748_v60, %v1635_v10  ;;  %vm2045_vm2 = vcmp.gt.f32.partialorder %v2013_v8, 0.0 }
 0x25c   : > { %2353 = vst.msk [vmem:[#allocation2 + $0x1] sm:$0xff] %vm2352_vm15, %v2257_v1 }
 0x25d   : > { %v6028_v47 = vpop.eup %6027  ;;  %v1751_v15 = vpop.f32.mrf.mxu0  ;;  %v2122_v16 = vmul.f32 1.442695, %v2077_v43 }
 0x25e   : > { %v1910_v52 = vpop.f32.mrf.mxu1  ;;  %v5710_v18 = vadd.f32 -1.0, %v6028_v47 }
 0x25f   : > { %v1978_v19 = vadd.f32 %v1910_v52, %v1749_v6  ;;  %6029 = vpow2.f32 %v2122_v16 }
 0x260   : > { %v2204_v21 = vsel %vm2044_vm1, %v2012_v57, %v5710_v18 }
 0x261   : > { %v2014_v24 = vadd.f32 %v7008_v9, %v1978_v19  ;;  %2280 = vrot.lane.b32.xlu2 %v2204_v21, %s6476_s24 }
 0x262   : > { %v1638_v38 = vpop.f32.mrf.mxu3 }
 0x263   : > { %v2078_v25 = vmin.f32 %v2014_v24, 0.0  ;;  %v1405_v27 = vpop.permute.xlu2 %1404  ;;  %v2433_v11 = vld [vmem:[#allocation2 + $0x1] sm:$0xff]  ;;  %v1752_v22 = vadd.f32 %v1751_v15, %v1638_v38  ;;  %vm2046_vm3 = vcmp.gt.f32.partialorder %v2014_v24, 0.0 }
 0x264   : > { %1474 = vst.msk [vmem:[#allocation2 + $0x141] sm:$0xff] %vm1446_vm0, %v1405_v27  ;;  %2498 = vmatmul.f32.vlgmr.msrb.gmra.mxu2 %v2433_v11 }
 0x265   : > { %v6030_v20 = vpop.eup %6029  ;;  %v1754_v29 = vpop.f32.mrf.mxu0  ;;  %v2124_v23 = vmul.f32 1.442695, %v2078_v25 }
 0x266   : > { %v1913_v30 = vpop.f32.mrf.mxu1  ;;  %v5711_v28 = vadd.f32 -1.0, %v6030_v20 }
 0x267   : > { %v1979_v42 = vadd.f32 %v1913_v30, %v1752_v22  ;;  %6031 = vpow2.f32 %v2124_v23  ;;  %v2742_v23 = vld [vmem:[#allocation7 + $0x108] sm:$0xff] }
 0x268   : > { %v2205_v4 = vsel %vm2045_vm2, %v2013_v8, %v5711_v28  ;;  %2771 = vmatpush.msra.mxu0 %v2742_v23 }
 0x269   : > { %v2015_v17 = vadd.f32 %v7008_v9, %v1979_v42  ;;  %2282 = vrot.lane.b32.xlu0 %v2205_v4, %s6476_s24 }
 0x26a   : > { %v1641_v33 = vpop.f32.mrf.mxu3 }
 0x26b   : > { %v2079_v13 = vmin.f32 %v2015_v17, 0.0  ;;  %v1554_v34 = vld [vmem:[#allocation2 + $0x141] sm:$0xff]  ;;  %v1755_v39 = vadd.f32 %v1754_v29, %v1641_v33  ;;  %vm2047_vm4 = vcmp.gt.f32.partialorder %v2015_v17, 0.0 }
 0x26c   : > { %v1506_v35 = vld [vmem:[#allocation2 + $0x140] sm:$0xff]  ;;  %1673 = vmatmul.f32.gmra.mxu3 %v1554_v34 }
 0x26d   : > { %v1828_v53 = vld [vmem:[#allocation2 + $0x13a] sm:$0xff]  ;;  %1786 = vmatmul.f32.gmra.mxu0 %v1506_v35  ;;  %v6032_v40 = vpop.eup %6031  ;;  %v1757_v41 = vpop.f32.mrf.mxu0  ;;  %v2126_v44 = vmul.f32 1.442695, %v2079_v13  ;;  %v1829_v37 = vld [vmem:[#allocation2 + $0x142] sm:$0xff] }
 0x26e   : > { %1945 = vmatmul.f32.gmra.mxu1 %v1828_v53  ;;  %v1916_v48 = vpop.f32.mrf.mxu1  ;;  %v5712_v49 = vadd.f32 -1.0, %v6032_v40  ;;  %v2741_v53 = vld [vmem:[#allocation7 + $0x100] sm:$0xff] }
 0x26f   : > { %v1980_v58 = vadd.f32 %v1916_v48, %v1755_v39  ;;  %6033 = vpow2.f32 %v2126_v44  ;;  %2772 = vmatpush.msra.mxu0 %v2741_v53 }
 0x270   : > { %v2206_v31 = vsel %vm2046_vm3, %v2014_v24, %v5712_v49  ;;  %v2418_v24 = vld [vmem:[#allocation7 + $0x8] sm:$0xff] }
 0x271   : > { %v2016_v45 = vadd.f32 %v7008_v9, %v1980_v58  ;;  %2284 = vrot.lane.b32.xlu1 %v2206_v31, %s6476_s24  ;;  %2609 = vmatpush.msra.mxu3 %v2418_v24  ;;  %v7136_v58 = vld [vmem:[%s8063_s4] ss:$0 sm:$0xff] }
 0x272   : > { %v1644_v36 = vpop.f32.mrf.mxu3 }
 0x273   : > { %v2080_v50 = vmin.f32 %v2016_v45, 0.0  ;;  %v2263_v51 = vpop.permute.xlu2 %2262  ;;  %v1758_v54 = vadd.f32 %v1757_v41, %v1644_v36  ;;  %vm2048_vm5 = vcmp.gt.f32.partialorder %v2016_v45, 0.0 }
 0x274   : > { %2356 = vst.msk [vmem:[#allocation2 + $0x21] sm:$0xff] %vm2352_vm15, %v2263_v51 }
 0x275   : > { %v6034_v55 = vpop.eup %6033  ;;  %v1760_v56 = vpop.f32.mrf.mxu0  ;;  %v2128_v57 = vmul.f32 1.442695, %v2080_v50 }
 0x276   : > { %1948 = vmatmul.f32.gmra.mxu1 %v1829_v37  ;;  %v1919_v59 = vpop.f32.mrf.mxu1  ;;  %v5713_v46 = vadd.f32 -1.0, %v6034_v55 }
 0x277   : > { %v1981_v26 = vadd.f32 %v1919_v59, %v1758_v54  ;;  %6035 = vpow2.f32 %v2128_v57 }
 0x278   : > { %v2207_v7 = vsel %vm2047_vm4, %v2015_v17, %v5713_v46  ;;  %v2417_v17 = vld [vmem:[#allocation7] sm:$0xff] }
 0x279   : > { %v2017_v61 = vadd.f32 %v7008_v9, %v1981_v26  ;;  %2286 = vrot.lane.b32.xlu2 %v2207_v7, %s6476_s24  ;;  %2610 = vmatpush.msra.mxu3 %v2417_v17 }
 0x27a   : > { %v1647_v0 = vpop.f32.mrf.mxu3 }
 0x27b   : > { %v2081_v60 = vmin.f32 %v2017_v61, 0.0  ;;  %v1411_v2 = vpop.permute.xlu2 %1410  ;;  %v2259_v62 = vpop.permute.xlu1 %2258  ;;  %v1761_v8 = vadd.f32 %v1760_v56, %v1647_v0  ;;  %vm2049_vm6 = vcmp.gt.f32.partialorder %v2017_v61, 0.0  ;;  %v2436_v32 = vld [vmem:[#allocation2 + $0x21] sm:$0xff] }
 0x27c   : > { %1477 = vst.msk [vmem:[#allocation2 + $0x169] sm:$0xff] %vm1446_vm0, %v1411_v2 }
 0x27d   : > { %v6036_v5 = vpop.eup %6035  ;;  %2354 = vst.msk [vmem:[#allocation2 + $0x9] sm:$0xff] %vm2352_vm15, %v2259_v62  ;;  %v1763_v43 = vpop.f32.mrf.mxu0  ;;  %v2130_v1 = vmul.f32 1.442695, %v2081_v60 }
 0x27e   : > { %v1922_v10 = vpop.f32.mrf.mxu1  ;;  %v5714_v12 = vadd.f32 -1.0, %v6036_v5 }
 0x27f   : > { %v1982_v6 = vadd.f32 %v1922_v10, %v1761_v8  ;;  %6037 = vpow2.f32 %v2130_v1 }
 0x280   : > { %v2208_v47 = vsel %vm2048_vm5, %v2016_v45, %v5714_v12 }
 0x281   : > { %v2018_v15 = vadd.f32 %v7008_v9, %v1982_v6  ;;  %2288 = vrot.lane.b32.xlu0 %v2208_v47, %s6476_s24 }
 0x282   : > { %v1650_v19 = vpop.f32.mrf.mxu3 }
 0x283   : > { %v2082_v16 = vmin.f32 %v2018_v15, 0.0  ;;  %v1407_v52 = vpop.permute.xlu1 %1406  ;;  %v2261_v18 = vpop.permute.xlu0 %2260  ;;  %v1764_v27 = vadd.f32 %v1763_v43, %v1650_v19  ;;  %vm2050_vm7 = vcmp.gt.f32.partialorder %v2018_v15, 0.0  ;;  %v1557_v0 = vld [vmem:[#allocation2 + $0x169] sm:$0xff] }
 0x284   : > { %1475 = vst.msk [vmem:[#allocation2 + $0x151] sm:$0xff] %vm1446_vm0, %v1407_v52  ;;  %v2434_v21 = vld [vmem:[#allocation2 + $0x9] sm:$0xff] }
 0x285   : > { %v6038_v25 = vpop.eup %6037  ;;  %2355 = vst.msk [vmem:[#allocation2 + $0x19] sm:$0xff] %vm2352_vm15, %v2261_v18  ;;  %2501 = vmatmul.f32.gmra.mxu2 %v2434_v21  ;;  %v1766_v38 = vpop.f32.mrf.mxu0  ;;  %v2132_v11 = vmul.f32 1.442695, %v2082_v16  ;;  %v1509_v3 = vld [vmem:[#allocation2 + $0x168] sm:$0xff] }
 0x286   : > { %v5715_v14 = vadd.f32 -1.0, %v6038_v25 }
 0x287   : > { %v1925_v22 = vpop.f32.mrf.mxu1  ;;  %6039 = vpow2.f32 %v2132_v11 }
 0x288   : > { %v1983_v20 = vadd.f32 %v1925_v22, %v1764_v27  ;;  %v2209_v29 = vsel %vm2049_vm6, %v2017_v61, %v5715_v14 }
 0x289   : > { %2290 = vrot.lane.b32.xlu1 %v2209_v29, %s6476_s24 }
 0x28a   : > { %v2019_v30 = vadd.f32 %v7008_v9, %v1983_v20  ;;  %v1653_v33 = vpop.f32.mrf.mxu3 }
 0x28b   : > { %v1409_v28 = vpop.permute.xlu0 %1408  ;;  %v1555_v42 = vld [vmem:[#allocation2 + $0x151] sm:$0xff]  ;;  %v2269_v35 = vpop.permute.xlu2 %2268  ;;  %v1767_v63 = vadd.f32 %v1766_v38, %v1653_v33 }
 0x28c   : > { %v1507_v4 = vld [vmem:[#allocation2 + $0x150] sm:$0xff]  ;;  %v2083_v13 = vmin.f32 %v2019_v30, 0.0  ;;  %1476 = vst.msk [vmem:[#allocation2 + $0x159] sm:$0xff] %vm1446_vm0, %v1409_v28  ;;  %1676 = vmatmul.f32.gmra.mxu3 %v1555_v42  ;;  %v2435_v34 = vld [vmem:[#allocation2 + $0x19] sm:$0xff]  ;;  %vm2051_vm8 = vcmp.gt.f32.partialorder %v2019_v30, 0.0 }
 0x28d   : > { %1789 = vmatmul.f32.gmra.mxu0 %v1507_v4  ;;  %v6040_v39 = vpop.eup %6039  ;;  %2504 = vmatmul.f32.gmra.mxu2 %v2435_v34  ;;  %v1769_v40 = vpop.f32.mrf.mxu0  ;;  %2359 = vst.msk [vmem:[#allocation2 + $0x49] sm:$0xff] %vm2352_vm15, %v2269_v35  ;;  %v2385_v34 = vld [vmem:[#allocation2] sm:$0xff] }
 0x28e   : > { %v2134_v9 = vmul.f32 1.442695, %v2083_v13  ;;  %v5716_v41 = vadd.f32 -1.0, %v6040_v39  ;;  %v2708_v35 = vld [vmem:[#allocation2 + $0x2] sm:$0xff] }
 0x28f   : > { %v1928_v44 = vpop.f32.mrf.mxu1 }
 0x290   : > { %v1984_v48 = vadd.f32 %v1928_v44, %v1767_v63  ;;  %6041 = vpow2.f32 %v2134_v9  ;;  %v2210_v49 = vsel %vm2050_vm7, %v2018_v15, %v5716_v41 }
 0x291   : > { %2292 = vrot.lane.b32.xlu2 %v2210_v49, %s6476_s24 }
 0x292   : > { %v2020_v31 = vadd.f32 %v7136_v58, %v1984_v48  ;;  %v1656_v37 = vpop.f32.mrf.mxu3 }
 0x293   : > { %v2265_v45 = vpop.permute.xlu1 %2264  ;;  %v1556_v50 = vld [vmem:[#allocation2 + $0x159] sm:$0xff]  ;;  %v1770_v55 = vadd.f32 %v1769_v40, %v1656_v37 }
 0x294   : > { %v1508_v51 = vld [vmem:[#allocation2 + $0x158] sm:$0xff]  ;;  %v2084_v54 = vmin.f32 %v2020_v31, 0.0  ;;  %2357 = vst.msk [vmem:[#allocation2 + $0x31] sm:$0xff] %vm2352_vm15, %v2265_v45  ;;  %1679 = vmatmul.f32.gmra.mxu3 %v1556_v50  ;;  %vm2052_vm9 = vcmp.gt.f32.partialorder %v2020_v31, 0.0  ;;  %v2439_v13 = vld [vmem:[#allocation2 + $0x49] sm:$0xff] }
 0x295   : > { %v1830_v36 = vld [vmem:[#allocation2 + $0x152] sm:$0xff]  ;;  %1792 = vmatmul.f32.gmra.mxu0 %v1508_v51  ;;  %2507 = vmatmul.f32.gmra.mxu2 %v2436_v32  ;;  %v1772_v57 = vpop.f32.mrf.mxu0  ;;  %v1831_v1 = vld [vmem:[#allocation2 + $0x15a] sm:$0xff] }
 0x296   : > { %1951 = vmatmul.f32.gmra.mxu1 %v1830_v36  ;;  %v6042_v56 = vpop.eup %6041  ;;  %v2136_v59 = vmul.f32 1.442695, %v2084_v54  ;;  %v2386_v36 = vld [vmem:[#allocation2 + $0x8] sm:$0xff] }
 0x297   : > { %v1931_v46 = vpop.f32.mrf.mxu1  ;;  %v5717_v26 = vadd.f32 -1.0, %v6042_v56  ;;  %v2709_v54 = vld [vmem:[#allocation2 + $0xa] sm:$0xff] }
 0x298   : > { %v1985_v7 = vadd.f32 %v1931_v46, %v1770_v55  ;;  %6043 = vpow2.f32 %v2136_v59  ;;  %v3662_v59 = vld [vmem:[#allocation8 + $0x178] sm:$0xff] }
 0x299   : > { %v2211_v61 = vsel %vm2051_vm8, %v2019_v30, %v5717_v26  ;;  %3663 = vmatpush.msrb.mxu3 %v3662_v59 }
 0x29a   : > { %v2021_v60 = vadd.f32 %v7136_v58, %v1985_v7  ;;  %2294 = vrot.lane.b32.xlu0 %v2211_v61, %s6476_s24  ;;  %v1659_v43 = vpop.f32.mrf.mxu3 }
 0x29b   : > { %v1413_v2 = vpop.permute.xlu1 %1412  ;;  %v2267_v62 = vpop.permute.xlu0 %2266  ;;  %v2437_v5 = vld [vmem:[#allocation2 + $0x31] sm:$0xff]  ;;  %v1773_v10 = vadd.f32 %v1772_v57, %v1659_v43 }
 0x29c   : > { %v2085_v8 = vmin.f32 %v2021_v60, 0.0  ;;  %1478 = vst.msk [vmem:[#allocation2 + $0x171] sm:$0xff] %vm1446_vm0, %v1413_v2  ;;  %1682 = vmatmul.f32.gmra.mxu3 %v1557_v0  ;;  %vm2053_vm0 = vcmp.gt.f32.partialorder %v2021_v60, 0.0  ;;  %v3338_v57 = vld [vmem:[#allocation8 + $0x78] sm:$0xff] }
 0x29d   : > { %1795 = vmatmul.f32.gmra.mxu0 %v1509_v3  ;;  %2358 = vst.msk [vmem:[#allocation2 + $0x39] sm:$0xff] %vm2352_vm15, %v2267_v62  ;;  %2510 = vmatmul.f32.gmra.mxu2 %v2437_v5  ;;  %v1775_v16 = vpop.f32.mrf.mxu0  ;;  %v2387_v3 = vld [vmem:[#allocation2 + $0x18] sm:$0xff] }
 0x29e   : > { %1954 = vmatmul.f32.gmra.mxu1 %v1831_v1  ;;  %v6044_v12 = vpop.eup %6043  ;;  %v2138_v6 = vmul.f32 1.442695, %v2085_v8  ;;  %3501 = vmatpush.msra.mxu2 %v3338_v57  ;;  %v2710_v5 = vld [vmem:[#allocation2 + $0x1a] sm:$0xff] }
 0x29f   : > { %v1934_v47 = vpop.f32.mrf.mxu1  ;;  %v5718_v15 = vadd.f32 -1.0, %v6044_v12  ;;  %v3387_v1 = vld [vmem:[#allocation8 + $0xf8] sm:$0xff] }
 0x2a0   : > { %v1986_v52 = vadd.f32 %v1934_v47, %v1773_v10  ;;  %6045 = vpow2.f32 %v2138_v6  ;;  %3388 = vmatpush.msra.mxu1 %v3387_v1 }
 0x2a1   : > { %v2212_v18 = vsel %vm2052_vm9, %v2020_v31, %v5718_v15 }
 0x2a2   : > { %v2022_v19 = vadd.f32 %v7136_v58, %v1986_v52  ;;  %2296 = vrot.lane.b32.xlu1 %v2212_v18, %s6476_s24  ;;  %v1662_v11 = vpop.f32.mrf.mxu3  ;;  %v2711_v52 = vld [vmem:[#allocation2 + $0x22] sm:$0xff] }
 0x2a3   : > { %v1558_v21 = vld [vmem:[#allocation2 + $0x171] sm:$0xff]  ;;  %v2275_v27 = vpop.permute.xlu2 %2274  ;;  %v1776_v22 = vadd.f32 %v1775_v16, %v1662_v11  ;;  %v2388_v16 = vld [vmem:[#allocation2 + $0x20] sm:$0xff] }
 0x2a4   : > { %v1510_v24 = vld [vmem:[#allocation2 + $0x170] sm:$0xff]  ;;  %v2086_v38 = vmin.f32 %v2022_v19, 0.0  ;;  %1685 = vmatmul.f32.gmra.mxu3 %v1558_v21  ;;  %v2438_v14 = vld [vmem:[#allocation2 + $0x39] sm:$0xff]  ;;  %2362 = vst.msk [vmem:[#allocation2 + $0x69] sm:$0xff] %vm2352_vm15, %v2275_v27  ;;  %vm2054_vm10 = vcmp.gt.f32.partialorder %v2022_v19, 0.0 }
 0x2a5   : > { %v1832_v25 = vld [vmem:[#allocation2 + $0x16a] sm:$0xff]  ;;  %1798 = vmatmul.f32.gmra.mxu0 %v1510_v24  ;;  %2513 = vmatmul.f32.gmra.mxu2 %v2438_v14  ;;  %v1778_v4 = vpop.f32.mrf.mxu0  ;;  %v1833_v63 = vld [vmem:[#allocation2 + $0x172] sm:$0xff] }
 0x2a6   : > { %1957 = vmatmul.f32.gmra.mxu1 %v1832_v25  ;;  %v6046_v20 = vpop.eup %6045  ;;  %v2140_v29 = vmul.f32 1.442695, %v2086_v38  ;;  %v3337_v24 = vld [vmem:[#allocation8 + $0x70] sm:$0xff] }
 0x2a7   : > { %v1937_v23 = vpop.f32.mrf.mxu1  ;;  %v5719_v30 = vadd.f32 -1.0, %v6046_v20  ;;  %3502 = vmatpush.msra.mxu2 %v3337_v24  ;;  %v2389_v11 = vld [vmem:[#allocation2 + $0x30] sm:$0xff] }
 0x2a8   : > { %v1987_v28 = vadd.f32 %v1937_v23, %v1776_v22  ;;  %6047 = vpow2.f32 %v2140_v29  ;;  %v2712_v14 = vld [vmem:[#allocation2 + $0x32] sm:$0xff] }
 0x2a9   : > { %v2213_v42 = vsel %vm2053_vm0, %v2021_v60, %v5719_v30  ;;  %v3661_v22 = vld [vmem:[#allocation8 + $0x170] sm:$0xff]  ;;  %v2390_v23 = vld [vmem:[#allocation2 + $0x38] sm:$0xff] }
 0x2aa   : > { %v2023_v17 = vadd.f32 %v7136_v58, %v1987_v28  ;;  %2298 = vrot.lane.b32.xlu2 %v2213_v42, %s6476_s24  ;;  %v1665_v39 = vpop.f32.mrf.mxu3  ;;  %v3386_v20 = vld [vmem:[#allocation8 + $0xf0] sm:$0xff]  ;;  %3664 = vmatpush.msrb.mxu3 %v3661_v22  ;;  %v2713_v30 = vld [vmem:[#allocation2 + $0x3a] sm:$0xff]  ;;  %v3336_v42 = vld [vmem:[#allocation8 + $0x68] sm:$0xff] }
 0x2ab   : > { %v2271_v33 = vpop.permute.xlu0 %2270  ;;  %v1779_v40 = vadd.f32 %v1778_v4, %v1665_v39  ;;  %v2442_v18 = vld [vmem:[#allocation2 + $0x69] sm:$0xff]  ;;  %3389 = vmatpush.msra.mxu1 %v3386_v20  ;;  %3503 = vmatpush.msra.mxu2 %v3336_v42 }
 0x2ac   : > { %v2087_v53 = vmin.f32 %v2023_v17, 0.0  ;;  %2360 = vst.msk [vmem:[#allocation2 + $0x51] sm:$0xff] %vm2352_vm15, %v2271_v33  ;;  %2611 = vmatmul.f32.vlgmr.msra.gmra.mxu3 %v2385_v34  ;;  %vm2055_vm11 = vcmp.gt.f32.partialorder %v2023_v17, 0.0  ;;  %v3660_v4 = vld [vmem:[#allocation8 + $0x168] sm:$0xff]  ;;  %v3333_v22 = vld [vmem:[#allocation8 + $0x50] sm:$0xff] }
 0x2ad   : > { %2773 = vmatmul.f32.vlgmr.msra.gmra.mxu0 %v2708_v35  ;;  %2516 = vmatmul.f32.gmra.mxu2 %v2439_v13  ;;  %v1781_v37 = vpop.f32.mrf.mxu0  ;;  %v2391_v33 = vld [vmem:[#allocation2 + $0x48] sm:$0xff] }
 0x2ae   : > { %1960 = vmatmul.f32.gmra.mxu1 %v1833_v63  ;;  %v6048_v9 = vpop.eup %6047  ;;  %v2142_v41 = vmul.f32 1.442695, %v2087_v53  ;;  %3665 = vmatpush.msrb.mxu3 %v3660_v4  ;;  %v3385_v35 = vld [vmem:[#allocation8 + $0xe8] sm:$0xff]  ;;  %v3657_v4 = vld [vmem:[#allocation8 + $0x150] sm:$0xff] }
 0x2af   : > { %v1940_v44 = vpop.f32.mrf.mxu1  ;;  %v5720_v48 = vadd.f32 -1.0, %v6048_v9  ;;  %3390 = vmatpush.msra.mxu1 %v3385_v35 }
 0x2b0   : > { %v1988_v49 = vadd.f32 %v1940_v44, %v1779_v40  ;;  %6049 = vpow2.f32 %v2142_v41  ;;  %v3335_v44 = vld [vmem:[#allocation8 + $0x60] sm:$0xff] }
 0x2b1   : > { %v2214_v31 = vsel %vm2054_vm10, %v2022_v19, %v5720_v48  ;;  %3504 = vmatpush.msra.mxu2 %v3335_v44 }
 0x2b2   : > { %v2024_v45 = vadd.f32 %v7136_v58, %v1988_v49  ;;  %2300 = vrot.lane.b32.xlu0 %v2214_v31, %s6476_s24  ;;  %v1668_v55 = vpop.f32.mrf.mxu3  ;;  %v3659_v49 = vld [vmem:[#allocation8 + $0x160] sm:$0xff] }
 0x2b3   : > { %v2273_v50 = vpop.permute.xlu1 %2272  ;;  %v2440_v51 = vld [vmem:[#allocation2 + $0x51] sm:$0xff]  ;;  %v1782_v56 = vadd.f32 %v1781_v37, %v1668_v55  ;;  %3666 = vmatpush.msrb.mxu3 %v3659_v49 }
 0x2b4   : > { %v2088_v32 = vmin.f32 %v2024_v45, 0.0  ;;  %2361 = vst.msk [vmem:[#allocation2 + $0x61] sm:$0xff] %vm2352_vm15, %v2273_v50  ;;  %2614 = vmatmul.f32.gmra.mxu3 %v2386_v36  ;;  %vm2056_vm12 = vcmp.gt.f32.partialorder %v2024_v45, 0.0  ;;  %v2714_v34 = vld [vmem:[#allocation2 + $0x4a] sm:$0xff]  ;;  %v2715_v40 = vld [vmem:[#allocation2 + $0x52] sm:$0xff] }
 0x2b5   : > { %2776 = vmatmul.f32.gmra.mxu0 %v2709_v54  ;;  %2519 = vmatmul.f32.gmra.mxu2 %v2440_v51  ;;  %v2392_v63 = vld [vmem:[#allocation2 + $0x50] sm:$0xff]  ;;  %v1784_v41 = vpop.f32.mrf.mxu0 }
 0x2b6   : > { %v6050_v46 = vpop.eup %6049  ;;  %v2144_v26 = vmul.f32 1.442695, %v2088_v32  ;;  %v3384_v32 = vld [vmem:[#allocation8 + $0xe0] sm:$0xff] }
 0x2b7   : > { %v1943_v7 = vpop.f32.mrf.mxu1  ;;  %v5721_v61 = vadd.f32 -1.0, %v6050_v46  ;;  %3391 = vmatpush.msra.mxu1 %v3384_v32 }
 0x2b8   : > { %v1989_v60 = vadd.f32 %v1943_v7, %v1782_v56  ;;  %6051 = vpow2.f32 %v2144_v26 }
 0x2b9   : > { %v2215_v2 = vsel %vm2055_vm11, %v2023_v17, %v5721_v61 }
 0x2ba   : > { %v2025_v62 = vadd.f32 %v7136_v58, %v1989_v60  ;;  %2302 = vrot.lane.b32.xlu1 %v2215_v2, %s6476_s24  ;;  %v1671_v9 = vpop.f32.mrf.mxu3  ;;  %v2717_v2 = vld [vmem:[#allocation2 + $0x6a] sm:$0xff] }
 0x2bb   : > { %v2441_v0 = vld [vmem:[#allocation2 + $0x61] sm:$0xff]  ;;  %v2281_v8 = vpop.permute.xlu2 %2280  ;;  %v1785_v48 = vadd.f32 %v1784_v41, %v1671_v9 }
 0x2bc   : > { %v2089_v43 = vmin.f32 %v2025_v62, 0.0  ;;  %2617 = vmatmul.f32.gmra.mxu3 %v2387_v3  ;;  %2365 = vst.msk [vmem:[#allocation2 + $0x91] sm:$0xff] %vm2352_vm15, %v2281_v8  ;;  %vm2057_vm13 = vcmp.gt.f32.partialorder %v2025_v62, 0.0  ;;  %v2393_v51 = vld [vmem:[#allocation2 + $0x60] sm:$0xff]  ;;  %v2394_v60 = vld [vmem:[#allocation2 + $0x68] sm:$0xff] }
 0x2bd   : > { %2779 = vmatmul.f32.gmra.mxu0 %v2710_v5  ;;  %2522 = vmatmul.f32.gmra.mxu2 %v2441_v0  ;;  %v2716_v36 = vld [vmem:[#allocation2 + $0x62] sm:$0xff]  ;;  %v3334_v5 = vld [vmem:[#allocation8 + $0x58] sm:$0xff] }
 0x2be   : > { %v6052_v10 = vpop.eup %6051  ;;  %v2146_v12 = vmul.f32 1.442695, %v2089_v43  ;;  %3505 = vmatpush.msra.mxu2 %v3334_v5 }
 0x2bf   : > { %v5722_v6 = vadd.f32 -1.0, %v6052_v10 }
 0x2c0   : > { %6053 = vpow2.f32 %v2146_v12  ;;  %3506 = vmatpush.msra.mxu2 %v3333_v22 }
 0x2c1   : > { %v2216_v47 = vsel %vm2056_vm12, %v2024_v45, %v5722_v6 }
 0x2c2   : > { %2304 = vrot.lane.b32.xlu2 %v2216_v47, %s6476_s24 }
 0x2c3   : > { %v2277_v15 = vpop.permute.xlu0 %2276  ;;  %v2445_v17 = vld [vmem:[#allocation2 + $0x91] sm:$0xff] }
 0x2c4   : > { %2363 = vst.msk [vmem:[#allocation2 + $0x79] sm:$0xff] %vm2352_vm15, %v2277_v15  ;;  %2620 = vmatmul.f32.gmra.mxu3 %v2388_v16  ;;  %v3658_v16 = vld [vmem:[#allocation8 + $0x158] sm:$0xff] }
 0x2c5   : > { %2782 = vmatmul.f32.gmra.mxu0 %v2711_v52  ;;  %2525 = vmatmul.f32.gmra.mxu2 %v2442_v18  ;;  %v3383_v52 = vld [vmem:[#allocation8 + $0xd8] sm:$0xff] }
 0x2c6   : > { %v6054_v19 = vpop.eup %6053  ;;  %3667 = vmatpush.msrb.mxu3 %v3658_v16  ;;  %3392 = vmatpush.msra.mxu1 %v3383_v52 }
 0x2c7   : > { %v5723_v21 = vadd.f32 -1.0, %v6054_v19 }
 0x2c8   : > { %3668 = vmatpush.msrb.mxu3 %v3657_v4 }
 0x2c9   : > { %v2217_v25 = vsel %vm2057_vm13, %v2025_v62, %v5723_v21 }
 0x2ca   : > { %2306 = vrot.lane.b32.xlu0 %v2217_v25, %s6476_s24 }
 0x2cb   : > { %v2279_v27 = vpop.permute.xlu1 %2278  ;;  %v2443_v38 = vld [vmem:[#allocation2 + $0x79] sm:$0xff] }
 0x2cc   : > { %2364 = vst.msk [vmem:[#allocation2 + $0x81] sm:$0xff] %vm2352_vm15, %v2279_v27  ;;  %2623 = vmatmul.f32.gmra.mxu3 %v2389_v11  ;;  %v2395_v6 = vld [vmem:[#allocation2 + $0x78] sm:$0xff] }
 0x2cd   : > { %2785 = vmatmul.f32.gmra.mxu0 %v2712_v14  ;;  %2528 = vmatmul.f32.gmra.mxu2 %v2443_v38 }
 0x2d3   : > { %v2444_v29 = vld [vmem:[#allocation2 + $0x81] sm:$0xff]  ;;  %v2287_v28 = vpop.permute.xlu2 %2286 }
 0x2d4   : > { %2626 = vmatmul.f32.gmra.mxu3 %v2390_v23  ;;  %2368 = vst.msk [vmem:[#allocation2 + $0xb1] sm:$0xff] %vm2352_vm15, %v2287_v28  ;;  %v2718_v47 = vld [vmem:[#allocation2 + $0x7a] sm:$0xff]  ;;  %v2719_v27 = vld [vmem:[#allocation2 + $0x82] sm:$0xff]  ;;  %v2397_v23 = vld [vmem:[#allocation2 + $0x90] sm:$0xff] }
 0x2d5   : > { %2788 = vmatmul.f32.gmra.mxu0 %v2713_v30  ;;  %2531 = vmatmul.f32.gmra.mxu2 %v2444_v29  ;;  %v2396_v25 = vld [vmem:[#allocation2 + $0x80] sm:$0xff] }
 0x2db   : > { %v2283_v13 = vpop.permute.xlu0 %2282  ;;  %v2448_v62 = vld [vmem:[#allocation2 + $0xb1] sm:$0xff] }
 0x2dc   : > { %2366 = vst.msk [vmem:[#allocation2 + $0x99] sm:$0xff] %vm2352_vm15, %v2283_v13  ;;  %2629 = vmatmul.f32.gmra.mxu3 %v2391_v33 }
 0x2dd   : > { %2791 = vmatmul.f32.gmra.mxu0 %v2714_v34  ;;  %2534 = vmatmul.f32.gmra.mxu2 %v2445_v17  ;;  %v3382_v17 = vld [vmem:[#allocation8 + $0xd0] sm:$0xff] }
 0x2de   : > { %3393 = vmatpush.msra.mxu1 %v3382_v17  ;;  %v3380_v17 = vld [vmem:[#allocation8 + $0xc0] sm:$0xff] }
 0x2e3   : > { %v2285_v53 = vpop.permute.xlu1 %2284  ;;  %v2446_v39 = vld [vmem:[#allocation2 + $0x99] sm:$0xff] }
 0x2e4   : > { %2367 = vst.msk [vmem:[#allocation2 + $0xa9] sm:$0xff] %vm2352_vm15, %v2285_v53  ;;  %2632 = vmatmul.f32.gmra.mxu3 %v2392_v63  ;;  %v2720_v30 = vld [vmem:[#allocation2 + $0x92] sm:$0xff]  ;;  %v2721_v63 = vld [vmem:[#allocation2 + $0x9a] sm:$0xff] }
 0x2e5   : > { %2794 = vmatmul.f32.gmra.mxu0 %v2715_v40  ;;  %2537 = vmatmul.f32.gmra.mxu2 %v2446_v39  ;;  %v2398_v39 = vld [vmem:[#allocation2 + $0x98] sm:$0xff] }
 0x2e7   : > { %v7169_v18 = vpop.f32.mrf.mxu2 }
 0x2ea   : > { %v1787_v55 = vpop.f32.mrf.mxu0 }
 0x2eb   : > { %v1946_v31 = vpop.f32.mrf.mxu1  ;;  %v2447_v50 = vld [vmem:[#allocation2 + $0xa9] sm:$0xff]  ;;  %v2293_v54 = vpop.permute.xlu2 %2292 }
 0x2ec   : > { %v1990_v45 = vadd.f32 %v1946_v31, %v1785_v48  ;;  %2635 = vmatmul.f32.gmra.mxu3 %v2393_v51  ;;  %2371 = vst.msk [vmem:[#allocation2 + $0xd9] sm:$0xff] %vm2352_vm15, %v2293_v54  ;;  %v2399_v54 = vld [vmem:[#allocation2 + $0xa8] sm:$0xff] }
 0x2ed   : > { %2797 = vmatmul.f32.gmra.mxu0 %v2716_v36  ;;  %2540 = vmatmul.f32.gmra.mxu2 %v2447_v50 }
 0x2ee   : > { %v2026_v37 = vadd.f32 %v7136_v58, %v1990_v45 }
 0x2ef   : > { %v1674_v57 = vpop.f32.mrf.mxu3 }
 0x2f0   : > { %v2090_v56 = vmin.f32 %v2026_v37, 0.0  ;;  %v1788_v59 = vadd.f32 %v1787_v55, %v1674_v57  ;;  %vm2058_vm14 = vcmp.gt.f32.partialorder %v2026_v37, 0.0  ;;  %v3656_v57 = vld [vmem:[#allocation8 + $0x148] sm:$0xff] }
 0x2f1   : > { %3669 = vmatpush.msrb.mxu3 %v3656_v57 }
 0x2f2   : > { %v2148_v46 = vmul.f32 1.442695, %v2090_v56  ;;  %v3332_v56 = vld [vmem:[#allocation8 + $0x48] sm:$0xff] }
 0x2f3   : > { %v1949_v26 = vpop.f32.mrf.mxu1  ;;  %v2289_v61 = vpop.permute.xlu0 %2288  ;;  %v2451_v29 = vld [vmem:[#allocation2 + $0xd9] sm:$0xff]  ;;  %3507 = vmatpush.msra.mxu2 %v3332_v56 }
 0x2f4   : > { %v1991_v7 = vadd.f32 %v1949_v26, %v1788_v59  ;;  %6055 = vpow2.f32 %v2148_v46  ;;  %2369 = vst.msk [vmem:[#allocation2 + $0xc1] sm:$0xff] %vm2352_vm15, %v2289_v61  ;;  %2638 = vmatmul.f32.gmra.mxu3 %v2394_v60  ;;  %v3381_v46 = vld [vmem:[#allocation8 + $0xc8] sm:$0xff]  ;;  %v2403_v57 = vld [vmem:[#allocation2 + $0xd8] sm:$0xff] }
 0x2f5   : > { %2800 = vmatmul.f32.gmra.mxu0 %v2717_v2  ;;  %2543 = vmatmul.f32.gmra.mxu2 %v2448_v62 }
 0x2f6   : > { %v2027_v0 = vadd.f32 %v7136_v58, %v1991_v7  ;;  %3394 = vmatpush.msra.mxu1 %v3381_v46 }
 0x2f8   : > { %v2091_v3 = vmin.f32 %v2027_v0, 0.0  ;;  %vm2059_vm1 = vcmp.gt.f32.partialorder %v2027_v0, 0.0  ;;  %3395 = vmatpush.msra.mxu1 %v3380_v17  ;;  %v3653_v17 = vld [vmem:[#allocation8 + $0x130] sm:$0xff] }
 0x2fa   : > { %v6056_v8 = vpop.eup %6055  ;;  %v2150_v43 = vmul.f32 1.442695, %v2091_v3 }
 0x2fb   : > { %v5724_v1 = vadd.f32 -1.0, %v6056_v8  ;;  %v2291_v10 = vpop.permute.xlu1 %2290  ;;  %v2449_v12 = vld [vmem:[#allocation2 + $0xc1] sm:$0xff] }
 0x2fc   : > { %6057 = vpow2.f32 %v2150_v43  ;;  %2370 = vst.msk [vmem:[#allocation2 + $0xc9] sm:$0xff] %vm2352_vm15, %v2291_v10  ;;  %2641 = vmatmul.f32.gmra.mxu3 %v2395_v6  ;;  %v2400_v43 = vld [vmem:[#allocation2 + $0xb0] sm:$0xff] }
 0x2fd   : > { %v2218_v15 = vsel %vm2058_vm14, %v2026_v37, %v5724_v1  ;;  %2803 = vmatmul.f32.gmra.mxu0 %v2718_v47  ;;  %2546 = vmatmul.f32.gmra.mxu2 %v2449_v12  ;;  %v2722_v37 = vld [vmem:[#allocation2 + $0xaa] sm:$0xff]  ;;  %v2723_v1 = vld [vmem:[#allocation2 + $0xb2] sm:$0xff] }
 0x2fe   : > { %2308 = vrot.lane.b32.xlu1 %v2218_v15, %s6476_s24 }
 0x302   : > { %v6058_v19 = vpop.eup %6057 }
 0x303   : > { %v5725_v21 = vadd.f32 -1.0, %v6058_v19  ;;  %v2450_v24 = vld [vmem:[#allocation2 + $0xc9] sm:$0xff] }
 0x304   : > { %2644 = vmatmul.f32.gmra.mxu3 %v2396_v25  ;;  %v2299_v11 = vpop.permute.xlu2 %2298  ;;  %v2724_v22 = vld [vmem:[#allocation2 + $0xc2] sm:$0xff] }
 0x305   : > { %v2219_v38 = vsel %vm2059_vm1, %v2027_v0, %v5725_v21  ;;  %2806 = vmatmul.f32.gmra.mxu0 %v2719_v27  ;;  %2549 = vmatmul.f32.gmra.mxu2 %v2450_v24  ;;  %2374 = vst.msk [vmem:[#allocation2 + $0xf9] sm:$0xff] %vm2352_vm15, %v2299_v11  ;;  %v2401_v11 = vld [vmem:[#allocation2 + $0xc0] sm:$0xff] }
 0x306   : > { %2310 = vrot.lane.b32.xlu2 %v2219_v38, %s6476_s24 }
 0x308   : > { %v7173_v14 = vpop.f32.mrf.mxu2 }
 0x30a   : > { %v1790_v20 = vpop.f32.mrf.mxu0 }
 0x30c   : > { %v2295_v28 = vpop.permute.xlu0 %2294  ;;  %2647 = vmatmul.f32.gmra.mxu3 %v2397_v23  ;;  %v2454_v6 = vld [vmem:[#allocation2 + $0xf9] sm:$0xff] }
 0x30d   : > { %2809 = vmatmul.f32.gmra.mxu0 %v2720_v30  ;;  %2372 = vst.msk [vmem:[#allocation2 + $0xe1] sm:$0xff] %vm2352_vm15, %v2295_v28  ;;  %2552 = vmatmul.f32.gmra.mxu2 %v2451_v29  ;;  %v3331_v28 = vld [vmem:[#allocation8 + $0x40] sm:$0xff] }
 0x30e   : > { %3508 = vmatpush.msra.mxu2 %v3331_v28 }
 0x30f   : > { %v1677_v42 = vpop.f32.mrf.mxu3 }
 0x310   : > { %v1791_v13 = vadd.f32 %v1790_v20, %v1677_v42  ;;  %v7176_v33 = vpop.f32.mrf.mxu2  ;;  %v3655_v42 = vld [vmem:[#allocation8 + $0x140] sm:$0xff] }
 0x311   : > { %3670 = vmatpush.msrb.mxu3 %v3655_v42 }
 0x312   : > { %v1793_v34 = vpop.f32.mrf.mxu0 }
 0x313   : > { %v1952_v35 = vpop.f32.mrf.mxu1 }
 0x314   : > { %v1992_v53 = vadd.f32 %v1952_v35, %v1791_v13  ;;  %v2297_v40 = vpop.permute.xlu1 %2296  ;;  %v2452_v9 = vld [vmem:[#allocation2 + $0xe1] sm:$0xff]  ;;  %2650 = vmatmul.f32.gmra.mxu3 %v2398_v39 }
 0x315   : > { %2812 = vmatmul.f32.gmra.mxu0 %v2721_v63  ;;  %2373 = vst.msk [vmem:[#allocation2 + $0xf1] sm:$0xff] %vm2352_vm15, %v2297_v40  ;;  %2555 = vmatmul.f32.gmra.mxu2 %v2452_v9 }
 0x316   : > { %v2028_v41 = vadd.f32 %v7136_v58, %v1992_v53  ;;  %v7198_v53 = vld [vmem:[%s8065_s6] ss:$0 sm:$0xff] }
 0x317   : > { %v1680_v48 = vpop.f32.mrf.mxu3 }
 0x318   : > { %v2092_v44 = vmin.f32 %v2028_v41, 0.0  ;;  %v1794_v49 = vadd.f32 %v1793_v34, %v1680_v48  ;;  %v7180_v31 = vpop.f32.mrf.mxu2  ;;  %vm2060_vm2 = vcmp.gt.f32.partialorder %v2028_v41, 0.0 }
 0x31a   : > { %v1796_v45 = vpop.f32.mrf.mxu0  ;;  %v2152_v50 = vmul.f32 1.442695, %v2092_v44  ;;  %v2725_v44 = vld [vmem:[#allocation2 + $0xca] sm:$0xff] }
 0x31b   : > { %v1955_v51 = vpop.f32.mrf.mxu1 }
 0x31c   : > { %v1993_v36 = vadd.f32 %v1955_v51, %v1794_v49  ;;  %6059 = vpow2.f32 %v2152_v50  ;;  %v2305_v32 = vpop.permute.xlu2 %2304  ;;  %v2453_v55 = vld [vmem:[#allocation2 + $0xf1] sm:$0xff]  ;;  %2653 = vmatmul.f32.gmra.mxu3 %v2399_v54 }
 0x31d   : > { %2815 = vmatmul.f32.gmra.mxu0 %v2722_v37  ;;  %2377 = vst.msk [vmem:[#allocation2 + $0x121] sm:$0xff] %vm2352_vm15, %v2305_v32  ;;  %2558 = vmatmul.f32.gmra.mxu2 %v2453_v55  ;;  %v2728_v42 = vld [vmem:[#allocation2 + $0xf2] sm:$0xff] }
 0x31e   : > { %v2029_v59 = vadd.f32 %v7136_v58, %v1993_v36 }
 0x31f   : > { %v1683_v7 = vpop.f32.mrf.mxu3 }
 0x320   : > { %v2093_v26 = vmin.f32 %v2029_v59, 0.0  ;;  %v1797_v61 = vadd.f32 %v1796_v45, %v1683_v7  ;;  %v7184_v0 = vpop.f32.mrf.mxu2  ;;  %vm2061_vm3 = vcmp.gt.f32.partialorder %v2029_v59, 0.0 }
 0x322   : > { %v6060_v60 = vpop.eup %6059  ;;  %v1799_v2 = vpop.f32.mrf.mxu0  ;;  %v2154_v62 = vmul.f32 1.442695, %v2093_v26 }
 0x323   : > { %v1958_v3 = vpop.f32.mrf.mxu1  ;;  %v5726_v5 = vadd.f32 -1.0, %v6060_v60  ;;  %v3330_v60 = vld [vmem:[#allocation8 + $0x38] sm:$0xff] }
 0x324   : > { %v1994_v8 = vadd.f32 %v1958_v3, %v1797_v61  ;;  %6061 = vpow2.f32 %v2154_v62  ;;  %v2301_v10 = vpop.permute.xlu0 %2300  ;;  %2656 = vmatmul.f32.gmra.mxu3 %v2400_v43  ;;  %v2457_v61 = vld [vmem:[#allocation2 + $0x121] sm:$0xff]  ;;  %3509 = vmatpush.msra.mxu2 %v3330_v60 }
 0x325   : > { %v2220_v12 = vsel %vm2060_vm2, %v2028_v41, %v5726_v5  ;;  %2818 = vmatmul.f32.gmra.mxu0 %v2723_v1  ;;  %2375 = vst.msk [vmem:[#allocation2 + $0x109] sm:$0xff] %vm2352_vm15, %v2301_v10  ;;  %2561 = vmatmul.f32.gmra.mxu2 %v2454_v6  ;;  %v2402_v41 = vld [vmem:[#allocation2 + $0xc8] sm:$0xff] }
 0x326   : > { %v2030_v47 = vadd.f32 %v7136_v58, %v1994_v8  ;;  %2312 = vrot.lane.b32.xlu0 %v2220_v12, %s6476_s24 }
 0x327   : > { %v1686_v16 = vpop.f32.mrf.mxu3 }
 0x328   : > { %v2094_v15 = vmin.f32 %v2030_v47, 0.0  ;;  %v1800_v52 = vadd.f32 %v1799_v2, %v1686_v16  ;;  %v7189_v20 = vpop.f32.mrf.mxu2  ;;  %vm2062_vm4 = vcmp.gt.f32.partialorder %v2030_v47, 0.0  ;;  %v3654_v2 = vld [vmem:[#allocation8 + $0x138] sm:$0xff] }
 0x329   : > { %3671 = vmatpush.msrb.mxu3 %v3654_v2 }
 0x32a   : > { %v6062_v19 = vpop.eup %6061  ;;  %v2774_v21 = vpop.f32.mrf.mxu0  ;;  %v2156_v24 = vmul.f32 1.442695, %v2094_v15  ;;  %v2404_v15 = vld [vmem:[#allocation2 + $0xe0] sm:$0xff] }
 0x32b   : > { %v1961_v25 = vpop.f32.mrf.mxu1  ;;  %v5727_v27 = vadd.f32 -1.0, %v6062_v19  ;;  %v2727_v19 = vld [vmem:[#allocation2 + $0xe2] sm:$0xff]  ;;  %3672 = vmatpush.msrb.mxu3 %v3653_v17 }
 0x32c   : > { %v1995_v38 = vadd.f32 %v1961_v25, %v1800_v52  ;;  %6063 = vpow2.f32 %v2156_v24  ;;  %v2303_v29 = vpop.permute.xlu1 %2302  ;;  %v2455_v30 = vld [vmem:[#allocation2 + $0x109] sm:$0xff]  ;;  %2659 = vmatmul.f32.gmra.mxu3 %v2401_v11 }
 0x32d   : > { %v2221_v23 = vsel %vm2061_vm3, %v2029_v59, %v5727_v27  ;;  %2821 = vmatmul.f32.gmra.mxu0 %v2724_v22  ;;  %2376 = vst.msk [vmem:[#allocation2 + $0x111] sm:$0xff] %vm2352_vm15, %v2303_v29  ;;  %2564 = vmatmul.f32.gmra.mxu2 %v2455_v30  ;;  %v2726_v59 = vld [vmem:[#allocation2 + $0xda] sm:$0xff]  ;;  %v2405_v30 = vld [vmem:[#allocation2 + $0xf0] sm:$0xff] }
 0x32e   : > { %v2031_v4 = vadd.f32 %v7136_v58, %v1995_v38  ;;  %2314 = vrot.lane.b32.xlu1 %v2221_v23, %s6476_s24 }
 0x32f   : > { %v2612_v34 = vpop.f32.mrf.mxu3 }
 0x330   : > { %v2095_v13 = vmin.f32 %v2031_v4, 0.0  ;;  %v2613_v35 = vadd.f32 %v2612_v34, %v7169_v18  ;;  %v7202_v18 = vpop.f32.mrf.mxu2  ;;  %vm2063_vm5 = vcmp.gt.f32.partialorder %v2031_v4, 0.0 }
 0x332   : > { %v6064_v39 = vpop.eup %6063  ;;  %v2777_v58 = vpop.f32.mrf.mxu0  ;;  %v2158_v63 = vmul.f32 1.442695, %v2095_v13  ;;  %v2870_v40 = vadd.f32 %v2774_v21, %v2613_v35 }
 0x333   : > { %v5728_v9 = vadd.f32 -1.0, %v6064_v39 }
 0x334   : > { %6065 = vpow2.f32 %v2158_v63  ;;  %v2906_v48 = vadd.f32 %v7198_v53, %v2870_v40  ;;  %v2456_v45 = vld [vmem:[#allocation2 + $0x111] sm:$0xff]  ;;  %2662 = vmatmul.f32.gmra.mxu3 %v2402_v41 }
 0x335   : > { %v2222_v49 = vsel %vm2062_vm4, %v2030_v47, %v5728_v9  ;;  %2824 = vmatmul.f32.gmra.mxu0 %v2725_v44  ;;  %2567 = vmatmul.f32.gmra.mxu2 %v2456_v45  ;;  %v2406_v44 = vld [vmem:[#allocation2 + $0xf8] sm:$0xff]  ;;  %vm3258_vm4 = vcmask 228512  }
 0x336   : > { %2316 = vrot.lane.b32.xlu2 %v2222_v49, %s6476_s24  ;;  %v2970_v50 = vmin.f32 %v2906_v48, 0.0  ;;  %vm2938_vm6 = vcmp.gt.f32.partialorder %v2906_v48, 0.0  ;;  %v2729_v45 = vld [vmem:[#allocation2 + $0xfa] sm:$0xff] }
 0x337   : > { %v2615_v51 = vpop.f32.mrf.mxu3 }
 0x338   : > { %v2616_v36 = vadd.f32 %v2615_v51, %v7173_v14  ;;  %v3002_v54 = vmul.f32 1.442695, %v2970_v50  ;;  %v3379_v14 = vld [vmem:[#allocation8 + $0xb8] sm:$0xff]  ;;  %v7208_v8 = vpop.f32.mrf.mxu2 }
 0x339   : > { %3396 = vmatpush.msra.mxu1 %v3379_v14 }
 0x33a   : > { %v6066_v37 = vpop.eup %6065  ;;  %v2780_v32 = vpop.f32.mrf.mxu0  ;;  %v2871_v55 = vadd.f32 %v2777_v58, %v2616_v36  ;;  %6067 = vpow2.f32 %v3002_v54 }
 0x33b   : > { %v5729_v56 = vadd.f32 -1.0, %v6066_v37 }
 0x33c   : > { %v2907_v46 = vadd.f32 %v7198_v53, %v2871_v55  ;;  %v2307_v26 = vpop.permute.xlu0 %2306  ;;  %2665 = vmatmul.f32.gmra.mxu3 %v2403_v57  ;;  %v2407_v57 = vld [vmem:[#allocation2 + $0x108] sm:$0xff] }
 0x33d   : > { %v2223_v7 = vsel %vm2063_vm5, %v2031_v4, %v5729_v56  ;;  %2827 = vmatmul.f32.gmra.mxu0 %v2726_v59  ;;  %2378 = vst.msk [vmem:[#allocation2 + $0x129] sm:$0xff] %vm2352_vm15, %v2307_v26  ;;  %2570 = vmatmul.f32.gmra.mxu2 %v2457_v61  ;;  %v3329_v4 = vld [vmem:[#allocation8 + $0x30] sm:$0xff]  ;;  %v3328_v26 = vld [vmem:[#allocation8 + $0x28] sm:$0xff] }
 0x33e   : > { %2318 = vrot.lane.b32.xlu0 %v2223_v7, %s6476_s24  ;;  %v2971_v62 = vmin.f32 %v2907_v46, 0.0  ;;  %vm2939_vm7 = vcmp.gt.f32.partialorder %v2907_v46, 0.0  ;;  %3510 = vmatpush.msra.mxu2 %v3329_v4  ;;  %v3652_v7 = vld [vmem:[#allocation8 + $0x128] sm:$0xff] }
 0x33f   : > { %v2618_v3 = vpop.f32.mrf.mxu3  ;;  %v3377_v61 = vld [vmem:[#allocation8 + $0xa8] sm:$0xff]  ;;  %3673 = vmatpush.msrb.mxu3 %v3652_v7  ;;  %v3375_v7 = vld [vmem:[#allocation8 + $0x98] sm:$0xff] }
 0x340   : > { %v6068_v5 = vpop.eup %6067  ;;  %v2619_v43 = vadd.f32 %v2618_v3, %v7176_v33  ;;  %v3004_v1 = vmul.f32 1.442695, %v2971_v62  ;;  %v7214_v22 = vpop.f32.mrf.mxu2  ;;  %3511 = vmatpush.msra.mxu2 %v3328_v26  ;;  %v3650_v26 = vld [vmem:[#allocation8 + $0x118] sm:$0xff] }
 0x341   : > { %v5730_v12 = vadd.f32 -1.0, %v6068_v5 }
 0x342   : > { %v2783_v10 = vpop.f32.mrf.mxu0  ;;  %v2872_v6 = vadd.f32 %v2780_v32, %v2619_v43  ;;  %6069 = vpow2.f32 %v3004_v1 }
 0x343   : > { %v3098_v47 = vsel %vm2938_vm6, %v2906_v48, %v5730_v12 }
 0x344   : > { %v2908_v16 = vadd.f32 %v7198_v53, %v2872_v6  ;;  %3162 = vrot.lane.b32.xlu1 %v3098_v47, %s6477_s22  ;;  %v2458_v52 = vld [vmem:[#allocation2 + $0x129] sm:$0xff]  ;;  %2668 = vmatmul.f32.gmra.mxu3 %v2404_v15  ;;  %v2731_v15 = vld [vmem:[#allocation2 + $0x112] sm:$0xff] }
 0x345   : > { %2573 = vmatmul.f32.gmra.mxu2 %v2458_v52  ;;  %2830 = vmatmul.f32.gmra.mxu0 %v2727_v19  ;;  %v2408_v6 = vld [vmem:[#allocation2 + $0x110] sm:$0xff] }
 0x346   : > { %v2972_v21 = vmin.f32 %v2908_v16, 0.0  ;;  %vm2940_vm8 = vcmp.gt.f32.partialorder %v2908_v16, 0.0 }
 0x347   : > { %v2621_v33 = vpop.f32.mrf.mxu3 }
 0x348   : > { %v6070_v24 = vpop.eup %6069  ;;  %v2622_v25 = vadd.f32 %v2621_v33, %v7180_v31  ;;  %v3006_v27 = vmul.f32 1.442695, %v2972_v21  ;;  %v3378_v31 = vld [vmem:[#allocation8 + $0xb0] sm:$0xff]  ;;  %v7219_v48 = vpop.f32.mrf.mxu2 }
 0x349   : > { %v5731_v11 = vadd.f32 -1.0, %v6070_v24  ;;  %3397 = vmatpush.msra.mxu1 %v3378_v31 }
 0x34a   : > { %v2786_v38 = vpop.f32.mrf.mxu0  ;;  %v2873_v29 = vadd.f32 %v2783_v10, %v2622_v25  ;;  %6071 = vpow2.f32 %v3006_v27 }
 0x34b   : > { %v3099_v23 = vsel %vm2939_vm7, %v2907_v46, %v5731_v11  ;;  %v2730_v46 = vld [vmem:[#allocation2 + $0x10a] sm:$0xff]  ;;  %3398 = vmatpush.msra.mxu1 %v3377_v61  ;;  %v2409_v11 = vld [vmem:[#allocation2 + $0x120] sm:$0xff] }
 0x34c   : > { %v2909_v28 = vadd.f32 %v7198_v53, %v2873_v29  ;;  %3164 = vrot.lane.b32.xlu2 %v3099_v23, %s6477_s22  ;;  %2671 = vmatmul.f32.gmra.mxu3 %v2405_v30  ;;  %v2732_v29 = vld [vmem:[#allocation2 + $0x122] sm:$0xff] }
 0x34d   : > { %2833 = vmatmul.f32.gmra.mxu0 %v2728_v42  ;;  %v3327_v30 = vld [vmem:[#allocation8 + $0x20] sm:$0xff] }
 0x34e   : > { %v2973_v13 = vmin.f32 %v2909_v28, 0.0  ;;  %vm2941_vm9 = vcmp.gt.f32.partialorder %v2909_v28, 0.0  ;;  %v3376_v42 = vld [vmem:[#allocation8 + $0xa0] sm:$0xff]  ;;  %3512 = vmatpush.msra.mxu2 %v3327_v30 }
 0x34f   : > { %v2624_v34 = vpop.f32.mrf.mxu3  ;;  %3399 = vmatpush.msra.mxu1 %v3376_v42 }
 0x350   : > { %v6072_v35 = vpop.eup %6071  ;;  %v2625_v39 = vadd.f32 %v2624_v34, %v7184_v0  ;;  %v3008_v58 = vmul.f32 1.442695, %v2973_v13 }
 0x351   : > { %v5732_v40 = vadd.f32 -1.0, %v6072_v35  ;;  %3400 = vmatpush.msra.mxu1 %v3375_v7 }
 0x352   : > { %v2789_v63 = vpop.f32.mrf.mxu0  ;;  %v2874_v9 = vadd.f32 %v2786_v38, %v2625_v39  ;;  %6073 = vpow2.f32 %v3008_v58 }
 0x353   : > { %v3100_v41 = vsel %vm2940_vm8, %v2908_v16, %v5732_v40 }
 0x354   : > { %v2910_v49 = vadd.f32 %v7198_v53, %v2874_v9  ;;  %3166 = vrot.lane.b32.xlu0 %v3100_v41, %s6477_s22  ;;  %2674 = vmatmul.f32.gmra.mxu3 %v2406_v44  ;;  %v2410_v9 = vld [vmem:[#allocation2 + $0x128] sm:$0xff] }
 0x355   : > { %2836 = vmatmul.f32.gmra.mxu0 %v2729_v45  ;;  %v2733_v44 = vld [vmem:[#allocation2 + $0x12a] sm:$0xff] }
 0x356   : > { %v2974_v50 = vmin.f32 %v2910_v49, 0.0  ;;  %vm2942_vm0 = vcmp.gt.f32.partialorder %v2910_v49, 0.0 }
 0x357   : > { %v2627_v51 = vpop.f32.mrf.mxu3 }
 0x358   : > { %v6074_v0 = vpop.eup %6073  ;;  %v2628_v36 = vadd.f32 %v2627_v51, %v7189_v20  ;;  %v3010_v54 = vmul.f32 1.442695, %v2974_v50  ;;  %v7226_v20 = vpop.f32.mrf.mxu2 }
 0x359   : > { %v5733_v32 = vadd.f32 -1.0, %v6074_v0 }
 0x35a   : > { %v2792_v37 = vpop.f32.mrf.mxu0  ;;  %v2875_v55 = vadd.f32 %v2789_v63, %v2628_v36  ;;  %6075 = vpow2.f32 %v3010_v54 }
 0x35b   : > { %v3101_v56 = vsel %vm2941_vm9, %v2909_v28, %v5733_v32  ;;  %v3651_v28 = vld [vmem:[#allocation8 + $0x120] sm:$0xff] }
 0x35c   : > { %v2911_v59 = vadd.f32 %v7198_v53, %v2875_v55  ;;  %3168 = vrot.lane.b32.xlu1 %v3101_v56, %s6477_s22  ;;  %2677 = vmatmul.f32.gmra.mxu3 %v2407_v57 }
 0x35d   : > { %2839 = vmatmul.f32.gmra.mxu0 %v2730_v46  ;;  %3674 = vmatpush.msrb.mxu3 %v3651_v28  ;;  %v3326_v46 = vld [vmem:[#allocation8 + $0x18] sm:$0xff] }
 0x35e   : > { %v2975_v60 = vmin.f32 %v2911_v59, 0.0  ;;  %vm2943_vm10 = vcmp.gt.f32.partialorder %v2911_v59, 0.0  ;;  %3513 = vmatpush.msra.mxu2 %v3326_v46 }
 0x35f   : > { %v2630_v14 = vpop.f32.mrf.mxu3  ;;  %3675 = vmatpush.msrb.mxu3 %v3650_v26 }
 0x360   : > { %v2311_v2 = vpop.permute.xlu2 %2310  ;;  %v6076_v62 = vpop.eup %6075  ;;  %v2631_v3 = vadd.f32 %v2630_v14, %v7202_v18  ;;  %v3012_v5 = vmul.f32 1.442695, %v2975_v60 }
 0x361   : > { %2380 = vst.msk [vmem:[#allocation2 + $0x141] sm:$0xff] %vm2352_vm15, %v2311_v2  ;;  %v5734_v1 = vadd.f32 -1.0, %v6076_v62  ;;  %v7232_v21 = vpop.f32.mrf.mxu2 }
 0x362   : > { %v2795_v43 = vpop.f32.mrf.mxu0  ;;  %v2876_v10 = vadd.f32 %v2792_v37, %v2631_v3  ;;  %6077 = vpow2.f32 %v3012_v5 }
 0x363   : > { %v3102_v12 = vsel %vm2942_vm0, %v2910_v49, %v5734_v1 }
 0x364   : > { %v2912_v47 = vadd.f32 %v7198_v53, %v2876_v10  ;;  %3170 = vrot.lane.b32.xlu2 %v3102_v12, %s6477_s22  ;;  %2680 = vmatmul.f32.gmra.mxu3 %v2408_v6 }
 0x365   : > { %2842 = vmatmul.f32.gmra.mxu0 %v2731_v15 }
 0x366   : > { %v2976_v16 = vmin.f32 %v2912_v47, 0.0  ;;  %vm2944_vm11 = vcmp.gt.f32.partialorder %v2912_v47, 0.0 }
 0x367   : > { %v2633_v52 = vpop.f32.mrf.mxu3 }
 0x368   : > { %v6078_v19 = vpop.eup %6077  ;;  %v2634_v18 = vadd.f32 %v2633_v52, %v7208_v8  ;;  %v3014_v33 = vmul.f32 1.442695, %v2976_v16  ;;  %v2460_v61 = vld [vmem:[#allocation2 + $0x141] sm:$0xff] }
 0x369   : > { %v5735_v25 = vadd.f32 -1.0, %v6078_v19  ;;  %v7239_v58 = vpop.f32.mrf.mxu2  ;;  %v2735_v6 = vld [vmem:[#allocation2 + $0x142] sm:$0xff] }
 0x36a   : > { %v2798_v24 = vpop.f32.mrf.mxu0  ;;  %v2877_v27 = vadd.f32 %v2795_v43, %v2634_v18  ;;  %6079 = vpow2.f32 %v3014_v33 }
 0x36b   : > { %v3103_v38 = vsel %vm2943_vm10, %v2911_v59, %v5735_v25 }
 0x36c   : > { %v2913_v23 = vadd.f32 %v7198_v53, %v2877_v27  ;;  %3172 = vrot.lane.b32.xlu0 %v3103_v38, %s6477_s22  ;;  %2683 = vmatmul.f32.gmra.mxu3 %v2409_v11  ;;  %v3325_v38 = vld [vmem:[#allocation8 + $0x10] sm:$0xff] }
 0x36d   : > { %2845 = vmatmul.f32.gmra.mxu0 %v2732_v29  ;;  %v3649_v11 = vld [vmem:[#allocation8 + $0x110] sm:$0xff]  ;;  %3514 = vmatpush.msra.mxu2 %v3325_v38 }
 0x36e   : > { %v2977_v8 = vmin.f32 %v2913_v23, 0.0  ;;  %vm2945_vm12 = vcmp.gt.f32.partialorder %v2913_v23, 0.0  ;;  %v3374_v29 = vld [vmem:[#allocation8 + $0x90] sm:$0xff]  ;;  %3676 = vmatpush.msrb.mxu3 %v3649_v11 }
 0x36f   : > { %v2636_v17 = vpop.f32.mrf.mxu3  ;;  %3401 = vmatpush.msra.mxu1 %v3374_v29 }
 0x370   : > { %v2309_v4 = vpop.permute.xlu1 %2308  ;;  %v6080_v31 = vpop.eup %6079  ;;  %v2637_v13 = vadd.f32 %v2636_v17, %v7214_v22  ;;  %v3016_v34 = vmul.f32 1.442695, %v2977_v8 }
 0x371   : > { %2379 = vst.msk [vmem:[#allocation2 + $0x139] sm:$0xff] %vm2352_vm15, %v2309_v4  ;;  %v5736_v39 = vadd.f32 -1.0, %v6080_v31  ;;  %v7244_v57 = vpop.f32.mrf.mxu2 }
 0x372   : > { %v2801_v35 = vpop.f32.mrf.mxu0  ;;  %v2878_v63 = vadd.f32 %v2798_v24, %v2637_v13  ;;  %6081 = vpow2.f32 %v3016_v34 }
 0x373   : > { %v3104_v40 = vsel %vm2944_vm11, %v2912_v47, %v5736_v39 }
 0x374   : > { %v2914_v41 = vadd.f32 %v7198_v53, %v2878_v63  ;;  %3174 = vrot.lane.b32.xlu1 %v3104_v40, %s6477_s22  ;;  %2686 = vmatmul.f32.gmra.mxu3 %v2410_v9 }
 0x375   : > { %2848 = vmatmul.f32.gmra.mxu0 %v2733_v44 }
 0x376   : > { %v2978_v49 = vmin.f32 %v2914_v41, 0.0  ;;  %vm2946_vm13 = vcmp.gt.f32.partialorder %v2914_v41, 0.0 }
 0x377   : > { %v2639_v22 = vpop.f32.mrf.mxu3 }
 0x378   : > { %v2459_v45 = vld [vmem:[#allocation2 + $0x139] sm:$0xff]  ;;  %v6082_v50 = vpop.eup %6081  ;;  %v2640_v51 = vadd.f32 %v2639_v22, %v7219_v48  ;;  %v3018_v0 = vmul.f32 1.442695, %v2978_v49 }
 0x379   : > { %2576 = vmatmul.f32.gmra.mxu2 %v2459_v45  ;;  %v5737_v54 = vadd.f32 -1.0, %v6082_v50  ;;  %v2411_v55 = vld [vmem:[#allocation2 + $0x138] sm:$0xff]  ;;  %v2412_v10 = vld [vmem:[#allocation2 + $0x140] sm:$0xff]  ;;  %v7251_v47 = vpop.f32.mrf.mxu2 }
 0x37a   : > { %v2804_v36 = vpop.f32.mrf.mxu0  ;;  %v2879_v37 = vadd.f32 %v2801_v35, %v2640_v51  ;;  %6083 = vpow2.f32 %v3018_v0  ;;  %v2734_v56 = vld [vmem:[#allocation2 + $0x13a] sm:$0xff]  ;;  %v3324_v0 = vld [vmem:[#allocation8 + $0x8] sm:$0xff] }
 0x37b   : > { %v3105_v32 = vsel %vm2945_vm12, %v2913_v23, %v5737_v54  ;;  %v3373_v54 = vld [vmem:[#allocation8 + $0x88] sm:$0xff]  ;;  %3515 = vmatpush.msra.mxu2 %v3324_v0 }
 0x37c   : > { %v2915_v59 = vadd.f32 %v7198_v53, %v2879_v37  ;;  %3176 = vrot.lane.b32.xlu2 %v3105_v32, %s6477_s22  ;;  %2689 = vmatmul.f32.gmra.mxu3 %v2411_v55  ;;  %v3323_v37 = vld [vmem:[#allocation8] sm:$0xff] }
 0x37d   : > { %2851 = vmatmul.f32.gmra.mxu0 %v2734_v56  ;;  %v3647_v32 = vld [vmem:[#allocation8 + $0x100] sm:$0xff]  ;;  %3402 = vmatpush.msra.mxu1 %v3373_v54 }
 0x37e   : > { %v2979_v48 = vmin.f32 %v2915_v59, 0.0  ;;  %vm2947_vm14 = vcmp.gt.f32.partialorder %v2915_v59, 0.0  ;;  %v3372_v56 = vld [vmem:[#allocation8 + $0x80] sm:$0xff]  ;;  %3516 = vmatpush.msra.mxu2 %v3323_v37 }
 0x37f   : > { %v2642_v60 = vpop.f32.mrf.mxu3  ;;  %3403 = vmatpush.msra.mxu1 %v3372_v56 }
 0x380   : > { %v6084_v2 = vpop.eup %6083  ;;  %v2643_v14 = vadd.f32 %v2642_v60, %v7226_v20  ;;  %v3020_v62 = vmul.f32 1.442695, %v2979_v48 }
 0x381   : > { %2579 = vmatmul.f32.gmra.mxu2 %v2460_v61  ;;  %v5738_v5 = vadd.f32 -1.0, %v6084_v2  ;;  %v7256_v42 = vpop.f32.mrf.mxu2 }
 0x382   : > { %v2807_v3 = vpop.f32.mrf.mxu0  ;;  %v2880_v43 = vadd.f32 %v2804_v36, %v2643_v14  ;;  %6085 = vpow2.f32 %v3020_v62  ;;  %v3648_v36 = vld [vmem:[#allocation8 + $0x108] sm:$0xff] }
 0x383   : > { %v3106_v1 = vsel %vm2946_vm13, %v2914_v41, %v5738_v5  ;;  %3677 = vmatpush.msrb.mxu3 %v3648_v36 }
 0x384   : > { %v2916_v12 = vadd.f32 %v7198_v53, %v2880_v43  ;;  %3178 = vrot.lane.b32.xlu0 %v3106_v1, %s6477_s22  ;;  %2692 = vmatmul.f32.gmra.mxu3 %v2412_v10 }
 0x385   : > { %2854 = vmatmul.f32.gmra.mxu0 %v2735_v6  ;;  %3678 = vmatpush.msrb.mxu3 %v3647_v32 }
 0x386   : > { %v2980_v15 = vmin.f32 %v2916_v12, 0.0  ;;  %vm2948_vm1 = vcmp.gt.f32.partialorder %v2916_v12, 0.0 }
 0x387   : > { %v2645_v16 = vpop.f32.mrf.mxu3 }
 0x388   : > { %v6086_v20 = vpop.eup %6085  ;;  %v2646_v52 = vadd.f32 %v2645_v16, %v7232_v21  ;;  %v3022_v19 = vmul.f32 1.442695, %v2980_v15 }
 0x389   : > { %v5739_v33 = vadd.f32 -1.0, %v6086_v20  ;;  %v7264_v45 = vpop.f32.mrf.mxu2 }
 0x38a   : > { %v2810_v18 = vpop.f32.mrf.mxu0  ;;  %v2881_v24 = vadd.f32 %v2807_v3, %v2646_v52  ;;  %6087 = vpow2.f32 %v3022_v19 }
 0x38b   : > { %v3107_v25 = vsel %vm2947_vm14, %v2915_v59, %v5739_v33 }
 0x38c   : > { %v2917_v27 = vadd.f32 %v7198_v53, %v2881_v24  ;;  %3180 = vrot.lane.b32.xlu1 %v3107_v25, %s6477_s22 }
 0x38e   : > { %v2981_v23 = vmin.f32 %v2917_v27, 0.0  ;;  %vm2949_vm2 = vcmp.gt.f32.partialorder %v2917_v27, 0.0 }
 0x38f   : > { %v2648_v21 = vpop.f32.mrf.mxu3 }
 0x390   : > { %v2317_v30 = vpop.permute.xlu2 %2316  ;;  %v6088_v28 = vpop.eup %6087  ;;  %v2649_v8 = vadd.f32 %v2648_v21, %v7239_v58  ;;  %v3024_v4 = vmul.f32 1.442695, %v2981_v23 }
 0x391   : > { %2383 = vst.msk [vmem:[#allocation2 + $0x169] sm:$0xff] %vm2352_vm15, %v2317_v30  ;;  %v5740_v31 = vadd.f32 -1.0, %v6088_v28  ;;  %v2550_v3 = vpop.f32.mrf.mxu2 }
 0x392   : > { %v2813_v17 = vpop.f32.mrf.mxu0  ;;  %v2882_v13 = vadd.f32 %v2810_v18, %v2649_v8  ;;  %6089 = vpow2.f32 %v3024_v4 }
 0x393   : > { %v3108_v34 = vsel %vm2948_vm1, %v2916_v12, %v5740_v31 }
 0x394   : > { %v2918_v35 = vadd.f32 %v7198_v53, %v2882_v13  ;;  %3182 = vrot.lane.b32.xlu2 %v3108_v34, %s6477_s22 }
 0x396   : > { %v2982_v39 = vmin.f32 %v2918_v35, 0.0  ;;  %vm2950_vm3 = vcmp.gt.f32.partialorder %v2918_v35, 0.0 }
 0x397   : > { %v2651_v40 = vpop.f32.mrf.mxu3 }
 0x398   : > { %v2313_v63 = vpop.permute.xlu0 %2312  ;;  %v6090_v9 = vpop.eup %6089  ;;  %v2652_v41 = vadd.f32 %v2651_v40, %v7244_v57  ;;  %v3026_v58 = vmul.f32 1.442695, %v2982_v39  ;;  %v2463_v11 = vld [vmem:[#allocation2 + $0x169] sm:$0xff] }
 0x399   : > { %2381 = vst.msk [vmem:[#allocation2 + $0x151] sm:$0xff] %vm2352_vm15, %v2313_v63  ;;  %v5741_v49 = vadd.f32 -1.0, %v6090_v9  ;;  %v2553_v25 = vpop.f32.mrf.mxu2  ;;  %v2415_v23 = vld [vmem:[#allocation2 + $0x168] sm:$0xff] }
 0x39a   : > { %v2816_v44 = vpop.f32.mrf.mxu0  ;;  %v2883_v22 = vadd.f32 %v2813_v17, %v2652_v41  ;;  %6091 = vpow2.f32 %v3026_v58 }
 0x39b   : > { %v3109_v50 = vsel %vm2949_vm2, %v2917_v27, %v5741_v49 }
 0x39c   : > { %v2919_v51 = vadd.f32 %v7198_v53, %v2883_v22  ;;  %3184 = vrot.lane.b32.xlu0 %v3109_v50, %s6477_s22 }
 0x39e   : > { %v2983_v55 = vmin.f32 %v2919_v51, 0.0  ;;  %vm2951_vm5 = vcmp.gt.f32.partialorder %v2919_v51, 0.0 }
 0x39f   : > { %v2654_v46 = vpop.f32.mrf.mxu3 }
 0x3a0   : > { %v2315_v57 = vpop.permute.xlu1 %2314  ;;  %v2461_v59 = vld [vmem:[#allocation2 + $0x151] sm:$0xff]  ;;  %v6092_v7 = vpop.eup %6091  ;;  %v2655_v48 = vadd.f32 %v2654_v46, %v7251_v47  ;;  %v3028_v61 = vmul.f32 1.442695, %v2983_v55 }
 0x3a1   : > { %v2413_v26 = vld [vmem:[#allocation2 + $0x150] sm:$0xff]  ;;  %2382 = vst.msk [vmem:[#allocation2 + $0x159] sm:$0xff] %vm2352_vm15, %v2315_v57  ;;  %2582 = vmatmul.f32.gmra.mxu2 %v2461_v59  ;;  %v5742_v2 = vadd.f32 -1.0, %v6092_v7  ;;  %v2556_v49 = vpop.f32.mrf.mxu2 }
 0x3a2   : > { %2695 = vmatmul.f32.gmra.mxu3 %v2413_v26  ;;  %v2819_v60 = vpop.f32.mrf.mxu0  ;;  %v2884_v14 = vadd.f32 %v2816_v44, %v2655_v48  ;;  %6093 = vpow2.f32 %v3028_v61 }
 0x3a3   : > { %v3110_v62 = vsel %vm2950_vm3, %v2918_v35, %v5742_v2 }
 0x3a4   : > { %v2920_v5 = vadd.f32 %v7198_v53, %v2884_v14  ;;  %3186 = vrot.lane.b32.xlu1 %v3110_v62, %s6477_s22 }
 0x3a6   : > { %v3165_v43 = vpop.permute.xlu2 %3164  ;;  %v2984_v1 = vmin.f32 %v2920_v5, 0.0  ;;  %vm2952_vm6 = vcmp.gt.f32.partialorder %v2920_v5, 0.0 }
 0x3a7   : > { %v2657_v12 = vpop.f32.mrf.mxu3  ;;  %3260 = vst.msk [vmem:[#allocation2 + $0x9] sm:$0xff] %vm3258_vm4, %v3165_v43 }
 0x3a8   : > { %v2462_v10 = vld [vmem:[#allocation2 + $0x159] sm:$0xff]  ;;  %v6094_v15 = vpop.eup %6093  ;;  %v2658_v16 = vadd.f32 %v2657_v12, %v7256_v42  ;;  %v3030_v20 = vmul.f32 1.442695, %v2984_v1 }
 0x3a9   : > { %v2414_v6 = vld [vmem:[#allocation2 + $0x158] sm:$0xff]  ;;  %2585 = vmatmul.f32.gmra.mxu2 %v2462_v10  ;;  %v5743_v19 = vadd.f32 -1.0, %v6094_v15 }
 0x3aa   : > { %v2736_v47 = vld [vmem:[#allocation2 + $0x152] sm:$0xff]  ;;  %2698 = vmatmul.f32.gmra.mxu3 %v2414_v6  ;;  %v2822_v52 = vpop.f32.mrf.mxu0  ;;  %v2885_v18 = vadd.f32 %v2819_v60, %v2658_v16  ;;  %6095 = vpow2.f32 %v3030_v20  ;;  %v2737_v28 = vld [vmem:[#allocation2 + $0x15a] sm:$0xff]  ;;  %v2559_v60 = vpop.f32.mrf.mxu2 }
 0x3ab   : > { %2857 = vmatmul.f32.gmra.mxu0 %v2736_v47  ;;  %v3111_v33 = vsel %vm2951_vm5, %v2919_v51, %v5743_v19 }
 0x3ac   : > { %v2921_v24 = vadd.f32 %v7198_v53, %v2885_v18  ;;  %3188 = vrot.lane.b32.xlu2 %v3111_v33, %s6477_s22 }
 0x3ae   : > { %v2985_v27 = vmin.f32 %v2921_v24, 0.0  ;;  %v3615_v10 = vld [vmem:[#allocation2 + $0xa] sm:$0xff] }
 0x3af   : > { %v2660_v29 = vpop.f32.mrf.mxu3 }
 0x3b0   : > { %v2319_v38 = vpop.permute.xlu0 %2318  ;;  %v6096_v30 = vpop.eup %6095  ;;  %v2661_v21 = vadd.f32 %v2660_v29, %v7264_v45  ;;  %v3032_v42 = vmul.f32 1.442695, %v2985_v27 }
 0x3b1   : > { %2384 = vst.msk [vmem:[#allocation2 + $0x171] sm:$0xff] %vm2352_vm15, %v2319_v38  ;;  %2588 = vmatmul.f32.gmra.mxu2 %v2463_v11  ;;  %v5744_v4 = vadd.f32 -1.0, %v6096_v30  ;;  %vm2953_vm15 = vcmp.gt.f32.partialorder %v2921_v24, 0.0 }
 0x3b2   : > { %2701 = vmatmul.f32.gmra.mxu3 %v2415_v23  ;;  %v2825_v8 = vpop.f32.mrf.mxu0  ;;  %v2886_v17 = vadd.f32 %v2822_v52, %v2661_v21  ;;  %6097 = vpow2.f32 %v3032_v42  ;;  %v2562_v18 = vpop.f32.mrf.mxu2 }
 0x3b3   : > { %2860 = vmatmul.f32.gmra.mxu0 %v2737_v28  ;;  %v3112_v31 = vsel %vm2952_vm6, %v2920_v5, %v5744_v4  ;;  %v5825_v4 = vld [vmem:[%s8068_s9 + $0x178] sm:$0xff] }
 0x3b4   : > { %v2922_v13 = vadd.f32 %v7198_v53, %v2886_v17  ;;  %3190 = vrot.lane.b32.xlu0 %v3112_v31, %s6477_s22  ;;  %4569 = vmatpush.msrb.mxu2 %v5825_v4 }
 0x3b6   : > { %v3163_v34 = vpop.permute.xlu1 %3162  ;;  %v2986_v35 = vmin.f32 %v2922_v13, 0.0  ;;  %vm2954_vm7 = vcmp.gt.f32.partialorder %v2922_v13, 0.0 }
 0x3b7   : > { %v2663_v63 = vpop.f32.mrf.mxu3  ;;  %3259 = vst.msk [vmem:[#allocation2 + $0x1] sm:$0xff] %vm3258_vm4, %v3163_v34 }
 0x3b8   : > { %v2464_v39 = vld [vmem:[#allocation2 + $0x171] sm:$0xff]  ;;  %v6098_v41 = vpop.eup %6097  ;;  %v2664_v58 = vadd.f32 %v2663_v63, %v2550_v3  ;;  %v3034_v44 = vmul.f32 1.442695, %v2986_v35  ;;  %v3340_v3 = vld [vmem:[#allocation2 + $0x9] sm:$0xff] }
 0x3b9   : > { %v2416_v40 = vld [vmem:[#allocation2 + $0x170] sm:$0xff]  ;;  %2591 = vmatmul.f32.gmra.mxu2 %v2464_v39  ;;  %v5745_v22 = vadd.f32 -1.0, %v6098_v41 }
 0x3ba   : > { %v2738_v9 = vld [vmem:[#allocation2 + $0x16a] sm:$0xff]  ;;  %2704 = vmatmul.f32.gmra.mxu3 %v2416_v40  ;;  %v2828_v45 = vpop.f32.mrf.mxu0  ;;  %v2887_v50 = vadd.f32 %v2825_v8, %v2664_v58  ;;  %6099 = vpow2.f32 %v3034_v44  ;;  %v2739_v46 = vld [vmem:[#allocation2 + $0x172] sm:$0xff]  ;;  %v2565_v39 = vpop.f32.mrf.mxu2 }
 0x3bb   : > { %2863 = vmatmul.f32.gmra.mxu0 %v2738_v9  ;;  %v3113_v51 = vsel %vm2953_vm15, %v2921_v24, %v5745_v22 }
 0x3bc   : > { %v2923_v0 = vadd.f32 %v7198_v53, %v2887_v50  ;;  %3192 = vrot.lane.b32.xlu1 %v3113_v51, %s6477_s22  ;;  %v5809_v50 = vld [vmem:[%s8068_s9 + $0xf8] sm:$0xff] }
 0x3bd   : > { %v4244_v51 = vld [vmem:[%s8068_s9 + $0x78] sm:$0xff]  ;;  %4294 = vmatpush.msrb.mxu0 %v5809_v50 }
 0x3be   : > { %v3171_v36 = vpop.permute.xlu2 %3170  ;;  %v3339_v54 = vld [vmem:[#allocation2 + $0x1] sm:$0xff]  ;;  %v2987_v55 = vmin.f32 %v2923_v0, 0.0  ;;  %vm2955_vm8 = vcmp.gt.f32.partialorder %v2923_v0, 0.0  ;;  %4407 = vmatpush.msrb.mxu1 %v4244_v51 }
 0x3bf   : > { %v3291_v37 = vld [vmem:[#allocation2] sm:$0xff]  ;;  %v2666_v56 = vpop.f32.mrf.mxu3  ;;  %3404 = vmatmul.f32.vlgmr.msra.gmra.mxu1 %v3339_v54  ;;  %3263 = vst.msk [vmem:[#allocation2 + $0x31] sm:$0xff] %vm3258_vm4, %v3171_v36  ;;  %v3292_v1 = vld [vmem:[#allocation2 + $0x8] sm:$0xff] }
 0x3c0   : > { %v3614_v32 = vld [vmem:[#allocation2 + $0x2] sm:$0xff]  ;;  %v6100_v57 = vpop.eup %6099  ;;  %v2667_v59 = vadd.f32 %v2666_v56, %v2553_v25  ;;  %v3036_v26 = vmul.f32 1.442695, %v2987_v55 }
 0x3c1   : > { %3517 = vmatmul.f32.vlgmr.msra.gmra.mxu2 %v3291_v37  ;;  %v5746_v7 = vadd.f32 -1.0, %v6100_v57 }
 0x3c2   : > { %3679 = vmatmul.f32.vlgmr.msrb.gmra.mxu3 %v3614_v32  ;;  %v2888_v48 = vadd.f32 %v2828_v45, %v2667_v59  ;;  %v2831_v61 = vpop.f32.mrf.mxu0  ;;  %6101 = vpow2.f32 %v3036_v26 }
 0x3c3   : > { %2866 = vmatmul.f32.gmra.mxu0 %v2739_v46  ;;  %v3114_v2 = vsel %vm2954_vm7, %v2922_v13, %v5746_v7  ;;  %v2568_v46 = vpop.f32.mrf.mxu2 }
 0x3c4   : > { %v2924_v14 = vadd.f32 %v7198_v53, %v2888_v48  ;;  %3194 = vrot.lane.b32.xlu2 %v3114_v2, %s6477_s22  ;;  %v5824_v2 = vld [vmem:[%s8068_s9 + $0x170] sm:$0xff] }
 0x3c5   : > { %4570 = vmatpush.msrb.mxu2 %v5824_v2 }
 0x3c6   : > { %v3167_v62 = vpop.permute.xlu0 %3166  ;;  %v2988_v5 = vmin.f32 %v2924_v14, 0.0  ;;  %vm2956_vm9 = vcmp.gt.f32.partialorder %v2924_v14, 0.0  ;;  %v3343_v36 = vld [vmem:[#allocation2 + $0x31] sm:$0xff] }
 0x3c7   : > { %3261 = vst.msk [vmem:[#allocation2 + $0x19] sm:$0xff] %vm3258_vm4, %v3167_v62  ;;  %v2669_v43 = vpop.f32.mrf.mxu3  ;;  %3407 = vmatmul.f32.gmra.mxu1 %v3340_v3  ;;  %v3295_v55 = vld [vmem:[#allocation2 + $0x30] sm:$0xff] }
 0x3c8   : > { %v6102_v12 = vpop.eup %6101  ;;  %v2670_v6 = vadd.f32 %v2669_v43, %v2556_v49  ;;  %v3038_v47 = vmul.f32 1.442695, %v2988_v5 }
 0x3c9   : > { %3520 = vmatmul.f32.gmra.mxu2 %v3292_v1  ;;  %v5747_v15 = vadd.f32 -1.0, %v6102_v12 }
 0x3ca   : > { %3682 = vmatmul.f32.gmra.mxu3 %v3615_v10  ;;  %v2889_v16 = vadd.f32 %v2831_v61, %v2670_v6  ;;  %v2834_v20 = vpop.f32.mrf.mxu0  ;;  %6103 = vpow2.f32 %v3038_v47 }
 0x3cb   : > { %v3115_v52 = vsel %vm2955_vm8, %v2923_v0, %v5747_v15  ;;  %v2571_v15 = vpop.f32.mrf.mxu2 }
 0x3cc   : > { %v2925_v19 = vadd.f32 %v7198_v53, %v2889_v16  ;;  %3196 = vrot.lane.b32.xlu0 %v3115_v52, %s6477_s22  ;;  %v7314_v52 = vld [vmem:[%s8065_s6] ss:$0 sm:$0xff] }
 0x3ce   : > { %v3169_v33 = vpop.permute.xlu1 %3168  ;;  %v3341_v24 = vld [vmem:[#allocation2 + $0x19] sm:$0xff]  ;;  %v2989_v27 = vmin.f32 %v2925_v19, 0.0  ;;  %vm2957_vm0 = vcmp.gt.f32.partialorder %v2925_v19, 0.0 }
 0x3cf   : > { %v3293_v25 = vld [vmem:[#allocation2 + $0x18] sm:$0xff]  ;;  %3262 = vst.msk [vmem:[#allocation2 + $0x21] sm:$0xff] %vm3258_vm4, %v3169_v33  ;;  %v2672_v38 = vpop.f32.mrf.mxu3  ;;  %3410 = vmatmul.f32.gmra.mxu1 %v3341_v24  ;;  %v4243_v33 = vld [vmem:[%s8068_s9 + $0x70] sm:$0xff] }
 0x3d0   : > { %v6104_v11 = vpop.eup %6103  ;;  %v2673_v29 = vadd.f32 %v2672_v38, %v2559_v60  ;;  %v3040_v23 = vmul.f32 1.442695, %v2989_v27  ;;  %4408 = vmatpush.msrb.mxu1 %v4243_v33  ;;  %v4241_v33 = vld [vmem:[%s8068_s9 + $0x60] sm:$0xff] }
 0x3d1   : > { %3523 = vmatmul.f32.gmra.mxu2 %v3293_v25  ;;  %v5748_v30 = vadd.f32 -1.0, %v6104_v11 }
 0x3d2   : > { %v2890_v21 = vadd.f32 %v2834_v20, %v2673_v29  ;;  %v2837_v28 = vpop.f32.mrf.mxu0  ;;  %6105 = vpow2.f32 %v3040_v23 }
 0x3d3   : > { %v3116_v42 = vsel %vm2956_vm9, %v2924_v14, %v5748_v30 }
 0x3d4   : > { %v2926_v8 = vadd.f32 %v7198_v53, %v2890_v21  ;;  %3198 = vrot.lane.b32.xlu1 %v3116_v42, %s6477_s22 }
 0x3d6   : > { %v3177_v17 = vpop.permute.xlu2 %3176  ;;  %v3342_v31 = vld [vmem:[#allocation2 + $0x21] sm:$0xff]  ;;  %v2990_v35 = vmin.f32 %v2926_v8, 0.0  ;;  %vm2958_vm10 = vcmp.gt.f32.partialorder %v2926_v8, 0.0 }
 0x3d7   : > { %v3294_v13 = vld [vmem:[#allocation2 + $0x20] sm:$0xff]  ;;  %3266 = vst.msk [vmem:[#allocation2 + $0x51] sm:$0xff] %vm3258_vm4, %v3177_v17  ;;  %v2675_v63 = vpop.f32.mrf.mxu3  ;;  %3413 = vmatmul.f32.gmra.mxu1 %v3342_v31  ;;  %v2574_v31 = vpop.f32.mrf.mxu2 }
 0x3d8   : > { %v3616_v34 = vld [vmem:[#allocation2 + $0x1a] sm:$0xff]  ;;  %v6106_v40 = vpop.eup %6105  ;;  %v2676_v9 = vadd.f32 %v2675_v63, %v2562_v18  ;;  %v3042_v41 = vmul.f32 1.442695, %v2990_v35  ;;  %v3617_v54 = vld [vmem:[#allocation2 + $0x22] sm:$0xff]  ;;  %v5808_v18 = vld [vmem:[%s8068_s9 + $0xf0] sm:$0xff] }
 0x3d9   : > { %3685 = vmatmul.f32.gmra.mxu3 %v3616_v34  ;;  %3526 = vmatmul.f32.gmra.mxu2 %v3294_v13  ;;  %v5749_v58 = vadd.f32 -1.0, %v6106_v40 }
 0x3da   : > { %v2891_v44 = vadd.f32 %v2837_v28, %v2676_v9  ;;  %v2840_v49 = vpop.f32.mrf.mxu0  ;;  %6107 = vpow2.f32 %v3042_v41  ;;  %4295 = vmatpush.msrb.mxu0 %v5808_v18  ;;  %v5823_v28 = vld [vmem:[%s8068_s9 + $0x168] sm:$0xff]  ;;  %v5806_v18 = vld [vmem:[%s8068_s9 + $0xe0] sm:$0xff] }
 0x3db   : > { %v3117_v45 = vsel %vm2957_vm0, %v2925_v19, %v5749_v58  ;;  %4571 = vmatpush.msrb.mxu2 %v5823_v28 }
 0x3dc   : > { %v2927_v22 = vadd.f32 %v7198_v53, %v2891_v44  ;;  %3200 = vrot.lane.b32.xlu2 %v3117_v45, %s6477_s22  ;;  %v4242_v45 = vld [vmem:[%s8068_s9 + $0x68] sm:$0xff] }
 0x3dd   : > { %4409 = vmatpush.msrb.mxu1 %v4242_v45 }
 0x3de   : > { %v3173_v0 = vpop.permute.xlu0 %3172  ;;  %v2991_v37 = vmin.f32 %v2927_v22, 0.0  ;;  %vm2959_vm11 = vcmp.gt.f32.partialorder %v2927_v22, 0.0  ;;  %v3346_v35 = vld [vmem:[#allocation2 + $0x51] sm:$0xff] }
 0x3df   : > { %3264 = vst.msk [vmem:[#allocation2 + $0x39] sm:$0xff] %vm3258_vm4, %v3173_v0  ;;  %v2678_v32 = vpop.f32.mrf.mxu3  ;;  %3416 = vmatmul.f32.gmra.mxu1 %v3343_v36 }
 0x3e0   : > { %v6108_v56 = vpop.eup %6107  ;;  %v2679_v57 = vadd.f32 %v2678_v32, %v2565_v39  ;;  %v3044_v59 = vmul.f32 1.442695, %v2991_v37  ;;  %4410 = vmatpush.msrb.mxu1 %v4241_v33 }
 0x3e1   : > { %3688 = vmatmul.f32.gmra.mxu3 %v3617_v54  ;;  %3529 = vmatmul.f32.gmra.mxu2 %v3295_v55  ;;  %v5750_v26 = vadd.f32 -1.0, %v6108_v56  ;;  %v3621_v55 = vld [vmem:[#allocation2 + $0x52] sm:$0xff] }
 0x3e2   : > { %v2892_v7 = vadd.f32 %v2840_v49, %v2679_v57  ;;  %v2843_v48 = vpop.f32.mrf.mxu0  ;;  %6109 = vpow2.f32 %v3044_v59  ;;  %v5807_v49 = vld [vmem:[%s8068_s9 + $0xe8] sm:$0xff] }
 0x3e3   : > { %v3118_v61 = vsel %vm2958_vm10, %v2926_v8, %v5750_v26  ;;  %4296 = vmatpush.msrb.mxu0 %v5807_v49 }
 0x3e4   : > { %v2928_v60 = vadd.f32 %v7198_v53, %v2892_v7  ;;  %3202 = vrot.lane.b32.xlu0 %v3118_v61, %s6477_s22 }
 0x3e5   : > { %4297 = vmatpush.msrb.mxu0 %v5806_v18 }
 0x3e6   : > { %v3175_v14 = vpop.permute.xlu1 %3174  ;;  %v3344_v62 = vld [vmem:[#allocation2 + $0x39] sm:$0xff]  ;;  %v2992_v43 = vmin.f32 %v2928_v60, 0.0  ;;  %vm2960_vm12 = vcmp.gt.f32.partialorder %v2928_v60, 0.0 }
 0x3e7   : > { %v3296_v3 = vld [vmem:[#allocation2 + $0x38] sm:$0xff]  ;;  %3265 = vst.msk [vmem:[#allocation2 + $0x49] sm:$0xff] %vm3258_vm4, %v3175_v14  ;;  %v2681_v1 = vpop.f32.mrf.mxu3  ;;  %3419 = vmatmul.f32.gmra.mxu1 %v3344_v62  ;;  %v5822_v14 = vld [vmem:[%s8068_s9 + $0x160] sm:$0xff] }
 0x3e8   : > { %v3618_v5 = vld [vmem:[#allocation2 + $0x32] sm:$0xff]  ;;  %v6110_v10 = vpop.eup %6109  ;;  %v2682_v12 = vadd.f32 %v2681_v1, %v2568_v46  ;;  %v3046_v53 = vmul.f32 1.442695, %v2992_v43  ;;  %v3619_v38 = vld [vmem:[#allocation2 + $0x3a] sm:$0xff]  ;;  %4572 = vmatpush.msrb.mxu2 %v5822_v14 }
 0x3e9   : > { %3691 = vmatmul.f32.gmra.mxu3 %v3618_v5  ;;  %3532 = vmatmul.f32.gmra.mxu2 %v3296_v3  ;;  %v5751_v6 = vadd.f32 -1.0, %v6110_v10 }
 0x3ea   : > { %v2893_v47 = vadd.f32 %v2843_v48, %v2682_v12  ;;  %6111 = vpow2.f32 %v3046_v53  ;;  %v2846_v16 = vpop.f32.mrf.mxu0 }
 0x3eb   : > { %v3119_v20 = vsel %vm2959_vm11, %v2927_v22, %v5751_v6 }
 0x3ec   : > { %v2929_v19 = vadd.f32 %v7314_v52, %v2893_v47  ;;  %3204 = vrot.lane.b32.xlu1 %v3119_v20, %s6477_s22 }
 0x3ee   : > { %v3183_v24 = vpop.permute.xlu2 %3182  ;;  %v3345_v25 = vld [vmem:[#allocation2 + $0x49] sm:$0xff]  ;;  %v2993_v11 = vmin.f32 %v2929_v19, 0.0  ;;  %vm2961_vm13 = vcmp.gt.f32.partialorder %v2929_v19, 0.0 }
 0x3ef   : > { %v3297_v27 = vld [vmem:[#allocation2 + $0x48] sm:$0xff]  ;;  %3269 = vst.msk [vmem:[#allocation2 + $0x79] sm:$0xff] %vm3258_vm4, %v3183_v24  ;;  %v2684_v29 = vpop.f32.mrf.mxu3  ;;  %3422 = vmatmul.f32.gmra.mxu1 %v3345_v25  ;;  %v3298_v9 = vld [vmem:[#allocation2 + $0x50] sm:$0xff] }
 0x3f0   : > { %v6112_v23 = vpop.eup %6111  ;;  %v2685_v30 = vadd.f32 %v2684_v29, %v2571_v15  ;;  %v3048_v21 = vmul.f32 1.442695, %v2993_v11  ;;  %v3620_v39 = vld [vmem:[#allocation2 + $0x4a] sm:$0xff] }
 0x3f1   : > { %3694 = vmatmul.f32.gmra.mxu3 %v3619_v38  ;;  %3535 = vmatmul.f32.gmra.mxu2 %v3297_v27  ;;  %v5752_v42 = vadd.f32 -1.0, %v6112_v23 }
 0x3f2   : > { %v2894_v8 = vadd.f32 %v2846_v16, %v2685_v30  ;;  %6113 = vpow2.f32 %v3048_v21  ;;  %v2849_v13 = vpop.f32.mrf.mxu0 }
 0x3f3   : > { %v3120_v4 = vsel %vm2960_vm12, %v2928_v60, %v5752_v42  ;;  %v5821_v42 = vld [vmem:[%s8068_s9 + $0x158] sm:$0xff] }
 0x3f4   : > { %v2930_v17 = vadd.f32 %v7314_v52, %v2894_v8  ;;  %3206 = vrot.lane.b32.xlu2 %v3120_v4, %s6477_s22  ;;  %4573 = vmatpush.msrb.mxu2 %v5821_v42 }
 0x3f6   : > { %v3179_v34 = vpop.permute.xlu0 %3178  ;;  %v2994_v63 = vmin.f32 %v2930_v17, 0.0  ;;  %vm2962_vm14 = vcmp.gt.f32.partialorder %v2930_v17, 0.0  ;;  %v3349_v27 = vld [vmem:[#allocation2 + $0x79] sm:$0xff] }
 0x3f7   : > { %3267 = vst.msk [vmem:[#allocation2 + $0x61] sm:$0xff] %vm3258_vm4, %v3179_v34  ;;  %v2687_v40 = vpop.f32.mrf.mxu3  ;;  %3425 = vmatmul.f32.gmra.mxu1 %v3346_v35  ;;  %v3301_v29 = vld [vmem:[#allocation2 + $0x78] sm:$0xff] }
 0x3f8   : > { %v6114_v41 = vpop.eup %6113  ;;  %v2688_v58 = vadd.f32 %v2687_v40, %v2574_v31  ;;  %v3050_v44 = vmul.f32 1.442695, %v2994_v63  ;;  %v4240_v63 = vld [vmem:[%s8068_s9 + $0x58] sm:$0xff] }
 0x3f9   : > { %3697 = vmatmul.f32.gmra.mxu3 %v3620_v39  ;;  %3538 = vmatmul.f32.gmra.mxu2 %v3298_v9  ;;  %v5753_v22 = vadd.f32 -1.0, %v6114_v41  ;;  %v5805_v39 = vld [vmem:[%s8068_s9 + $0xd8] sm:$0xff] }
 0x3fa   : > { %v2895_v50 = vadd.f32 %v2849_v13, %v2688_v58  ;;  %6115 = vpow2.f32 %v3050_v44  ;;  %v2852_v57 = vpop.f32.mrf.mxu0  ;;  %4298 = vmatpush.msrb.mxu0 %v5805_v39  ;;  %4411 = vmatpush.msrb.mxu1 %v4240_v63 }
 0x3fb   : > { %v3121_v51 = vsel %vm2961_vm13, %v2929_v19, %v5753_v22 }
 0x3fc   : > { %v2931_v0 = vadd.f32 %v7314_v52, %v2895_v50  ;;  %3208 = vrot.lane.b32.xlu0 %v3121_v51, %s6477_s22  ;;  %v2577_v36 = vpop.f32.mrf.mxu2 }
 0x3fe   : > { %v3181_v54 = vpop.permute.xlu1 %3180  ;;  %v3347_v37 = vld [vmem:[#allocation2 + $0x61] sm:$0xff]  ;;  %v2995_v56 = vmin.f32 %v2931_v0, 0.0  ;;  %vm2963_vm1 = vcmp.gt.f32.partialorder %v2931_v0, 0.0 }
 0x3ff   : > { %v3299_v32 = vld [vmem:[#allocation2 + $0x60] sm:$0xff]  ;;  %3268 = vst.msk [vmem:[#allocation2 + $0x69] sm:$0xff] %vm3258_vm4, %v3181_v54  ;;  %v2690_v59 = vpop.f32.mrf.mxu3  ;;  %3428 = vmatmul.f32.gmra.mxu1 %v3347_v37 }
 0x400   : > { %v6116_v46 = vpop.eup %6115  ;;  %v2691_v26 = vadd.f32 %v2690_v59, %v2577_v36  ;;  %v3052_v7 = vmul.f32 1.442695, %v2995_v56  ;;  %v4239_v56 = vld [vmem:[%s8068_s9 + $0x50] sm:$0xff] }
 0x401   : > { %3700 = vmatmul.f32.gmra.mxu3 %v3621_v55  ;;  %3541 = vmatmul.f32.gmra.mxu2 %v3299_v32  ;;  %v5754_v48 = vadd.f32 -1.0, %v6116_v46  ;;  %v5820_v32 = vld [vmem:[%s8068_s9 + $0x150] sm:$0xff] }
 0x402   : > { %v2896_v61 = vadd.f32 %v2852_v57, %v2691_v26  ;;  %6117 = vpow2.f32 %v3052_v7  ;;  %v2855_v15 = vpop.f32.mrf.mxu0  ;;  %v5804_v55 = vld [vmem:[%s8068_s9 + $0xd0] sm:$0xff]  ;;  %4574 = vmatpush.msrb.mxu2 %v5820_v32  ;;  %4412 = vmatpush.msrb.mxu1 %v4239_v56  ;;  %v5802_v56 = vld [vmem:[%s8068_s9 + $0xc0] sm:$0xff] }
 0x403   : > { %v3122_v60 = vsel %vm2962_vm14, %v2930_v17, %v5754_v48  ;;  %4299 = vmatpush.msrb.mxu0 %v5804_v55 }
 0x404   : > { %v2932_v2 = vadd.f32 %v7314_v52, %v2896_v61  ;;  %3210 = vrot.lane.b32.xlu1 %v3122_v60, %s6477_s22  ;;  %v2580_v10 = vpop.f32.mrf.mxu2 }
 0x406   : > { %v3189_v62 = vpop.permute.xlu2 %3188  ;;  %v3348_v3 = vld [vmem:[#allocation2 + $0x69] sm:$0xff]  ;;  %v2996_v1 = vmin.f32 %v2932_v2, 0.0  ;;  %vm2964_vm2 = vcmp.gt.f32.partialorder %v2932_v2, 0.0 }
 0x407   : > { %v3300_v5 = vld [vmem:[#allocation2 + $0x68] sm:$0xff]  ;;  %3272 = vst.msk [vmem:[#allocation2 + $0x99] sm:$0xff] %vm3258_vm4, %v3189_v62  ;;  %v2693_v12 = vpop.f32.mrf.mxu3  ;;  %3431 = vmatmul.f32.gmra.mxu1 %v3348_v3 }
 0x408   : > { %v3622_v43 = vld [vmem:[#allocation2 + $0x62] sm:$0xff]  ;;  %v6118_v53 = vpop.eup %6117  ;;  %v2694_v6 = vadd.f32 %v2693_v12, %v2580_v10  ;;  %v3054_v47 = vmul.f32 1.442695, %v2996_v1  ;;  %v3623_v38 = vld [vmem:[#allocation2 + $0x6a] sm:$0xff] }
 0x409   : > { %3703 = vmatmul.f32.gmra.mxu3 %v3622_v43  ;;  %3544 = vmatmul.f32.gmra.mxu2 %v3300_v5  ;;  %v5755_v16 = vadd.f32 -1.0, %v6118_v53  ;;  %v5819_v12 = vld [vmem:[%s8068_s9 + $0x148] sm:$0xff] }
 0x40a   : > { %v2897_v20 = vadd.f32 %v2855_v15, %v2694_v6  ;;  %6119 = vpow2.f32 %v3054_v47  ;;  %4575 = vmatpush.msrb.mxu2 %v5819_v12 }
 0x40b   : > { %v3123_v19 = vsel %vm2963_vm1, %v2931_v0, %v5755_v16 }
 0x40c   : > { %v2933_v24 = vadd.f32 %v7314_v52, %v2897_v20  ;;  %3212 = vrot.lane.b32.xlu2 %v3123_v19, %s6477_s22 }
 0x40e   : > { %v3185_v25 = vpop.permute.xlu0 %3184  ;;  %v2997_v11 = vmin.f32 %v2933_v24, 0.0  ;;  %vm2965_vm3 = vcmp.gt.f32.partialorder %v2933_v24, 0.0  ;;  %v3352_v51 = vld [vmem:[#allocation2 + $0x99] sm:$0xff] }
 0x40f   : > { %3270 = vst.msk [vmem:[#allocation2 + $0x81] sm:$0xff] %vm3258_vm4, %v3185_v25  ;;  %3434 = vmatmul.f32.gmra.mxu1 %v3349_v27  ;;  %v3627_v14 = vld [vmem:[#allocation2 + $0x9a] sm:$0xff]  ;;  %v4238_v25 = vld [vmem:[%s8068_s9 + $0x48] sm:$0xff] }
 0x410   : > { %v6120_v23 = vpop.eup %6119  ;;  %v3056_v30 = vmul.f32 1.442695, %v2997_v11  ;;  %4413 = vmatpush.msrb.mxu1 %v4238_v25  ;;  %v5817_v25 = vld [vmem:[%s8068_s9 + $0x138] sm:$0xff] }
 0x411   : > { %3706 = vmatmul.f32.gmra.mxu3 %v3623_v38  ;;  %3547 = vmatmul.f32.gmra.mxu2 %v3301_v29  ;;  %v5756_v21 = vadd.f32 -1.0, %v6120_v23 }
 0x412   : > { %6121 = vpow2.f32 %v3056_v30 }
 0x413   : > { %v3124_v28 = vsel %vm2964_vm2, %v2932_v2, %v5756_v21 }
 0x414   : > { %3214 = vrot.lane.b32.xlu0 %v3124_v28, %s6477_s22 }
 0x416   : > { %v3187_v8 = vpop.permute.xlu1 %3186  ;;  %v3350_v4 = vld [vmem:[#allocation2 + $0x81] sm:$0xff] }
 0x417   : > { %v3302_v17 = vld [vmem:[#allocation2 + $0x80] sm:$0xff]  ;;  %3271 = vst.msk [vmem:[#allocation2 + $0x91] sm:$0xff] %vm3258_vm4, %v3187_v8  ;;  %3437 = vmatmul.f32.gmra.mxu1 %v3350_v4 }
 0x418   : > { %v3624_v31 = vld [vmem:[#allocation2 + $0x7a] sm:$0xff]  ;;  %v6122_v13 = vpop.eup %6121  ;;  %v3625_v58 = vld [vmem:[#allocation2 + $0x82] sm:$0xff] }
 0x419   : > { %3709 = vmatmul.f32.gmra.mxu3 %v3624_v31  ;;  %3550 = vmatmul.f32.gmra.mxu2 %v3302_v17  ;;  %v5757_v34 = vadd.f32 -1.0, %v6122_v13 }
 0x41b   : > { %v3125_v35 = vsel %vm2965_vm3, %v2933_v24, %v5757_v34  ;;  %v5803_v24 = vld [vmem:[%s8068_s9 + $0xc8] sm:$0xff] }
 0x41c   : > { %3216 = vrot.lane.b32.xlu1 %v3125_v35, %s6477_s22  ;;  %4300 = vmatpush.msrb.mxu0 %v5803_v24 }
 0x41e   : > { %v3195_v40 = vpop.permute.xlu2 %3194  ;;  %v3351_v9 = vld [vmem:[#allocation2 + $0x91] sm:$0xff]  ;;  %4301 = vmatpush.msrb.mxu0 %v5802_v56 }
 0x41f   : > { %v3303_v41 = vld [vmem:[#allocation2 + $0x90] sm:$0xff]  ;;  %3275 = vst.msk [vmem:[#allocation2 + $0xc1] sm:$0xff] %vm3258_vm4, %v3195_v40  ;;  %3440 = vmatmul.f32.gmra.mxu1 %v3351_v9  ;;  %v3304_v54 = vld [vmem:[#allocation2 + $0x98] sm:$0xff] }
 0x420   : > { %v3626_v0 = vld [vmem:[#allocation2 + $0x92] sm:$0xff] }
 0x421   : > { %3712 = vmatmul.f32.gmra.mxu3 %v3625_v58  ;;  %3553 = vmatmul.f32.gmra.mxu2 %v3303_v41 }
 0x424   : > { %v2583_v44 = vpop.f32.mrf.mxu2 }
 0x425   : > { %v2696_v49 = vpop.f32.mrf.mxu3 }
 0x426   : > { %v2697_v45 = vadd.f32 %v2696_v49, %v2583_v44  ;;  %v3191_v50 = vpop.permute.xlu0 %3190  ;;  %v3355_v31 = vld [vmem:[#allocation2 + $0xc1] sm:$0xff]  ;;  %v7399_v44 = vld [vmem:[%s8067_s8] ss:$0 sm:$0xff] }
 0x427   : > { %3273 = vst.msk [vmem:[#allocation2 + $0xa9] sm:$0xff] %vm3258_vm4, %v3191_v50  ;;  %3443 = vmatmul.f32.gmra.mxu1 %v3352_v51  ;;  %v3307_v35 = vld [vmem:[#allocation2 + $0xc0] sm:$0xff] }
 0x428   : > { %v2858_v22 = vpop.f32.mrf.mxu0 }
 0x429   : > { %v2898_v36 = vadd.f32 %v2858_v22, %v2697_v45  ;;  %3715 = vmatmul.f32.gmra.mxu3 %v3626_v0  ;;  %3556 = vmatmul.f32.gmra.mxu2 %v3304_v54 }
 0x42b   : > { %v2934_v37 = vadd.f32 %v7314_v52, %v2898_v36 }
 0x42c   : > { %v2586_v59 = vpop.f32.mrf.mxu2 }
 0x42d   : > { %v2998_v57 = vmin.f32 %v2934_v37, 0.0  ;;  %v2699_v46 = vpop.f32.mrf.mxu3  ;;  %vm2966_vm5 = vcmp.gt.f32.partialorder %v2934_v37, 0.0 }
 0x42e   : > { %v2700_v26 = vadd.f32 %v2699_v46, %v2586_v59  ;;  %v3193_v61 = vpop.permute.xlu1 %3192  ;;  %v3353_v60 = vld [vmem:[#allocation2 + $0xa9] sm:$0xff] }
 0x42f   : > { %v3058_v7 = vmul.f32 1.442695, %v2998_v57  ;;  %v3305_v2 = vld [vmem:[#allocation2 + $0xa8] sm:$0xff]  ;;  %3274 = vst.msk [vmem:[#allocation2 + $0xb1] sm:$0xff] %vm3258_vm4, %v3193_v61  ;;  %3446 = vmatmul.f32.gmra.mxu1 %v3353_v60  ;;  %v4237_v57 = vld [vmem:[%s8068_s9 + $0x40] sm:$0xff] }
 0x430   : > { %v2861_v48 = vpop.f32.mrf.mxu0  ;;  %4414 = vmatpush.msrb.mxu1 %v4237_v57 }
 0x431   : > { %v2899_v62 = vadd.f32 %v2861_v48, %v2700_v26  ;;  %3718 = vmatmul.f32.gmra.mxu3 %v3627_v14  ;;  %6123 = vpow2.f32 %v3058_v7  ;;  %3559 = vmatmul.f32.gmra.mxu2 %v3305_v2 }
 0x433   : > { %v2935_v3 = vadd.f32 %v7314_v52, %v2899_v62 }
 0x434   : > { %v2589_v43 = vpop.f32.mrf.mxu2 }
 0x435   : > { %v2999_v5 = vmin.f32 %v2935_v3, 0.0  ;;  %v2702_v1 = vpop.f32.mrf.mxu3  ;;  %vm2967_vm6 = vcmp.gt.f32.partialorder %v2935_v3, 0.0 }
 0x436   : > { %v2703_v10 = vadd.f32 %v2702_v1, %v2589_v43  ;;  %v3201_v15 = vpop.permute.xlu2 %3200  ;;  %v3354_v20 = vld [vmem:[#allocation2 + $0xb1] sm:$0xff] }
 0x437   : > { %v6124_v53 = vpop.eup %6123  ;;  %v3060_v6 = vmul.f32 1.442695, %v2999_v5  ;;  %v3306_v19 = vld [vmem:[#allocation2 + $0xb0] sm:$0xff]  ;;  %3278 = vst.msk [vmem:[#allocation2 + $0xe1] sm:$0xff] %vm3258_vm4, %v3201_v15  ;;  %3449 = vmatmul.f32.gmra.mxu1 %v3354_v20 }
 0x438   : > { %v2864_v47 = vpop.f32.mrf.mxu0  ;;  %v5758_v16 = vadd.f32 -1.0, %v6124_v53  ;;  %v3628_v18 = vld [vmem:[#allocation2 + $0xaa] sm:$0xff]  ;;  %v3629_v13 = vld [vmem:[#allocation2 + $0xb2] sm:$0xff] }
 0x439   : > { %v2900_v33 = vadd.f32 %v2864_v47, %v2703_v10  ;;  %3721 = vmatmul.f32.gmra.mxu3 %v3628_v18  ;;  %6125 = vpow2.f32 %v3060_v6  ;;  %3562 = vmatmul.f32.gmra.mxu2 %v3306_v19 }
 0x43a   : > { %v3126_v27 = vsel %vm2966_vm5, %v2934_v37, %v5758_v16  ;;  %v5818_v37 = vld [vmem:[%s8068_s9 + $0x140] sm:$0xff] }
 0x43b   : > { %v2936_v38 = vadd.f32 %v7314_v52, %v2900_v33  ;;  %3218 = vrot.lane.b32.xlu2 %v3126_v27, %s6477_s22  ;;  %4576 = vmatpush.msrb.mxu2 %v5818_v37  ;;  %v5801_v27 = vld [vmem:[%s8068_s9 + $0xb8] sm:$0xff] }
 0x43c   : > { %v2592_v29 = vpop.f32.mrf.mxu2  ;;  %v3405_v21 = vpop.f32.mrf.mxu1  ;;  %4302 = vmatpush.msrb.mxu0 %v5801_v27 }
 0x43d   : > { %v3000_v11 = vmin.f32 %v2936_v38, 0.0  ;;  %v2705_v23 = vpop.f32.mrf.mxu3  ;;  %vm2968_vm15 = vcmp.gt.f32.partialorder %v2936_v38, 0.0  ;;  %4577 = vmatpush.msrb.mxu2 %v5817_v25 }
 0x43e   : > { %v2706_v30 = vadd.f32 %v2705_v23, %v2592_v29  ;;  %v3197_v4 = vpop.permute.xlu0 %3196  ;;  %v3358_v19 = vld [vmem:[#allocation2 + $0xe1] sm:$0xff] }
 0x43f   : > { %v6126_v28 = vpop.eup %6125  ;;  %v3062_v42 = vmul.f32 1.442695, %v3000_v11  ;;  %3276 = vst.msk [vmem:[#allocation2 + $0xc9] sm:$0xff] %vm3258_vm4, %v3197_v4  ;;  %3452 = vmatmul.f32.gmra.mxu1 %v3355_v31 }
 0x440   : > { %v2867_v8 = vpop.f32.mrf.mxu0  ;;  %v5759_v17 = vadd.f32 -1.0, %v6126_v28 }
 0x441   : > { %v2901_v34 = vadd.f32 %v2867_v8, %v2706_v30  ;;  %3724 = vmatmul.f32.gmra.mxu3 %v3629_v13  ;;  %6127 = vpow2.f32 %v3062_v42  ;;  %3565 = vmatmul.f32.gmra.mxu2 %v3307_v35  ;;  %v3633_v13 = vld [vmem:[#allocation2 + $0xe2] sm:$0xff] }
 0x442   : > { %v3127_v39 = vsel %vm2967_vm6, %v2935_v3, %v5759_v17 }
 0x443   : > { %v2937_v63 = vadd.f32 %v7314_v52, %v2901_v34  ;;  %3220 = vrot.lane.b32.xlu0 %v3127_v39, %s6477_s22 }
 0x444   : > { %v3518_v9 = vpop.f32.mrf.mxu2  ;;  %v3408_v49 = vpop.f32.mrf.mxu1 }
 0x445   : > { %v3001_v40 = vmin.f32 %v2937_v63, 0.0  ;;  %v3680_v41 = vpop.f32.mrf.mxu3  ;;  %v3519_v58 = vadd.f32 %v3518_v9, %v3405_v21  ;;  %vm2969_vm7 = vcmp.gt.f32.partialorder %v2937_v63, 0.0 }
 0x446   : > { %v3199_v51 = vpop.permute.xlu1 %3198  ;;  %v3356_v36 = vld [vmem:[#allocation2 + $0xc9] sm:$0xff] }
 0x447   : > { %v6128_v45 = vpop.eup %6127  ;;  %v3064_v22 = vmul.f32 1.442695, %v3001_v40  ;;  %v3776_v50 = vadd.f32 %v3680_v41, %v3519_v58  ;;  %v3308_v54 = vld [vmem:[#allocation2 + $0xc8] sm:$0xff]  ;;  %3277 = vst.msk [vmem:[#allocation2 + $0xd9] sm:$0xff] %vm3258_vm4, %v3199_v51  ;;  %3455 = vmatmul.f32.gmra.mxu1 %v3356_v36  ;;  %v5816_v36 = vld [vmem:[%s8068_s9 + $0x130] sm:$0xff] }
 0x448   : > { %v5760_v0 = vadd.f32 -1.0, %v6128_v45  ;;  %v3630_v52 = vld [vmem:[#allocation2 + $0xc2] sm:$0xff]  ;;  %v3631_v43 = vld [vmem:[#allocation2 + $0xca] sm:$0xff]  ;;  %4578 = vmatpush.msrb.mxu2 %v5816_v36 }
 0x449   : > { %3727 = vmatmul.f32.gmra.mxu3 %v3630_v52  ;;  %6129 = vpow2.f32 %v3064_v22  ;;  %v3812_v32 = vadd.f32 %v7399_v44, %v3776_v50  ;;  %3568 = vmatmul.f32.gmra.mxu2 %v3308_v54  ;;  %v5800_v54 = vld [vmem:[%s8068_s9 + $0xb0] sm:$0xff] }
 0x44a   : > { %v3128_v55 = vsel %vm2968_vm15, %v2936_v38, %v5760_v0  ;;  %v4236_v38 = vld [vmem:[%s8068_s9 + $0x38] sm:$0xff]  ;;  %v4235_v52 = vld [vmem:[%s8068_s9 + $0x30] sm:$0xff]  ;;  %4303 = vmatpush.msrb.mxu0 %v5800_v54  ;;  %vm4164_vm15 = vcmask 294112  }
 0x44b   : > { %3222 = vrot.lane.b32.xlu1 %v3128_v55, %s6477_s22  ;;  %v3876_v59 = vmin.f32 %v3812_v32, 0.0  ;;  %vm3844_vm8 = vcmp.gt.f32.partialorder %v3812_v32, 0.0  ;;  %4415 = vmatpush.msrb.mxu1 %v4236_v38  ;;  %v5815_v38 = vld [vmem:[%s8068_s9 + $0x128] sm:$0xff] }
 0x44c   : > { %v3521_v46 = vpop.f32.mrf.mxu2  ;;  %v3411_v7 = vpop.f32.mrf.mxu1  ;;  %4579 = vmatpush.msrb.mxu2 %v5815_v38 }
 0x44d   : > { %v3522_v26 = vadd.f32 %v3521_v46, %v3408_v49  ;;  %v3908_v48 = vmul.f32 1.442695, %v3876_v59  ;;  %v3683_v60 = vpop.f32.mrf.mxu3  ;;  %4416 = vmatpush.msrb.mxu1 %v4235_v52 }
 0x44e   : > { %v3207_v14 = vpop.permute.xlu2 %3206  ;;  %v3357_v3 = vld [vmem:[#allocation2 + $0xd9] sm:$0xff] }
 0x44f   : > { %v6130_v61 = vpop.eup %6129  ;;  %v3777_v2 = vadd.f32 %v3683_v60, %v3522_v26  ;;  %v3309_v5 = vld [vmem:[#allocation2 + $0xd8] sm:$0xff]  ;;  %6131 = vpow2.f32 %v3908_v48  ;;  %3281 = vst.msk [vmem:[#allocation2 + $0x109] sm:$0xff] %vm3258_vm4, %v3207_v14  ;;  %3458 = vmatmul.f32.gmra.mxu1 %v3357_v3  ;;  %v3310_v24 = vld [vmem:[#allocation2 + $0xe0] sm:$0xff] }
 0x450   : > { %v5761_v62 = vadd.f32 -1.0, %v6130_v61  ;;  %v3632_v18 = vld [vmem:[#allocation2 + $0xda] sm:$0xff] }
 0x451   : > { %3730 = vmatmul.f32.gmra.mxu3 %v3631_v43  ;;  %v3813_v1 = vadd.f32 %v7399_v44, %v3777_v2  ;;  %3571 = vmatmul.f32.gmra.mxu2 %v3309_v5 }
 0x452   : > { %v3129_v10 = vsel %vm2969_vm7, %v2937_v63, %v5761_v62 }
 0x453   : > { %3224 = vrot.lane.b32.xlu2 %v3129_v10, %s6477_s22  ;;  %v3877_v12 = vmin.f32 %v3813_v1, 0.0  ;;  %s6478_s22 = smov 28   ;;  %vm3845_vm9 = vcmp.gt.f32.partialorder %v3813_v1, 0.0 }
 0x454   : > { %v3524_v53 = vpop.f32.mrf.mxu2  ;;  %v3414_v47 = vpop.f32.mrf.mxu1 }
 0x455   : > { %v6132_v6 = vpop.eup %6131  ;;  %v3910_v15 = vmul.f32 1.442695, %v3877_v12  ;;  %v3525_v11 = vadd.f32 %v3524_v53, %v3411_v7 }
 0x456   : > { %v5762_v16 = vadd.f32 -1.0, %v6132_v6  ;;  %v3203_v20 = vpop.permute.xlu0 %3202  ;;  %v3361_v60 = vld [vmem:[#allocation2 + $0x109] sm:$0xff] }
 0x457   : > { %6133 = vpow2.f32 %v3910_v15  ;;  %3279 = vst.msk [vmem:[#allocation2 + $0xf1] sm:$0xff] %vm3258_vm4, %v3203_v20  ;;  %3461 = vmatmul.f32.gmra.mxu1 %v3358_v19  ;;  %v3313_v62 = vld [vmem:[#allocation2 + $0x108] sm:$0xff] }
 0x458   : > { %v4004_v33 = vsel %vm3844_vm8, %v3812_v32, %v5762_v16 }
 0x459   : > { %3733 = vmatmul.f32.gmra.mxu3 %v3632_v18  ;;  %4068 = vrot.lane.b32.xlu0 %v4004_v33, %s6478_s22 }
 0x45a   : > { %3574 = vmatmul.f32.gmra.mxu2 %v3310_v24 }
 0x45c   : > { %v3686_v29 = vpop.f32.mrf.mxu3  ;;  %v3527_v23 = vpop.f32.mrf.mxu2 }
 0x45d   : > { %v3778_v30 = vadd.f32 %v3686_v29, %v3525_v11  ;;  %v6134_v21 = vpop.eup %6133  ;;  %v3417_v28 = vpop.f32.mrf.mxu1  ;;  %v3528_v39 = vadd.f32 %v3527_v23, %v3414_v47  ;;  %v5799_v11 = vld [vmem:[%s8068_s9 + $0xa8] sm:$0xff] }
 0x45e   : > { %v5763_v8 = vadd.f32 -1.0, %v6134_v21  ;;  %v3205_v4 = vpop.permute.xlu1 %3204  ;;  %v3359_v17 = vld [vmem:[#allocation2 + $0xf1] sm:$0xff]  ;;  %v4234_v29 = vld [vmem:[%s8068_s9 + $0x28] sm:$0xff]  ;;  %4304 = vmatpush.msrb.mxu0 %v5799_v11 }
 0x45f   : > { %v3814_v42 = vadd.f32 %v7399_v44, %v3778_v30  ;;  %v3311_v31 = vld [vmem:[#allocation2 + $0xf0] sm:$0xff]  ;;  %3280 = vst.msk [vmem:[#allocation2 + $0xf9] sm:$0xff] %vm3258_vm4, %v3205_v4  ;;  %3464 = vmatmul.f32.gmra.mxu1 %v3359_v17 }
 0x460   : > { %v4005_v35 = vsel %vm3845_vm9, %v3813_v1, %v5763_v8  ;;  %4417 = vmatpush.msrb.mxu1 %v4234_v29  ;;  %v5813_v29 = vld [vmem:[%s8068_s9 + $0x118] sm:$0xff] }
 0x461   : > { %v3878_v34 = vmin.f32 %v3814_v42, 0.0  ;;  %3736 = vmatmul.f32.gmra.mxu3 %v3633_v13  ;;  %4070 = vrot.lane.b32.xlu1 %v4005_v35, %s6478_s22  ;;  %vm3846_vm0 = vcmp.gt.f32.partialorder %v3814_v42, 0.0 }
 0x462   : > { %3577 = vmatmul.f32.gmra.mxu2 %v3311_v31 }
 0x463   : > { %v3912_v63 = vmul.f32 1.442695, %v3878_v34 }
 0x464   : > { %v3689_v40 = vpop.f32.mrf.mxu3  ;;  %v3530_v9 = vpop.f32.mrf.mxu2 }
 0x465   : > { %v3779_v41 = vadd.f32 %v3689_v40, %v3528_v39  ;;  %6135 = vpow2.f32 %v3912_v63  ;;  %v3420_v58 = vpop.f32.mrf.mxu1  ;;  %v3531_v32 = vadd.f32 %v3530_v9, %v3417_v28 }
 0x466   : > { %v3213_v45 = vpop.permute.xlu2 %3212  ;;  %v3360_v22 = vld [vmem:[#allocation2 + $0xf9] sm:$0xff] }
 0x467   : > { %v3815_v49 = vadd.f32 %v7399_v44, %v3779_v41  ;;  %v3312_v50 = vld [vmem:[#allocation2 + $0xf8] sm:$0xff]  ;;  %3284 = vst.msk [vmem:[#allocation2 + $0x129] sm:$0xff] %vm3258_vm4, %v3213_v45  ;;  %3467 = vmatmul.f32.gmra.mxu1 %v3360_v22 }
 0x468   : > { %v3634_v51 = vld [vmem:[#allocation2 + $0xf2] sm:$0xff]  ;;  %v3635_v2 = vld [vmem:[#allocation2 + $0xfa] sm:$0xff] }
 0x469   : > { %v3879_v0 = vmin.f32 %v3815_v49, 0.0  ;;  %3739 = vmatmul.f32.gmra.mxu3 %v3634_v51  ;;  %vm3847_vm10 = vcmp.gt.f32.partialorder %v3815_v49, 0.0 }
 0x46a   : > { %3580 = vmatmul.f32.gmra.mxu2 %v3312_v50 }
 0x46b   : > { %v6136_v37 = vpop.eup %6135  ;;  %v3914_v55 = vmul.f32 1.442695, %v3879_v0 }
 0x46c   : > { %v3692_v56 = vpop.f32.mrf.mxu3  ;;  %v5764_v57 = vadd.f32 -1.0, %v6136_v37  ;;  %v3533_v59 = vpop.f32.mrf.mxu2 }
 0x46d   : > { %v3780_v46 = vadd.f32 %v3692_v56, %v3531_v32  ;;  %6137 = vpow2.f32 %v3914_v55  ;;  %v3423_v26 = vpop.f32.mrf.mxu1  ;;  %v3534_v5 = vadd.f32 %v3533_v59, %v3420_v58  ;;  %v5814_v55 = vld [vmem:[%s8068_s9 + $0x120] sm:$0xff] }
 0x46e   : > { %v4006_v7 = vsel %vm3846_vm0, %v3814_v42, %v5764_v57  ;;  %v3209_v61 = vpop.permute.xlu0 %3208  ;;  %v3364_v51 = vld [vmem:[#allocation2 + $0x129] sm:$0xff]  ;;  %v5798_v56 = vld [vmem:[%s8068_s9 + $0xa0] sm:$0xff]  ;;  %4580 = vmatpush.msrb.mxu2 %v5814_v55 }
 0x46f   : > { %v3816_v48 = vadd.f32 %v7399_v44, %v3780_v46  ;;  %4072 = vrot.lane.b32.xlu2 %v4006_v7, %s6478_s22  ;;  %3282 = vst.msk [vmem:[#allocation2 + $0x111] sm:$0xff] %vm3258_vm4, %v3209_v61  ;;  %3470 = vmatmul.f32.gmra.mxu1 %v3361_v60  ;;  %v4233_v57 = vld [vmem:[%s8068_s9 + $0x20] sm:$0xff]  ;;  %v4231_v55 = vld [vmem:[%s8068_s9 + $0x10] sm:$0xff] }
 0x470   : > { %4305 = vmatpush.msrb.mxu0 %v5798_v56  ;;  %4418 = vmatpush.msrb.mxu1 %v4233_v57 }
 0x471   : > { %v3880_v14 = vmin.f32 %v3816_v48, 0.0  ;;  %3742 = vmatmul.f32.gmra.mxu3 %v3635_v2  ;;  %vm3848_vm11 = vcmp.gt.f32.partialorder %v3816_v48, 0.0  ;;  %4581 = vmatpush.msrb.mxu2 %v5813_v29 }
 0x472   : > { %3583 = vmatmul.f32.gmra.mxu2 %v3313_v62 }
 0x473   : > { %v6138_v3 = vpop.eup %6137  ;;  %v3916_v43 = vmul.f32 1.442695, %v3880_v14 }
 0x474   : > { %v3695_v1 = vpop.f32.mrf.mxu3  ;;  %v5765_v10 = vadd.f32 -1.0, %v6138_v3  ;;  %v3536_v12 = vpop.f32.mrf.mxu2  ;;  %v3639_v3 = vld [vmem:[#allocation2 + $0x12a] sm:$0xff] }
 0x475   : > { %v3781_v53 = vadd.f32 %v3695_v1, %v3534_v5  ;;  %6139 = vpow2.f32 %v3916_v43  ;;  %v3426_v6 = vpop.f32.mrf.mxu1  ;;  %v3537_v25 = vadd.f32 %v3536_v12, %v3423_v26 }
 0x476   : > { %v4007_v47 = vsel %vm3847_vm10, %v3815_v49, %v5765_v10  ;;  %v3211_v16 = vpop.permute.xlu1 %3210  ;;  %v3362_v20 = vld [vmem:[#allocation2 + $0x111] sm:$0xff] }
 0x477   : > { %v3817_v15 = vadd.f32 %v7399_v44, %v3781_v53  ;;  %4074 = vrot.lane.b32.xlu0 %v4007_v47, %s6478_s22  ;;  %v3314_v19 = vld [vmem:[#allocation2 + $0x110] sm:$0xff]  ;;  %3283 = vst.msk [vmem:[#allocation2 + $0x121] sm:$0xff] %vm3258_vm4, %v3211_v16  ;;  %3473 = vmatmul.f32.gmra.mxu1 %v3362_v20 }
 0x478   : > { %v3636_v18 = vld [vmem:[#allocation2 + $0x10a] sm:$0xff]  ;;  %v3637_v13 = vld [vmem:[#allocation2 + $0x112] sm:$0xff] }
 0x479   : > { %v3881_v33 = vmin.f32 %v3817_v15, 0.0  ;;  %3745 = vmatmul.f32.gmra.mxu3 %v3636_v18  ;;  %vm3849_vm12 = vcmp.gt.f32.partialorder %v3817_v15, 0.0 }
 0x47a   : > { %3586 = vmatmul.f32.gmra.mxu2 %v3314_v19 }
 0x47b   : > { %v6140_v24 = vpop.eup %6139  ;;  %v3918_v27 = vmul.f32 1.442695, %v3881_v33 }
 0x47c   : > { %v3698_v23 = vpop.f32.mrf.mxu3  ;;  %v5766_v30 = vadd.f32 -1.0, %v6140_v24  ;;  %v3539_v21 = vpop.f32.mrf.mxu2 }
 0x47d   : > { %v3782_v28 = vadd.f32 %v3698_v23, %v3537_v25  ;;  %6141 = vpow2.f32 %v3918_v27  ;;  %v3429_v42 = vpop.f32.mrf.mxu1  ;;  %v3540_v39 = vadd.f32 %v3539_v21, %v3426_v6  ;;  %v5797_v23 = vld [vmem:[%s8068_s9 + $0x98] sm:$0xff] }
 0x47e   : > { %v4008_v8 = vsel %vm3848_vm11, %v3816_v48, %v5766_v30  ;;  %v3363_v17 = vld [vmem:[#allocation2 + $0x121] sm:$0xff]  ;;  %v4232_v30 = vld [vmem:[%s8068_s9 + $0x18] sm:$0xff]  ;;  %4306 = vmatpush.msrb.mxu0 %v5797_v23 }
 0x47f   : > { %v3818_v4 = vadd.f32 %v7399_v44, %v3782_v28  ;;  %4076 = vrot.lane.b32.xlu1 %v4008_v8, %s6478_s22  ;;  %v3315_v31 = vld [vmem:[#allocation2 + $0x120] sm:$0xff]  ;;  %3476 = vmatmul.f32.gmra.mxu1 %v3363_v17  ;;  %v3316_v54 = vld [vmem:[#allocation2 + $0x128] sm:$0xff] }
 0x480   : > { %v3638_v0 = vld [vmem:[#allocation2 + $0x122] sm:$0xff]  ;;  %4419 = vmatpush.msrb.mxu1 %v4232_v30 }
 0x481   : > { %v3882_v34 = vmin.f32 %v3818_v4, 0.0  ;;  %3748 = vmatmul.f32.gmra.mxu3 %v3637_v13  ;;  %vm3850_vm13 = vcmp.gt.f32.partialorder %v3818_v4, 0.0 }
 0x482   : > { %3589 = vmatmul.f32.gmra.mxu2 %v3315_v31  ;;  %4420 = vmatpush.msrb.mxu1 %v4231_v55 }
 0x483   : > { %v6142_v35 = vpop.eup %6141  ;;  %v3920_v63 = vmul.f32 1.442695, %v3882_v34 }
 0x484   : > { %v3701_v40 = vpop.f32.mrf.mxu3  ;;  %v5767_v9 = vadd.f32 -1.0, %v6142_v35  ;;  %v3542_v41 = vpop.f32.mrf.mxu2 }
 0x485   : > { %v3783_v58 = vadd.f32 %v3701_v40, %v3540_v39  ;;  %6143 = vpow2.f32 %v3920_v63  ;;  %v3432_v49 = vpop.f32.mrf.mxu1  ;;  %v3543_v37 = vadd.f32 %v3542_v41, %v3429_v42 }
 0x486   : > { %v4009_v45 = vsel %vm3849_vm12, %v3817_v15, %v5767_v9  ;;  %v3215_v50 = vpop.permute.xlu0 %3214 }
 0x487   : > { %v3819_v22 = vadd.f32 %v7399_v44, %v3783_v58  ;;  %4078 = vrot.lane.b32.xlu2 %v4009_v45, %s6478_s22  ;;  %3285 = vst.msk [vmem:[#allocation2 + $0x139] sm:$0xff] %vm3258_vm4, %v3215_v50  ;;  %3479 = vmatmul.f32.gmra.mxu1 %v3364_v51 }
 0x489   : > { %v3883_v36 = vmin.f32 %v3819_v22, 0.0  ;;  %3751 = vmatmul.f32.gmra.mxu3 %v3638_v0  ;;  %vm3851_vm14 = vcmp.gt.f32.partialorder %v3819_v22, 0.0 }
 0x48a   : > { %3592 = vmatmul.f32.gmra.mxu2 %v3316_v54 }
 0x48b   : > { %v6144_v52 = vpop.eup %6143  ;;  %v3922_v32 = vmul.f32 1.442695, %v3883_v36 }
 0x48c   : > { %v3704_v59 = vpop.f32.mrf.mxu3  ;;  %v5768_v46 = vadd.f32 -1.0, %v6144_v52  ;;  %v3545_v26 = vpop.f32.mrf.mxu2 }
 0x48d   : > { %v3784_v7 = vadd.f32 %v3704_v59, %v3543_v37  ;;  %6145 = vpow2.f32 %v3922_v32  ;;  %v3435_v48 = vpop.f32.mrf.mxu1  ;;  %v3546_v1 = vadd.f32 %v3545_v26, %v3432_v49  ;;  %v5812_v37 = vld [vmem:[%s8068_s9 + $0x110] sm:$0xff] }
 0x48e   : > { %v4010_v61 = vsel %vm3850_vm13, %v3818_v4, %v5768_v46  ;;  %v3217_v2 = vpop.permute.xlu1 %3216  ;;  %v3365_v14 = vld [vmem:[#allocation2 + $0x139] sm:$0xff]  ;;  %v5796_v32 = vld [vmem:[%s8068_s9 + $0x90] sm:$0xff]  ;;  %4582 = vmatpush.msrb.mxu2 %v5812_v37 }
 0x48f   : > { %v3820_v60 = vadd.f32 %v7399_v44, %v3784_v7  ;;  %4080 = vrot.lane.b32.xlu0 %v4010_v61, %s6478_s22  ;;  %v3317_v62 = vld [vmem:[#allocation2 + $0x138] sm:$0xff]  ;;  %3286 = vst.msk [vmem:[#allocation2 + $0x141] sm:$0xff] %vm3258_vm4, %v3217_v2  ;;  %3482 = vmatmul.f32.gmra.mxu1 %v3365_v14 }
 0x490   : > { %4307 = vmatpush.msrb.mxu0 %v5796_v32 }
 0x491   : > { %v3884_v5 = vmin.f32 %v3820_v60, 0.0  ;;  %3754 = vmatmul.f32.gmra.mxu3 %v3639_v3  ;;  %vm3852_vm1 = vcmp.gt.f32.partialorder %v3820_v60, 0.0  ;;  %v5795_v3 = vld [vmem:[%s8068_s9 + $0x88] sm:$0xff] }
 0x492   : > { %3595 = vmatmul.f32.gmra.mxu2 %v3317_v62  ;;  %4308 = vmatpush.msrb.mxu0 %v5795_v3 }
 0x493   : > { %v6146_v43 = vpop.eup %6145  ;;  %v3924_v10 = vmul.f32 1.442695, %v3884_v5  ;;  %v4230_v5 = vld [vmem:[%s8068_s9 + $0x8] sm:$0xff] }
 0x494   : > { %v3707_v12 = vpop.f32.mrf.mxu3  ;;  %v5769_v53 = vadd.f32 -1.0, %v6146_v43  ;;  %v3548_v47 = vpop.f32.mrf.mxu2  ;;  %v5794_v43 = vld [vmem:[%s8068_s9 + $0x80] sm:$0xff]  ;;  %4421 = vmatpush.msrb.mxu1 %v4230_v5 }
 0x495   : > { %v3219_v6 = vpop.permute.xlu2 %3218  ;;  %v3785_v15 = vadd.f32 %v3707_v12, %v3546_v1  ;;  %6147 = vpow2.f32 %v3924_v10  ;;  %v3438_v16 = vpop.f32.mrf.mxu1  ;;  %v3549_v38 = vadd.f32 %v3548_v47, %v3435_v48  ;;  %v4229_v12 = vld [vmem:[%s8068_s9] sm:$0xff]  ;;  %4309 = vmatpush.msrb.mxu0 %v5794_v43 }
 0x496   : > { %3287 = vst.msk [vmem:[#allocation2 + $0x151] sm:$0xff] %vm3258_vm4, %v3219_v6  ;;  %v4011_v20 = vsel %vm3851_vm14, %v3819_v22, %v5769_v53  ;;  %v3366_v18 = vld [vmem:[#allocation2 + $0x141] sm:$0xff]  ;;  %4422 = vmatpush.msrb.mxu1 %v4229_v12 }
 0x497   : > { %v3821_v19 = vadd.f32 %v7399_v44, %v3785_v15  ;;  %4082 = vrot.lane.b32.xlu1 %v4011_v20, %s6478_s22  ;;  %v3318_v33 = vld [vmem:[#allocation2 + $0x140] sm:$0xff]  ;;  %3485 = vmatmul.f32.gmra.mxu1 %v3366_v18 }
 0x498   : > { %v3640_v24 = vld [vmem:[#allocation2 + $0x13a] sm:$0xff]  ;;  %v3641_v34 = vld [vmem:[#allocation2 + $0x142] sm:$0xff] }
 0x499   : > { %v3885_v25 = vmin.f32 %v3821_v19, 0.0  ;;  %3757 = vmatmul.f32.gmra.mxu3 %v3640_v24  ;;  %vm3853_vm2 = vcmp.gt.f32.partialorder %v3821_v19, 0.0 }
 0x49a   : > { %3598 = vmatmul.f32.gmra.mxu2 %v3318_v33 }
 0x49b   : > { %v6148_v27 = vpop.eup %6147  ;;  %v3926_v11 = vmul.f32 1.442695, %v3885_v25  ;;  %v5811_v25 = vld [vmem:[%s8068_s9 + $0x108] sm:$0xff] }
 0x49c   : > { %v3710_v21 = vpop.f32.mrf.mxu3  ;;  %v5770_v28 = vadd.f32 -1.0, %v6148_v27  ;;  %v3551_v42 = vpop.f32.mrf.mxu2  ;;  %4583 = vmatpush.msrb.mxu2 %v5811_v25 }
 0x49d   : > { %v3786_v8 = vadd.f32 %v3710_v21, %v3549_v38  ;;  %6149 = vpow2.f32 %v3926_v11  ;;  %v3441_v4 = vpop.f32.mrf.mxu1  ;;  %v3367_v13 = vld [vmem:[#allocation2 + $0x151] sm:$0xff]  ;;  %v3552_v40 = vadd.f32 %v3551_v42, %v3438_v16  ;;  %v5810_v11 = vld [vmem:[%s8068_s9 + $0x100] sm:$0xff] }
 0x49e   : > { %v4012_v17 = vsel %vm3852_vm1, %v3820_v60, %v5770_v28  ;;  %v3319_v39 = vld [vmem:[#allocation2 + $0x150] sm:$0xff]  ;;  %4584 = vmatpush.msrb.mxu2 %v5810_v11 }
 0x49f   : > { %v3822_v31 = vadd.f32 %v7399_v44, %v3786_v8  ;;  %4084 = vrot.lane.b32.xlu2 %v4012_v17, %s6478_s22  ;;  %3488 = vmatmul.f32.gmra.mxu1 %v3367_v13 }
 0x4a1   : > { %v3886_v35 = vmin.f32 %v3822_v31, 0.0  ;;  %3760 = vmatmul.f32.gmra.mxu3 %v3641_v34  ;;  %vm3854_vm3 = vcmp.gt.f32.partialorder %v3822_v31, 0.0 }
 0x4a2   : > { %3601 = vmatmul.f32.gmra.mxu2 %v3319_v39 }
 0x4a3   : > { %v6150_v63 = vpop.eup %6149  ;;  %v3928_v9 = vmul.f32 1.442695, %v3886_v35 }
 0x4a4   : > { %v3713_v41 = vpop.f32.mrf.mxu3  ;;  %v5771_v58 = vadd.f32 -1.0, %v6150_v63  ;;  %v3554_v49 = vpop.f32.mrf.mxu2 }
 0x4a5   : > { %v3787_v45 = vadd.f32 %v3713_v41, %v3552_v40  ;;  %6151 = vpow2.f32 %v3928_v9  ;;  %v3444_v22 = vpop.f32.mrf.mxu1  ;;  %v3555_v54 = vadd.f32 %v3554_v49, %v3441_v4 }
 0x4a6   : > { %v4013_v50 = vsel %vm3853_vm2, %v3821_v19, %v5771_v58 }
 0x4a7   : > { %v3823_v51 = vadd.f32 %v7399_v44, %v3787_v45  ;;  %4086 = vrot.lane.b32.xlu0 %v4013_v50, %s6478_s22 }
 0x4a9   : > { %v3887_v0 = vmin.f32 %v3823_v51, 0.0  ;;  %vm3855_vm5 = vcmp.gt.f32.partialorder %v3823_v51, 0.0 }
 0x4ab   : > { %v6152_v36 = vpop.eup %6151  ;;  %v3930_v52 = vmul.f32 1.442695, %v3887_v0 }
 0x4ac   : > { %v3716_v56 = vpop.f32.mrf.mxu3  ;;  %v5772_v57 = vadd.f32 -1.0, %v6152_v36  ;;  %v3557_v46 = vpop.f32.mrf.mxu2 }
 0x4ad   : > { %v3225_v59 = vpop.permute.xlu2 %3224  ;;  %v3788_v26 = vadd.f32 %v3716_v56, %v3555_v54  ;;  %6153 = vpow2.f32 %v3930_v52  ;;  %v3447_v7 = vpop.f32.mrf.mxu1  ;;  %v3558_v14 = vadd.f32 %v3557_v46, %v3444_v22 }
 0x4ae   : > { %3290 = vst.msk [vmem:[#allocation2 + $0x171] sm:$0xff] %vm3258_vm4, %v3225_v59  ;;  %v4014_v48 = vsel %vm3854_vm3, %v3822_v31, %v5772_v57 }
 0x4af   : > { %v3824_v61 = vadd.f32 %v7399_v44, %v3788_v26  ;;  %4088 = vrot.lane.b32.xlu1 %v4014_v48, %s6478_s22 }
 0x4b1   : > { %v3888_v60 = vmin.f32 %v3824_v61, 0.0  ;;  %vm3856_vm6 = vcmp.gt.f32.partialorder %v3824_v61, 0.0 }
 0x4b3   : > { %v6154_v2 = vpop.eup %6153  ;;  %v3932_v62 = vmul.f32 1.442695, %v3888_v60 }
 0x4b4   : > { %v3719_v1 = vpop.f32.mrf.mxu3  ;;  %v5773_v10 = vadd.f32 -1.0, %v6154_v2  ;;  %v3560_v6 = vpop.f32.mrf.mxu2 }
 0x4b5   : > { %v3221_v53 = vpop.permute.xlu0 %3220  ;;  %v3789_v47 = vadd.f32 %v3719_v1, %v3558_v14  ;;  %6155 = vpow2.f32 %v3932_v62  ;;  %v3450_v15 = vpop.f32.mrf.mxu1  ;;  %v3561_v33 = vadd.f32 %v3560_v6, %v3447_v7  ;;  %v3370_v56 = vld [vmem:[#allocation2 + $0x171] sm:$0xff] }
 0x4b6   : > { %3288 = vst.msk [vmem:[#allocation2 + $0x159] sm:$0xff] %vm3258_vm4, %v3221_v53  ;;  %v4015_v16 = vsel %vm3855_vm5, %v3823_v51, %v5773_v10  ;;  %v3645_v6 = vld [vmem:[#allocation2 + $0x172] sm:$0xff] }
 0x4b7   : > { %v3825_v20 = vadd.f32 %v7399_v44, %v3789_v47  ;;  %4090 = vrot.lane.b32.xlu2 %v4015_v16, %s6478_s22 }
 0x4b9   : > { %v3889_v19 = vmin.f32 %v3825_v20, 0.0 }
 0x4bb   : > { %v6156_v18 = vpop.eup %6155  ;;  %v3934_v24 = vmul.f32 1.442695, %v3889_v19 }
 0x4bc   : > { %v3722_v27 = vpop.f32.mrf.mxu3  ;;  %v5774_v38 = vadd.f32 -1.0, %v6156_v18  ;;  %v3563_v30 = vpop.f32.mrf.mxu2 }
 0x4bd   : > { %v3223_v29 = vpop.permute.xlu1 %3222  ;;  %v3368_v23 = vld [vmem:[#allocation2 + $0x159] sm:$0xff]  ;;  %v3790_v28 = vadd.f32 %v3722_v27, %v3561_v33  ;;  %6157 = vpow2.f32 %v3934_v24  ;;  %v3453_v8 = vpop.f32.mrf.mxu1  ;;  %v3564_v34 = vadd.f32 %v3563_v30, %v3450_v15 }
 0x4be   : > { %v3320_v21 = vld [vmem:[#allocation2 + $0x158] sm:$0xff]  ;;  %3289 = vst.msk [vmem:[#allocation2 + $0x169] sm:$0xff] %vm3258_vm4, %v3223_v29  ;;  %3491 = vmatmul.f32.gmra.mxu1 %v3368_v23  ;;  %v4016_v4 = vsel %vm3856_vm6, %v3824_v61, %v5774_v38  ;;  %vm3857_vm4 = vcmp.gt.f32.partialorder %v3825_v20, 0.0 }
 0x4bf   : > { %v3642_v42 = vld [vmem:[#allocation2 + $0x152] sm:$0xff]  ;;  %3604 = vmatmul.f32.gmra.mxu2 %v3320_v21  ;;  %v3826_v17 = vadd.f32 %v7399_v44, %v3790_v28  ;;  %4092 = vrot.lane.b32.xlu0 %v4016_v4, %s6478_s22  ;;  %v3643_v49 = vld [vmem:[#allocation2 + $0x15a] sm:$0xff] }
 0x4c0   : > { %3763 = vmatmul.f32.gmra.mxu3 %v3642_v42 }
 0x4c1   : > { %v3890_v31 = vmin.f32 %v3826_v17, 0.0  ;;  %vm3858_vm7 = vcmp.gt.f32.partialorder %v3826_v17, 0.0 }
 0x4c3   : > { %v6158_v13 = vpop.eup %6157  ;;  %v3936_v35 = vmul.f32 1.442695, %v3890_v31 }
 0x4c4   : > { %v3725_v39 = vpop.f32.mrf.mxu3  ;;  %v5775_v63 = vadd.f32 -1.0, %v6158_v13  ;;  %v3566_v9 = vpop.f32.mrf.mxu2 }
 0x4c5   : > { %v3369_v40 = vld [vmem:[#allocation2 + $0x169] sm:$0xff]  ;;  %v3791_v58 = vadd.f32 %v3725_v39, %v3564_v34  ;;  %6159 = vpow2.f32 %v3936_v35  ;;  %v3456_v45 = vpop.f32.mrf.mxu1  ;;  %v3567_v54 = vadd.f32 %v3566_v9, %v3453_v8 }
 0x4c6   : > { %v3321_v41 = vld [vmem:[#allocation2 + $0x168] sm:$0xff]  ;;  %3494 = vmatmul.f32.gmra.mxu1 %v3369_v40  ;;  %v4017_v22 = vsel %vm3857_vm4, %v3825_v20, %v5775_v63  ;;  %v3322_v59 = vld [vmem:[#allocation2 + $0x170] sm:$0xff] }
 0x4c7   : > { %3607 = vmatmul.f32.gmra.mxu2 %v3321_v41  ;;  %v3827_v50 = vadd.f32 %v7399_v44, %v3791_v58  ;;  %4094 = vrot.lane.b32.xlu1 %v4017_v22, %s6478_s22  ;;  %v3644_v26 = vld [vmem:[#allocation2 + $0x16a] sm:$0xff] }
 0x4c8   : > { %3766 = vmatmul.f32.gmra.mxu3 %v3643_v49 }
 0x4c9   : > { %v3891_v51 = vmin.f32 %v3827_v50, 0.0  ;;  %v4073_v0 = vpop.permute.xlu2 %4072  ;;  %vm3859_vm8 = vcmp.gt.f32.partialorder %v3827_v50, 0.0 }
 0x4ca   : > { %4167 = vst.msk [vmem:[#allocation2 + $0x19] sm:$0xff] %vm4164_vm15, %v4073_v0 }
 0x4cb   : > { %v6160_v36 = vpop.eup %6159  ;;  %v3938_v52 = vmul.f32 1.442695, %v3891_v51  ;;  %v4069_v37 = vpop.permute.xlu0 %4068 }
 0x4cc   : > { %v3728_v32 = vpop.f32.mrf.mxu3  ;;  %v5776_v55 = vadd.f32 -1.0, %v6160_v36  ;;  %v3569_v57 = vpop.f32.mrf.mxu2  ;;  %4165 = vst.msk [vmem:[#allocation2 + $0x1] sm:$0xff] %vm4164_vm15, %v4069_v37 }
 0x4cd   : > { %v3792_v46 = vadd.f32 %v3728_v32, %v3567_v54  ;;  %6161 = vpow2.f32 %v3938_v52  ;;  %v3459_v7 = vpop.f32.mrf.mxu1  ;;  %v3570_v14 = vadd.f32 %v3569_v57, %v3456_v45 }
 0x4ce   : > { %3497 = vmatmul.f32.gmra.mxu1 %v3370_v56  ;;  %v4018_v48 = vsel %vm3858_vm7, %v3826_v17, %v5776_v55 }
 0x4cf   : > { %3610 = vmatmul.f32.gmra.mxu2 %v3322_v59  ;;  %v3828_v61 = vadd.f32 %v7399_v44, %v3792_v46  ;;  %4096 = vrot.lane.b32.xlu2 %v4018_v48, %s6478_s22 }
 0x4d0   : > { %3769 = vmatmul.f32.gmra.mxu3 %v3644_v26 }
 0x4d1   : > { %v3892_v60 = vmin.f32 %v3828_v61, 0.0  ;;  %vm3860_vm9 = vcmp.gt.f32.partialorder %v3828_v61, 0.0  ;;  %v4247_v34 = vld [vmem:[#allocation2 + $0x19] sm:$0xff] }
 0x4d2   : > { %v4199_v9 = vld [vmem:[#allocation2 + $0x18] sm:$0xff] }
 0x4d3   : > { %v6162_v2 = vpop.eup %6161  ;;  %v3940_v62 = vmul.f32 1.442695, %v3892_v60  ;;  %v4071_v3 = vpop.permute.xlu1 %4070  ;;  %v4245_v43 = vld [vmem:[#allocation2 + $0x1] sm:$0xff] }
 0x4d4   : > { %v3731_v5 = vpop.f32.mrf.mxu3  ;;  %v4197_v1 = vld [vmem:[#allocation2] sm:$0xff]  ;;  %v5777_v10 = vadd.f32 -1.0, %v6162_v2  ;;  %v3572_v12 = vpop.f32.mrf.mxu2  ;;  %4310 = vmatmul.f32.vlgmr.msrb.gmra.mxu0 %v4245_v43  ;;  %4166 = vst.msk [vmem:[#allocation2 + $0x9] sm:$0xff] %vm4164_vm15, %v4071_v3 }
 0x4d5   : > { %v3793_v53 = vadd.f32 %v3731_v5, %v3570_v14  ;;  %6163 = vpow2.f32 %v3940_v62  ;;  %v3462_v47 = vpop.f32.mrf.mxu1  ;;  %v3573_v18 = vadd.f32 %v3572_v12, %v3459_v7  ;;  %v7546_v5 = vld [vmem:[%s8067_s8] ss:$0 sm:$0xff] }
 0x4d6   : > { %4423 = vmatmul.f32.vlgmr.msrb.gmra.mxu1 %v4197_v1  ;;  %v4019_v15 = vsel %vm3859_vm8, %v3827_v50, %v5777_v10 }
 0x4d7   : > { %v3829_v16 = vadd.f32 %v7399_v44, %v3793_v53  ;;  %4098 = vrot.lane.b32.xlu0 %v4019_v15, %s6478_s22 }
 0x4d8   : > { %3772 = vmatmul.f32.gmra.mxu3 %v3645_v6 }
 0x4d9   : > { %v3893_v20 = vmin.f32 %v3829_v16, 0.0  ;;  %vm3861_vm0 = vcmp.gt.f32.partialorder %v3829_v16, 0.0 }
 0x4db   : > { %v6164_v19 = vpop.eup %6163  ;;  %v3942_v33 = vmul.f32 1.442695, %v3893_v20  ;;  %v4246_v25 = vld [vmem:[#allocation2 + $0x9] sm:$0xff] }
 0x4dc   : > { %v3734_v24 = vpop.f32.mrf.mxu3  ;;  %v4198_v27 = vld [vmem:[#allocation2 + $0x8] sm:$0xff]  ;;  %v5778_v11 = vadd.f32 -1.0, %v6164_v19  ;;  %4313 = vmatmul.f32.gmra.mxu0 %v4246_v25 }
 0x4dd   : > { %v4520_v38 = vld [vmem:[#allocation2 + $0x2] sm:$0xff]  ;;  %v3575_v29 = vpop.f32.mrf.mxu2  ;;  %v3794_v23 = vadd.f32 %v3734_v24, %v3573_v18  ;;  %6165 = vpow2.f32 %v3942_v33  ;;  %v3465_v30 = vpop.f32.mrf.mxu1  ;;  %v4521_v35 = vld [vmem:[#allocation2 + $0xa] sm:$0xff] }
 0x4de   : > { %4585 = vmatmul.f32.vlgmr.msrb.gmra.mxu2 %v4520_v38  ;;  %4426 = vmatmul.f32.gmra.mxu1 %v4198_v27  ;;  %v4020_v21 = vsel %vm3860_vm9, %v3828_v61, %v5778_v11  ;;  %v3576_v17 = vadd.f32 %v3575_v29, %v3462_v47 }
 0x4df   : > { %v3830_v28 = vadd.f32 %v7399_v44, %v3794_v23  ;;  %4100 = vrot.lane.b32.xlu1 %v4020_v21, %s6478_s22 }
 0x4e1   : > { %v3894_v42 = vmin.f32 %v3830_v28, 0.0  ;;  %v4079_v8 = vpop.permute.xlu2 %4078  ;;  %vm3862_vm10 = vcmp.gt.f32.partialorder %v3830_v28, 0.0 }
 0x4e2   : > { %4170 = vst.msk [vmem:[#allocation2 + $0x39] sm:$0xff] %vm4164_vm15, %v4079_v8 }
 0x4e3   : > { %v6166_v4 = vpop.eup %6165  ;;  %v3944_v31 = vmul.f32 1.442695, %v3894_v42 }
 0x4e4   : > { %v3737_v13 = vpop.f32.mrf.mxu3  ;;  %v5779_v39 = vadd.f32 -1.0, %v6166_v4  ;;  %4316 = vmatmul.f32.gmra.mxu0 %v4247_v34 }
 0x4e5   : > { %v3578_v63 = vpop.f32.mrf.mxu2  ;;  %v3795_v40 = vadd.f32 %v3737_v13, %v3576_v17  ;;  %6167 = vpow2.f32 %v3944_v31  ;;  %v3468_v41 = vpop.f32.mrf.mxu1 }
 0x4e6   : > { %4588 = vmatmul.f32.gmra.mxu2 %v4521_v35  ;;  %4429 = vmatmul.f32.gmra.mxu1 %v4199_v9  ;;  %v4021_v58 = vsel %vm3861_vm0, %v3829_v16, %v5779_v39  ;;  %v3579_v51 = vadd.f32 %v3578_v63, %v3465_v30 }
 0x4e7   : > { %v3831_v49 = vadd.f32 %v7399_v44, %v3795_v40  ;;  %4102 = vrot.lane.b32.xlu2 %v4021_v58, %s6478_s22 }
 0x4e9   : > { %v3895_v45 = vmin.f32 %v3831_v49, 0.0  ;;  %v4075_v22 = vpop.permute.xlu0 %4074  ;;  %vm3863_vm11 = vcmp.gt.f32.partialorder %v3831_v49, 0.0  ;;  %v4250_v29 = vld [vmem:[#allocation2 + $0x39] sm:$0xff] }
 0x4ea   : > { %4168 = vst.msk [vmem:[#allocation2 + $0x21] sm:$0xff] %vm4164_vm15, %v4075_v22 }
 0x4eb   : > { %v6168_v50 = vpop.eup %6167  ;;  %v3946_v0 = vmul.f32 1.442695, %v3895_v45 }
 0x4ec   : > { %v3740_v36 = vpop.f32.mrf.mxu3  ;;  %v5780_v54 = vadd.f32 -1.0, %v6168_v50 }
 0x4ed   : > { %v3581_v52 = vpop.f32.mrf.mxu2  ;;  %v3796_v37 = vadd.f32 %v3740_v36, %v3579_v51  ;;  %6169 = vpow2.f32 %v3946_v0  ;;  %v3471_v56 = vpop.f32.mrf.mxu1 }
 0x4ee   : > { %v4022_v32 = vsel %vm3862_vm10, %v3830_v28, %v5780_v54  ;;  %v3582_v61 = vadd.f32 %v3581_v52, %v3468_v41  ;;  %v4525_v41 = vld [vmem:[#allocation2 + $0x3a] sm:$0xff] }
 0x4ef   : > { %v3832_v55 = vadd.f32 %v7399_v44, %v3796_v37  ;;  %4104 = vrot.lane.b32.xlu0 %v4022_v32, %s6478_s22 }
 0x4f1   : > { %v3896_v57 = vmin.f32 %v3832_v55, 0.0  ;;  %v4077_v59 = vpop.permute.xlu1 %4076  ;;  %v4248_v46 = vld [vmem:[#allocation2 + $0x21] sm:$0xff]  ;;  %vm3864_vm12 = vcmp.gt.f32.partialorder %v3832_v55, 0.0 }
 0x4f2   : > { %v4200_v26 = vld [vmem:[#allocation2 + $0x20] sm:$0xff]  ;;  %4169 = vst.msk [vmem:[#allocation2 + $0x31] sm:$0xff] %vm4164_vm15, %v4077_v59  ;;  %4319 = vmatmul.f32.gmra.mxu0 %v4248_v46 }
 0x4f3   : > { %v4522_v7 = vld [vmem:[#allocation2 + $0x1a] sm:$0xff]  ;;  %4432 = vmatmul.f32.gmra.mxu1 %v4200_v26  ;;  %v6170_v48 = vpop.eup %6169  ;;  %v3948_v60 = vmul.f32 1.442695, %v3896_v57  ;;  %v4523_v47 = vld [vmem:[#allocation2 + $0x22] sm:$0xff] }
 0x4f4   : > { %4591 = vmatmul.f32.gmra.mxu2 %v4522_v7  ;;  %v3743_v2 = vpop.f32.mrf.mxu3  ;;  %v5781_v14 = vadd.f32 -1.0, %v6170_v48 }
 0x4f5   : > { %v3584_v62 = vpop.f32.mrf.mxu2  ;;  %v3797_v44 = vadd.f32 %v3743_v2, %v3582_v61  ;;  %6171 = vpow2.f32 %v3948_v60  ;;  %v3474_v6 = vpop.f32.mrf.mxu1 }
 0x4f6   : > { %v4023_v3 = vsel %vm3863_vm11, %v3831_v49, %v5781_v14  ;;  %v3585_v16 = vadd.f32 %v3584_v62, %v3471_v56 }
 0x4f7   : > { %v3833_v43 = vadd.f32 %v7546_v5, %v3797_v44  ;;  %4106 = vrot.lane.b32.xlu1 %v4023_v3, %s6478_s22 }
 0x4f9   : > { %v3897_v1 = vmin.f32 %v3833_v43, 0.0  ;;  %v4085_v10 = vpop.permute.xlu2 %4084  ;;  %v4249_v12 = vld [vmem:[#allocation2 + $0x31] sm:$0xff]  ;;  %vm3865_vm13 = vcmp.gt.f32.partialorder %v3833_v43, 0.0 }
 0x4fa   : > { %v4201_v53 = vld [vmem:[#allocation2 + $0x30] sm:$0xff]  ;;  %4173 = vst.msk [vmem:[#allocation2 + $0x61] sm:$0xff] %vm4164_vm15, %v4085_v10  ;;  %4322 = vmatmul.f32.gmra.mxu0 %v4249_v12  ;;  %v4202_v23 = vld [vmem:[#allocation2 + $0x38] sm:$0xff] }
 0x4fb   : > { %4435 = vmatmul.f32.gmra.mxu1 %v4201_v53  ;;  %v6172_v15 = vpop.eup %6171  ;;  %v3950_v20 = vmul.f32 1.442695, %v3897_v1  ;;  %v4524_v30 = vld [vmem:[#allocation2 + $0x32] sm:$0xff] }
 0x4fc   : > { %4594 = vmatmul.f32.gmra.mxu2 %v4523_v47  ;;  %v3746_v19 = vpop.f32.mrf.mxu3  ;;  %v5782_v18 = vadd.f32 -1.0, %v6172_v15 }
 0x4fd   : > { %v3587_v33 = vpop.f32.mrf.mxu2  ;;  %v3798_v24 = vadd.f32 %v3746_v19, %v3585_v16  ;;  %6173 = vpow2.f32 %v3950_v20  ;;  %v3477_v8 = vpop.f32.mrf.mxu1 }
 0x4fe   : > { %v4024_v25 = vsel %vm3864_vm12, %v3832_v55, %v5782_v18  ;;  %v3588_v28 = vadd.f32 %v3587_v33, %v3474_v6 }
 0x4ff   : > { %v3834_v27 = vadd.f32 %v7546_v5, %v3798_v24  ;;  %4108 = vrot.lane.b32.xlu2 %v4024_v25, %s6478_s22 }
 0x501   : > { %v3898_v38 = vmin.f32 %v3834_v27, 0.0  ;;  %v4081_v11 = vpop.permute.xlu0 %4080  ;;  %vm3866_vm14 = vcmp.gt.f32.partialorder %v3834_v27, 0.0  ;;  %v4205_v1 = vld [vmem:[#allocation2 + $0x60] sm:$0xff] }
 0x502   : > { %4171 = vst.msk [vmem:[#allocation2 + $0x49] sm:$0xff] %vm4164_vm15, %v4081_v11  ;;  %4325 = vmatmul.f32.gmra.mxu0 %v4250_v29 }
 0x503   : > { %4438 = vmatmul.f32.gmra.mxu1 %v4202_v23  ;;  %v6174_v21 = vpop.eup %6173  ;;  %v3952_v42 = vmul.f32 1.442695, %v3898_v38 }
 0x504   : > { %4597 = vmatmul.f32.gmra.mxu2 %v4524_v30  ;;  %v3749_v4 = vpop.f32.mrf.mxu3  ;;  %v5783_v17 = vadd.f32 -1.0, %v6174_v21 }
 0x505   : > { %v3590_v31 = vpop.f32.mrf.mxu2  ;;  %v3799_v13 = vadd.f32 %v3749_v4, %v3588_v28  ;;  %6175 = vpow2.f32 %v3952_v42  ;;  %v3480_v36 = vpop.f32.mrf.mxu1 }
 0x506   : > { %v4025_v34 = vsel %vm3865_vm13, %v3833_v43, %v5783_v17  ;;  %v3591_v49 = vadd.f32 %v3590_v31, %v3477_v8  ;;  %v4253_v43 = vld [vmem:[#allocation2 + $0x61] sm:$0xff] }
 0x507   : > { %v3835_v35 = vadd.f32 %v7546_v5, %v3799_v13  ;;  %4110 = vrot.lane.b32.xlu0 %v4025_v34, %s6478_s22 }
 0x509   : > { %v3899_v39 = vmin.f32 %v3835_v35, 0.0  ;;  %v4083_v63 = vpop.permute.xlu1 %4082  ;;  %v4251_v40 = vld [vmem:[#allocation2 + $0x49] sm:$0xff]  ;;  %vm3867_vm1 = vcmp.gt.f32.partialorder %v3835_v35, 0.0 }
 0x50a   : > { %v4203_v9 = vld [vmem:[#allocation2 + $0x48] sm:$0xff]  ;;  %4172 = vst.msk [vmem:[#allocation2 + $0x51] sm:$0xff] %vm4164_vm15, %v4083_v63  ;;  %4328 = vmatmul.f32.gmra.mxu0 %v4251_v40 }
 0x50b   : > { %4441 = vmatmul.f32.gmra.mxu1 %v4203_v9  ;;  %v6176_v58 = vpop.eup %6175  ;;  %v3954_v45 = vmul.f32 1.442695, %v3899_v39 }
 0x50c   : > { %4600 = vmatmul.f32.gmra.mxu2 %v4525_v41  ;;  %v3752_v22 = vpop.f32.mrf.mxu3  ;;  %v5784_v50 = vadd.f32 -1.0, %v6176_v58 }
 0x50d   : > { %v3593_v51 = vpop.f32.mrf.mxu2  ;;  %v3800_v0 = vadd.f32 %v3752_v22, %v3591_v49  ;;  %6177 = vpow2.f32 %v3954_v45  ;;  %v3483_v62 = vpop.f32.mrf.mxu1 }
 0x50e   : > { %v4026_v54 = vsel %vm3866_vm14, %v3834_v27, %v5784_v50  ;;  %v3594_v46 = vadd.f32 %v3593_v51, %v3480_v36 }
 0x50f   : > { %v3836_v52 = vadd.f32 %v7546_v5, %v3800_v0  ;;  %4112 = vrot.lane.b32.xlu1 %v4026_v54, %s6478_s22 }
 0x511   : > { %v3900_v37 = vmin.f32 %v3836_v52, 0.0  ;;  %v4091_v32 = vpop.permute.xlu2 %4090  ;;  %v4252_v55 = vld [vmem:[#allocation2 + $0x51] sm:$0xff]  ;;  %vm3868_vm2 = vcmp.gt.f32.partialorder %v3836_v52, 0.0 }
 0x512   : > { %v4204_v56 = vld [vmem:[#allocation2 + $0x50] sm:$0xff]  ;;  %4176 = vst.msk [vmem:[#allocation2 + $0x81] sm:$0xff] %vm4164_vm15, %v4091_v32  ;;  %4331 = vmatmul.f32.gmra.mxu0 %v4252_v55 }
 0x513   : > { %v4526_v57 = vld [vmem:[#allocation2 + $0x4a] sm:$0xff]  ;;  %4444 = vmatmul.f32.gmra.mxu1 %v4204_v56  ;;  %v6178_v59 = vpop.eup %6177  ;;  %v3956_v26 = vmul.f32 1.442695, %v3900_v37  ;;  %v4527_v10 = vld [vmem:[#allocation2 + $0x52] sm:$0xff] }
 0x514   : > { %4603 = vmatmul.f32.gmra.mxu2 %v4526_v57  ;;  %v3755_v7 = vpop.f32.mrf.mxu3  ;;  %v5785_v48 = vadd.f32 -1.0, %v6178_v59 }
 0x515   : > { %v3801_v61 = vadd.f32 %v3755_v7, %v3594_v46  ;;  %6179 = vpow2.f32 %v3956_v26  ;;  %v3596_v60 = vpop.f32.mrf.mxu2  ;;  %v3486_v11 = vpop.f32.mrf.mxu1 }
 0x516   : > { %v4027_v2 = vsel %vm3867_vm1, %v3835_v35, %v5785_v48  ;;  %v3597_v53 = vadd.f32 %v3596_v60, %v3483_v62 }
 0x517   : > { %v3837_v14 = vadd.f32 %v7546_v5, %v3801_v61  ;;  %4114 = vrot.lane.b32.xlu2 %v4027_v2, %s6478_s22 }
 0x519   : > { %v3901_v44 = vmin.f32 %v3837_v14, 0.0  ;;  %v4087_v3 = vpop.permute.xlu0 %4086  ;;  %vm3869_vm3 = vcmp.gt.f32.partialorder %v3837_v14, 0.0  ;;  %v4256_v58 = vld [vmem:[#allocation2 + $0x81] sm:$0xff] }
 0x51a   : > { %4174 = vst.msk [vmem:[#allocation2 + $0x69] sm:$0xff] %vm4164_vm15, %v4087_v3  ;;  %4334 = vmatmul.f32.gmra.mxu0 %v4253_v43  ;;  %v4531_v32 = vld [vmem:[#allocation2 + $0x82] sm:$0xff] }
 0x51b   : > { %4447 = vmatmul.f32.gmra.mxu1 %v4205_v1  ;;  %v6180_v12 = vpop.eup %6179  ;;  %v3958_v6 = vmul.f32 1.442695, %v3901_v44 }
 0x51c   : > { %4606 = vmatmul.f32.gmra.mxu2 %v4527_v10  ;;  %v3758_v47 = vpop.f32.mrf.mxu3  ;;  %v5786_v15 = vadd.f32 -1.0, %v6180_v12 }
 0x51d   : > { %v3802_v16 = vadd.f32 %v3758_v47, %v3597_v53  ;;  %6181 = vpow2.f32 %v3958_v6  ;;  %v3599_v18 = vpop.f32.mrf.mxu2  ;;  %v3489_v50 = vpop.f32.mrf.mxu1 }
 0x51e   : > { %v4028_v20 = vsel %vm3868_vm2, %v3836_v52, %v5786_v15  ;;  %v3600_v23 = vadd.f32 %v3599_v18, %v3486_v11 }
 0x51f   : > { %v3838_v19 = vadd.f32 %v7546_v5, %v3802_v16  ;;  %4116 = vrot.lane.b32.xlu0 %v4028_v20, %s6478_s22 }
 0x521   : > { %v3902_v33 = vmin.f32 %v3838_v19, 0.0  ;;  %v4089_v24 = vpop.permute.xlu1 %4088  ;;  %v4254_v25 = vld [vmem:[#allocation2 + $0x69] sm:$0xff]  ;;  %vm3870_vm5 = vcmp.gt.f32.partialorder %v3838_v19, 0.0 }
 0x522   : > { %v4206_v27 = vld [vmem:[#allocation2 + $0x68] sm:$0xff]  ;;  %4175 = vst.msk [vmem:[#allocation2 + $0x79] sm:$0xff] %vm4164_vm15, %v4089_v24  ;;  %4337 = vmatmul.f32.gmra.mxu0 %v4254_v25 }
 0x523   : > { %v4528_v38 = vld [vmem:[#allocation2 + $0x62] sm:$0xff]  ;;  %4450 = vmatmul.f32.gmra.mxu1 %v4206_v27  ;;  %v6182_v29 = vpop.eup %6181  ;;  %v3960_v30 = vmul.f32 1.442695, %v3902_v33  ;;  %v4529_v35 = vld [vmem:[#allocation2 + $0x6a] sm:$0xff] }
 0x524   : > { %4609 = vmatmul.f32.gmra.mxu2 %v4528_v38  ;;  %v3761_v21 = vpop.f32.mrf.mxu3  ;;  %v5787_v28 = vadd.f32 -1.0, %v6182_v29 }
 0x525   : > { %v3803_v42 = vadd.f32 %v3761_v21, %v3600_v23  ;;  %6183 = vpow2.f32 %v3960_v30  ;;  %v3602_v37 = vpop.f32.mrf.mxu2 }
 0x526   : > { %v4029_v8 = vsel %vm3869_vm3, %v3837_v14, %v5787_v28  ;;  %v3603_v56 = vadd.f32 %v3602_v37, %v3489_v50 }
 0x527   : > { %v3839_v4 = vadd.f32 %v7546_v5, %v3803_v42  ;;  %4118 = vrot.lane.b32.xlu1 %v4029_v8, %s6478_s22 }
 0x529   : > { %v3903_v17 = vmin.f32 %v3839_v4, 0.0  ;;  %v4097_v31 = vpop.permute.xlu2 %4096  ;;  %v4255_v13 = vld [vmem:[#allocation2 + $0x79] sm:$0xff]  ;;  %vm3871_vm6 = vcmp.gt.f32.partialorder %v3839_v4, 0.0 }
 0x52a   : > { %v4207_v34 = vld [vmem:[#allocation2 + $0x78] sm:$0xff]  ;;  %4179 = vst.msk [vmem:[#allocation2 + $0xa9] sm:$0xff] %vm4164_vm15, %v4097_v31  ;;  %4340 = vmatmul.f32.gmra.mxu0 %v4255_v13  ;;  %v4208_v49 = vld [vmem:[#allocation2 + $0x80] sm:$0xff] }
 0x52b   : > { %4453 = vmatmul.f32.gmra.mxu1 %v4207_v34  ;;  %v6184_v39 = vpop.eup %6183  ;;  %v3962_v63 = vmul.f32 1.442695, %v3903_v17  ;;  %v4530_v45 = vld [vmem:[#allocation2 + $0x7a] sm:$0xff] }
 0x52c   : > { %4612 = vmatmul.f32.gmra.mxu2 %v4529_v35  ;;  %v5788_v40 = vadd.f32 -1.0, %v6184_v39 }
 0x52d   : > { %6185 = vpow2.f32 %v3962_v63 }
 0x52e   : > { %v4030_v9 = vsel %vm3870_vm5, %v3838_v19, %v5788_v40 }
 0x52f   : > { %4120 = vrot.lane.b32.xlu2 %v4030_v9, %s6478_s22 }
 0x531   : > { %v4093_v41 = vpop.permute.xlu0 %4092  ;;  %v4259_v43 = vld [vmem:[#allocation2 + $0xa9] sm:$0xff] }
 0x532   : > { %4177 = vst.msk [vmem:[#allocation2 + $0x91] sm:$0xff] %vm4164_vm15, %v4093_v41  ;;  %4343 = vmatmul.f32.gmra.mxu0 %v4256_v58  ;;  %v4211_v1 = vld [vmem:[#allocation2 + $0xa8] sm:$0xff] }
 0x533   : > { %4456 = vmatmul.f32.gmra.mxu1 %v4208_v49  ;;  %v6186_v22 = vpop.eup %6185 }
 0x534   : > { %4615 = vmatmul.f32.gmra.mxu2 %v4530_v45  ;;  %v5789_v51 = vadd.f32 -1.0, %v6186_v22 }
 0x536   : > { %v4031_v0 = vsel %vm3871_vm6, %v3839_v4, %v5789_v51  ;;  %v7586_v51 = vld [vmem:[%s8069_s10] ss:$0 sm:$0xff] }
 0x537   : > { %4122 = vrot.lane.b32.xlu0 %v4031_v0, %s6478_s22 }
 0x539   : > { %v4095_v36 = vpop.permute.xlu1 %4094  ;;  %v4257_v54 = vld [vmem:[#allocation2 + $0x91] sm:$0xff] }
 0x53a   : > { %v4209_v52 = vld [vmem:[#allocation2 + $0x90] sm:$0xff]  ;;  %4178 = vst.msk [vmem:[#allocation2 + $0x99] sm:$0xff] %vm4164_vm15, %v4095_v36  ;;  %4346 = vmatmul.f32.gmra.mxu0 %v4257_v54 }
 0x53b   : > { %4459 = vmatmul.f32.gmra.mxu1 %v4209_v52  ;;  %v3492_v55 = vpop.f32.mrf.mxu1 }
 0x53c   : > { %4618 = vmatmul.f32.gmra.mxu2 %v4531_v32 }
 0x541   : > { %v4103_v57 = vpop.permute.xlu2 %4102  ;;  %v4258_v59 = vld [vmem:[#allocation2 + $0x99] sm:$0xff] }
 0x542   : > { %v4210_v46 = vld [vmem:[#allocation2 + $0x98] sm:$0xff]  ;;  %v3605_v7 = vpop.f32.mrf.mxu2  ;;  %4182 = vst.msk [vmem:[#allocation2 + $0xc9] sm:$0xff] %vm4164_vm15, %v4103_v57  ;;  %4349 = vmatmul.f32.gmra.mxu0 %v4258_v59 }
 0x543   : > { %v4532_v26 = vld [vmem:[#allocation2 + $0x92] sm:$0xff]  ;;  %v3764_v48 = vpop.f32.mrf.mxu3  ;;  %4462 = vmatmul.f32.gmra.mxu1 %v4210_v46  ;;  %v3495_v60 = vpop.f32.mrf.mxu1  ;;  %v3606_v62 = vadd.f32 %v3605_v7, %v3492_v55  ;;  %v4533_v12 = vld [vmem:[#allocation2 + $0x9a] sm:$0xff] }
 0x544   : > { %v3804_v61 = vadd.f32 %v3764_v48, %v3603_v56  ;;  %4621 = vmatmul.f32.gmra.mxu2 %v4532_v26 }
 0x546   : > { %v3840_v2 = vadd.f32 %v7546_v5, %v3804_v61 }
 0x548   : > { %v3904_v14 = vmin.f32 %v3840_v2, 0.0  ;;  %vm3872_vm4 = vcmp.gt.f32.partialorder %v3840_v2, 0.0 }
 0x549   : > { %v4099_v3 = vpop.permute.xlu0 %4098  ;;  %v4262_v32 = vld [vmem:[#allocation2 + $0xc9] sm:$0xff] }
 0x54a   : > { %v3964_v44 = vmul.f32 1.442695, %v3904_v14  ;;  %4180 = vst.msk [vmem:[#allocation2 + $0xb1] sm:$0xff] %vm4164_vm15, %v4099_v3  ;;  %4352 = vmatmul.f32.gmra.mxu0 %v4259_v43  ;;  %v3608_v47 = vpop.f32.mrf.mxu2 }
 0x54b   : > { %v3767_v10 = vpop.f32.mrf.mxu3  ;;  %4465 = vmatmul.f32.gmra.mxu1 %v4211_v1  ;;  %v3498_v6 = vpop.f32.mrf.mxu1  ;;  %v3609_v19 = vadd.f32 %v3608_v47, %v3495_v60  ;;  %v4537_v1 = vld [vmem:[#allocation2 + $0xca] sm:$0xff] }
 0x54c   : > { %v3805_v53 = vadd.f32 %v3767_v10, %v3606_v62  ;;  %4624 = vmatmul.f32.gmra.mxu2 %v4533_v12  ;;  %6187 = vpow2.f32 %v3964_v44 }
 0x54e   : > { %v3841_v15 = vadd.f32 %v7546_v5, %v3805_v53 }
 0x550   : > { %v3905_v16 = vmin.f32 %v3841_v15, 0.0  ;;  %vm3873_vm7 = vcmp.gt.f32.partialorder %v3841_v15, 0.0 }
 0x551   : > { %v4101_v33 = vpop.permute.xlu1 %4100  ;;  %v4260_v24 = vld [vmem:[#allocation2 + $0xb1] sm:$0xff]  ;;  %v4311_v23 = vpop.f32.mrf.mxu0 }
 0x552   : > { %v6188_v20 = vpop.eup %6187  ;;  %v3966_v18 = vmul.f32 1.442695, %v3905_v16  ;;  %v4212_v25 = vld [vmem:[#allocation2 + $0xb0] sm:$0xff]  ;;  %4181 = vst.msk [vmem:[#allocation2 + $0xc1] sm:$0xff] %vm4164_vm15, %v4101_v33  ;;  %4355 = vmatmul.f32.gmra.mxu0 %v4260_v24  ;;  %v3611_v42 = vpop.f32.mrf.mxu2 }
 0x553   : > { %v4534_v27 = vld [vmem:[#allocation2 + $0xaa] sm:$0xff]  ;;  %v3770_v38 = vpop.f32.mrf.mxu3  ;;  %v5790_v11 = vadd.f32 -1.0, %v6188_v20  ;;  %4468 = vmatmul.f32.gmra.mxu1 %v4212_v25  ;;  %v4424_v30 = vpop.f32.mrf.mxu1  ;;  %v3612_v17 = vadd.f32 %v3611_v42, %v3498_v6  ;;  %v4535_v40 = vld [vmem:[#allocation2 + $0xb2] sm:$0xff] }
 0x554   : > { %v3806_v29 = vadd.f32 %v3770_v38, %v3609_v19  ;;  %4627 = vmatmul.f32.gmra.mxu2 %v4534_v27  ;;  %6189 = vpow2.f32 %v3966_v18  ;;  %v4425_v22 = vadd.f32 %v4424_v30, %v4311_v23 }
 0x555   : > { %v4032_v21 = vsel %vm3872_vm4, %v3840_v2, %v5790_v11 }
 0x556   : > { %v3842_v28 = vadd.f32 %v7546_v5, %v3806_v29  ;;  %4124 = vrot.lane.b32.xlu1 %v4032_v21, %s6478_s22 }
 0x558   : > { %v3906_v8 = vmin.f32 %v3842_v28, 0.0  ;;  %vm3874_vm8 = vcmp.gt.f32.partialorder %v3842_v28, 0.0 }
 0x559   : > { %v4109_v13 = vpop.permute.xlu2 %4108  ;;  %v4261_v34 = vld [vmem:[#allocation2 + $0xc1] sm:$0xff]  ;;  %v4314_v49 = vpop.f32.mrf.mxu0 }
 0x55a   : > { %v6190_v4 = vpop.eup %6189  ;;  %v3968_v31 = vmul.f32 1.442695, %v3906_v8  ;;  %v4213_v35 = vld [vmem:[#allocation2 + $0xc0] sm:$0xff]  ;;  %4185 = vst.msk [vmem:[#allocation2 + $0xf1] sm:$0xff] %vm4164_vm15, %v4109_v13  ;;  %4358 = vmatmul.f32.gmra.mxu0 %v4261_v34  ;;  %v4214_v55 = vld [vmem:[#allocation2 + $0xc8] sm:$0xff] }
 0x55b   : > { %v3773_v39 = vpop.f32.mrf.mxu3  ;;  %v5791_v63 = vadd.f32 -1.0, %v6190_v4  ;;  %4471 = vmatmul.f32.gmra.mxu1 %v4213_v35  ;;  %v4427_v45 = vpop.f32.mrf.mxu1  ;;  %v4536_v56 = vld [vmem:[#allocation2 + $0xc2] sm:$0xff] }
 0x55c   : > { %v3807_v9 = vadd.f32 %v3773_v39, %v3612_v17  ;;  %4630 = vmatmul.f32.gmra.mxu2 %v4535_v40  ;;  %6191 = vpow2.f32 %v3968_v31  ;;  %v4428_v26 = vadd.f32 %v4427_v45, %v4314_v49 }
 0x55d   : > { %v4033_v41 = vsel %vm3873_vm7, %v3841_v15, %v5791_v63 }
 0x55e   : > { %v3843_v58 = vadd.f32 %v7546_v5, %v3807_v9  ;;  %4126 = vrot.lane.b32.xlu2 %v4033_v41, %s6478_s22 }
 0x560   : > { %v3907_v50 = vmin.f32 %v3843_v58, 0.0  ;;  %vm3875_vm9 = vcmp.gt.f32.partialorder %v3843_v58, 0.0 }
 0x561   : > { %v4586_v0 = vpop.f32.mrf.mxu2  ;;  %v4105_v37 = vpop.permute.xlu0 %4104  ;;  %v4265_v8 = vld [vmem:[#allocation2 + $0xf1] sm:$0xff] }
 0x562   : > { %v6192_v36 = vpop.eup %6191  ;;  %v3970_v54 = vmul.f32 1.442695, %v3907_v50  ;;  %v4682_v52 = vadd.f32 %v4586_v0, %v4425_v22  ;;  %4183 = vst.msk [vmem:[#allocation2 + $0xd9] sm:$0xff] %vm4164_vm15, %v4105_v37  ;;  %4361 = vmatmul.f32.gmra.mxu0 %v4262_v32  ;;  %v4317_v48 = vpop.f32.mrf.mxu0  ;;  %v4217_v4 = vld [vmem:[#allocation2 + $0xf0] sm:$0xff] }
 0x563   : > { %v5792_v5 = vadd.f32 -1.0, %v6192_v36  ;;  %4474 = vmatmul.f32.gmra.mxu1 %v4214_v55  ;;  %v4430_v61 = vpop.f32.mrf.mxu1 }
 0x564   : > { %v7590_v57 = vadd.f32 %v7586_v51, %v4682_v52  ;;  %4633 = vmatmul.f32.gmra.mxu2 %v4536_v56  ;;  %6193 = vpow2.f32 %v3970_v54  ;;  %v4431_v25 = vadd.f32 %v4430_v61, %v4317_v48 }
 0x565   : > { %v4034_v59 = vsel %vm3874_vm8, %v3842_v28, %v5792_v5 }
 0x566   : > { %v4750_v46 = vsub.f32 0.0, %v7590_v57  ;;  %4128 = vrot.lane.b32.xlu0 %v4034_v59, %s6478_s22 }
 0x568   : > { %v4782_v7 = vmul.f32 1.442695, %v4750_v46 }
 0x569   : > { %v4589_v60 = vpop.f32.mrf.mxu2  ;;  %v4107_v62 = vpop.permute.xlu1 %4106  ;;  %v4263_v44 = vld [vmem:[#allocation2 + $0xd9] sm:$0xff] }
 0x56a   : > { %v6194_v2 = vpop.eup %6193  ;;  %6195 = vpow2.f32 %v4782_v7  ;;  %v4683_v14 = vadd.f32 %v4589_v60, %v4428_v26  ;;  %v4215_v3 = vld [vmem:[#allocation2 + $0xd8] sm:$0xff]  ;;  %4184 = vst.msk [vmem:[#allocation2 + $0xe1] sm:$0xff] %vm4164_vm15, %v4107_v62  ;;  %4364 = vmatmul.f32.gmra.mxu0 %v4263_v44 }
 0x56b   : > { %v5793_v43 = vadd.f32 -1.0, %v6194_v2  ;;  %4477 = vmatmul.f32.gmra.mxu1 %v4215_v3 }
 0x56c   : > { %v7596_v10 = vadd.f32 %v7586_v51, %v4683_v14  ;;  %4636 = vmatmul.f32.gmra.mxu2 %v4537_v1 }
 0x56d   : > { %v4035_v12 = vsel %vm3875_vm9, %v3843_v58, %v5793_v43 }
 0x56e   : > { %v4751_v53 = vsub.f32 0.0, %v7596_v10  ;;  %4130 = vrot.lane.b32.xlu1 %v4035_v12, %s6478_s22  ;;  %s6479_s22 = smov 120  }
 0x56f   : > { %v4320_v15 = vpop.f32.mrf.mxu0 }
 0x570   : > { %v6196_v6 = vpop.eup %6195  ;;  %v4784_v47 = vmul.f32 1.442695, %v4751_v53  ;;  %v4433_v16 = vpop.f32.mrf.mxu1 }
 0x571   : > { %v4846_v20 = vadd.f32 1.0, %v6196_v6  ;;  %v4115_v19 = vpop.permute.xlu2 %4114  ;;  %v4264_v18 = vld [vmem:[#allocation2 + $0xe1] sm:$0xff]  ;;  %v4434_v35 = vadd.f32 %v4433_v16, %v4320_v15 }
 0x572   : > { %6197 = vpow2.f32 %v4784_v47  ;;  %v4216_v33 = vld [vmem:[#allocation2 + $0xe0] sm:$0xff]  ;;  %4188 = vst.msk [vmem:[#allocation2 + $0x111] sm:$0xff] %vm4164_vm15, %v4115_v19  ;;  %4367 = vmatmul.f32.gmra.mxu0 %v4264_v18 }
 0x573   : > { %v4538_v24 = vld [vmem:[#allocation2 + $0xda] sm:$0xff]  ;;  %6199 = vrcp.f32 %v4846_v20  ;;  %4480 = vmatmul.f32.gmra.mxu1 %v4216_v33  ;;  %v4539_v31 = vld [vmem:[#allocation2 + $0xe2] sm:$0xff]  ;;  %v4889_v39 = vand.u32 2147483648, %v4846_v20  ;;  %v4887_v9 = vand.u32 2147483647, %v4846_v20  ;;  %vm4883_vm10 = vweird.f32 %v4846_v20 }
 0x574   : > { %4639 = vmatmul.f32.gmra.mxu2 %v4538_v24 }
 0x575   : > { %v4890_v0 = vor.u32 1.1754944e-38, %v4889_v39  ;;  %vm4888_vm12 = vcmp.eq.f32.partialorder %v4887_v9, 8.507059e+37 }
 0x577   : > { %v4592_v27 = vpop.f32.mrf.mxu2  ;;  %v4323_v29 = vpop.f32.mrf.mxu0 }
 0x578   : > { %v6198_v38 = vpop.eup %6197  ;;  %v4684_v11 = vadd.f32 %v4592_v27, %v4431_v25  ;;  %v4436_v23 = vpop.f32.mrf.mxu1 }
 0x579   : > { %v6200_v30 = vpop.eup %6199  ;;  %v7601_v21 = vadd.f32 1.0, %v6198_v38  ;;  %v4111_v42 = vpop.permute.xlu0 %4110  ;;  %v4437_v26 = vadd.f32 %v4436_v23, %v4323_v29 }
 0x57a   : > { %v7604_v28 = vadd.f32 %v7586_v51, %v4684_v11  ;;  %v4879_v17 = vmul.f32 %v6200_v30, %v4846_v20  ;;  %4186 = vst.msk [vmem:[#allocation2 + $0xf9] sm:$0xff] %vm4164_vm15, %v4111_v42  ;;  %4370 = vmatmul.f32.gmra.mxu0 %v4265_v8  ;;  %vm4884_vm0 = vweird.f32 %v6200_v30 }
 0x57b   : > { %6201 = vrcp.f32 %v7601_v21  ;;  %4483 = vmatmul.f32.gmra.mxu1 %v4217_v4  ;;  %vm4885_vm11 = vmor %vm4883_vm10, %vm4884_vm0  ;;  %v4904_v7 = vand.u32 2147483648, %v7601_v21  ;;  %v4902_v2 = vand.u32 2147483647, %v7601_v21  ;;  %vm4898_vm14 = vweird.f32 %v7601_v21  ;;  %v4268_v4 = vld [vmem:[#allocation2 + $0x111] sm:$0xff] }
 0x57c   : > { %v4752_v13 = vsub.f32 0.0, %v7604_v28  ;;  %4642 = vmatmul.f32.gmra.mxu2 %v4539_v31  ;;  %v4880_v34 = vsub.f32 1.0, %v4879_v17 }
 0x57d   : > { %v4905_v12 = vor.u32 1.1754944e-38, %v4904_v7  ;;  %vm4903_vm2 = vcmp.eq.f32.partialorder %v4902_v2, 8.507059e+37  ;;  %v4543_v7 = vld [vmem:[#allocation2 + $0x112] sm:$0xff] }
 0x57e   : > { %v4786_v63 = vmul.f32 1.442695, %v4752_v13  ;;  %v4881_v40 = vmul.f32 %v6200_v30, %v4880_v34 }
 0x57f   : > { %v4595_v41 = vpop.f32.mrf.mxu2  ;;  %v4326_v49 = vpop.f32.mrf.mxu0 }
 0x580   : > { %6203 = vpow2.f32 %v4786_v63  ;;  %v4685_v58 = vadd.f32 %v4595_v41, %v4434_v35  ;;  %v4439_v45 = vpop.f32.mrf.mxu1  ;;  %v4882_v22 = vadd.f32 %v6200_v30, %v4881_v40 }
 0x581   : > { %v6202_v50 = vpop.eup %6201  ;;  %v4113_v54 = vpop.permute.xlu1 %4112  ;;  %v4266_v37 = vld [vmem:[#allocation2 + $0xf9] sm:$0xff]  ;;  %v4440_v24 = vadd.f32 %v4439_v45, %v4326_v49 }
 0x582   : > { %v7610_v36 = vadd.f32 %v7586_v51, %v4685_v58  ;;  %v4886_v52 = vsel %vm4885_vm11, %v6200_v30, %v4882_v22  ;;  %v4218_v32 = vld [vmem:[#allocation2 + $0xf8] sm:$0xff]  ;;  %v4894_v5 = vmul.f32 %v6202_v50, %v7601_v21  ;;  %4187 = vst.msk [vmem:[#allocation2 + $0x109] sm:$0xff] %vm4164_vm15, %v4113_v54  ;;  %4373 = vmatmul.f32.gmra.mxu0 %v4266_v37  ;;  %vm4899_vm13 = vweird.f32 %v6202_v50 }
 0x583   : > { %v4540_v55 = vld [vmem:[#allocation2 + $0xf2] sm:$0xff]  ;;  %v4891_v56 = vsel %vm4888_vm12, %v4890_v0, %v4886_v52  ;;  %4486 = vmatmul.f32.gmra.mxu1 %v4218_v32  ;;  %vm4900_vm1 = vmor %vm4898_vm14, %vm4899_vm13  ;;  %v4541_v19 = vld [vmem:[#allocation2 + $0xfa] sm:$0xff] }
 0x584   : > { %v4753_v59 = vsub.f32 0.0, %v7610_v36  ;;  %5390 = vrot.lane.b32.xlu2 %v4891_v56, %s6479_s22  ;;  %4645 = vmatmul.f32.gmra.mxu2 %v4540_v55  ;;  %v4895_v46 = vsub.f32 1.0, %v4894_v5 }
 0x586   : > { %v6204_v48 = vpop.eup %6203  ;;  %v4788_v61 = vmul.f32 1.442695, %v4753_v59  ;;  %v4896_v60 = vmul.f32 %v6202_v50, %v4895_v46 }
 0x587   : > { %v4848_v14 = vadd.f32 1.0, %v6204_v48  ;;  %v4598_v62 = vpop.f32.mrf.mxu2  ;;  %v4329_v3 = vpop.f32.mrf.mxu0 }
 0x588   : > { %6205 = vpow2.f32 %v4788_v61  ;;  %v4686_v44 = vadd.f32 %v4598_v62, %v4437_v26  ;;  %v4442_v43 = vpop.f32.mrf.mxu1  ;;  %v4897_v1 = vadd.f32 %v6202_v50, %v4896_v60 }
 0x589   : > { %6207 = vrcp.f32 %v4848_v14  ;;  %v4121_v6 = vpop.permute.xlu2 %4120  ;;  %v4267_v15 = vld [vmem:[#allocation2 + $0x109] sm:$0xff]  ;;  %v4917_v34 = vand.u32 2147483647, %v4848_v14  ;;  %v4919_v35 = vand.u32 2147483648, %v4848_v14  ;;  %v4443_v9 = vadd.f32 %v4442_v43, %v4329_v3 }
 0x58a   : > { %v7620_v53 = vadd.f32 %v7586_v51, %v4686_v44  ;;  %v4901_v47 = vsel %vm4900_vm1, %v6202_v50, %v4897_v1  ;;  %v4219_v16 = vld [vmem:[#allocation2 + $0x108] sm:$0xff]  ;;  %4191 = vst.msk [vmem:[#allocation2 + $0x139] sm:$0xff] %vm4164_vm15, %v4121_v6  ;;  %4376 = vmatmul.f32.gmra.mxu0 %v4267_v15  ;;  %v4220_v17 = vld [vmem:[#allocation2 + $0x110] sm:$0xff]  ;;  %vm4913_vm5 = vweird.f32 %v4848_v14 }
 0x58b   : > { %v4906_v20 = vsel %vm4903_vm2, %v4905_v12, %v4901_v47  ;;  %4489 = vmatmul.f32.gmra.mxu1 %v4219_v16  ;;  %v4542_v13 = vld [vmem:[#allocation2 + $0x10a] sm:$0xff]  ;;  %vm4918_vm4 = vcmp.eq.f32.partialorder %v4917_v34, 8.507059e+37  ;;  %v4920_v50 = vor.u32 1.1754944e-38, %v4919_v35 }
 0x58c   : > { %v4754_v18 = vsub.f32 0.0, %v7620_v53  ;;  %5392 = vrot.lane.b32.xlu0 %v4906_v20, %s6479_s22  ;;  %4648 = vmatmul.f32.gmra.mxu2 %v4541_v19 }
 0x58e   : > { %v6206_v33 = vpop.eup %6205  ;;  %v4790_v25 = vmul.f32 1.442695, %v4754_v18 }
 0x58f   : > { %v6208_v27 = vpop.eup %6207  ;;  %v7625_v38 = vadd.f32 1.0, %v6206_v33  ;;  %v4601_v11 = vpop.f32.mrf.mxu2 }
 0x590   : > { %6209 = vpow2.f32 %v4790_v25  ;;  %v4687_v29 = vadd.f32 %v4601_v11, %v4440_v24  ;;  %v4332_v23 = vpop.f32.mrf.mxu0  ;;  %v4445_v30 = vpop.f32.mrf.mxu1  ;;  %v4909_v21 = vmul.f32 %v6208_v27, %v4848_v14  ;;  %vm4914_vm3 = vweird.f32 %v6208_v27 }
 0x591   : > { %6211 = vrcp.f32 %v7625_v38  ;;  %v4117_v8 = vpop.permute.xlu0 %4116  ;;  %vm4915_vm6 = vmor %vm4913_vm5, %vm4914_vm3  ;;  %v4932_v48 = vand.u32 2147483647, %v7625_v38  ;;  %v4934_v61 = vand.u32 2147483648, %v7625_v38  ;;  %v4446_v62 = vadd.f32 %v4445_v30, %v4332_v23 }
 0x592   : > { %v7629_v42 = vadd.f32 %v7586_v51, %v4687_v29  ;;  %v4910_v31 = vsub.f32 1.0, %v4909_v21  ;;  %4189 = vst.msk [vmem:[#allocation2 + $0x121] sm:$0xff] %vm4164_vm15, %v4117_v8  ;;  %4379 = vmatmul.f32.gmra.mxu0 %v4268_v4  ;;  %vm4928_vm8 = vweird.f32 %v7625_v38 }
 0x593   : > { %4492 = vmatmul.f32.gmra.mxu1 %v4220_v17  ;;  %vm4933_vm0 = vcmp.eq.f32.partialorder %v4932_v48, 8.507059e+37  ;;  %v4935_v6 = vor.u32 1.1754944e-38, %v4934_v61 }
 0x594   : > { %v4755_v39 = vsub.f32 0.0, %v7629_v42  ;;  %4651 = vmatmul.f32.gmra.mxu2 %v4542_v13  ;;  %v4911_v63 = vmul.f32 %v6208_v27, %v4910_v31 }
 0x596   : > { %v6210_v40 = vpop.eup %6209  ;;  %v4792_v41 = vmul.f32 1.442695, %v4755_v39  ;;  %v4912_v58 = vadd.f32 %v6208_v27, %v4911_v63 }
 0x597   : > { %v6212_v49 = vpop.eup %6211  ;;  %v7633_v45 = vadd.f32 1.0, %v6210_v40  ;;  %v4604_v22 = vpop.f32.mrf.mxu2 }
 0x598   : > { %6213 = vpow2.f32 %v4792_v41  ;;  %v4688_v0 = vadd.f32 %v4604_v22, %v4443_v9  ;;  %v4335_v54 = vpop.f32.mrf.mxu0  ;;  %v4448_v52 = vpop.f32.mrf.mxu1  ;;  %v4916_v37 = vsel %vm4915_vm6, %v6208_v27, %v4912_v58  ;;  %v4924_v32 = vmul.f32 %v6212_v49, %v7625_v38  ;;  %v4271_v22 = vld [vmem:[#allocation2 + $0x139] sm:$0xff] }
 0x599   : > { %6215 = vrcp.f32 %v7633_v45  ;;  %v4921_v55 = vsel %vm4918_vm4, %v4920_v50, %v4916_v37  ;;  %v4119_v56 = vpop.permute.xlu1 %4118  ;;  %v4269_v59 = vld [vmem:[#allocation2 + $0x121] sm:$0xff]  ;;  %vm4929_vm7 = vweird.f32 %v6212_v49  ;;  %v4947_v11 = vand.u32 2147483647, %v7633_v45  ;;  %v4223_v50 = vld [vmem:[#allocation2 + $0x138] sm:$0xff] }
 0x59a   : > { %v7638_v5 = vadd.f32 %v7586_v51, %v4688_v0  ;;  %5394 = vrot.lane.b32.xlu1 %v4921_v55, %s6479_s22  ;;  %v4221_v46 = vld [vmem:[#allocation2 + $0x120] sm:$0xff]  ;;  %v4925_v26 = vsub.f32 1.0, %v4924_v32  ;;  %4190 = vst.msk [vmem:[#allocation2 + $0x129] sm:$0xff] %vm4164_vm15, %v4119_v56  ;;  %4382 = vmatmul.f32.gmra.mxu0 %v4269_v59  ;;  %vm4930_vm9 = vmor %vm4928_vm8, %vm4929_vm7  ;;  %v4949_v29 = vand.u32 2147483648, %v7633_v45  ;;  %v4449_v8 = vadd.f32 %v4448_v52, %v4335_v54 }
 0x59b   : > { %4495 = vmatmul.f32.gmra.mxu1 %v4221_v46  ;;  %vm4943_vm11 = vweird.f32 %v7633_v45  ;;  %vm4948_vm13 = vcmp.eq.f32.partialorder %v4947_v11, 8.507059e+37 }
 0x59c   : > { %v4756_v60 = vsub.f32 0.0, %v7638_v5  ;;  %4654 = vmatmul.f32.gmra.mxu2 %v4543_v7  ;;  %v4926_v2 = vmul.f32 %v6212_v49, %v4925_v26  ;;  %v4950_v35 = vor.u32 1.1754944e-38, %v4949_v29 }
 0x59e   : > { %v6214_v14 = vpop.eup %6213  ;;  %v4794_v44 = vmul.f32 1.442695, %v4756_v60  ;;  %v4927_v3 = vadd.f32 %v6212_v49, %v4926_v2 }
 0x59f   : > { %v6216_v43 = vpop.eup %6215  ;;  %v7646_v1 = vadd.f32 1.0, %v6214_v14  ;;  %v4607_v12 = vpop.f32.mrf.mxu2 }
 0x5a0   : > { %6217 = vpow2.f32 %v4794_v44  ;;  %v4689_v47 = vadd.f32 %v4607_v12, %v4446_v62  ;;  %v4338_v15 = vpop.f32.mrf.mxu0  ;;  %v4451_v16 = vpop.f32.mrf.mxu1  ;;  %v4931_v20 = vsel %vm4930_vm9, %v6212_v49, %v4927_v3  ;;  %v4939_v19 = vmul.f32 %v6216_v43, %v7633_v45 }
 0x5a1   : > { %6219 = vrcp.f32 %v7646_v1  ;;  %v4936_v18 = vsel %vm4933_vm0, %v4935_v6, %v4931_v20  ;;  %v4270_v24 = vld [vmem:[#allocation2 + $0x129] sm:$0xff]  ;;  %vm4944_vm10 = vweird.f32 %v6216_v43  ;;  %v4962_v52 = vand.u32 2147483647, %v7646_v1 }
 0x5a2   : > { %v7651_v33 = vadd.f32 %v7586_v51, %v4689_v47  ;;  %5396 = vrot.lane.b32.xlu2 %v4936_v18, %s6479_s22  ;;  %v4222_v25 = vld [vmem:[#allocation2 + $0x128] sm:$0xff]  ;;  %v4940_v38 = vsub.f32 1.0, %v4939_v19  ;;  %4385 = vmatmul.f32.gmra.mxu0 %v4270_v24  ;;  %vm4945_vm12 = vmor %vm4943_vm11, %vm4944_vm10  ;;  %v4964_v37 = vand.u32 2147483648, %v7646_v1  ;;  %v4452_v59 = vadd.f32 %v4451_v16, %v4338_v15 }
 0x5a3   : > { %v4544_v27 = vld [vmem:[#allocation2 + $0x122] sm:$0xff]  ;;  %4498 = vmatmul.f32.gmra.mxu1 %v4222_v25  ;;  %v4545_v54 = vld [vmem:[#allocation2 + $0x12a] sm:$0xff]  ;;  %vm4958_vm1 = vweird.f32 %v7646_v1  ;;  %vm4963_vm3 = vcmp.eq.f32.partialorder %v4962_v52, 8.507059e+37 }
 0x5a4   : > { %v4757_v23 = vsub.f32 0.0, %v7651_v33  ;;  %4657 = vmatmul.f32.gmra.mxu2 %v4544_v27  ;;  %v4941_v30 = vmul.f32 %v6216_v43, %v4940_v38  ;;  %v4965_v60 = vor.u32 1.1754944e-38, %v4964_v37 }
 0x5a6   : > { %v6218_v21 = vpop.eup %6217  ;;  %v4796_v4 = vmul.f32 1.442695, %v4757_v23  ;;  %v4942_v17 = vadd.f32 %v6216_v43, %v4941_v30 }
 0x5a7   : > { %v6220_v31 = vpop.eup %6219  ;;  %v7658_v13 = vadd.f32 1.0, %v6218_v21  ;;  %v4610_v34 = vpop.f32.mrf.mxu2 }
 0x5a8   : > { %6221 = vpow2.f32 %v4796_v4  ;;  %v4690_v39 = vadd.f32 %v4610_v34, %v4449_v8  ;;  %v4341_v63 = vpop.f32.mrf.mxu0  ;;  %v4454_v40 = vpop.f32.mrf.mxu1  ;;  %v4946_v9 = vsel %vm4945_vm12, %v6216_v43, %v4942_v17  ;;  %v4954_v41 = vmul.f32 %v6220_v31, %v7646_v1 }
 0x5a9   : > { %6223 = vrcp.f32 %v7658_v13  ;;  %v4951_v58 = vsel %vm4948_vm13, %v4950_v35, %v4946_v9  ;;  %v4123_v45 = vpop.permute.xlu0 %4122  ;;  %vm4959_vm14 = vweird.f32 %v6220_v31  ;;  %v4977_v16 = vand.u32 2147483647, %v7658_v13 }
 0x5aa   : > { %v7663_v49 = vadd.f32 %v7586_v51, %v4690_v39  ;;  %5398 = vrot.lane.b32.xlu0 %v4951_v58, %s6479_s22  ;;  %v4955_v0 = vsub.f32 1.0, %v4954_v41  ;;  %4192 = vst.msk [vmem:[#allocation2 + $0x141] sm:$0xff] %vm4164_vm15, %v4123_v45  ;;  %4388 = vmatmul.f32.gmra.mxu0 %v4271_v22  ;;  %vm4960_vm2 = vmor %vm4958_vm1, %vm4959_vm14  ;;  %v4979_v20 = vand.u32 2147483648, %v7658_v13  ;;  %v4455_v25 = vadd.f32 %v4454_v40, %v4341_v63 }
 0x5ab   : > { %4501 = vmatmul.f32.gmra.mxu1 %v4223_v50  ;;  %vm4973_vm6 = vweird.f32 %v7658_v13  ;;  %vm4978_vm7 = vcmp.eq.f32.partialorder %v4977_v16, 8.507059e+37 }
 0x5ac   : > { %v4758_v32 = vsub.f32 0.0, %v7663_v49  ;;  %4660 = vmatmul.f32.gmra.mxu2 %v4545_v54  ;;  %v4956_v55 = vmul.f32 %v6220_v31, %v4955_v0  ;;  %v4980_v30 = vor.u32 1.1754944e-38, %v4979_v20 }
 0x5ae   : > { %v6222_v56 = vpop.eup %6221  ;;  %v4798_v46 = vmul.f32 1.442695, %v4758_v32  ;;  %v4957_v26 = vadd.f32 %v6220_v31, %v4956_v55 }
 0x5af   : > { %v6224_v7 = vpop.eup %6223  ;;  %v7671_v48 = vadd.f32 1.0, %v6222_v56  ;;  %v4613_v61 = vpop.f32.mrf.mxu2 }
 0x5b0   : > { %6225 = vpow2.f32 %v4798_v46  ;;  %v4691_v2 = vadd.f32 %v4613_v61, %v4452_v59  ;;  %v4344_v14 = vpop.f32.mrf.mxu0  ;;  %v4457_v62 = vpop.f32.mrf.mxu1  ;;  %v4961_v44 = vsel %vm4960_vm2, %v6220_v31, %v4957_v26  ;;  %v4969_v3 = vmul.f32 %v6224_v7, %v7658_v13 }
 0x5b1   : > { %6227 = vrcp.f32 %v7671_v48  ;;  %v4966_v43 = vsel %vm4963_vm3, %v4965_v60, %v4961_v44  ;;  %v4272_v1 = vld [vmem:[#allocation2 + $0x141] sm:$0xff]  ;;  %vm4974_vm5 = vweird.f32 %v6224_v7  ;;  %v4992_v40 = vand.u32 2147483647, %v7671_v48 }
 0x5b2   : > { %v7676_v12 = vadd.f32 %v7586_v51, %v4691_v2  ;;  %5400 = vrot.lane.b32.xlu1 %v4966_v43, %s6479_s22  ;;  %v4224_v6 = vld [vmem:[#allocation2 + $0x140] sm:$0xff]  ;;  %v4970_v15 = vsub.f32 1.0, %v4969_v3  ;;  %4391 = vmatmul.f32.gmra.mxu0 %v4272_v1  ;;  %vm4975_vm4 = vmor %vm4973_vm6, %vm4974_vm5  ;;  %v4994_v9 = vand.u32 2147483648, %v7671_v48  ;;  %v4458_v22 = vadd.f32 %v4457_v62, %v4344_v14 }
 0x5b3   : > { %v4546_v47 = vld [vmem:[#allocation2 + $0x13a] sm:$0xff]  ;;  %4504 = vmatmul.f32.gmra.mxu1 %v4224_v6  ;;  %v4547_v63 = vld [vmem:[#allocation2 + $0x142] sm:$0xff]  ;;  %vm4988_vm9 = vweird.f32 %v7671_v48  ;;  %vm4993_vm10 = vcmp.eq.f32.partialorder %v4992_v40, 8.507059e+37 }
 0x5b4   : > { %v4759_v19 = vsub.f32 0.0, %v7676_v12  ;;  %4663 = vmatmul.f32.gmra.mxu2 %v4546_v47  ;;  %v4971_v18 = vmul.f32 %v6224_v7, %v4970_v15  ;;  %v4995_v32 = vor.u32 1.1754944e-38, %v4994_v9 }
 0x5b6   : > { %v6226_v24 = vpop.eup %6225  ;;  %v4800_v27 = vmul.f32 1.442695, %v4759_v19  ;;  %v4972_v38 = vadd.f32 %v6224_v7, %v4971_v18 }
 0x5b7   : > { %v6228_v11 = vpop.eup %6227  ;;  %v4854_v29 = vadd.f32 1.0, %v6226_v24  ;;  %v4616_v23 = vpop.f32.mrf.mxu2 }
 0x5b8   : > { %6229 = vpow2.f32 %v4800_v27  ;;  %v4127_v21 = vpop.permute.xlu2 %4126  ;;  %v4692_v8 = vadd.f32 %v4616_v23, %v4455_v25  ;;  %v4347_v4 = vpop.f32.mrf.mxu0  ;;  %v4976_v17 = vsel %vm4975_vm4, %v6224_v7, %v4972_v38  ;;  %v4984_v31 = vmul.f32 %v6228_v11, %v7671_v48 }
 0x5b9   : > { %6231 = vrcp.f32 %v4854_v29  ;;  %4194 = vst.msk [vmem:[#allocation2 + $0x159] sm:$0xff] %vm4164_vm15, %v4127_v21  ;;  %v4460_v34 = vpop.f32.mrf.mxu1  ;;  %v4981_v35 = vsel %vm4978_vm7, %v4980_v30, %v4976_v17  ;;  %vm4989_vm8 = vweird.f32 %v6228_v11  ;;  %v5007_v60 = vand.u32 2147483647, %v4854_v29 }
 0x5ba   : > { %v7686_v13 = vadd.f32 %v7586_v51, %v4692_v8  ;;  %5402 = vrot.lane.b32.xlu2 %v4981_v35, %s6479_s22  ;;  %v4985_v39 = vsub.f32 1.0, %v4984_v31  ;;  %vm4990_vm0 = vmor %vm4988_vm9, %vm4989_vm8  ;;  %v5009_v2 = vand.u32 2147483648, %v4854_v29  ;;  %v4461_v3 = vadd.f32 %v4460_v34, %v4347_v4 }
 0x5bb   : > { %vm5003_vm12 = vweird.f32 %v4854_v29  ;;  %vm5008_vm14 = vcmp.eq.f32.partialorder %v5007_v60, 8.507059e+37 }
 0x5bc   : > { %v4760_v41 = vsub.f32 0.0, %v7686_v13  ;;  %4666 = vmatmul.f32.gmra.mxu2 %v4547_v63  ;;  %v4986_v58 = vmul.f32 %v6228_v11, %v4985_v39  ;;  %v5010_v16 = vor.u32 1.1754944e-38, %v5009_v2 }
 0x5be   : > { %v6230_v45 = vpop.eup %6229  ;;  %v4802_v50 = vmul.f32 1.442695, %v4760_v41  ;;  %v4987_v0 = vadd.f32 %v6228_v11, %v4986_v58 }
 0x5bf   : > { %v6232_v54 = vpop.eup %6231  ;;  %v4855_v52 = vadd.f32 1.0, %v6230_v45  ;;  %v4619_v37 = vpop.f32.mrf.mxu2 }
 0x5c0   : > { %6233 = vpow2.f32 %v4802_v50  ;;  %v4693_v55 = vadd.f32 %v4619_v37, %v4458_v22  ;;  %v4350_v56 = vpop.f32.mrf.mxu0  ;;  %v4991_v59 = vsel %vm4990_vm0, %v6228_v11, %v4987_v0  ;;  %v4999_v46 = vmul.f32 %v6232_v54, %v4854_v29 }
 0x5c1   : > { %6235 = vrcp.f32 %v4855_v52  ;;  %v4463_v26 = vpop.f32.mrf.mxu1  ;;  %v4996_v7 = vsel %vm4993_vm10, %v4995_v32, %v4991_v59  ;;  %vm5004_vm11 = vweird.f32 %v6232_v54  ;;  %v5022_v23 = vand.u32 2147483647, %v4855_v52 }
 0x5c2   : > { %v7694_v61 = vadd.f32 %v7586_v51, %v4693_v55  ;;  %5404 = vrot.lane.b32.xlu0 %v4996_v7, %s6479_s22  ;;  %v5000_v48 = vsub.f32 1.0, %v4999_v46  ;;  %vm5005_vm13 = vmor %vm5003_vm12, %vm5004_vm11  ;;  %v5024_v30 = vand.u32 2147483648, %v4855_v52  ;;  %v4464_v17 = vadd.f32 %v4463_v26, %v4350_v56 }
 0x5c3   : > { %vm5018_vm2 = vweird.f32 %v4855_v52  ;;  %vm5023_vm5 = vcmp.eq.f32.partialorder %v5022_v23, 8.507059e+37  ;;  %vm5518_vm0 = vcmask 64512  }
 0x5c4   : > { %v4761_v14 = vsub.f32 0.0, %v7694_v61  ;;  %v5001_v62 = vmul.f32 %v6232_v54, %v5000_v48  ;;  %v5025_v9 = vor.u32 1.1754944e-38, %v5024_v30 }
 0x5c6   : > { %v6234_v44 = vpop.eup %6233  ;;  %v4804_v43 = vmul.f32 1.442695, %v4761_v14  ;;  %v5002_v1 = vadd.f32 %v6232_v54, %v5001_v62 }
 0x5c7   : > { %v6236_v6 = vpop.eup %6235  ;;  %v7698_v47 = vadd.f32 1.0, %v6234_v44  ;;  %v4622_v15 = vpop.f32.mrf.mxu2 }
 0x5c8   : > { %6237 = vpow2.f32 %v4804_v43  ;;  %v4125_v20 = vpop.permute.xlu1 %4124  ;;  %v4694_v19 = vadd.f32 %v4622_v15, %v4461_v3  ;;  %v4353_v18 = vpop.f32.mrf.mxu0  ;;  %v5006_v24 = vsel %vm5005_vm13, %v6232_v54, %v5002_v1  ;;  %v5014_v25 = vmul.f32 %v6236_v6, %v4855_v52  ;;  %v4274_v15 = vld [vmem:[#allocation2 + $0x159] sm:$0xff] }
 0x5c9   : > { %6239 = vrcp.f32 %v7698_v47  ;;  %4193 = vst.msk [vmem:[#allocation2 + $0x151] sm:$0xff] %vm4164_vm15, %v4125_v20  ;;  %v4466_v27 = vpop.f32.mrf.mxu1  ;;  %v5011_v38 = vsel %vm5008_vm14, %v5010_v16, %v5006_v24  ;;  %vm5019_vm1 = vweird.f32 %v6236_v6  ;;  %v5037_v56 = vand.u32 2147483647, %v7698_v47  ;;  %v4549_v24 = vld [vmem:[#allocation2 + $0x15a] sm:$0xff] }
 0x5ca   : > { %v7703_v11 = vadd.f32 %v7586_v51, %v4694_v19  ;;  %5406 = vrot.lane.b32.xlu1 %v5011_v38, %s6479_s22  ;;  %v5015_v29 = vsub.f32 1.0, %v5014_v25  ;;  %vm7709_vm3 = vmor %vm5018_vm2, %vm5019_vm1  ;;  %v5039_v59 = vand.u32 2147483648, %v7698_v47  ;;  %v4467_v48 = vadd.f32 %v4466_v27, %v4353_v18 }
 0x5cb   : > { %vm5033_vm4 = vweird.f32 %v7698_v47  ;;  %vm7736_vm8 = vcmp.eq.f32.partialorder %v5037_v56, 8.507059e+37 }
 0x5cc   : > { %v4762_v21 = vsub.f32 0.0, %v7703_v11  ;;  %v5016_v8 = vmul.f32 %v6236_v6, %v5015_v29  ;;  %v5040_v1 = vor.u32 1.1754944e-38, %v5039_v59 }
 0x5ce   : > { %v6238_v4 = vpop.eup %6237  ;;  %v4806_v31 = vmul.f32 1.442695, %v4762_v21  ;;  %v5017_v34 = vadd.f32 %v6236_v6, %v5016_v8 }
 0x5cf   : > { %v6240_v35 = vpop.eup %6239  ;;  %v7707_v39 = vadd.f32 1.0, %v6238_v4  ;;  %v4625_v63 = vpop.f32.mrf.mxu2 }
 0x5d0   : > { %6241 = vpow2.f32 %v4806_v31  ;;  %v4273_v41 = vld [vmem:[#allocation2 + $0x151] sm:$0xff]  ;;  %v4695_v45 = vadd.f32 %v4625_v63, %v4464_v17  ;;  %v4356_v50 = vpop.f32.mrf.mxu0  ;;  %v5021_v0 = vsel %vm7709_vm3, %v6236_v6, %v5017_v34  ;;  %v5029_v54 = vmul.f32 %v6240_v35, %v7698_v47 }
 0x5d1   : > { %v4225_v58 = vld [vmem:[#allocation2 + $0x150] sm:$0xff]  ;;  %6243 = vrcp.f32 %v7707_v39  ;;  %4394 = vmatmul.f32.gmra.mxu0 %v4273_v41  ;;  %v4469_v52 = vpop.f32.mrf.mxu1  ;;  %v5026_v37 = vsel %vm5023_vm5, %v5025_v9, %v5021_v0  ;;  %vm5034_vm6 = vweird.f32 %v6240_v35  ;;  %v4226_v16 = vld [vmem:[#allocation2 + $0x158] sm:$0xff]  ;;  %v5052_v23 = vand.u32 2147483647, %v7707_v39 }
 0x5d2   : > { %v4548_v22 = vld [vmem:[#allocation2 + $0x152] sm:$0xff]  ;;  %4507 = vmatmul.f32.gmra.mxu1 %v4225_v58  ;;  %v7719_v32 = vadd.f32 %v7586_v51, %v4695_v45  ;;  %5408 = vrot.lane.b32.xlu2 %v5026_v37, %s6479_s22  ;;  %v5030_v55 = vsub.f32 1.0, %v5029_v54  ;;  %vm7732_vm7 = vmor %vm5033_vm4, %vm5034_vm6  ;;  %v5054_v30 = vand.u32 2147483648, %v7707_v39  ;;  %v4470_v17 = vadd.f32 %v4469_v52, %v4356_v50 }
 0x5d3   : > { %4669 = vmatmul.f32.gmra.mxu2 %v4548_v22  ;;  %vm5048_vm10 = vweird.f32 %v7707_v39  ;;  %vm5053_vm12 = vcmp.eq.f32.partialorder %v5052_v23, 8.507059e+37 }
 0x5d4   : > { %v4763_v46 = vsub.f32 0.0, %v7719_v32  ;;  %v5031_v26 = vmul.f32 %v6240_v35, %v5030_v55  ;;  %v5055_v45 = vor.u32 1.1754944e-38, %v5054_v30 }
 0x5d6   : > { %v6242_v7 = vpop.eup %6241  ;;  %v4808_v60 = vmul.f32 1.442695, %v4763_v46  ;;  %v5032_v2 = vadd.f32 %v6240_v35, %v5031_v26 }
 0x5d7   : > { %v6244_v14 = vpop.eup %6243  ;;  %v7730_v62 = vadd.f32 1.0, %v6242_v7  ;;  %v4628_v44 = vpop.f32.mrf.mxu2 }
 0x5d8   : > { %6245 = vpow2.f32 %v4808_v60  ;;  %v4129_v6 = vpop.permute.xlu0 %4128  ;;  %v4696_v20 = vadd.f32 %v4628_v44, %v4467_v48  ;;  %v4359_v19 = vpop.f32.mrf.mxu0  ;;  %v5036_v47 = vsel %vm7732_vm7, %v6240_v35, %v5032_v2  ;;  %v5044_v18 = vmul.f32 %v6244_v14, %v7707_v39 }
 0x5d9   : > { %6247 = vrcp.f32 %v7730_v62  ;;  %4195 = vst.msk [vmem:[#allocation2 + $0x169] sm:$0xff] %vm4164_vm15, %v4129_v6  ;;  %4397 = vmatmul.f32.gmra.mxu0 %v4274_v15  ;;  %v4472_v25 = vpop.f32.mrf.mxu1  ;;  %v5041_v27 = vsel %vm7736_vm8, %v5040_v1, %v5036_v47  ;;  %vm5049_vm9 = vweird.f32 %v6244_v14  ;;  %v5067_v46 = vand.u32 2147483647, %v7730_v62 }
 0x5da   : > { %4510 = vmatmul.f32.gmra.mxu1 %v4226_v16  ;;  %v7752_v38 = vadd.f32 %v7586_v51, %v4696_v20  ;;  %5410 = vrot.lane.b32.xlu0 %v5041_v27, %s6479_s22  ;;  %v5045_v29 = vsub.f32 1.0, %v5044_v18  ;;  %vm7768_vm11 = vmor %vm5048_vm10, %vm5049_vm9  ;;  %v5069_v26 = vand.u32 2147483648, %v7730_v62  ;;  %v4473_v2 = vadd.f32 %v4472_v25, %v4359_v19  ;;  %v7800_v27 = vld [vmem:[%s8069_s10] ss:$0 sm:$0xff] }
 0x5db   : > { %4672 = vmatmul.f32.gmra.mxu2 %v4549_v24  ;;  %vm5063_vm13 = vweird.f32 %v7730_v62  ;;  %vm5068_vm1 = vcmp.eq.f32.partialorder %v5067_v46, 8.507059e+37 }
 0x5dc   : > { %v4764_v21 = vsub.f32 0.0, %v7752_v38  ;;  %v5046_v8 = vmul.f32 %v6244_v14, %v5045_v29  ;;  %v5070_v6 = vor.u32 1.1754944e-38, %v5069_v26 }
 0x5de   : > { %v6246_v4 = vpop.eup %6245  ;;  %v4810_v31 = vmul.f32 1.442695, %v4764_v21  ;;  %v5391_v34 = vpop.permute.xlu2 %5390  ;;  %v5047_v35 = vadd.f32 %v6244_v14, %v5046_v8 }
 0x5df   : > { %v6248_v63 = vpop.eup %6247  ;;  %v7760_v40 = vadd.f32 1.0, %v6246_v4  ;;  %v5486_v9 = vmul.f32 %v5391_v34, %v7590_v57  ;;  %v4631_v41 = vpop.f32.mrf.mxu2 }
 0x5e0   : > { %6249 = vpow2.f32 %v4810_v31  ;;  %v4131_v39 = vpop.permute.xlu1 %4130  ;;  %v4275_v22 = vld [vmem:[#allocation2 + $0x169] sm:$0xff]  ;;  %v4697_v0 = vadd.f32 %v4631_v41, %v4470_v17  ;;  %v4362_v54 = vpop.f32.mrf.mxu0  ;;  %v5051_v52 = vsel %vm7768_vm11, %v6244_v14, %v5047_v35  ;;  %v5059_v37 = vmul.f32 %v6248_v63, %v7730_v62 }
 0x5e1   : > { %v4227_v50 = vld [vmem:[#allocation2 + $0x168] sm:$0xff]  ;;  %6251 = vrcp.f32 %v7760_v40  ;;  %4196 = vst.msk [vmem:[#allocation2 + $0x171] sm:$0xff] %vm4164_vm15, %v4131_v39  ;;  %4400 = vmatmul.f32.gmra.mxu0 %v4275_v22  ;;  %v4475_v57 = vpop.f32.mrf.mxu1  ;;  %v5056_v55 = vsel %vm5053_vm12, %v5055_v45, %v5051_v52  ;;  %vm5064_vm15 = vweird.f32 %v6248_v63  ;;  %v5082_v30 = vand.u32 2147483647, %v7760_v40 }
 0x5e2   : > { %4513 = vmatmul.f32.gmra.mxu1 %v4227_v50  ;;  %5519 = vst.msk [vmem:[%s7765_s26] sm:$0xff] %vm5518_vm0, %v5486_v9  ;;  %v7780_v56 = vadd.f32 %v7586_v51, %v4697_v0  ;;  %5412 = vrot.lane.b32.xlu1 %v5056_v55, %s6479_s22  ;;  %v5060_v59 = vsub.f32 1.0, %v5059_v37  ;;  %vm7789_vm14 = vmor %vm5063_vm13, %vm5064_vm15  ;;  %v5084_v21 = vand.u32 2147483648, %v7760_v40  ;;  %v4476_v31 = vadd.f32 %v4475_v57, %v4362_v54 }
 0x5e3   : > { %vm5078_vm3 = vweird.f32 %v7760_v40  ;;  %vm5083_vm6 = vcmp.eq.f32.partialorder %v5082_v30, 8.507059e+37 }
 0x5e4   : > { %v4765_v7 = vsub.f32 0.0, %v7780_v56  ;;  %v5061_v48 = vmul.f32 %v6248_v63, %v5060_v59  ;;  %v5085_v58 = vor.u32 1.1754944e-38, %v5084_v21 }
 0x5e6   : > { %v6250_v60 = vpop.eup %6249  ;;  %v4812_v14 = vmul.f32 1.442695, %v4765_v7  ;;  %v5062_v44 = vadd.f32 %v6248_v63, %v5061_v48 }
 0x5e7   : > { %v6252_v3 = vpop.eup %6251  ;;  %v7787_v51 = vadd.f32 1.0, %v6250_v60  ;;  %v4634_v43 = vpop.f32.mrf.mxu2 }
 0x5e8   : > { %6253 = vpow2.f32 %v4812_v14  ;;  %v4276_v15 = vld [vmem:[#allocation2 + $0x171] sm:$0xff]  ;;  %v4698_v20 = vadd.f32 %v4634_v43, %v4473_v2  ;;  %v4365_v19 = vpop.f32.mrf.mxu0  ;;  %v5066_v18 = vsel %vm7789_vm14, %v6248_v63, %v5062_v44  ;;  %v5074_v62 = vmul.f32 %v6252_v3, %v7760_v40 }
 0x5e9   : > { %v4228_v16 = vld [vmem:[#allocation2 + $0x170] sm:$0xff]  ;;  %6255 = vrcp.f32 %v7787_v51  ;;  %4403 = vmatmul.f32.gmra.mxu0 %v4276_v15  ;;  %v4478_v24 = vpop.f32.mrf.mxu1  ;;  %v5071_v25 = vsel %vm5068_vm1, %v5070_v6, %v5066_v18  ;;  %vm5079_vm2 = vweird.f32 %v6252_v3  ;;  %v5097_v57 = vand.u32 2147483647, %v7787_v51 }
 0x5ea   : > { %v4550_v47 = vld [vmem:[#allocation2 + $0x16a] sm:$0xff]  ;;  %4516 = vmatmul.f32.gmra.mxu1 %v4228_v16  ;;  %v7803_v29 = vadd.f32 %v7800_v27, %v4698_v20  ;;  %5414 = vrot.lane.b32.xlu2 %v5071_v25, %s6479_s22  ;;  %v5075_v23 = vsub.f32 1.0, %v5074_v62  ;;  %vm5080_vm5 = vmor %vm5078_vm3, %vm5079_vm2  ;;  %v4551_v0 = vld [vmem:[#allocation2 + $0x172] sm:$0xff]  ;;  %v5099_v55 = vand.u32 2147483648, %v7787_v51  ;;  %v4479_v7 = vadd.f32 %v4478_v24, %v4365_v19 }
 0x5eb   : > { %4675 = vmatmul.f32.gmra.mxu2 %v4550_v47  ;;  %vm5093_vm7 = vweird.f32 %v7787_v51  ;;  %vm5098_vm9 = vcmp.eq.f32.partialorder %v5097_v57, 8.507059e+37 }
 0x5ec   : > { %v4766_v8 = vsub.f32 0.0, %v7803_v29  ;;  %v5076_v4 = vmul.f32 %v6252_v3, %v5075_v23 }
 0x5ee   : > { %v6254_v17 = vpop.eup %6253  ;;  %v4814_v34 = vmul.f32 1.442695, %v4766_v8  ;;  %v5077_v35 = vadd.f32 %v6252_v3, %v5076_v4 }
 0x5ef   : > { %v6256_v63 = vpop.eup %6255  ;;  %v7810_v9 = vadd.f32 1.0, %v6254_v17  ;;  %v4637_v41 = vpop.f32.mrf.mxu2 }
 0x5f0   : > { %6257 = vpow2.f32 %v4814_v34  ;;  %v4699_v45 = vadd.f32 %v4637_v41, %v4476_v31  ;;  %v4368_v39 = vpop.f32.mrf.mxu0  ;;  %v5081_v22 = vsel %vm5080_vm5, %v6252_v3, %v5077_v35  ;;  %v5089_v50 = vmul.f32 %v6256_v63, %v7787_v51 }
 0x5f1   : > { %6259 = vrcp.f32 %v7810_v9  ;;  %v4481_v54 = vpop.f32.mrf.mxu1  ;;  %v5086_v52 = vsel %vm5083_vm6, %v5085_v58, %v5081_v22  ;;  %vm5094_vm4 = vweird.f32 %v6256_v63  ;;  %v5100_v3 = vor.u32 1.1754944e-38, %v5099_v55 }
 0x5f2   : > { %v7815_v40 = vadd.f32 %v7800_v27, %v4699_v45  ;;  %5416 = vrot.lane.b32.xlu0 %v5086_v52, %s6479_s22  ;;  %v5090_v37 = vsub.f32 1.0, %v5089_v50  ;;  %vm5095_vm8 = vmor %vm5093_vm7, %vm5094_vm4  ;;  %v5112_v19 = vand.u32 2147483647, %v7810_v9  ;;  %v5114_v18 = vand.u32 2147483648, %v7810_v9 }
 0x5f3   : > { %4678 = vmatmul.f32.gmra.mxu2 %v4551_v0  ;;  %v4482_v21 = vadd.f32 %v4481_v54, %v4368_v39  ;;  %vm5108_vm11 = vweird.f32 %v7810_v9 }
 0x5f4   : > { %v4767_v59 = vsub.f32 0.0, %v7815_v40  ;;  %v5091_v46 = vmul.f32 %v6256_v63, %v5090_v37  ;;  %vm5113_vm15 = vcmp.eq.f32.partialorder %v5112_v19, 8.507059e+37  ;;  %v5115_v41 = vor.u32 1.1754944e-38, %v5114_v18 }
 0x5f6   : > { %v6258_v26 = vpop.eup %6257  ;;  %v4816_v48 = vmul.f32 1.442695, %v4767_v59  ;;  %v5092_v60 = vadd.f32 %v6256_v63, %v5091_v46 }
 0x5f7   : > { %v6260_v2 = vpop.eup %6259  ;;  %v7822_v14 = vadd.f32 1.0, %v6258_v26  ;;  %v4640_v44 = vpop.f32.mrf.mxu2 }
 0x5f8   : > { %6261 = vpow2.f32 %v4816_v48  ;;  %v4700_v43 = vadd.f32 %v4640_v44, %v4479_v7  ;;  %v4371_v1 = vpop.f32.mrf.mxu0  ;;  %v5096_v6 = vsel %vm5095_vm8, %v6256_v63, %v5092_v60  ;;  %v5104_v15 = vmul.f32 %v6260_v2, %v7810_v9 }
 0x5f9   : > { %6263 = vrcp.f32 %v7822_v14  ;;  %v4484_v16 = vpop.f32.mrf.mxu1  ;;  %v5101_v20 = vsel %vm5098_vm9, %v5100_v3, %v5096_v6  ;;  %vm5109_vm10 = vweird.f32 %v6260_v2  ;;  %v5127_v0 = vand.u32 2147483647, %v7822_v14 }
 0x5fa   : > { %v7827_v47 = vadd.f32 %v7800_v27, %v4700_v43  ;;  %5418 = vrot.lane.b32.xlu1 %v5101_v20, %s6479_s22  ;;  %v5105_v51 = vsub.f32 1.0, %v5104_v15  ;;  %vm5110_vm12 = vmor %vm5108_vm11, %vm5109_vm10  ;;  %v5129_v54 = vand.u32 2147483648, %v7822_v14  ;;  %v4485_v55 = vadd.f32 %v4484_v16, %v4371_v1 }
 0x5fb   : > { %vm5123_vm14 = vweird.f32 %v7822_v14  ;;  %vm5128_vm2 = vcmp.eq.f32.partialorder %v5127_v0, 8.507059e+37 }
 0x5fc   : > { %v4768_v62 = vsub.f32 0.0, %v7827_v47  ;;  %v5397_v24 = vpop.permute.xlu2 %5396  ;;  %v5106_v25 = vmul.f32 %v6260_v2, %v5105_v51  ;;  %v5130_v60 = vor.u32 1.1754944e-38, %v5129_v54 }
 0x5fd   : > { %v5489_v23 = vmul.f32 %v5397_v24, %v7610_v36 }
 0x5fe   : > { %v6262_v30 = vpop.eup %6261  ;;  %v4818_v8 = vmul.f32 1.442695, %v4768_v62  ;;  %v5393_v4 = vpop.permute.xlu0 %5392  ;;  %v5107_v17 = vadd.f32 %v6260_v2, %v5106_v25 }
 0x5ff   : > { %v6264_v31 = vpop.eup %6263  ;;  %v7835_v34 = vadd.f32 1.0, %v6262_v30  ;;  %5522 = vst.msk [vmem:[%s7765_s26 + $0x18] sm:$0xff] %vm5518_vm0, %v5489_v23  ;;  %v5487_v35 = vmul.f32 %v5393_v4, %v7596_v10  ;;  %v4643_v63 = vpop.f32.mrf.mxu2 }
 0x600   : > { %6265 = vpow2.f32 %v4818_v8  ;;  %v4701_v36 = vadd.f32 %v4643_v63, %v4482_v21  ;;  %v4374_v58 = vpop.f32.mrf.mxu0  ;;  %v5111_v45 = vsel %vm5110_vm12, %v6260_v2, %v5107_v17  ;;  %v5119_v39 = vmul.f32 %v6264_v31, %v7822_v14 }
 0x601   : > { %6267 = vrcp.f32 %v7835_v34  ;;  %5520 = vst.msk [vmem:[%s7765_s26 + $0x8] sm:$0xff] %vm5518_vm0, %v5487_v35  ;;  %v4487_v9 = vpop.f32.mrf.mxu1  ;;  %v5116_v22 = vsel %vm5113_vm15, %v5115_v41, %v5111_v45  ;;  %vm5124_vm13 = vweird.f32 %v6264_v31  ;;  %v5142_v16 = vand.u32 2147483647, %v7835_v34 }
 0x602   : > { %v7845_v50 = vadd.f32 %v7800_v27, %v4701_v36  ;;  %5420 = vrot.lane.b32.xlu2 %v5116_v22, %s6479_s22  ;;  %v5120_v10 = vsub.f32 1.0, %v5119_v39  ;;  %vm5125_vm1 = vmor %vm5123_vm14, %vm5124_vm13  ;;  %v5144_v20 = vand.u32 2147483648, %v7835_v34  ;;  %v4488_v25 = vadd.f32 %v4487_v9, %v4374_v58 }
 0x603   : > { %vm5138_vm5 = vweird.f32 %v7835_v34  ;;  %vm5143_vm4 = vcmp.eq.f32.partialorder %v5142_v16, 8.507059e+37 }
 0x604   : > { %v4769_v52 = vsub.f32 0.0, %v7845_v50  ;;  %v5121_v37 = vmul.f32 %v6264_v31, %v5120_v10  ;;  %v5145_v17 = vor.u32 1.1754944e-38, %v5144_v20 }
 0x606   : > { %v6266_v57 = vpop.eup %6265  ;;  %v4820_v59 = vmul.f32 1.442695, %v4769_v52  ;;  %v5122_v46 = vadd.f32 %v6264_v31, %v5121_v37 }
 0x607   : > { %v6268_v26 = vpop.eup %6267  ;;  %v7852_v7 = vadd.f32 1.0, %v6266_v57  ;;  %v4646_v48 = vpop.f32.mrf.mxu2 }
 0x608   : > { %6269 = vpow2.f32 %v4820_v59  ;;  %v4702_v2 = vadd.f32 %v4646_v48, %v4485_v55  ;;  %v4377_v44 = vpop.f32.mrf.mxu0  ;;  %v5126_v3 = vsel %vm5125_vm1, %v6264_v31, %v5122_v46  ;;  %v5134_v43 = vmul.f32 %v6268_v26, %v7835_v34 }
 0x609   : > { %6271 = vrcp.f32 %v7852_v7  ;;  %v4490_v1 = vpop.f32.mrf.mxu1  ;;  %v5131_v6 = vsel %vm5128_vm2, %v5130_v60, %v5126_v3  ;;  %vm5139_vm3 = vweird.f32 %v6268_v26  ;;  %v5157_v45 = vand.u32 2147483647, %v7852_v7 }
 0x60a   : > { %v7857_v15 = vadd.f32 %v7800_v27, %v4702_v2  ;;  %5422 = vrot.lane.b32.xlu0 %v5131_v6, %s6479_s22  ;;  %v5135_v14 = vsub.f32 1.0, %v5134_v43  ;;  %vm5140_vm6 = vmor %vm5138_vm5, %vm5139_vm3  ;;  %v5159_v39 = vand.u32 2147483648, %v7852_v7  ;;  %v4491_v52 = vadd.f32 %v4490_v1, %v4377_v44 }
 0x60b   : > { %vm5153_vm8 = vweird.f32 %v7852_v7  ;;  %vm5158_vm10 = vcmp.eq.f32.partialorder %v5157_v45, 8.507059e+37 }
 0x60c   : > { %v4770_v51 = vsub.f32 0.0, %v7857_v15  ;;  %v5395_v19 = vpop.permute.xlu1 %5394  ;;  %v5136_v18 = vmul.f32 %v6268_v26, %v5135_v14 }
 0x60d   : > { %v5488_v62 = vmul.f32 %v5395_v19, %v7604_v28 }
 0x60e   : > { %v6270_v24 = vpop.eup %6269  ;;  %v4822_v23 = vmul.f32 1.442695, %v4770_v51  ;;  %v5137_v30 = vadd.f32 %v6268_v26, %v5136_v18 }
 0x60f   : > { %v6272_v21 = vpop.eup %6271  ;;  %v7865_v8 = vadd.f32 1.0, %v6270_v24  ;;  %5521 = vst.msk [vmem:[%s7765_s26 + $0x10] sm:$0xff] %vm5518_vm0, %v5488_v62  ;;  %v4649_v4 = vpop.f32.mrf.mxu2 }
 0x610   : > { %6273 = vpow2.f32 %v4822_v23  ;;  %v4703_v31 = vadd.f32 %v4649_v4, %v4488_v25  ;;  %v5141_v35 = vsel %vm5140_vm6, %v6268_v26, %v5137_v30  ;;  %v5149_v28 = vmul.f32 %v6272_v21, %v7852_v7  ;;  %v4380_v34 = vpop.f32.mrf.mxu0 }
 0x611   : > { %6275 = vrcp.f32 %v7865_v8  ;;  %v5146_v63 = vsel %vm5143_vm4, %v5145_v17, %v5141_v35  ;;  %v4493_v58 = vpop.f32.mrf.mxu1  ;;  %vm5154_vm7 = vweird.f32 %v6272_v21  ;;  %v5160_v26 = vor.u32 1.1754944e-38, %v5159_v39 }
 0x612   : > { %v7872_v41 = vadd.f32 %v7800_v27, %v4703_v31  ;;  %5424 = vrot.lane.b32.xlu1 %v5146_v63, %s6479_s22  ;;  %v5150_v36 = vsub.f32 1.0, %v5149_v28  ;;  %vm5155_vm9 = vmor %vm5153_vm8, %vm5154_vm7  ;;  %v5172_v3 = vand.u32 2147483647, %v7865_v8  ;;  %v5174_v43 = vand.u32 2147483648, %v7865_v8 }
 0x613   : > { %v4494_v18 = vadd.f32 %v4493_v58, %v4380_v34  ;;  %vm5168_vm12 = vweird.f32 %v7865_v8 }
 0x614   : > { %v4771_v9 = vsub.f32 0.0, %v7872_v41  ;;  %v5403_v22 = vpop.permute.xlu2 %5402  ;;  %v5151_v10 = vmul.f32 %v6272_v21, %v5150_v36  ;;  %vm5173_vm13 = vcmp.eq.f32.partialorder %v5172_v3, 8.507059e+37 }
 0x615   : > { %v5492_v0 = vmul.f32 %v5403_v22, %v7638_v5 }
 0x616   : > { %v6274_v54 = vpop.eup %6273  ;;  %v4824_v37 = vmul.f32 1.442695, %v4771_v9  ;;  %v5152_v57 = vadd.f32 %v6272_v21, %v5151_v10 }
 0x617   : > { %v6276_v55 = vpop.eup %6275  ;;  %v7880_v59 = vadd.f32 1.0, %v6274_v54  ;;  %5525 = vst.msk [vmem:[%s7765_s26 + $0x30] sm:$0xff] %vm5518_vm0, %v5492_v0  ;;  %v4652_v46 = vpop.f32.mrf.mxu2 }
 0x618   : > { %6277 = vpow2.f32 %v4824_v37  ;;  %v4704_v48 = vadd.f32 %v4652_v46, %v4491_v52  ;;  %v5156_v60 = vsel %vm5155_vm9, %v6272_v21, %v5152_v57  ;;  %v5164_v5 = vmul.f32 %v6276_v55, %v7865_v8  ;;  %v4383_v6 = vpop.f32.mrf.mxu0 }
 0x619   : > { %6279 = vrcp.f32 %v7880_v59  ;;  %v5161_v2 = vsel %vm5158_vm10, %v5160_v26, %v5156_v60  ;;  %vm5169_vm11 = vweird.f32 %v6276_v55  ;;  %v4496_v20 = vpop.f32.mrf.mxu1  ;;  %v5175_v21 = vor.u32 1.1754944e-38, %v5174_v43 }
 0x61a   : > { %v7887_v44 = vadd.f32 %v7800_v27, %v4704_v48  ;;  %5426 = vrot.lane.b32.xlu2 %v5161_v2, %s6479_s22  ;;  %v5165_v7 = vsub.f32 1.0, %v5164_v5  ;;  %vm5170_vm15 = vmor %vm5168_vm12, %vm5169_vm11  ;;  %v5187_v28 = vand.u32 2147483647, %v7880_v59  ;;  %v5189_v63 = vand.u32 2147483648, %v7880_v59 }
 0x61b   : > { %v4497_v9 = vadd.f32 %v4496_v20, %v4383_v6  ;;  %vm5183_vm1 = vweird.f32 %v7880_v59 }
 0x61c   : > { %v4772_v1 = vsub.f32 0.0, %v7887_v44  ;;  %v5399_v14 = vpop.permute.xlu0 %5398  ;;  %v5166_v16 = vmul.f32 %v6276_v55, %v5165_v7  ;;  %vm5188_vm3 = vcmp.eq.f32.partialorder %v5187_v28, 8.507059e+37 }
 0x61d   : > { %v5490_v51 = vmul.f32 %v5399_v14, %v7620_v53 }
 0x61e   : > { %v6278_v19 = vpop.eup %6277  ;;  %v4826_v62 = vmul.f32 1.442695, %v4772_v1  ;;  %v5167_v24 = vadd.f32 %v6276_v55, %v5166_v16 }
 0x61f   : > { %v6280_v25 = vpop.eup %6279  ;;  %v7895_v23 = vadd.f32 1.0, %v6278_v19  ;;  %5523 = vst.msk [vmem:[%s7765_s26 + $0x20] sm:$0xff] %vm5518_vm0, %v5490_v51  ;;  %v4655_v30 = vpop.f32.mrf.mxu2 }
 0x620   : > { %6281 = vpow2.f32 %v4826_v62  ;;  %v4705_v4 = vadd.f32 %v4655_v30, %v4494_v18  ;;  %v5171_v17 = vsel %vm5170_vm15, %v6276_v55, %v5167_v24  ;;  %v5179_v53 = vmul.f32 %v6280_v25, %v7880_v59  ;;  %v4386_v10 = vpop.f32.mrf.mxu0 }
 0x621   : > { %6283 = vrcp.f32 %v7895_v23  ;;  %v5176_v31 = vsel %vm5173_vm13, %v5175_v21, %v5171_v17  ;;  %vm5184_vm14 = vweird.f32 %v6280_v25  ;;  %v4499_v37 = vpop.f32.mrf.mxu1  ;;  %v5190_v55 = vor.u32 1.1754944e-38, %v5189_v63 }
 0x622   : > { %v7902_v35 = vadd.f32 %v7800_v27, %v4705_v4  ;;  %5428 = vrot.lane.b32.xlu0 %v5176_v31, %s6479_s22  ;;  %v5180_v8 = vsub.f32 1.0, %v5179_v53  ;;  %vm5185_vm2 = vmor %vm5183_vm1, %vm5184_vm14  ;;  %v5202_v5 = vand.u32 2147483647, %v7895_v23  ;;  %v5204_v2 = vand.u32 2147483648, %v7895_v23 }
 0x623   : > { %v4500_v14 = vadd.f32 %v4499_v37, %v4386_v10  ;;  %vm5198_vm6 = vweird.f32 %v7895_v23 }
 0x624   : > { %v4773_v34 = vsub.f32 0.0, %v7902_v35  ;;  %v5401_v36 = vpop.permute.xlu1 %5400  ;;  %v5181_v58 = vmul.f32 %v6280_v25, %v5180_v8  ;;  %vm5203_vm7 = vcmp.eq.f32.partialorder %v5202_v5, 8.507059e+37  ;;  %v5205_v62 = vor.u32 1.1754944e-38, %v5204_v2 }
 0x625   : > { %v5491_v45 = vmul.f32 %v5401_v36, %v7629_v42 }
 0x626   : > { %v6282_v39 = vpop.eup %6281  ;;  %v4828_v22 = vmul.f32 1.442695, %v4773_v34  ;;  %v5182_v0 = vadd.f32 %v6280_v25, %v5181_v58 }
 0x627   : > { %v6284_v54 = vpop.eup %6283  ;;  %v7910_v52 = vadd.f32 1.0, %v6282_v39  ;;  %5524 = vst.msk [vmem:[%s7765_s26 + $0x28] sm:$0xff] %vm5518_vm0, %v5491_v45  ;;  %v4658_v57 = vpop.f32.mrf.mxu2 }
 0x628   : > { %6285 = vpow2.f32 %v4828_v22  ;;  %v4706_v46 = vadd.f32 %v4658_v57, %v4497_v9  ;;  %v5186_v42 = vsel %vm5185_vm2, %v6280_v25, %v5182_v0  ;;  %v5194_v26 = vmul.f32 %v6284_v54, %v7895_v23  ;;  %v4389_v30 = vpop.f32.mrf.mxu0 }
 0x629   : > { %6287 = vrcp.f32 %v7910_v52  ;;  %v5191_v48 = vsel %vm5188_vm3, %v5190_v55, %v5186_v42  ;;  %vm5199_vm5 = vweird.f32 %v6284_v54  ;;  %v4502_v21 = vpop.f32.mrf.mxu1  ;;  %v5217_v53 = vand.u32 2147483647, %v7910_v52 }
 0x62a   : > { %v7917_v59 = vadd.f32 %v7800_v27, %v4706_v46  ;;  %5430 = vrot.lane.b32.xlu1 %v5191_v48, %s6479_s22  ;;  %v5195_v60 = vsub.f32 1.0, %v5194_v26  ;;  %vm5200_vm4 = vmor %vm5198_vm6, %vm5199_vm5  ;;  %v5219_v31 = vand.u32 2147483648, %v7910_v52  ;;  %v4503_v58 = vadd.f32 %v4502_v21, %v4389_v30 }
 0x62b   : > { %vm5213_vm9 = vweird.f32 %v7910_v52  ;;  %vm5218_vm11 = vcmp.eq.f32.partialorder %v5217_v53, 8.507059e+37 }
 0x62c   : > { %v4774_v7 = vsub.f32 0.0, %v7917_v59  ;;  %v5409_v3 = vpop.permute.xlu2 %5408  ;;  %v5196_v43 = vmul.f32 %v6284_v54, %v5195_v60  ;;  %v5220_v0 = vor.u32 1.1754944e-38, %v5219_v31 }
 0x62d   : > { %v5495_v1 = vmul.f32 %v5409_v3, %v7676_v12 }
 0x62e   : > { %v6286_v6 = vpop.eup %6285  ;;  %v4830_v16 = vmul.f32 1.442695, %v4774_v7  ;;  %v5197_v20 = vadd.f32 %v6284_v54, %v5196_v43 }
 0x62f   : > { %v6288_v51 = vpop.eup %6287  ;;  %v7925_v19 = vadd.f32 1.0, %v6286_v6  ;;  %5528 = vst.msk [vmem:[%s7765_s26 + $0x48] sm:$0xff] %vm5518_vm0, %v5495_v1  ;;  %v4661_v18 = vpop.f32.mrf.mxu2 }
 0x630   : > { %6289 = vpow2.f32 %v4830_v16  ;;  %v4707_v24 = vadd.f32 %v4661_v18, %v4500_v14  ;;  %v5201_v25 = vsel %vm5200_vm4, %v6284_v54, %v5197_v20  ;;  %v5209_v12 = vmul.f32 %v6288_v51, %v7910_v52  ;;  %v4392_v46 = vpop.f32.mrf.mxu0 }
 0x631   : > { %6291 = vrcp.f32 %v7925_v19  ;;  %v5206_v4 = vsel %vm5203_vm7, %v5205_v62, %v5201_v25  ;;  %vm5214_vm8 = vweird.f32 %v6288_v51  ;;  %v4505_v42 = vpop.f32.mrf.mxu1  ;;  %v5232_v26 = vand.u32 2147483647, %v7925_v19 }
 0x632   : > { %v7932_v23 = vadd.f32 %v7800_v27, %v4707_v24  ;;  %5432 = vrot.lane.b32.xlu2 %v5206_v4, %s6479_s22  ;;  %v5210_v17 = vsub.f32 1.0, %v5209_v12  ;;  %vm5215_vm10 = vmor %vm5213_vm9, %vm5214_vm8  ;;  %v5234_v48 = vand.u32 2147483648, %v7925_v19  ;;  %v4506_v43 = vadd.f32 %v4505_v42, %v4392_v46 }
 0x633   : > { %vm5228_vm15 = vweird.f32 %v7925_v19  ;;  %vm5233_vm14 = vcmp.eq.f32.partialorder %v5232_v26, 8.507059e+37 }
 0x634   : > { %v4775_v8 = vsub.f32 0.0, %v7932_v23  ;;  %v5405_v28 = vpop.permute.xlu0 %5404  ;;  %v5211_v63 = vmul.f32 %v6288_v51, %v5210_v17 }
 0x635   : > { %v5493_v34 = vmul.f32 %v5405_v28, %v7651_v33 }
 0x636   : > { %v6290_v36 = vpop.eup %6289  ;;  %v4832_v45 = vmul.f32 1.442695, %v4775_v8  ;;  %v5212_v39 = vadd.f32 %v6288_v51, %v5211_v63 }
 0x637   : > { %v6292_v9 = vpop.eup %6291  ;;  %v7940_v22 = vadd.f32 1.0, %v6290_v36  ;;  %5526 = vst.msk [vmem:[%s7765_s26 + $0x38] sm:$0xff] %vm5518_vm0, %v5493_v34  ;;  %v4664_v10 = vpop.f32.mrf.mxu2 }
 0x638   : > { %6293 = vpow2.f32 %v4832_v45  ;;  %v4708_v54 = vadd.f32 %v4664_v10, %v4503_v58  ;;  %v5216_v37 = vsel %vm5215_vm10, %v6288_v51, %v5212_v39  ;;  %v5224_v33 = vmul.f32 %v6292_v9, %v7925_v19 }
 0x639   : > { %6295 = vrcp.f32 %v7940_v22  ;;  %v5221_v57 = vsel %vm5218_vm11, %v5220_v0, %v5216_v37  ;;  %vm5229_vm12 = vweird.f32 %v6292_v9  ;;  %v5235_v51 = vor.u32 1.1754944e-38, %v5234_v48 }
 0x63a   : > { %v7947_v55 = vadd.f32 %v7800_v27, %v4708_v54  ;;  %5434 = vrot.lane.b32.xlu0 %v5221_v57, %s6479_s22  ;;  %v5225_v52 = vsub.f32 1.0, %v5224_v33  ;;  %vm5230_vm13 = vmor %vm5228_vm15, %vm5229_vm12  ;;  %v5249_v12 = vand.u32 2147483648, %v7940_v22  ;;  %v5247_v17 = vand.u32 2147483647, %v7940_v22 }
 0x63b   : > { %vm5243_vm2 = vweird.f32 %v7940_v22 }
 0x63c   : > { %v4776_v60 = vsub.f32 0.0, %v7947_v55  ;;  %v5407_v5 = vpop.permute.xlu1 %5406  ;;  %v5226_v2 = vmul.f32 %v6292_v9, %v5225_v52  ;;  %v5250_v36 = vor.u32 1.1754944e-38, %v5249_v12  ;;  %vm5248_vm5 = vcmp.eq.f32.partialorder %v5247_v17, 8.507059e+37 }
 0x63d   : > { %v5494_v7 = vmul.f32 %v5407_v5, %v7663_v49 }
 0x63e   : > { %v6294_v3 = vpop.eup %6293  ;;  %v4834_v1 = vmul.f32 1.442695, %v4776_v60  ;;  %v5227_v6 = vadd.f32 %v6292_v9, %v5226_v2 }
 0x63f   : > { %v6296_v14 = vpop.eup %6295  ;;  %v4871_v16 = vadd.f32 1.0, %v6294_v3  ;;  %5527 = vst.msk [vmem:[%s7765_s26 + $0x40] sm:$0xff] %vm5518_vm0, %v5494_v7  ;;  %v4667_v20 = vpop.f32.mrf.mxu2 }
 0x640   : > { %6297 = vpow2.f32 %v4834_v1  ;;  %v4709_v18 = vadd.f32 %v4667_v20, %v4506_v43  ;;  %v5231_v62 = vsel %vm5230_vm13, %v6292_v9, %v5227_v6  ;;  %v5239_v24 = vmul.f32 %v6296_v14, %v7940_v22 }
 0x641   : > { %6299 = vrcp.f32 %v4871_v16  ;;  %v5236_v49 = vsel %vm5233_vm14, %v5235_v51, %v5231_v62  ;;  %vm5244_vm1 = vweird.f32 %v6296_v14  ;;  %v5264_v9 = vand.u32 2147483648, %v4871_v16 }
 0x642   : > { %v7959_v25 = vadd.f32 %v7800_v27, %v4709_v18  ;;  %5436 = vrot.lane.b32.xlu1 %v5236_v49, %s6479_s22  ;;  %v5240_v19 = vsub.f32 1.0, %v5239_v24  ;;  %vm5245_vm3 = vmor %vm5243_vm2, %vm5244_vm1  ;;  %v5262_v22 = vand.u32 2147483647, %v4871_v16  ;;  %vm5258_vm4 = vweird.f32 %v4871_v16 }
 0x643   : > { %v5265_v26 = vor.u32 1.1754944e-38, %v5264_v9 }
 0x644   : > { %v4777_v30 = vsub.f32 0.0, %v7959_v25  ;;  %v5415_v21 = vpop.permute.xlu2 %5414  ;;  %v5241_v4 = vmul.f32 %v6296_v14, %v5240_v19  ;;  %vm5263_vm8 = vcmp.eq.f32.partialorder %v5262_v22, 8.507059e+37 }
 0x645   : > { %v5498_v53 = vmul.f32 %v5415_v21, %v7703_v11 }
 0x646   : > { %v6298_v31 = vpop.eup %6297  ;;  %v4836_v8 = vmul.f32 1.442695, %v4777_v30  ;;  %v5242_v28 = vadd.f32 %v6296_v14, %v5241_v4 }
 0x647   : > { %v6300_v63 = vpop.eup %6299  ;;  %v4872_v34 = vadd.f32 1.0, %v6298_v31  ;;  %5531 = vst.msk [vmem:[%s7765_s26 + $0x60] sm:$0xff] %vm5518_vm0, %v5498_v53 }
 0x648   : > { %6301 = vpow2.f32 %v4836_v8  ;;  %v5246_v58 = vsel %vm5245_vm3, %v6296_v14, %v5242_v28  ;;  %v5254_v45 = vmul.f32 %v6300_v63, %v4871_v16  ;;  %vm5259_vm6 = vweird.f32 %v6300_v63 }
 0x649   : > { %6303 = vrcp.f32 %v4872_v34  ;;  %v5251_v39 = vsel %vm5248_vm5, %v5250_v36, %v5246_v58  ;;  %vm5260_vm7 = vmor %vm5258_vm4, %vm5259_vm6  ;;  %v5279_v2 = vand.u32 2147483648, %v4872_v34  ;;  %v5277_v1 = vand.u32 2147483647, %v4872_v34 }
 0x64a   : > { %5438 = vrot.lane.b32.xlu2 %v5251_v39, %s6479_s22  ;;  %v5255_v11 = vsub.f32 1.0, %v5254_v45  ;;  %vm5273_vm10 = vweird.f32 %v4872_v34 }
 0x64b   : > { %v5280_v18 = vor.u32 1.1754944e-38, %v5279_v2  ;;  %vm5278_vm12 = vcmp.eq.f32.partialorder %v5277_v1, 8.507059e+37 }
 0x64c   : > { %v5411_v10 = vpop.permute.xlu0 %5410  ;;  %v5256_v0 = vmul.f32 %v6300_v63, %v5255_v11 }
 0x64d   : > { %v5496_v54 = vmul.f32 %v5411_v10, %v7686_v13 }
 0x64e   : > { %v6302_v37 = vpop.eup %6301  ;;  %v5257_v33 = vadd.f32 %v6300_v63, %v5256_v0  ;;  %v4395_v46 = vpop.f32.mrf.mxu0 }
 0x64f   : > { %v6304_v57 = vpop.eup %6303  ;;  %v4873_v52 = vadd.f32 1.0, %v6302_v37  ;;  %v4508_v42 = vpop.f32.mrf.mxu1  ;;  %5529 = vst.msk [vmem:[%s7765_s26 + $0x50] sm:$0xff] %vm5518_vm0, %v5496_v54 }
 0x650   : > { %v5261_v48 = vsel %vm5260_vm7, %v6300_v63, %v5257_v33  ;;  %v5269_v60 = vmul.f32 %v6304_v57, %v4872_v34  ;;  %v4509_v7 = vadd.f32 %v4508_v42, %v4395_v46  ;;  %vm5274_vm9 = vweird.f32 %v6304_v57 }
 0x651   : > { %6305 = vrcp.f32 %v4873_v52  ;;  %v5266_v5 = vsel %vm5263_vm8, %v5265_v26, %v5261_v48  ;;  %vm5275_vm11 = vmor %vm5273_vm10, %vm5274_vm9  ;;  %v5292_v4 = vand.u32 2147483647, %v4873_v52  ;;  %v5294_v17 = vand.u32 2147483648, %v4873_v52 }
 0x652   : > { %5440 = vrot.lane.b32.xlu0 %v5266_v5, %s6479_s22  ;;  %v5270_v13 = vsub.f32 1.0, %v5269_v60  ;;  %vm5288_vm13 = vweird.f32 %v4873_v52 }
 0x653   : > { %v5295_v45 = vor.u32 1.1754944e-38, %v5294_v17  ;;  %vm5293_vm1 = vcmp.eq.f32.partialorder %v5292_v4, 8.507059e+37 }
 0x654   : > { %v5413_v3 = vpop.permute.xlu1 %5412  ;;  %v5271_v43 = vmul.f32 %v6304_v57, %v5270_v13 }
 0x655   : > { %v5497_v14 = vmul.f32 %v5413_v3, %v7694_v61 }
 0x656   : > { %v4670_v6 = vpop.f32.mrf.mxu2  ;;  %v5272_v20 = vadd.f32 %v6304_v57, %v5271_v43  ;;  %v4398_v19 = vpop.f32.mrf.mxu0 }
 0x657   : > { %v4710_v16 = vadd.f32 %v4670_v6, %v4509_v7  ;;  %v6306_v51 = vpop.eup %6305  ;;  %5530 = vst.msk [vmem:[%s7765_s26 + $0x58] sm:$0xff] %vm5518_vm0, %v5497_v14  ;;  %v4511_v12 = vpop.f32.mrf.mxu1 }
 0x658   : > { %v5276_v24 = vsel %vm5275_vm11, %v6304_v57, %v5272_v20  ;;  %v5284_v49 = vmul.f32 %v6306_v51, %v4873_v52  ;;  %v4512_v31 = vadd.f32 %v4511_v12, %v4398_v19  ;;  %vm5289_vm15 = vweird.f32 %v6306_v51 }
 0x659   : > { %v7978_v62 = vadd.f32 %v7800_v27, %v4710_v16  ;;  %v5281_v30 = vsel %vm5278_vm12, %v5280_v18, %v5276_v24  ;;  %vm5290_vm14 = vmor %vm5288_vm13, %vm5289_vm15 }
 0x65a   : > { %5442 = vrot.lane.b32.xlu1 %v5281_v30, %s6479_s22  ;;  %v5285_v61 = vsub.f32 1.0, %v5284_v49 }
 0x65b   : > { %v4778_v21 = vsub.f32 0.0, %v7978_v62 }
 0x65c   : > { %v5421_v8 = vpop.permute.xlu2 %5420  ;;  %v5286_v28 = vmul.f32 %v6306_v51, %v5285_v61 }
 0x65d   : > { %v4838_v53 = vmul.f32 1.442695, %v4778_v21  ;;  %v5501_v34 = vmul.f32 %v5421_v8, %v7780_v56 }
 0x65e   : > { %v4673_v63 = vpop.f32.mrf.mxu2  ;;  %v5287_v58 = vadd.f32 %v6306_v51, %v5286_v28  ;;  %v4401_v33 = vpop.f32.mrf.mxu0 }
 0x65f   : > { %6307 = vpow2.f32 %v4838_v53  ;;  %v4711_v36 = vadd.f32 %v4673_v63, %v4512_v31  ;;  %5534 = vst.msk [vmem:[%s7765_s26 + $0x78] sm:$0xff] %vm5518_vm0, %v5501_v34  ;;  %v4514_v57 = vpop.f32.mrf.mxu1 }
 0x660   : > { %v5291_v11 = vsel %vm5290_vm14, %v6306_v51, %v5287_v58  ;;  %v4515_v46 = vadd.f32 %v4514_v57, %v4401_v33 }
 0x661   : > { %v7986_v39 = vadd.f32 %v7800_v27, %v4711_v36  ;;  %v5296_v9 = vsel %vm5293_vm1, %v5295_v45, %v5291_v11 }
 0x662   : > { %5444 = vrot.lane.b32.xlu2 %v5296_v9, %s6479_s22 }
 0x663   : > { %v4779_v10 = vsub.f32 0.0, %v7986_v39 }
 0x664   : > { %v5417_v22 = vpop.permute.xlu0 %5416 }
 0x665   : > { %v6308_v56 = vpop.eup %6307  ;;  %v4840_v0 = vmul.f32 1.442695, %v4779_v10  ;;  %v5499_v37 = vmul.f32 %v5417_v22, %v7719_v32 }
 0x666   : > { %v4874_v54 = vadd.f32 1.0, %v6308_v56  ;;  %v4404_v3 = vpop.f32.mrf.mxu0 }
 0x667   : > { %6309 = vpow2.f32 %v4840_v0  ;;  %5532 = vst.msk [vmem:[%s7765_s26 + $0x68] sm:$0xff] %vm5518_vm0, %v5499_v37  ;;  %v4517_v43 = vpop.f32.mrf.mxu1 }
 0x668   : > { %6311 = vrcp.f32 %v4874_v54  ;;  %v5307_v1 = vand.u32 2147483647, %v4874_v54  ;;  %v5309_v6 = vand.u32 2147483648, %v4874_v54  ;;  %v4518_v20 = vadd.f32 %v4517_v43, %v4404_v3 }
 0x669   : > { %vm5303_vm3 = vweird.f32 %v4874_v54 }
 0x66a   : > { %vm5308_vm6 = vcmp.eq.f32.partialorder %v5307_v1, 8.507059e+37  ;;  %v5310_v12 = vor.u32 1.1754944e-38, %v5309_v6 }
 0x66c   : > { %v5419_v42 = vpop.permute.xlu1 %5418 }
 0x66d   : > { %v6310_v52 = vpop.eup %6309  ;;  %v5500_v5 = vmul.f32 %v5419_v42, %v7752_v38 }
 0x66e   : > { %v6312_v26 = vpop.eup %6311  ;;  %v4875_v48 = vadd.f32 1.0, %v6310_v52  ;;  %v4676_v60 = vpop.f32.mrf.mxu2 }
 0x66f   : > { %v4712_v13 = vadd.f32 %v4676_v60, %v4515_v46  ;;  %v5299_v2 = vmul.f32 %v6312_v26, %v4874_v54  ;;  %5533 = vst.msk [vmem:[%s7765_s26 + $0x70] sm:$0xff] %vm5518_vm0, %v5500_v5  ;;  %vm5304_vm2 = vweird.f32 %v6312_v26 }
 0x670   : > { %6313 = vrcp.f32 %v4875_v48  ;;  %vm5305_vm5 = vmor %vm5303_vm3, %vm5304_vm2  ;;  %v5324_v31 = vand.u32 2147483648, %v4875_v48  ;;  %v5322_v28 = vand.u32 2147483647, %v4875_v48  ;;  %vm5318_vm7 = vweird.f32 %v4875_v48 }
 0x671   : > { %v7997_v32 = vadd.f32 %v7800_v27, %v4712_v13  ;;  %v5300_v7 = vsub.f32 1.0, %v5299_v2 }
 0x672   : > { %vm5323_vm9 = vcmp.eq.f32.partialorder %v5322_v28, 8.507059e+37 }
 0x673   : > { %v4780_v14 = vsub.f32 0.0, %v7997_v32  ;;  %v5301_v16 = vmul.f32 %v6312_v26, %v5300_v7 }
 0x674   : > { %v5427_v51 = vpop.permute.xlu2 %5426 }
 0x675   : > { %v4842_v38 = vmul.f32 1.442695, %v4780_v14  ;;  %v5302_v18 = vadd.f32 %v6312_v26, %v5301_v16  ;;  %v5504_v19 = vmul.f32 %v5427_v51, %v7827_v47 }
 0x676   : > { %v6314_v24 = vpop.eup %6313  ;;  %v4679_v49 = vpop.f32.mrf.mxu2 }
 0x677   : > { %6315 = vpow2.f32 %v4842_v38  ;;  %v4713_v30 = vadd.f32 %v4679_v49, %v4518_v20  ;;  %v5306_v21 = vsel %vm5305_vm5, %v6312_v26, %v5302_v18  ;;  %v5314_v61 = vmul.f32 %v6314_v24, %v4875_v48  ;;  %5537 = vst.msk [vmem:[%s7765_s26 + $0x90] sm:$0xff] %vm5518_vm0, %v5504_v19 }
 0x678   : > { %v5311_v4 = vsel %vm5308_vm6, %v5310_v12, %v5306_v21  ;;  %vm5319_vm4 = vweird.f32 %v6314_v24 }
 0x679   : > { %v8004_v17 = vadd.f32 %v7800_v27, %v4713_v30  ;;  %5446 = vrot.lane.b32.xlu0 %v5311_v4, %s6479_s22  ;;  %v5315_v53 = vsub.f32 1.0, %v5314_v61  ;;  %vm5320_vm8 = vmor %vm5318_vm7, %vm5319_vm4  ;;  %v5325_v27 = vor.u32 1.1754944e-38, %v5324_v31 }
 0x67b   : > { %v4781_v8 = vsub.f32 0.0, %v8004_v17  ;;  %v5316_v47 = vmul.f32 %v6314_v24, %v5315_v53 }
 0x67c   : > { %v5423_v36 = vpop.permute.xlu0 %5422 }
 0x67d   : > { %v6316_v63 = vpop.eup %6315  ;;  %v4844_v34 = vmul.f32 1.442695, %v4781_v8  ;;  %v5317_v58 = vadd.f32 %v6314_v24, %v5316_v47  ;;  %v5502_v11 = vmul.f32 %v5423_v36, %v7803_v29 }
 0x67e   : > { %v4876_v45 = vadd.f32 1.0, %v6316_v63 }
 0x67f   : > { %6317 = vpow2.f32 %v4844_v34  ;;  %v5321_v9 = vsel %vm5320_vm8, %v6314_v24, %v5317_v58  ;;  %5535 = vst.msk [vmem:[%s7765_s26 + $0x80] sm:$0xff] %vm5518_vm0, %v5502_v11 }
 0x680   : > { %6319 = vrcp.f32 %v4876_v45  ;;  %v5326_v10 = vsel %vm5323_vm9, %v5325_v27, %v5321_v9  ;;  %v5339_v57 = vand.u32 2147483648, %v4876_v45  ;;  %v5337_v46 = vand.u32 2147483647, %v4876_v45 }
 0x681   : > { %5448 = vrot.lane.b32.xlu1 %v5326_v10, %s6479_s22  ;;  %vm5333_vm11 = vweird.f32 %v4876_v45 }
 0x682   : > { %v5340_v5 = vor.u32 1.1754944e-38, %v5339_v57  ;;  %vm5338_vm15 = vcmp.eq.f32.partialorder %v5337_v46, 8.507059e+37 }
 0x684   : > { %v5425_v0 = vpop.permute.xlu1 %5424 }
 0x685   : > { %v6318_v56 = vpop.eup %6317  ;;  %v5503_v37 = vmul.f32 %v5425_v0, %v7815_v40 }
 0x686   : > { %v6320_v22 = vpop.eup %6319  ;;  %v4877_v54 = vadd.f32 1.0, %v6318_v56 }
 0x687   : > { %v5329_v33 = vmul.f32 %v6320_v22, %v4876_v45  ;;  %5536 = vst.msk [vmem:[%s7765_s26 + $0x88] sm:$0xff] %vm5518_vm0, %v5503_v37  ;;  %vm5334_vm10 = vweird.f32 %v6320_v22 }
 0x688   : > { %6321 = vrcp.f32 %v4877_v54  ;;  %vm5335_vm12 = vmor %vm5333_vm11, %vm5334_vm10  ;;  %v5354_v3 = vand.u32 2147483648, %v4877_v54  ;;  %v5352_v1 = vand.u32 2147483647, %v4877_v54  ;;  %vm5348_vm14 = vweird.f32 %v4877_v54 }
 0x689   : > { %v5330_v29 = vsub.f32 1.0, %v5329_v33 }
 0x68a   : > { %v5355_v16 = vor.u32 1.1754944e-38, %v5354_v3  ;;  %vm5353_vm2 = vcmp.eq.f32.partialorder %v5352_v1, 8.507059e+37 }
 0x68b   : > { %v5331_v52 = vmul.f32 %v6320_v22, %v5330_v29 }
 0x68c   : > { %v5433_v42 = vpop.permute.xlu2 %5432 }
 0x68d   : > { %v5332_v26 = vadd.f32 %v6320_v22, %v5331_v52  ;;  %v5507_v60 = vmul.f32 %v5433_v42, %v7872_v41 }
 0x68e   : > { %v6322_v48 = vpop.eup %6321 }
 0x68f   : > { %v5336_v13 = vsel %vm5335_vm12, %v6320_v22, %v5332_v26  ;;  %v5344_v40 = vmul.f32 %v6322_v48, %v4877_v54  ;;  %5540 = vst.msk [vmem:[%s7765_s26 + $0xa8] sm:$0xff] %vm5518_vm0, %v5507_v60  ;;  %vm5349_vm13 = vweird.f32 %v6322_v48 }
 0x690   : > { %v5341_v2 = vsel %vm5338_vm15, %v5340_v5, %v5336_v13  ;;  %vm5350_vm1 = vmor %vm5348_vm14, %vm5349_vm13 }
 0x691   : > { %5450 = vrot.lane.b32.xlu2 %v5341_v2, %s6479_s22  ;;  %v5345_v7 = vsub.f32 1.0, %v5344_v40 }
 0x693   : > { %v5346_v43 = vmul.f32 %v6322_v48, %v5345_v7 }
 0x694   : > { %v5429_v6 = vpop.permute.xlu0 %5428 }
 0x695   : > { %v5347_v41 = vadd.f32 %v6322_v48, %v5346_v43  ;;  %v5505_v14 = vmul.f32 %v5429_v6, %v7845_v50 }
 0x697   : > { %v5351_v20 = vsel %vm5350_vm1, %v6322_v48, %v5347_v41  ;;  %5538 = vst.msk [vmem:[%s7765_s26 + $0x98] sm:$0xff] %vm5518_vm0, %v5505_v14 }
 0x698   : > { %v5356_v38 = vsel %vm5353_vm2, %v5355_v16, %v5351_v20 }
 0x699   : > { %5452 = vrot.lane.b32.xlu0 %v5356_v38, %s6479_s22 }
 0x69c   : > { %v5431_v51 = vpop.permute.xlu1 %5430 }
 0x69d   : > { %v5506_v18 = vmul.f32 %v5431_v51, %v7857_v15 }
 0x69f   : > { %5539 = vst.msk [vmem:[%s7765_s26 + $0xa0] sm:$0xff] %vm5518_vm0, %v5506_v18 }
 0x6a4   : > { %v5439_v24 = vpop.permute.xlu2 %5438 }
 0x6a5   : > { %v5510_v50 = vmul.f32 %v5439_v24, %v7917_v59 }
 0x6a7   : > { %5543 = vst.msk [vmem:[%s7765_s26 + $0xc0] sm:$0xff] %vm5518_vm0, %v5510_v50 }
 0x6ac   : > { %v5435_v49 = vpop.permute.xlu0 %5434 }
 0x6ad   : > { %v5508_v19 = vmul.f32 %v5435_v49, %v7887_v44 }
 0x6af   : > { %5541 = vst.msk [vmem:[%s7765_s26 + $0xb0] sm:$0xff] %vm5518_vm0, %v5508_v19 }
 0x6b4   : > { %v5437_v12 = vpop.permute.xlu1 %5436 }
 0x6b5   : > { %v5509_v30 = vmul.f32 %v5437_v12, %v7902_v35 }
 0x6b7   : > { %5542 = vst.msk [vmem:[%s7765_s26 + $0xb8] sm:$0xff] %vm5518_vm0, %v5509_v30 }
 0x6bc   : > { %v5445_v15 = vpop.permute.xlu2 %5444 }
 0x6bd   : > { %v5513_v21 = vmul.f32 %v5445_v15, %v7959_v25 }
 0x6bf   : > { %5546 = vst.msk [vmem:[%s7765_s26 + $0xd8] sm:$0xff] %vm5518_vm0, %v5513_v21 }
 0x6c4   : > { %v5441_v59 = vpop.permute.xlu0 %5440 }
 0x6c5   : > { %v5511_v61 = vmul.f32 %v5441_v59, %v7932_v23 }
 0x6c7   : > { %5544 = vst.msk [vmem:[%s7765_s26 + $0xc8] sm:$0xff] %vm5518_vm0, %v5511_v61 }
 0x6cc   : > { %v5443_v44 = vpop.permute.xlu1 %5442 }
 0x6cd   : > { %v5512_v4 = vmul.f32 %v5443_v44, %v7947_v55 }
 0x6cf   : > { %5545 = vst.msk [vmem:[%s7765_s26 + $0xd0] sm:$0xff] %vm5518_vm0, %v5512_v4 }
 0x6eb   : > { %v5451_v35 = vpop.permute.xlu2 %5450  ;;  %v5447_v53 = vpop.permute.xlu0 %5446 }
 0x6ec   : > { %v5516_v31 = vmul.f32 %v5451_v35, %v7997_v32  ;;  %v5514_v25 = vmul.f32 %v5447_v53, %v7978_v62 }
 0x6ee   : > { %5549 = vst.msk [vmem:[%s7765_s26 + $0xf0] sm:$0xff] %vm5518_vm0, %v5516_v31 }
 0x6ef   : > { %5547 = vst.msk [vmem:[%s7765_s26 + $0xe0] sm:$0xff] %vm5518_vm0, %v5514_v25 }
 0x6f3   : > { %v5449_v8 = vpop.permute.xlu1 %5448 }
 0x6f4   : > { %v5515_v23 = vmul.f32 %v5449_v8, %v7986_v39 }
 0x6f6   : > { %5548 = vst.msk [vmem:[%s7765_s26 + $0xe8] sm:$0xff] %vm5518_vm0, %v5515_v23 }
 0x70b   : > { %v5453_v47 = vpop.permute.xlu0 %5452 }
 0x70c   : > { %v5517_v55 = vmul.f32 %v5453_v47, %v8004_v17 }
 0x70e   : > { %5550 = vst.msk [vmem:[%s7765_s26 + $0xf8] sm:$0xff] %vm5518_vm0, %v5517_v55 }
 0x70f PF: > { %s24_s17 = sadd.s32 1, %s6466_s17  }
 0x710   : > { %p21_p8 = scmp.ge.s32.totalorder %s24_s17, 4  }
 0x712   :  { %23 = sbr.rel (!%p21_p8) target bundleno = 3 (0x3), region = 121 }
 0x717   :  { %5573 = vsyncpa [#allocation4], 1 }
 0x718   :  { %5575 = vsyncpa [#allocation4 + $0x1], 1 }
 0x719   :  { %5576 = vsyncpa [#allocation6], 1 }
 0x71a   :  { %5577 = vsyncpa [#allocation9], 1 }

</bundles_post_ra>
